<compile_context>
chip_gen: v7x
topology: tpu7x:2x2x1
jax: 0.10.0
libtpu: 0.0.40
codegen_flags: <defaults>
</compile_context>

<pallas_src>
import functools

import jax
import jax.numpy as jnp
from jax.experimental import pallas as pl
from jax.experimental.pallas import tpu as pltpu


# ------------------------------ hardware probe -------------------------------

@functools.lru_cache(maxsize=None)
def _num_tensorcores():
    """Best-effort TensorCores-per-device count (perf heuristic only)."""
    try:
        info = pltpu.get_tpu_info()
        for name in ("num_cores", "num_tensorcores", "tensorcore_count",
                     "cores_per_chip", "core_count"):
            v = getattr(info, name, None)
            if isinstance(v, int) and v >= 1:
                return v
    except Exception:
        pass
    try:
        kind = jax.devices()[0].device_kind.lower()
        # v5e / v6e are single-TensorCore parts; v4/v5p megacore and v7x have 2.
        if "lite" in kind or "v5e" in kind or "v6e" in kind or "v6" in kind:
            return 1
    except Exception:
        pass
    return 2


# ------------------------------ tiling helpers -------------------------------

def _round_up(x, m):
    return ((x + m - 1) // m) * m


def _choose_tm(M, K, *, itemsize=2, target_bytes=2 << 20, max_tm=8192):
    """Rows per M-tile.

    Sized by bytes (~2 MiB of input per block) so skinny-K GEMMs still amortize the
    ~0.35 us fixed per-step pipeline cost.  Forced to >=2 blocks only on parts with
    >=2 TensorCores (megacore) and only when M is large enough.  Returns either the
    full M (a full-dim block is always legal) or a multiple of 32 strictly < M.
    """
    by_bytes = max(32, min(max_tm, (target_bytes // (K * itemsize)) // 32 * 32))
    if M <= by_bytes:
        if _num_tensorcores() >= 2 and M >= 64:
            return _round_up(pl.cdiv(M, 2), 32)   # 2 blocks -> both TensorCores busy
        return M                                   # one full block
    return by_bytes


# ----------------------------- Pallas kernels ---------------------------------

def _mm_bias_lrelu_kernel(x_ref, w_ref, b_ref, o_ref, *, negative_slope, apply_act):
    # INVARIANT: rows are fully independent (matmul + bias + LeakyReLU only).  The
    # boundary grid block over-reads stale rows along M; that is only safe while no
    # cross-row operation (reduction over M, normalization, ...) is ever added here.
    acc = jnp.dot(x_ref[...], w_ref[...], preferred_element_type=jnp.float32)
    acc = acc + b_ref[...]
    if apply_act:
        acc = jnp.where(acc >= 0.0, acc, negative_slope * acc)
    o_ref[...] = acc.astype(o_ref.dtype)


def fused_matmul_bias_act(x, w, b, *, negative_slope=0.2, apply_act=True,
                          out_dtype=jnp.bfloat16):
    """act(x @ w + b): x (M,K), w (K,N) -> (M,N), MXU matmul + f32 epilogue.

    When N in {32, 64} the plain store would be a masked partial-lane vst, so we fold
    pack = 128//N consecutive M rows into the lane dim: x is reshaped (free) to
    (M/pack, pack*K) and multiplied by the block-diagonal kron(I_pack, w), giving a
    lane-dense (M/pack, 128) output that is reshaped back in the wrapper.
    """
    M, K = x.shape
    K2, N = w.shape
    assert K == K2
    x = x.astype(jnp.bfloat16)
    w = w.astype(jnp.float32)
    b = b.astype(jnp.float32).reshape(1, N)

    pack = 128 // N if (N < 128 and 128 % N == 0) else 1
    if pack > 1:
        M_pad = _round_up(M, pack)
        if M_pad != M:
            x = jnp.pad(x, ((0, M_pad - M), (0, 0)))        # zero rows, sliced off below
        xp = x.reshape(M_pad // pack, pack * K)             # free row-major reshape
        wp = jnp.kron(jnp.eye(pack, dtype=jnp.float32), w)  # (pack*K, 128) block-diag
        bp = jnp.tile(b, (1, pack))                         # (1, 128)
    else:
        M_pad = M
        xp, wp, bp = x, w, b

    Mp, Kp = xp.shape
    Np = wp.shape[1]
    wp = wp.astype(jnp.bfloat16)

    TM = _choose_tm(Mp, Kp)
    grid = (pl.cdiv(Mp, TM),)

    kernel = functools.partial(
        _mm_bias_lrelu_kernel, negative_slope=negative_slope, apply_act=apply_act)

    out = pl.pallas_call(
        kernel,
        out_shape=jax.ShapeDtypeStruct((Mp, Np), out_dtype),
        grid_spec=pltpu.PrefetchScalarGridSpec(
            num_scalar_prefetch=0,
            grid=grid,
            in_specs=[
                pl.BlockSpec((TM, Kp), lambda i: (i, 0)),
                pl.BlockSpec((Kp, Np), lambda i: (0, 0)),
                pl.BlockSpec((1, Np), lambda i: (0, 0)),
            ],
            out_specs=pl.BlockSpec((TM, Np), lambda i: (i, 0)),
        ),
        compiler_params=pltpu.CompilerParams(
            dimension_semantics=("parallel",),
        ),
    )(xp, wp, bp)

    if pack > 1:
        out = out.reshape(M_pad, N)                          # free row-major reshape
        if M_pad != M:
            out = out[:M]
    return out


def _conv4_linear_kernel(p_ref, w4_ref, b4_ref, w5_ref, b5_ref, o_ref, *,
                         negative_slope):
    # layer4: matmul + bias + LeakyReLU (f32 math on bf16 inputs)
    h = jnp.dot(p_ref[...], w4_ref[...], preferred_element_type=jnp.float32)
    h = h + b4_ref[...]
    h = jnp.where(h >= 0.0, h, negative_slope * h)
    # layer5: Linear(256 -> 1) as a lane reduction while h is still in VMEM
    y = jnp.sum(h * w5_ref[...], axis=-1, keepdims=True) + b5_ref[...]
    o_ref[...] = y.astype(o_ref.dtype)


def conv4_linear_fused(x, w4, b4, w5, b5, *, negative_slope=0.2):
    """Layer4 (Conv3d k=2 s=2 on a 2x2x2 input) fused with Layer5 (Linear 256->1).

    With k == D == H == W == 2 and stride 2, the im2col patches are exactly
    x.reshape(B, 8*C) in (d, h, w, C) order — a free row-major reshape, no gather.
    """
    B = x.shape[0]
    Cin = x.shape[-1]
    Cout = w4.shape[0]
    K = 8 * Cin                                              # 2*2*2*128 = 1024

    patches = x.reshape(B, K).astype(jnp.bfloat16)
    w4m = jnp.transpose(w4, (2, 3, 4, 1, 0)).reshape(K, Cout).astype(jnp.bfloat16)
    b4r = b4.astype(jnp.float32).reshape(1, Cout)
    w5r = w5.reshape(1, Cout).astype(jnp.float32)            # tiny, keep f32
    b5r = b5.astype(jnp.float32).reshape(1, 1)

    TM = _choose_tm(B, K)
    grid = (pl.cdiv(B, TM),)

    kernel = functools.partial(_conv4_linear_kernel, negative_slope=negative_slope)
    out = pl.pallas_call(
        kernel,
        out_shape=jax.ShapeDtypeStruct((B, 1), jnp.float32),
        grid_spec=pltpu.PrefetchScalarGridSpec(
            num_scalar_prefetch=0,
            grid=grid,
            in_specs=[
                pl.BlockSpec((TM, K), lambda i: (i, 0)),
                pl.BlockSpec((K, Cout), lambda i: (0, 0)),
                pl.BlockSpec((1, Cout), lambda i: (0, 0)),
                pl.BlockSpec((1, Cout), lambda i: (0, 0)),
                pl.BlockSpec((1, 1), lambda i: (0, 0)),
            ],
            out_specs=pl.BlockSpec((TM, 1), lambda i: (i, 0)),
        ),
        compiler_params=pltpu.CompilerParams(
            dimension_semantics=("parallel",),
        ),
    )(patches, w4m, b4r, w5r, b5r)
    return out                                               # (B, 1) f32


# ------------------------------ conv as im2col --------------------------------

def _im2col_3d(x, k, s):
    """x: (B, D, H, W, C) -> (B*OD*OH*OW, k^3*C) patches (K order = kd,kh,kw,Cin)."""
    B, D, H, W, C = x.shape
    OD = (D - k) // s + 1
    OH = (H - k) // s + 1
    OW = (W - k) // s + 1
    cols = []
    for kd in range(k):
        for kh in range(k):
            for kw in range(k):
                cols.append(
                    x[:, kd:kd + s * OD:s, kh:kh + s * OH:s, kw:kw + s * OW:s, :])
    p = jnp.stack(cols, axis=-2)                              # (B, OD, OH, OW, k^3, C)
    return p.reshape(B * OD * OH * OW, k * k * k * C), (B, OD, OH, OW)


def conv3d_lrelu(x, w, b, *, stride, negative_slope=0.2):
    """VALID Conv3d + LeakyReLU. x: NDHWC, w: PyTorch (Cout, Cin, k, k, k)."""
    # TODO(synk): patches are materialized in HBM by XLA; fusing the tap reads into
    # the kernel would remove that round trip (largest relative win on v5e).
    Cout, Cin, k = w.shape[0], w.shape[1], w.shape[2]
    patches, (B, OD, OH, OW) = _im2col_3d(x, k, stride)
    # (Cout, Cin, kd, kh, kw) -> (kd, kh, kw, Cin, Cout) -> (K, Cout)
    w2 = jnp.transpose(w, (2, 3, 4, 1, 0)).reshape(k * k * k * Cin, Cout)
    y = fused_matmul_bias_act(patches, w2, b,
                              negative_slope=negative_slope, apply_act=True,
                              out_dtype=jnp.bfloat16)
    return y.reshape(B, OD, OH, OW, Cout)


# ------------------------------ parameters ------------------------------------

def init_params(key):
    ks = jax.random.split(key, 10)

    def conv_w(k, cout, cin, ksz):
        return 0.02 * jax.random.normal(k, (cout, cin, ksz, ksz, ksz), jnp.float32)

    return {
        "w1": conv_w(ks[0], 32, 1, 4),
        "b1": 0.02 * jax.random.normal(ks[1], (32,), jnp.float32),
        "w2": conv_w(ks[2], 64, 32, 4),
        "b2": 0.02 * jax.random.normal(ks[3], (64,), jnp.float32),
        "w3": conv_w(ks[4], 128, 64, 4),
        "b3": 0.02 * jax.random.normal(ks[5], (128,), jnp.float32),
        "w4": conv_w(ks[6], 256, 128, 2),
        "b4": 0.02 * jax.random.normal(ks[7], (256,), jnp.float32),
        "w5": 0.02 * jax.random.normal(ks[8], (1, 256), jnp.float32),  # Linear(256,1)
        "b5": 0.02 * jax.random.normal(ks[9], (1,), jnp.float32),
    }


# ------------------------------ forward pass -----------------------------------

def discriminator_forward(params, x):
    # x.view(-1, 1, 32, 32, 32)
    x = x.reshape(-1, 1, 32, 32, 32)                  # NCDHW
    x = jnp.transpose(x, (0, 2, 3, 4, 1))             # -> NDHWC
    x = x.astype(jnp.bfloat16)
    x = conv3d_lrelu(x, params["w1"], params["b1"], stride=2)   # (B,15,15,15, 32)
    x = conv3d_lrelu(x, params["w2"], params["b2"], stride=2)   # (B, 6, 6, 6, 64)
    x = conv3d_lrelu(x, params["w3"], params["b3"], stride=2)   # (B, 2, 2, 2,128)
    # layer4 + layer5 fused in a single Pallas call. PyTorch flattens (B,256,1,1,1)
    # -> (B,256) in channel order, which matches the channels-last (B,256) here.
    y = conv4_linear_fused(x, params["w4"], params["b4"],
                           params["w5"], params["b5"])
    return y                                           # (B, 1) f32


# ------------------------------ pure-JAX reference ------------------------------

def reference_forward(params, x):
    x = x.reshape(-1, 1, 32, 32, 32)
    x = jnp.transpose(x, (0, 2, 3, 4, 1))

    def conv(x, w, b, stride):
        w_dhwio = jnp.transpose(w, (2, 3, 4, 1, 0))
        y = jax.lax.conv_general_dilated(
            x, w_dhwio, (stride,) * 3, "VALID",
            dimension_numbers=("NDHWC", "DHWIO", "NDHWC"))
        y = y + b
        return jnp.where(y >= 0, y, 0.2 * y)

    x = conv(x, params["w1"], params["b1"], 2)
    x = conv(x, params["w2"], params["b2"], 2)
    x = conv(x, params["w3"], params["b3"], 2)
    x = conv(x, params["w4"], params["b4"], 2)
    B = x.shape[0]
    x = jnp.transpose(x, (0, 4, 1, 2, 3)).reshape(B, -1)
    return x @ params["w5"].T + params["b5"]


if __name__ == "__main__":
    key = jax.random.PRNGKey(0)
    kp, kx = jax.random.split(key)
    params = init_params(kp)
    x = jax.random.normal(kx, (2, 1, 32, 32, 32), jnp.float32)

    fwd = jax.jit(discriminator_forward)
    out = jax.block_until_ready(fwd(params, x))
    assert out.shape == (2, 1), out.shape

    ref = jax.block_until_ready(reference_forward(params, x))
    # bf16 inputs/activations -> relaxed (but still meaningful) tolerance vs f32 ref.
    err = float(jnp.max(jnp.abs(out - ref)))
    assert jnp.allclose(out, ref, rtol=5e-2, atol=5e-3), f"max abs err {err}"

    print("KERNEL_OK")
</pallas_src>

<mosaic_0001>
module attributes {stable_mosaic.version = 11 : i64} {
  func.func @_mm_bias_lrelu_kernel(%arg0: i32, %arg1: memref<864x256xbf16, #tpu.memory_space<vmem>>, %arg2: memref<256x128xbf16, #tpu.memory_space<vmem>>, %arg3: memref<1x128xf32, #tpu.memory_space<vmem>>, %arg4: memref<864x128xbf16, #tpu.memory_space<vmem>>) attributes {dimension_semantics = [#tpu.dimension_semantics<parallel>], iteration_bounds = array<i64: 2>, scalar_prefetch = 0 : i64, scratch_operands = 0 : i64, tpu.core_type = #tpu.core_type<tc>, window_params = [{transform_indices = @transform_0, window_bounds = array<i64: 864, 256>}, {pipeline_mode = #tpu.pipeline_mode<synchronous>, transform_indices = @transform_1, window_bounds = array<i64: 256, 128>}, {pipeline_mode = #tpu.pipeline_mode<synchronous>, transform_indices = @transform_2, window_bounds = array<i64: 1, 128>}, {transform_indices = @transform_3, window_bounds = array<i64: 864, 128>}]} {
    %c0 = arith.constant 0 : index
    %c0_0 = arith.constant 0 : index
    %0 = vector.load %arg1[%c0, %c0_0] : memref<864x256xbf16, #tpu.memory_space<vmem>>, vector<864x256xbf16>
    %c0_1 = arith.constant 0 : index
    %c0_2 = arith.constant 0 : index
    %1 = vector.load %arg2[%c0_1, %c0_2] : memref<256x128xbf16, #tpu.memory_space<vmem>>, vector<256x128xbf16>
    %cst = arith.constant dense<0.000000e+00> : vector<864x128xf32>
    %2 = tpu.matmul %0, %1, %cst {dimension_numbers = #tpu.dot_dimension_numbers<[1], [0], [0], [1], [0, 0, 1, 1], [], []>} : vector<864x256xbf16>, vector<256x128xbf16>, vector<864x128xf32> -> vector<864x128xf32>
    %c0_3 = arith.constant 0 : index
    %c0_4 = arith.constant 0 : index
    %3 = vector.load %arg3[%c0_3, %c0_4] : memref<1x128xf32, #tpu.memory_space<vmem>>, vector<1x128xf32>
    %4 = vector.broadcast %3 : vector<1x128xf32> to vector<864x128xf32>
    %5 = arith.addf %2, %4 : vector<864x128xf32>
    %cst_5 = arith.constant 0.000000e+00 : f32
    %6 = vector.broadcast %cst_5 : f32 to vector<864x128xf32>
    %7 = arith.cmpf oge, %5, %6 : vector<864x128xf32>
    %cst_6 = arith.constant 2.000000e-01 : f32
    %8 = vector.broadcast %cst_6 : f32 to vector<864x128xf32>
    %9 = arith.mulf %8, %5 : vector<864x128xf32>
    %10 = arith.select %7, %5, %9 : vector<864x128xi1>, vector<864x128xf32>
    %11 = arith.truncf %10 : vector<864x128xf32> to vector<864x128xbf16>
    %c0_7 = arith.constant 0 : index
    %c0_8 = arith.constant 0 : index
    %12 = vector.load %arg4[%c0_7, %c0_8] : memref<864x128xbf16, #tpu.memory_space<vmem>>, vector<864x128xbf16>
    tpu.vector_store %arg4[%c0_7, %c0_8], %11 {strides = array<i32>} : memref<864x128xbf16, #tpu.memory_space<vmem>>, vector<864x128xbf16>,
    return
  }
  func.func @transform_0(%arg0: i32) -> (i32, i32) {
    %c0_i32 = arith.constant 0 : i32
    %c0_i32_0 = arith.constant 0 : i32
    return %arg0, %c0_i32 : i32, i32
  }
  func.func @transform_1(%arg0: i32) -> (i32, i32) {
    %c0_i32 = arith.constant 0 : i32
    %c0_i32_0 = arith.constant 0 : i32
    %c0_i32_1 = arith.constant 0 : i32
    return %c0_i32, %c0_i32_0 : i32, i32
  }
  func.func @transform_2(%arg0: i32) -> (i32, i32) {
    %c0_i32 = arith.constant 0 : i32
    %c0_i32_0 = arith.constant 0 : i32
    %c0_i32_1 = arith.constant 0 : i32
    return %c0_i32, %c0_i32_0 : i32, i32
  }
  func.func @transform_3(%arg0: i32) -> (i32, i32) {
    %c0_i32 = arith.constant 0 : i32
    %c0_i32_0 = arith.constant 0 : i32
    return %arg0, %c0_i32 : i32, i32
  }
}

module attributes {stable_mosaic.version = 11 : i64} {
  func.func @_mm_bias_lrelu_kernel(%arg0: i32, %arg1: memref<128x4096xbf16, #tpu.memory_space<vmem>>, %arg2: memref<4096x128xbf16, #tpu.memory_space<vmem>>, %arg3: memref<1x128xf32, #tpu.memory_space<vmem>>, %arg4: memref<128x128xbf16, #tpu.memory_space<vmem>>) attributes {dimension_semantics = [#tpu.dimension_semantics<parallel>], iteration_bounds = array<i64: 2>, scalar_prefetch = 0 : i64, scratch_operands = 0 : i64, tpu.core_type = #tpu.core_type<tc>, window_params = [{transform_indices = @transform_0, window_bounds = array<i64: 128, 4096>}, {pipeline_mode = #tpu.pipeline_mode<synchronous>, transform_indices = @transform_1, window_bounds = array<i64: 4096, 128>}, {pipeline_mode = #tpu.pipeline_mode<synchronous>, transform_indices = @transform_2, window_bounds = array<i64: 1, 128>}, {transform_indices = @transform_3, window_bounds = array<i64: 128, 128>}]} {
    %c0 = arith.constant 0 : index
    %c0_0 = arith.constant 0 : index
    %0 = vector.load %arg1[%c0, %c0_0] : memref<128x4096xbf16, #tpu.memory_space<vmem>>, vector<128x4096xbf16>
    %c0_1 = arith.constant 0 : index
    %c0_2 = arith.constant 0 : index
    %1 = vector.load %arg2[%c0_1, %c0_2] : memref<4096x128xbf16, #tpu.memory_space<vmem>>, vector<4096x128xbf16>
    %cst = arith.constant dense<0.000000e+00> : vector<128x128xf32>
    %2 = tpu.matmul %0, %1, %cst {dimension_numbers = #tpu.dot_dimension_numbers<[1], [0], [0], [1], [0, 0, 1, 1], [], []>} : vector<128x4096xbf16>, vector<4096x128xbf16>, vector<128x128xf32> -> vector<128x128xf32>
    %c0_3 = arith.constant 0 : index
    %c0_4 = arith.constant 0 : index
    %3 = vector.load %arg3[%c0_3, %c0_4] : memref<1x128xf32, #tpu.memory_space<vmem>>, vector<1x128xf32>
    %4 = vector.broadcast %3 : vector<1x128xf32> to vector<128x128xf32>
    %5 = arith.addf %2, %4 : vector<128x128xf32>
    %cst_5 = arith.constant 0.000000e+00 : f32
    %6 = vector.broadcast %cst_5 : f32 to vector<128x128xf32>
    %7 = arith.cmpf oge, %5, %6 : vector<128x128xf32>
    %cst_6 = arith.constant 2.000000e-01 : f32
    %8 = vector.broadcast %cst_6 : f32 to vector<128x128xf32>
    %9 = arith.mulf %8, %5 : vector<128x128xf32>
    %10 = arith.select %7, %5, %9 : vector<128x128xi1>, vector<128x128xf32>
    %11 = arith.truncf %10 : vector<128x128xf32> to vector<128x128xbf16>
    %c0_7 = arith.constant 0 : index
    %c0_8 = arith.constant 0 : index
    %12 = vector.load %arg4[%c0_7, %c0_8] : memref<128x128xbf16, #tpu.memory_space<vmem>>, vector<128x128xbf16>
    tpu.vector_store %arg4[%c0_7, %c0_8], %11 {strides = array<i32>} : memref<128x128xbf16, #tpu.memory_space<vmem>>, vector<128x128xbf16>,
    return
  }
  func.func @transform_0(%arg0: i32) -> (i32, i32) {
    %c0_i32 = arith.constant 0 : i32
    %c0_i32_0 = arith.constant 0 : i32
    return %arg0, %c0_i32 : i32, i32
  }
  func.func @transform_1(%arg0: i32) -> (i32, i32) {
    %c0_i32 = arith.constant 0 : i32
    %c0_i32_0 = arith.constant 0 : i32
    %c0_i32_1 = arith.constant 0 : i32
    return %c0_i32, %c0_i32_0 : i32, i32
  }
  func.func @transform_2(%arg0: i32) -> (i32, i32) {
    %c0_i32 = arith.constant 0 : i32
    %c0_i32_0 = arith.constant 0 : i32
    %c0_i32_1 = arith.constant 0 : i32
    return %c0_i32, %c0_i32_0 : i32, i32
  }
  func.func @transform_3(%arg0: i32) -> (i32, i32) {
    %c0_i32 = arith.constant 0 : i32
    %c0_i32_0 = arith.constant 0 : i32
    return %arg0, %c0_i32 : i32, i32
  }
}

module attributes {stable_mosaic.version = 11 : i64} {
  func.func @_mm_bias_lrelu_kernel(%arg0: i32, %arg1: memref<16x4096xbf16, #tpu.memory_space<vmem>>, %arg2: memref<4096x128xbf16, #tpu.memory_space<vmem>>, %arg3: memref<1x128xf32, #tpu.memory_space<vmem>>, %arg4: memref<16x128xbf16, #tpu.memory_space<vmem>>) attributes {dimension_semantics = [#tpu.dimension_semantics<parallel>], iteration_bounds = array<i64: 1>, scalar_prefetch = 0 : i64, scratch_operands = 0 : i64, tpu.core_type = #tpu.core_type<tc>, window_params = [{transform_indices = @transform_0, window_bounds = array<i64: 16, 4096>}, {pipeline_mode = #tpu.pipeline_mode<synchronous>, transform_indices = @transform_1, window_bounds = array<i64: 4096, 128>}, {pipeline_mode = #tpu.pipeline_mode<synchronous>, transform_indices = @transform_2, window_bounds = array<i64: 1, 128>}, {transform_indices = @transform_3, window_bounds = array<i64: 16, 128>}]} {
    %c0 = arith.constant 0 : index
    %c0_0 = arith.constant 0 : index
    %0 = vector.load %arg1[%c0, %c0_0] : memref<16x4096xbf16, #tpu.memory_space<vmem>>, vector<16x4096xbf16>
    %c0_1 = arith.constant 0 : index
    %c0_2 = arith.constant 0 : index
    %1 = vector.load %arg2[%c0_1, %c0_2] : memref<4096x128xbf16, #tpu.memory_space<vmem>>, vector<4096x128xbf16>
    %cst = arith.constant dense<0.000000e+00> : vector<16x128xf32>
    %2 = tpu.matmul %0, %1, %cst {dimension_numbers = #tpu.dot_dimension_numbers<[1], [0], [0], [1], [0, 0, 1, 1], [], []>} : vector<16x4096xbf16>, vector<4096x128xbf16>, vector<16x128xf32> -> vector<16x128xf32>
    %c0_3 = arith.constant 0 : index
    %c0_4 = arith.constant 0 : index
    %3 = vector.load %arg3[%c0_3, %c0_4] : memref<1x128xf32, #tpu.memory_space<vmem>>, vector<1x128xf32>
    %4 = vector.broadcast %3 : vector<1x128xf32> to vector<16x128xf32>
    %5 = arith.addf %2, %4 : vector<16x128xf32>
    %cst_5 = arith.constant 0.000000e+00 : f32
    %6 = vector.broadcast %cst_5 : f32 to vector<16x128xf32>
    %7 = arith.cmpf oge, %5, %6 : vector<16x128xf32>
    %cst_6 = arith.constant 2.000000e-01 : f32
    %8 = vector.broadcast %cst_6 : f32 to vector<16x128xf32>
    %9 = arith.mulf %8, %5 : vector<16x128xf32>
    %10 = arith.select %7, %5, %9 : vector<16x128xi1>, vector<16x128xf32>
    %11 = arith.truncf %10 : vector<16x128xf32> to vector<16x128xbf16>
    %c0_7 = arith.constant 0 : index
    %c0_8 = arith.constant 0 : index
    %12 = vector.load %arg4[%c0_7, %c0_8] : memref<16x128xbf16, #tpu.memory_space<vmem>>, vector<16x128xbf16>
    tpu.vector_store %arg4[%c0_7, %c0_8], %11 {strides = array<i32>} : memref<16x128xbf16, #tpu.memory_space<vmem>>, vector<16x128xbf16>,
    return
  }
  func.func @transform_0(%arg0: i32) -> (i32, i32) {
    %c0_i32 = arith.constant 0 : i32
    %c0_i32_0 = arith.constant 0 : i32
    return %arg0, %c0_i32 : i32, i32
  }
  func.func @transform_1(%arg0: i32) -> (i32, i32) {
    %c0_i32 = arith.constant 0 : i32
    %c0_i32_0 = arith.constant 0 : i32
    %c0_i32_1 = arith.constant 0 : i32
    return %c0_i32, %c0_i32_0 : i32, i32
  }
  func.func @transform_2(%arg0: i32) -> (i32, i32) {
    %c0_i32 = arith.constant 0 : i32
    %c0_i32_0 = arith.constant 0 : i32
    %c0_i32_1 = arith.constant 0 : i32
    return %c0_i32, %c0_i32_0 : i32, i32
  }
  func.func @transform_3(%arg0: i32) -> (i32, i32) {
    %c0_i32 = arith.constant 0 : i32
    %c0_i32_0 = arith.constant 0 : i32
    return %arg0, %c0_i32 : i32, i32
  }
}

module attributes {stable_mosaic.version = 11 : i64} {
  func.func @_conv4_linear_kernel(%arg0: i32, %arg1: memref<2x1024xbf16, #tpu.memory_space<vmem>>, %arg2: memref<1024x256xbf16, #tpu.memory_space<vmem>>, %arg3: memref<1x256xf32, #tpu.memory_space<vmem>>, %arg4: memref<1x256xf32, #tpu.memory_space<vmem>>, %arg5: memref<1x1xf32, #tpu.memory_space<vmem>>, %arg6: memref<2x1xf32, #tpu.memory_space<vmem>>) attributes {dimension_semantics = [#tpu.dimension_semantics<parallel>], iteration_bounds = array<i64: 1>, scalar_prefetch = 0 : i64, scratch_operands = 0 : i64, tpu.core_type = #tpu.core_type<tc>, window_params = [{transform_indices = @transform_0, window_bounds = array<i64: 2, 1024>}, {pipeline_mode = #tpu.pipeline_mode<synchronous>, transform_indices = @transform_1, window_bounds = array<i64: 1024, 256>}, {pipeline_mode = #tpu.pipeline_mode<synchronous>, transform_indices = @transform_2, window_bounds = array<i64: 1, 256>}, {pipeline_mode = #tpu.pipeline_mode<synchronous>, transform_indices = @transform_3, window_bounds = array<i64: 1, 256>}, {pipeline_mode = #tpu.pipeline_mode<synchronous>, transform_indices = @transform_4, window_bounds = array<i64: 1, 1>}, {transform_indices = @transform_5, window_bounds = array<i64: 2, 1>}]} {
    %c0 = arith.constant 0 : index
    %c0_0 = arith.constant 0 : index
    %0 = vector.load %arg1[%c0, %c0_0] : memref<2x1024xbf16, #tpu.memory_space<vmem>>, vector<2x1024xbf16>
    %c0_1 = arith.constant 0 : index
    %c0_2 = arith.constant 0 : index
    %1 = vector.load %arg2[%c0_1, %c0_2] : memref<1024x256xbf16, #tpu.memory_space<vmem>>, vector<1024x256xbf16>
    %cst = arith.constant dense<0.000000e+00> : vector<2x256xf32>
    %2 = tpu.matmul %0, %1, %cst {dimension_numbers = #tpu.dot_dimension_numbers<[1], [0], [0], [1], [0, 0, 1, 1], [], []>} : vector<2x1024xbf16>, vector<1024x256xbf16>, vector<2x256xf32> -> vector<2x256xf32>
    %c0_3 = arith.constant 0 : index
    %c0_4 = arith.constant 0 : index
    %3 = vector.load %arg3[%c0_3, %c0_4] : memref<1x256xf32, #tpu.memory_space<vmem>>, vector<1x256xf32>
    %4 = vector.broadcast %3 : vector<1x256xf32> to vector<2x256xf32>
    %5 = arith.addf %2, %4 : vector<2x256xf32>
    %cst_5 = arith.constant 0.000000e+00 : f32
    %6 = vector.broadcast %cst_5 : f32 to vector<2x256xf32>
    %7 = arith.cmpf oge, %5, %6 : vector<2x256xf32>
    %cst_6 = arith.constant 2.000000e-01 : f32
    %8 = vector.broadcast %cst_6 : f32 to vector<2x256xf32>
    %9 = arith.mulf %8, %5 : vector<2x256xf32>
    %10 = arith.select %7, %5, %9 : vector<2x256xi1>, vector<2x256xf32>
    %c0_7 = arith.constant 0 : index
    %c0_8 = arith.constant 0 : index
    %11 = vector.load %arg4[%c0_7, %c0_8] : memref<1x256xf32, #tpu.memory_space<vmem>>, vector<1x256xf32>
    %12 = vector.broadcast %11 : vector<1x256xf32> to vector<2x256xf32>
    %13 = arith.mulf %10, %12 : vector<2x256xf32>
    %cst_9 = arith.constant dense<0.000000e+00> : vector<2xf32>
    %14 = vector.multi_reduction <add>, %13, %cst_9 [1] : vector<2x256xf32> to vector<2xf32>
    %15 = vector.shape_cast %14 : vector<2xf32> to vector<2x1xf32>
    %c0_10 = arith.constant 0 : index
    %c0_11 = arith.constant 0 : index
    %16 = vector.load %arg5[%c0_10, %c0_11] : memref<1x1xf32, #tpu.memory_space<vmem>>, vector<1x1xf32>
    %17 = vector.broadcast %16 : vector<1x1xf32> to vector<2x1xf32>
    %18 = arith.addf %15, %17 : vector<2x1xf32>
    %c0_12 = arith.constant 0 : index
    %c0_13 = arith.constant 0 : index
    %19 = vector.load %arg6[%c0_12, %c0_13] : memref<2x1xf32, #tpu.memory_space<vmem>>, vector<2x1xf32>
    tpu.vector_store %arg6[%c0_12, %c0_13], %18 {strides = array<i32>} : memref<2x1xf32, #tpu.memory_space<vmem>>, vector<2x1xf32>,
    return
  }
  func.func @transform_0(%arg0: i32) -> (i32, i32) {
    %c0_i32 = arith.constant 0 : i32
    %c0_i32_0 = arith.constant 0 : i32
    return %arg0, %c0_i32 : i32, i32
  }
  func.func @transform_1(%arg0: i32) -> (i32, i32) {
    %c0_i32 = arith.constant 0 : i32
    %c0_i32_0 = arith.constant 0 : i32
    %c0_i32_1 = arith.constant 0 : i32
    return %c0_i32, %c0_i32_0 : i32, i32
  }
  func.func @transform_2(%arg0: i32) -> (i32, i32) {
    %c0_i32 = arith.constant 0 : i32
    %c0_i32_0 = arith.constant 0 : i32
    %c0_i32_1 = arith.constant 0 : i32
    return %c0_i32, %c0_i32_0 : i32, i32
  }
  func.func @transform_3(%arg0: i32) -> (i32, i32) {
    %c0_i32 = arith.constant 0 : i32
    %c0_i32_0 = arith.constant 0 : i32
    %c0_i32_1 = arith.constant 0 : i32
    return %c0_i32, %c0_i32_0 : i32, i32
  }
  func.func @transform_4(%arg0: i32) -> (i32, i32) {
    %c0_i32 = arith.constant 0 : i32
    %c0_i32_0 = arith.constant 0 : i32
    %c0_i32_1 = arith.constant 0 : i32
    return %c0_i32, %c0_i32_0 : i32, i32
  }
  func.func @transform_5(%arg0: i32) -> (i32, i32) {
    %c0_i32 = arith.constant 0 : i32
    %c0_i32_0 = arith.constant 0 : i32
    return %arg0, %c0_i32 : i32, i32
  }
}

</mosaic_0001>

<bundles_post_ra>
// kernel: discriminator_forward.4
= control target key start
LH: loop header
LB: loop body
LE: loop exit
PB: predicated region body
PF: predicated region fallthrough
CT: control target
= control target key end

     0   :  { %s3878_s12 = smov 0   ;;  %s3880_s13 = smov 0   ;;  %s4479_s0 = inlined_call_operand.vmem [shape: bf16[1688,256], index: 0, kind: input, shape index: {}]   ;;  %s4480_s1 = inlined_call_operand.vmem [shape: bf16[256,128], index: 1, kind: input, shape index: {}]   ;;  %s4481_s2 = inlined_call_operand.vmem [shape: f32[1,128], index: 2, kind: input, shape index: {}]   ;;  %s4482_s3 = inlined_call_operand.vmem [shape: bf16[1688,128], index: 3, kind: output, shape index: {}]  }
   0x1   :  { %s3882_s14 = smov 0  }
   0x2 LB: > { %s3891_s15 = sadd.s32 4294967295, %s3823_s14   ;;  %s3893_s16 = sadd.s32 1, %s3823_s14   ;;  %s3823_s14 = sphi %s3882_s14, %s4489_s14   ;;  %s3819_s13 = sphi %s3880_s13, %s4488_s13   ;;  %s3815_s12 = sphi %s3878_s12, %s4487_s12  }
   0x3   : > { %s85_s17 = ssub.s32 %s3823_s14, %s3893_s16  ;;  %s88_s18 = sadd.s32 1, %s3819_s13 }
   0x4   : > { %p86_p0 = scmp.eq.s32.totalorder %s85_s17, 0  ;;  %p98_p1 = scmp.ne.s32.totalorder %s3819_s13, %s3815_s12 }
   0x5   : > { %p99_p2 = scmp.eq.s32.totalorder %s3891_s15, 1  ;;  %p2782_p3 = scmp.ge.s32.totalorder %s3823_s14, 1 }
   0x6   : > { %s3901_s19 = scalar_select %p86_p0, %s3819_s13, %s88_s18  }
   0x7   : > { %p3903_p4 = por %p99_p2, %p98_p1  ;;  %p149_p5 = scmp.lt.s32.totalorder %s3823_s14, 3 }
   0x9   : > { %p150_p6 = pnand %p2782_p3, %p149_p5 }
   0xa   : > { %v3590_v0 = vld [vmem:[%s4480_s1] sm:$0xff] (!%p150_p6)   ;;  %v3857_v1 = vmov (!%p150_p6), 0   ;;  %s3913_s23 = smul.u32 (!%p150_p6), 108, %s3891_s15  ;;  %v3591_v2 = vld [vmem:[%s4480_s1 + $0x8] sm:$0xff] (!%p150_p6)   ;;  %v3592_v3 = vld [vmem:[%s4480_s1 + $0x10] sm:$0xff] (!%p150_p6)   ;;  %s175_s21 = sand.u32 (!%p150_p6), 1, %s3815_s12  }
   0xb   : > { %153 = sbr.rel (%p150_p6) target bundleno = 596 (0x254), region = 32  ;;  %984 = vmatprep.subr.bf16.mxu0 (!%p150_p6), %v3857_v1  ;;  %3468 = vmatprep.subr.bf16.mxu1 (!%p150_p6), %v3857_v1  ;;  %v3593_v4 = vld [vmem:[%s4480_s1 + $0x18] sm:$0xff] (!%p150_p6)   ;;  %v3594_v5 = vld [vmem:[%s4480_s1 + $0x20] sm:$0xff] (!%p150_p6)   ;;  %v3595_v7 = vld [vmem:[%s4480_s1 + $0x28] sm:$0xff] (!%p150_p6)  }
   0xc   : > { %985 = vmatpush1.bf16.msra.mxu0 (!%p150_p6), %v3590_v0  ;;  %3484 = vmatpush1.bf16.msra.mxu1 (!%p150_p6), %v3590_v0  ;;  %p184_p7 = scmp.lt.s32.totalorder (!%p150_p6), %s3913_s23, 210  ;;  %v3596_v9 = vld [vmem:[%s4480_s1 + $0x30] sm:$0xff] (!%p150_p6)   ;;  %v3597_v10 = vld [vmem:[%s4480_s1 + $0x38] sm:$0xff] (!%p150_p6)   ;;  %v3598_v11 = vld [vmem:[%s4480_s1 + $0x40] sm:$0xff] (!%p150_p6)   ;;  %s3500_s22 = smul.u32 (!%p150_p6), 432, %s175_s21 }
   0xd   : > { %986 = vmatprep.subr.bf16.mxu0 (!%p150_p6), %v3857_v1  ;;  %3469 = vmatprep.subr.bf16.mxu1 (!%p150_p6), %v3857_v1  ;;  %v3599_v12 = vld [vmem:[%s4480_s1 + $0x48] sm:$0xff] (!%p150_p6)   ;;  %v3600_v13 = vld [vmem:[%s4480_s1 + $0x50] sm:$0xff] (!%p150_p6)   ;;  %v3601_v14 = vld [vmem:[%s4480_s1 + $0x58] sm:$0xff] (!%p150_p6)  }
   0xe   : > { %v3602_v15 = vld [vmem:[%s4480_s1 + $0x60] sm:$0xff] (!%p150_p6)   ;;  %v3603_v16 = vld [vmem:[%s4480_s1 + $0x68] sm:$0xff] (!%p150_p6)   ;;  %v3604_v17 = vld [vmem:[%s4480_s1 + $0x70] sm:$0xff] (!%p150_p6)   ;;  %s4117_s12 = scalar_lea.vmem (!%p150_p6), [#allocation2], %s3500_s22  }
   0xf   : > { %v3605_v18 = vld [vmem:[%s4480_s1 + $0x78] sm:$0xff] (!%p150_p6)  }
  0x10   : > { %987 = vmatpush1.bf16.msra.mxu0 (!%p150_p6), %v3591_v2  ;;  %3485 = vmatpush1.bf16.msra.mxu1 (!%p150_p6), %v3591_v2 }
  0x11   : > { %988 = vmatprep.subr.bf16.mxu0 (!%p150_p6), %v3857_v1  ;;  %3470 = vmatprep.subr.bf16.mxu1 (!%p150_p6), %v3857_v1 }
  0x12   : > { %s185_s28 = scalar_select %p184_p7, %s3913_s23, 210 }
  0x13   : > { %s2321_s25 = ssub.s32 (%p3903_p4), 211, %s3913_s23  ;;  %s3142_s26 = smul.u32 (%p3903_p4), 432, %s3891_s15 }
  0x14   : > { %989 = vmatpush1.bf16.msra.mxu0 %v3592_v3  ;;  %3486 = vmatpush1.bf16.msra.mxu1 %v3592_v3  ;;  %s3033_s4 = sshll.u32 %s185_s28, 3  ;;  %p2322_p8 = scmp.lt.s32.totalorder (%p3903_p4), %s2321_s25, 108 }
  0x15   : > { %990 = vmatprep.subr.bf16.mxu0 %v3857_v1  ;;  %3471 = vmatprep.subr.bf16.mxu1 %v3857_v1  ;;  %s3938_s9 = scalar_lea.vmem %s4479_s0, %s3033_s4  ;;  %s4287_s29 = scalar_lea.vmem (%p3903_p4), %s4482_s3, %s3142_s26  }
  0x16   : > { %v3608_v6 = vld [vmem:[%s3938_s9 + $0x4] ss:$8 sps:$4 sm:$0xff]   ;;  %v3611_v8 = vld [vmem:[%s3938_s9 + $0x1b4] ss:$8 sps:$4 sm:$0xff]   ;;  %v3606_v19 = vld [vmem:[%s3938_s9] ss:$8 sps:$4 sm:$0xff]  }
  0x17   : > { %1016 = vmatprep.mubr.bf16.mxu0 %v3608_v6  ;;  %1232 = vmatprep.mubr.bf16.mxu1 %v3611_v8  ;;  %v3609_v20 = vld [vmem:[%s3938_s9 + $0x1b0] ss:$8 sps:$4 sm:$0xff]   ;;  %v3612_v21 = vld [vmem:[%s3938_s9 + $0x14] ss:$8 sps:$4 sm:$0xff]   ;;  %v3614_v22 = vld [vmem:[%s3938_s9 + $0x1c4] ss:$8 sps:$4 sm:$0xff]  }
  0x18   : > { %991 = vmatpush1.bf16.msra.mxu0 %v3593_v4  ;;  %3487 = vmatpush1.bf16.msra.mxu1 %v3593_v4  ;;  %v3616_v23 = vld [vmem:[%s3938_s9 + $0x10] ss:$8 sps:$4 sm:$0xff]   ;;  %v3617_v24 = vld [vmem:[%s3938_s9 + $0x1c0] ss:$8 sps:$4 sm:$0xff]   ;;  %v3618_v25 = vld [vmem:[%s3938_s9 + $0x24] ss:$8 sps:$4 sm:$0xff]  }
  0x19   : > { %992 = vmatprep.subr.bf16.mxu0 %v3857_v1  ;;  %3472 = vmatprep.subr.bf16.mxu1 %v3857_v1  ;;  %v3620_v26 = vld [vmem:[%s3938_s9 + $0x1d4] ss:$8 sps:$4 sm:$0xff]   ;;  %v3622_v27 = vld [vmem:[%s3938_s9 + $0x20] ss:$8 sps:$4 sm:$0xff]   ;;  %v3623_v28 = vld [vmem:[%s3938_s9 + $0x1d0] ss:$8 sps:$4 sm:$0xff]  }
  0x1a   : > { %v3624_v29 = vld [vmem:[%s3938_s9 + $0x34] ss:$8 sps:$4 sm:$0xff]   ;;  %v3626_v30 = vld [vmem:[%s3938_s9 + $0x1e4] ss:$8 sps:$4 sm:$0xff]   ;;  %v3628_v31 = vld [vmem:[%s3938_s9 + $0x30] ss:$8 sps:$4 sm:$0xff]  }
  0x1b   : > { %v3629_v32 = vld [vmem:[%s3938_s9 + $0x1e0] ss:$8 sps:$4 sm:$0xff]   ;;  %v3630_v33 = vld [vmem:[%s3938_s9 + $0x44] ss:$8 sps:$4 sm:$0xff]   ;;  %v3632_v34 = vld [vmem:[%s3938_s9 + $0x1f4] ss:$8 sps:$4 sm:$0xff]  }
  0x1c   : > { %993 = vmatpush1.bf16.msra.mxu0 %v3594_v5  ;;  %3488 = vmatpush1.bf16.msra.mxu1 %v3594_v5  ;;  %v3634_v35 = vld [vmem:[%s3938_s9 + $0x40] ss:$8 sps:$4 sm:$0xff]   ;;  %v3635_v36 = vld [vmem:[%s3938_s9 + $0x1f0] ss:$8 sps:$4 sm:$0xff]   ;;  %v3636_v37 = vld [vmem:[%s3938_s9 + $0x54] ss:$8 sps:$4 sm:$0xff]  }
  0x1d   : > { %994 = vmatprep.subr.bf16.mxu0 %v3857_v1  ;;  %3473 = vmatprep.subr.bf16.mxu1 %v3857_v1  ;;  %v3638_v38 = vld [vmem:[%s3938_s9 + $0x204] ss:$8 sps:$4 sm:$0xff]   ;;  %v3640_v39 = vld [vmem:[%s3938_s9 + $0x50] ss:$8 sps:$4 sm:$0xff]   ;;  %v3641_v40 = vld [vmem:[%s3938_s9 + $0x200] ss:$8 sps:$4 sm:$0xff]  }
  0x1e   : > { %v3642_v41 = vld [vmem:[%s3938_s9 + $0x64] ss:$8 sps:$4 sm:$0xff]   ;;  %v3644_v42 = vld [vmem:[%s3938_s9 + $0x214] ss:$8 sps:$4 sm:$0xff]   ;;  %v3646_v43 = vld [vmem:[%s3938_s9 + $0x60] ss:$8 sps:$4 sm:$0xff]  }
  0x1f   : > { %v3647_v44 = vld [vmem:[%s3938_s9 + $0x210] ss:$8 sps:$4 sm:$0xff]   ;;  %v3648_v45 = vld [vmem:[%s3938_s9 + $0x74] ss:$8 sps:$4 sm:$0xff]   ;;  %v3650_v46 = vld [vmem:[%s3938_s9 + $0x224] ss:$8 sps:$4 sm:$0xff]  }
  0x20   : > { %995 = vmatpush1.bf16.msra.mxu0 %v3595_v7  ;;  %3489 = vmatpush1.bf16.msra.mxu1 %v3595_v7  ;;  %v3652_v47 = vld [vmem:[%s3938_s9 + $0x70] ss:$8 sps:$4 sm:$0xff]   ;;  %v3653_v48 = vld [vmem:[%s3938_s9 + $0x220] ss:$8 sps:$4 sm:$0xff]   ;;  %v3654_v49 = vld [vmem:[%s3938_s9 + $0x84] ss:$8 sps:$4 sm:$0xff]  }
  0x21   : > { %996 = vmatprep.subr.bf16.mxu0 %v3857_v1  ;;  %3474 = vmatprep.subr.bf16.mxu1 %v3857_v1  ;;  %v3656_v50 = vld [vmem:[%s3938_s9 + $0x234] ss:$8 sps:$4 sm:$0xff]   ;;  %v3658_v51 = vld [vmem:[%s3938_s9 + $0x80] ss:$8 sps:$4 sm:$0xff]   ;;  %v3659_v52 = vld [vmem:[%s3938_s9 + $0x230] ss:$8 sps:$4 sm:$0xff]  }
  0x22   : > { %v3660_v53 = vld [vmem:[%s3938_s9 + $0x94] ss:$8 sps:$4 sm:$0xff]   ;;  %v3662_v54 = vld [vmem:[%s3938_s9 + $0x244] ss:$8 sps:$4 sm:$0xff]   ;;  %v3664_v55 = vld [vmem:[%s3938_s9 + $0x90] ss:$8 sps:$4 sm:$0xff]  }
  0x23   : > { %v3665_v56 = vld [vmem:[%s3938_s9 + $0x240] ss:$8 sps:$4 sm:$0xff]   ;;  %v3666_v57 = vld [vmem:[%s3938_s9 + $0xa4] ss:$8 sps:$4 sm:$0xff]   ;;  %v3668_v58 = vld [vmem:[%s3938_s9 + $0x254] ss:$8 sps:$4 sm:$0xff]  }
  0x24   : > { %997 = vmatpush1.bf16.msra.mxu0 %v3596_v9  ;;  %3490 = vmatpush1.bf16.msra.mxu1 %v3596_v9  ;;  %v3670_v59 = vld [vmem:[%s3938_s9 + $0xa0] ss:$8 sps:$4 sm:$0xff]   ;;  %v3671_v60 = vld [vmem:[%s3938_s9 + $0x250] ss:$8 sps:$4 sm:$0xff]   ;;  %v3672_v61 = vld [vmem:[%s3938_s9 + $0xb4] ss:$8 sps:$4 sm:$0xff]  }
  0x25   : > { %998 = vmatprep.subr.bf16.mxu0 %v3857_v1  ;;  %3475 = vmatprep.subr.bf16.mxu1 %v3857_v1  ;;  %v3674_v62 = vld [vmem:[%s3938_s9 + $0x264] ss:$8 sps:$4 sm:$0xff]   ;;  %v3676_v63 = vld [vmem:[%s3938_s9 + $0xb0] ss:$8 sps:$4 sm:$0xff]   ;;  %v3677_v0 = vld [vmem:[%s3938_s9 + $0x260] ss:$8 sps:$4 sm:$0xff]  }
  0x26   : > { %v3680_v2 = vld [vmem:[%s3938_s9 + $0x274] ss:$8 sps:$4 sm:$0xff]   ;;  %v3682_v3 = vld [vmem:[%s3938_s9 + $0xc0] ss:$8 sps:$4 sm:$0xff]   ;;  %v3683_v4 = vld [vmem:[%s3938_s9 + $0x270] ss:$8 sps:$4 sm:$0xff]  }
  0x27   : > { %v3684_v5 = vld [vmem:[%s3938_s9 + $0xd4] ss:$8 sps:$4 sm:$0xff]   ;;  %v3686_v6 = vld [vmem:[%s3938_s9 + $0x284] ss:$8 sps:$4 sm:$0xff]   ;;  %v3688_v7 = vld [vmem:[%s3938_s9 + $0xd0] ss:$8 sps:$4 sm:$0xff]  }
  0x28   : > { %999 = vmatpush1.bf16.msra.mxu0 %v3597_v10  ;;  %3491 = vmatpush1.bf16.msra.mxu1 %v3597_v10  ;;  %v3689_v8 = vld [vmem:[%s3938_s9 + $0x280] ss:$8 sps:$4 sm:$0xff]   ;;  %v3690_v9 = vld [vmem:[%s3938_s9 + $0xe4] ss:$8 sps:$4 sm:$0xff]   ;;  %v3692_v10 = vld [vmem:[%s3938_s9 + $0x294] ss:$8 sps:$4 sm:$0xff]  }
  0x29   : > { %1000 = vmatprep.subr.bf16.mxu0 %v3857_v1  ;;  %3476 = vmatprep.subr.bf16.mxu1 %v3857_v1 }
  0x2c   : > { %1001 = vmatpush1.bf16.msra.mxu0 %v3598_v11  ;;  %3492 = vmatpush1.bf16.msra.mxu1 %v3598_v11  ;;  %v3694_v11 = vld [vmem:[%s3938_s9 + $0xe0] ss:$8 sps:$4 sm:$0xff]  }
  0x2d   : > { %1002 = vmatprep.subr.bf16.mxu0 %v3857_v1  ;;  %3477 = vmatprep.subr.bf16.mxu1 %v3857_v1 }
  0x30   : > { %1003 = vmatpush1.bf16.msra.mxu0 %v3599_v12  ;;  %3493 = vmatpush1.bf16.msra.mxu1 %v3599_v12  ;;  %v3695_v12 = vld [vmem:[%s3938_s9 + $0x290] ss:$8 sps:$4 sm:$0xff]  }
  0x31   : > { %1004 = vmatprep.subr.bf16.mxu0 %v3857_v1  ;;  %3478 = vmatprep.subr.bf16.mxu1 %v3857_v1 }
  0x34   : > { %1005 = vmatpush1.bf16.msra.mxu0 %v3600_v13  ;;  %3494 = vmatpush1.bf16.msra.mxu1 %v3600_v13  ;;  %v3696_v13 = vld [vmem:[%s3938_s9 + $0xf4] ss:$8 sps:$4 sm:$0xff]  }
  0x35   : > { %1006 = vmatprep.subr.bf16.mxu0 %v3857_v1  ;;  %3479 = vmatprep.subr.bf16.mxu1 %v3857_v1 }
  0x38   : > { %1007 = vmatpush1.bf16.msra.mxu0 %v3601_v14  ;;  %3495 = vmatpush1.bf16.msra.mxu1 %v3601_v14  ;;  %v3698_v14 = vld [vmem:[%s3938_s9 + $0x2a4] ss:$8 sps:$4 sm:$0xff]  }
  0x39   : > { %1008 = vmatprep.subr.bf16.mxu0 %v3857_v1  ;;  %3480 = vmatprep.subr.bf16.mxu1 %v3857_v1 }
  0x3c   : > { %1009 = vmatpush1.bf16.msra.mxu0 %v3602_v15  ;;  %3496 = vmatpush1.bf16.msra.mxu1 %v3602_v15  ;;  %v3700_v15 = vld [vmem:[%s3938_s9 + $0xf0] ss:$8 sps:$4 sm:$0xff]  }
  0x3d   : > { %1010 = vmatprep.subr.bf16.mxu0 %v3857_v1  ;;  %3481 = vmatprep.subr.bf16.mxu1 %v3857_v1 }
  0x40   : > { %1011 = vmatpush1.bf16.msra.mxu0 %v3603_v16  ;;  %3497 = vmatpush1.bf16.msra.mxu1 %v3603_v16  ;;  %v3701_v16 = vld [vmem:[%s3938_s9 + $0x2a0] ss:$8 sps:$4 sm:$0xff]  }
  0x41   : > { %1012 = vmatprep.subr.bf16.mxu0 %v3857_v1  ;;  %3482 = vmatprep.subr.bf16.mxu1 %v3857_v1 }
  0x44   : > { %1013 = vmatpush1.bf16.msra.mxu0 %v3604_v17  ;;  %3498 = vmatpush1.bf16.msra.mxu1 %v3604_v17  ;;  %v3702_v17 = vld [vmem:[%s3938_s9 + $0x104] ss:$8 sps:$4 sm:$0xff]  }
  0x45   : > { %1014 = vmatprep.subr.bf16.mxu0 %v3857_v1  ;;  %3483 = vmatprep.subr.bf16.mxu1 %v3857_v1  ;;  %v3678_v1 = vld [vmem:[%s3938_s9 + $0xc4] ss:$8 sps:$4 sm:$0xff]  }
  0x48   : > { %1015 = vmatpush1.bf16.msra.mxu0 %v3605_v18  ;;  %3499 = vmatpush1.bf16.msra.mxu1 %v3605_v18  ;;  %v3704_v18 = vld [vmem:[%s3938_s9 + $0x2b4] ss:$8 sps:$4 sm:$0xff]  }
  0x4b   : > { %1017 = vmatmul.mubr.bf16.vlgmr.msra.gmra.mrb[0].mxu0 %v3606_v19  ;;  %1233 = vmatmul.mubr.bf16.vlgmr.msra.gmra.mrb[0].mxu1 %v3609_v20  ;;  %v3706_v19 = vld [vmem:[%s3938_s9 + $0x100] ss:$8 sps:$4 sm:$0xff]   ;;  %v3707_v20 = vld [vmem:[%s3938_s9 + $0x2b0] ss:$8 sps:$4 sm:$0xff]  }
  0x4c   : > { %1024 = vmatprep.mubr.bf16.mxu0 %v3612_v21  ;;  %1240 = vmatprep.mubr.bf16.mxu1 %v3614_v22  ;;  %v3708_v21 = vld [vmem:[%s3938_s9 + $0x114] ss:$8 sps:$4 sm:$0xff]   ;;  %v3710_v22 = vld [vmem:[%s3938_s9 + $0x2c4] ss:$8 sps:$4 sm:$0xff]  }
  0x53   : > { %1025 = vmatmul.mubr.bf16.gmra.mrb[4].mxu0 %v3616_v23  ;;  %1241 = vmatmul.mubr.bf16.gmra.mrb[4].mxu1 %v3617_v24  ;;  %v3712_v23 = vld [vmem:[%s3938_s9 + $0x110] ss:$8 sps:$4 sm:$0xff]   ;;  %v3713_v24 = vld [vmem:[%s3938_s9 + $0x2c0] ss:$8 sps:$4 sm:$0xff]  }
  0x54   : > { %1032 = vmatprep.mubr.bf16.mxu0 %v3618_v25  ;;  %1248 = vmatprep.mubr.bf16.mxu1 %v3620_v26  ;;  %v3714_v25 = vld [vmem:[%s3938_s9 + $0x124] ss:$8 sps:$4 sm:$0xff]   ;;  %v3716_v26 = vld [vmem:[%s3938_s9 + $0x2d4] ss:$8 sps:$4 sm:$0xff]  }
  0x5b   : > { %1033 = vmatmul.mubr.bf16.gmra.mrb[8].mxu0 %v3622_v27  ;;  %1249 = vmatmul.mubr.bf16.gmra.mrb[8].mxu1 %v3623_v28  ;;  %v3718_v27 = vld [vmem:[%s3938_s9 + $0x120] ss:$8 sps:$4 sm:$0xff]   ;;  %v3719_v28 = vld [vmem:[%s3938_s9 + $0x2d0] ss:$8 sps:$4 sm:$0xff]  }
  0x5c   : > { %1040 = vmatprep.mubr.bf16.mxu0 %v3624_v29  ;;  %1256 = vmatprep.mubr.bf16.mxu1 %v3626_v30  ;;  %v3720_v29 = vld [vmem:[%s3938_s9 + $0x134] ss:$8 sps:$4 sm:$0xff]   ;;  %v3722_v30 = vld [vmem:[%s3938_s9 + $0x2e4] ss:$8 sps:$4 sm:$0xff]  }
  0x63   : > { %1041 = vmatmul.mubr.bf16.gmra.mrb[12].mxu0 %v3628_v31  ;;  %1257 = vmatmul.mubr.bf16.gmra.mrb[12].mxu1 %v3629_v32  ;;  %v3724_v31 = vld [vmem:[%s3938_s9 + $0x130] ss:$8 sps:$4 sm:$0xff]   ;;  %v3725_v32 = vld [vmem:[%s3938_s9 + $0x2e0] ss:$8 sps:$4 sm:$0xff]  }
  0x64   : > { %1048 = vmatprep.mubr.bf16.mxu0 %v3630_v33  ;;  %1264 = vmatprep.mubr.bf16.mxu1 %v3632_v34  ;;  %v3726_v33 = vld [vmem:[%s3938_s9 + $0x144] ss:$8 sps:$4 sm:$0xff]   ;;  %v3728_v34 = vld [vmem:[%s3938_s9 + $0x2f4] ss:$8 sps:$4 sm:$0xff]  }
  0x6b   : > { %1049 = vmatmul.mubr.bf16.gmra.mrb[16].mxu0 %v3634_v35  ;;  %1265 = vmatmul.mubr.bf16.gmra.mrb[16].mxu1 %v3635_v36  ;;  %v3730_v35 = vld [vmem:[%s3938_s9 + $0x140] ss:$8 sps:$4 sm:$0xff]   ;;  %v3731_v36 = vld [vmem:[%s3938_s9 + $0x2f0] ss:$8 sps:$4 sm:$0xff]  }
  0x6c   : > { %1056 = vmatprep.mubr.bf16.mxu0 %v3636_v37  ;;  %1272 = vmatprep.mubr.bf16.mxu1 %v3638_v38  ;;  %v3732_v37 = vld [vmem:[%s3938_s9 + $0x154] ss:$8 sps:$4 sm:$0xff]   ;;  %v3734_v38 = vld [vmem:[%s3938_s9 + $0x304] ss:$8 sps:$4 sm:$0xff]  }
  0x73   : > { %1057 = vmatmul.mubr.bf16.gmra.mrb[20].mxu0 %v3640_v39  ;;  %1273 = vmatmul.mubr.bf16.gmra.mrb[20].mxu1 %v3641_v40  ;;  %v3736_v39 = vld [vmem:[%s3938_s9 + $0x150] ss:$8 sps:$4 sm:$0xff]   ;;  %v3737_v40 = vld [vmem:[%s3938_s9 + $0x300] ss:$8 sps:$4 sm:$0xff]  }
  0x74   : > { %1064 = vmatprep.mubr.bf16.mxu0 %v3642_v41  ;;  %1280 = vmatprep.mubr.bf16.mxu1 %v3644_v42  ;;  %v3738_v41 = vld [vmem:[%s3938_s9 + $0x164] ss:$8 sps:$4 sm:$0xff]   ;;  %v3740_v42 = vld [vmem:[%s3938_s9 + $0x314] ss:$8 sps:$4 sm:$0xff]  }
  0x7b   : > { %1065 = vmatmul.mubr.bf16.gmra.mrb[24].mxu0 %v3646_v43  ;;  %1281 = vmatmul.mubr.bf16.gmra.mrb[24].mxu1 %v3647_v44  ;;  %v3742_v43 = vld [vmem:[%s3938_s9 + $0x160] ss:$8 sps:$4 sm:$0xff]   ;;  %v3743_v44 = vld [vmem:[%s3938_s9 + $0x310] ss:$8 sps:$4 sm:$0xff]  }
  0x7c   : > { %1072 = vmatprep.mubr.bf16.mxu0 %v3648_v45  ;;  %1288 = vmatprep.mubr.bf16.mxu1 %v3650_v46  ;;  %v3744_v45 = vld [vmem:[%s3938_s9 + $0x174] ss:$8 sps:$4 sm:$0xff]   ;;  %v3746_v46 = vld [vmem:[%s3938_s9 + $0x324] ss:$8 sps:$4 sm:$0xff]  }
  0x83   : > { %1073 = vmatmul.mubr.bf16.gmra.mrb[28].mxu0 %v3652_v47  ;;  %1289 = vmatmul.mubr.bf16.gmra.mrb[28].mxu1 %v3653_v48  ;;  %v3748_v47 = vld [vmem:[%s3938_s9 + $0x170] ss:$8 sps:$4 sm:$0xff]   ;;  %v3749_v48 = vld [vmem:[%s3938_s9 + $0x320] ss:$8 sps:$4 sm:$0xff]  }
  0x84   : > { %1080 = vmatprep.mubr.bf16.mxu0 %v3654_v49  ;;  %1296 = vmatprep.mubr.bf16.mxu1 %v3656_v50  ;;  %v3750_v49 = vld [vmem:[%s3938_s9 + $0x184] ss:$8 sps:$4 sm:$0xff]   ;;  %v3752_v50 = vld [vmem:[%s3938_s9 + $0x334] ss:$8 sps:$4 sm:$0xff]  }
  0x8b   : > { %1081 = vmatmul.mubr.bf16.gmra.mrb[32].mxu0 %v3658_v51  ;;  %1297 = vmatmul.mubr.bf16.gmra.mrb[32].mxu1 %v3659_v52  ;;  %v3754_v51 = vld [vmem:[%s3938_s9 + $0x180] ss:$8 sps:$4 sm:$0xff]   ;;  %v3755_v52 = vld [vmem:[%s3938_s9 + $0x330] ss:$8 sps:$4 sm:$0xff]  }
  0x8c   : > { %1088 = vmatprep.mubr.bf16.mxu0 %v3660_v53  ;;  %1304 = vmatprep.mubr.bf16.mxu1 %v3662_v54  ;;  %v3756_v53 = vld [vmem:[%s3938_s9 + $0x194] ss:$8 sps:$4 sm:$0xff]   ;;  %v3758_v54 = vld [vmem:[%s3938_s9 + $0x344] ss:$8 sps:$4 sm:$0xff]  }
  0x93   : > { %1089 = vmatmul.mubr.bf16.gmra.mrb[36].mxu0 %v3664_v55  ;;  %1305 = vmatmul.mubr.bf16.gmra.mrb[36].mxu1 %v3665_v56  ;;  %v3760_v55 = vld [vmem:[%s3938_s9 + $0x190] ss:$8 sps:$4 sm:$0xff]   ;;  %v3761_v56 = vld [vmem:[%s3938_s9 + $0x340] ss:$8 sps:$4 sm:$0xff]  }
  0x94   : > { %1096 = vmatprep.mubr.bf16.mxu0 %v3666_v57  ;;  %1312 = vmatprep.mubr.bf16.mxu1 %v3668_v58  ;;  %v3762_v57 = vld [vmem:[%s3938_s9 + $0x1a4] ss:$8 sps:$4 sm:$0xff]   ;;  %v3764_v58 = vld [vmem:[%s3938_s9 + $0x354] ss:$8 sps:$4 sm:$0xff]  }
  0x9b   : > { %1097 = vmatmul.mubr.bf16.gmra.mrb[40].mxu0 %v3670_v59  ;;  %1313 = vmatmul.mubr.bf16.gmra.mrb[40].mxu1 %v3671_v60  ;;  %v3766_v59 = vld [vmem:[%s3938_s9 + $0x1a0] ss:$8 sps:$4 sm:$0xff]   ;;  %v3767_v60 = vld [vmem:[%s3938_s9 + $0x350] ss:$8 sps:$4 sm:$0xff]  }
  0x9c   : > { %1104 = vmatprep.mubr.bf16.mxu0 %v3672_v61  ;;  %1320 = vmatprep.mubr.bf16.mxu1 %v3674_v62  ;;  %v4108_v61 = vld [vmem:[%s4481_s2] ss:$0 sm:$0xff] }
  0xa3   : > { %1105 = vmatmul.mubr.bf16.gmra.mrb[44].mxu0 %v3676_v63  ;;  %1321 = vmatmul.mubr.bf16.gmra.mrb[44].mxu1 %v3677_v0 }
  0xa4   : > { %1112 = vmatprep.mubr.bf16.mxu0 %v3678_v1  ;;  %1328 = vmatprep.mubr.bf16.mxu1 %v3680_v2 }
  0xab   : > { %1113 = vmatmul.mubr.bf16.gmra.mrb[48].mxu0 %v3682_v3  ;;  %1329 = vmatmul.mubr.bf16.gmra.mrb[48].mxu1 %v3683_v4 }
  0xac   : > { %1120 = vmatprep.mubr.bf16.mxu0 %v3684_v5  ;;  %1336 = vmatprep.mubr.bf16.mxu1 %v3686_v6 }
  0xb3   : > { %1121 = vmatmul.mubr.bf16.gmra.mrb[52].mxu0 %v3688_v7  ;;  %1337 = vmatmul.mubr.bf16.gmra.mrb[52].mxu1 %v3689_v8 }
  0xb4   : > { %1128 = vmatprep.mubr.bf16.mxu0 %v3690_v9  ;;  %1344 = vmatprep.mubr.bf16.mxu1 %v3692_v10 }
  0xbb   : > { %1129 = vmatmul.mubr.bf16.gmra.mrb[56].mxu0 %v3694_v11  ;;  %1345 = vmatmul.mubr.bf16.gmra.mrb[56].mxu1 %v3695_v12 }
  0xbc   : > { %1136 = vmatprep.mubr.bf16.mxu0 %v3696_v13  ;;  %1352 = vmatprep.mubr.bf16.mxu1 %v3698_v14 }
  0xc3   : > { %1137 = vmatmul.mubr.bf16.gmra.mrb[60].mxu0 %v3700_v15  ;;  %1353 = vmatmul.mubr.bf16.gmra.mrb[60].mxu1 %v3701_v16 }
  0xc4   : > { %1144 = vmatprep.mubr.bf16.mxu0 %v3702_v17  ;;  %1360 = vmatprep.mubr.bf16.mxu1 %v3704_v18 }
  0xcb   : > { %1145 = vmatmul.mubr.bf16.gmra.mrb[64].mxu0 %v3706_v19  ;;  %1361 = vmatmul.mubr.bf16.gmra.mrb[64].mxu1 %v3707_v20 }
  0xcc   : > { %1152 = vmatprep.mubr.bf16.mxu0 %v3708_v21  ;;  %1368 = vmatprep.mubr.bf16.mxu1 %v3710_v22 }
  0xd3   : > { %1153 = vmatmul.mubr.bf16.gmra.mrb[68].mxu0 %v3712_v23  ;;  %1369 = vmatmul.mubr.bf16.gmra.mrb[68].mxu1 %v3713_v24 }
  0xd4   : > { %1160 = vmatprep.mubr.bf16.mxu0 %v3714_v25  ;;  %1376 = vmatprep.mubr.bf16.mxu1 %v3716_v26 }
  0xdb   : > { %1161 = vmatmul.mubr.bf16.gmra.mrb[72].mxu0 %v3718_v27  ;;  %1377 = vmatmul.mubr.bf16.gmra.mrb[72].mxu1 %v3719_v28 }
  0xdc   : > { %1168 = vmatprep.mubr.bf16.mxu0 %v3720_v29  ;;  %1384 = vmatprep.mubr.bf16.mxu1 %v3722_v30 }
  0xe3   : > { %1169 = vmatmul.mubr.bf16.gmra.mrb[76].mxu0 %v3724_v31  ;;  %1385 = vmatmul.mubr.bf16.gmra.mrb[76].mxu1 %v3725_v32 }
  0xe4   : > { %1176 = vmatprep.mubr.bf16.mxu0 %v3726_v33  ;;  %1392 = vmatprep.mubr.bf16.mxu1 %v3728_v34 }
  0xeb   : > { %1177 = vmatmul.mubr.bf16.gmra.mrb[80].mxu0 %v3730_v35  ;;  %1393 = vmatmul.mubr.bf16.gmra.mrb[80].mxu1 %v3731_v36 }
  0xec   : > { %1184 = vmatprep.mubr.bf16.mxu0 %v3732_v37  ;;  %1400 = vmatprep.mubr.bf16.mxu1 %v3734_v38 }
  0xf3   : > { %1185 = vmatmul.mubr.bf16.gmra.mrb[84].mxu0 %v3736_v39  ;;  %1401 = vmatmul.mubr.bf16.gmra.mrb[84].mxu1 %v3737_v40 }
  0xf4   : > { %1192 = vmatprep.mubr.bf16.mxu0 %v3738_v41  ;;  %1408 = vmatprep.mubr.bf16.mxu1 %v3740_v42 }
  0xfb   : > { %1193 = vmatmul.mubr.bf16.gmra.mrb[88].mxu0 %v3742_v43  ;;  %1409 = vmatmul.mubr.bf16.gmra.mrb[88].mxu1 %v3743_v44 }
  0xfc   : > { %1200 = vmatprep.mubr.bf16.mxu0 %v3744_v45  ;;  %1416 = vmatprep.mubr.bf16.mxu1 %v3746_v46 }
 0x103   : > { %1201 = vmatmul.mubr.bf16.gmra.mrb[92].mxu0 %v3748_v47  ;;  %1417 = vmatmul.mubr.bf16.gmra.mrb[92].mxu1 %v3749_v48 }
 0x104   : > { %1208 = vmatprep.mubr.bf16.mxu0 %v3750_v49  ;;  %1424 = vmatprep.mubr.bf16.mxu1 %v3752_v50 }
 0x10b   : > { %1209 = vmatmul.mubr.bf16.gmra.mrb[96].mxu0 %v3754_v51  ;;  %1425 = vmatmul.mubr.bf16.gmra.mrb[96].mxu1 %v3755_v52 }
 0x10c   : > { %1216 = vmatprep.mubr.bf16.mxu0 %v3756_v53  ;;  %1432 = vmatprep.mubr.bf16.mxu1 %v3758_v54 }
 0x113   : > { %1217 = vmatmul.mubr.bf16.gmra.mrb[100].mxu0 %v3760_v55  ;;  %1433 = vmatmul.mubr.bf16.gmra.mrb[100].mxu1 %v3761_v56 }
 0x114   : > { %1224 = vmatprep.mubr.bf16.mxu0 %v3762_v57  ;;  %1440 = vmatprep.mubr.bf16.mxu1 %v3764_v58 }
 0x11b   : > { %1225 = vmatmul.mubr.bf16.gmra.mrb[104].mxu0 %v3766_v59  ;;  %1441 = vmatmul.mubr.bf16.gmra.mrb[104].mxu1 %v3767_v60 }
 0x11e   : > { %v1018_v62 = vpop.f32.mrb[0].mxu0  ;;  %v1234_v63 = vpop.f32.mrb[0].mxu1 }
 0x11f   : > { %v1019_v0 = vadd.f32 %v4108_v61, %v1018_v62  ;;  %v1235_v1 = vadd.f32 %v4108_v61, %v1234_v63  ;;  %v1020_v2 = vpop.f32.mrb[1].mxu0  ;;  %v1236_v3 = vpop.f32.mrb[1].mxu1 }
 0x120   : > { %v1021_v4 = vpop.f32.mrb[2].mxu0  ;;  %v1237_v5 = vpop.f32.mrb[2].mxu1 }
 0x121   : > { %v1557_v6 = vmul.f32 0.2, %v1019_v0  ;;  %v1611_v7 = vmul.f32 0.2, %v1235_v1  ;;  %v1022_v8 = vadd.f32 %v4108_v61, %v1021_v4  ;;  %v1238_v9 = vadd.f32 %v4108_v61, %v1237_v5  ;;  %v1023_v10 = vpop.f32.mrb[3].mxu0  ;;  %v1239_v11 = vpop.f32.mrb[3].mxu1 }
 0x122   : > { %vm1449_vm0 = vcmp.ge.f32.partialorder %v1019_v0, 0.0  ;;  %vm1503_vm1 = vcmp.ge.f32.partialorder %v1235_v1, 0.0 }
 0x123   : > { %vm1450_vm2 = vcmp.ge.f32.partialorder %v1022_v8, 0.0  ;;  %v1558_v12 = vmul.f32 0.2, %v1022_v8  ;;  %vm1504_vm3 = vcmp.ge.f32.partialorder %v1238_v9, 0.0  ;;  %v1612_v13 = vmul.f32 0.2, %v1238_v9 }
 0x124   : > { %v1665_v14 = vsel %vm1449_vm0, %v1019_v0, %v1557_v6  ;;  %v1719_v15 = vsel %vm1503_vm1, %v1235_v1, %v1611_v7 }
 0x125   : > { %v1666_v16 = vsel %vm1450_vm2, %v1022_v8, %v1558_v12  ;;  %v1720_v17 = vsel %vm1504_vm3, %v1238_v9, %v1612_v13 }
 0x126   : > { %v1026_v18 = vpop.f32.mrb[4].mxu0  ;;  %v1242_v19 = vpop.f32.mrb[4].mxu1  ;;  %v3148_v20 = vpack.c.bf16 %v1666_v16, %v1665_v14  ;;  %v3283_v21 = vpack.c.bf16 %v1720_v17, %v1719_v15 }
 0x127   : > { %v1027_v22 = vadd.f32 %v4108_v61, %v1026_v18  ;;  %v1243_v23 = vadd.f32 %v4108_v61, %v1242_v19  ;;  %v1028_v24 = vpop.f32.mrb[5].mxu0  ;;  %v1244_v25 = vpop.f32.mrb[5].mxu1 }
 0x128   : > { %v1029_v26 = vpop.f32.mrb[6].mxu0  ;;  %v1245_v27 = vpop.f32.mrb[6].mxu1  ;;  %3149 = vst [vmem:[%s4117_s12] sm:$0xff] %v3148_v20   ;;  %3441 = vst [vmem:[%s4117_s12 + $0xd8] sm:$0xff] %v3283_v21  }
 0x129   : > { %v1559_v28 = vmul.f32 0.2, %v1027_v22  ;;  %v1613_v29 = vmul.f32 0.2, %v1243_v23  ;;  %v1030_v30 = vadd.f32 %v4108_v61, %v1029_v26  ;;  %v1246_v31 = vadd.f32 %v4108_v61, %v1245_v27  ;;  %v1031_v32 = vpop.f32.mrb[7].mxu0  ;;  %v1247_v33 = vpop.f32.mrb[7].mxu1 }
 0x12a   : > { %vm1451_vm4 = vcmp.ge.f32.partialorder %v1027_v22, 0.0  ;;  %vm1505_vm5 = vcmp.ge.f32.partialorder %v1243_v23, 0.0 }
 0x12b   : > { %vm1452_vm6 = vcmp.ge.f32.partialorder %v1030_v30, 0.0  ;;  %v1560_v34 = vmul.f32 0.2, %v1030_v30  ;;  %vm1506_vm7 = vcmp.ge.f32.partialorder %v1246_v31, 0.0  ;;  %v1614_v35 = vmul.f32 0.2, %v1246_v31 }
 0x12c   : > { %v1667_v36 = vsel %vm1451_vm4, %v1027_v22, %v1559_v28  ;;  %v1721_v37 = vsel %vm1505_vm5, %v1243_v23, %v1613_v29 }
 0x12d   : > { %v1668_v38 = vsel %vm1452_vm6, %v1030_v30, %v1560_v34  ;;  %v1722_v39 = vsel %vm1506_vm7, %v1246_v31, %v1614_v35 }
 0x12e   : > { %v1034_v40 = vpop.f32.mrb[8].mxu0  ;;  %v1250_v41 = vpop.f32.mrb[8].mxu1  ;;  %v3153_v42 = vpack.c.bf16 %v1668_v38, %v1667_v36  ;;  %v3288_v43 = vpack.c.bf16 %v1722_v39, %v1721_v37 }
 0x12f   : > { %v1035_v44 = vadd.f32 %v4108_v61, %v1034_v40  ;;  %v1251_v45 = vadd.f32 %v4108_v61, %v1250_v41  ;;  %v1036_v46 = vpop.f32.mrb[9].mxu0  ;;  %v1252_v47 = vpop.f32.mrb[9].mxu1 }
 0x130   : > { %v1037_v48 = vpop.f32.mrb[10].mxu0  ;;  %v1253_v49 = vpop.f32.mrb[10].mxu1  ;;  %3415 = vst [vmem:[%s4117_s12 + $0x8] sm:$0xff] %v3153_v42   ;;  %3442 = vst [vmem:[%s4117_s12 + $0xe0] sm:$0xff] %v3288_v43  }
 0x131   : > { %v1561_v50 = vmul.f32 0.2, %v1035_v44  ;;  %v1615_v51 = vmul.f32 0.2, %v1251_v45  ;;  %v1038_v52 = vadd.f32 %v4108_v61, %v1037_v48  ;;  %v1254_v53 = vadd.f32 %v4108_v61, %v1253_v49  ;;  %v1039_v54 = vpop.f32.mrb[11].mxu0  ;;  %v1255_v55 = vpop.f32.mrb[11].mxu1 }
 0x132   : > { %vm1453_vm8 = vcmp.ge.f32.partialorder %v1035_v44, 0.0  ;;  %vm1507_vm9 = vcmp.ge.f32.partialorder %v1251_v45, 0.0 }
 0x133   : > { %vm1454_vm10 = vcmp.ge.f32.partialorder %v1038_v52, 0.0  ;;  %v1562_v56 = vmul.f32 0.2, %v1038_v52  ;;  %vm1508_vm11 = vcmp.ge.f32.partialorder %v1254_v53, 0.0  ;;  %v1616_v57 = vmul.f32 0.2, %v1254_v53 }
 0x134   : > { %v1669_v58 = vsel %vm1453_vm8, %v1035_v44, %v1561_v50  ;;  %v1723_v59 = vsel %vm1507_vm9, %v1251_v45, %v1615_v51 }
 0x135   : > { %v1670_v60 = vsel %vm1454_vm10, %v1038_v52, %v1562_v56  ;;  %v1724_v62 = vsel %vm1508_vm11, %v1254_v53, %v1616_v57 }
 0x136   : > { %v1042_v63 = vpop.f32.mrb[12].mxu0  ;;  %v1258_v0 = vpop.f32.mrb[12].mxu1  ;;  %v3158_v1 = vpack.c.bf16 %v1670_v60, %v1669_v58  ;;  %v3293_v2 = vpack.c.bf16 %v1724_v62, %v1723_v59 }
 0x137   : > { %v1043_v3 = vadd.f32 %v4108_v61, %v1042_v63  ;;  %v1259_v4 = vadd.f32 %v4108_v61, %v1258_v0  ;;  %v1044_v5 = vpop.f32.mrb[13].mxu0  ;;  %v1260_v6 = vpop.f32.mrb[13].mxu1 }
 0x138   : > { %v1045_v7 = vpop.f32.mrb[14].mxu0  ;;  %v1261_v8 = vpop.f32.mrb[14].mxu1  ;;  %3416 = vst [vmem:[%s4117_s12 + $0x10] sm:$0xff] %v3158_v1   ;;  %3443 = vst [vmem:[%s4117_s12 + $0xe8] sm:$0xff] %v3293_v2  }
 0x139   : > { %v1563_v9 = vmul.f32 0.2, %v1043_v3  ;;  %v1617_v10 = vmul.f32 0.2, %v1259_v4  ;;  %v1046_v11 = vadd.f32 %v4108_v61, %v1045_v7  ;;  %v1262_v12 = vadd.f32 %v4108_v61, %v1261_v8  ;;  %v1047_v13 = vpop.f32.mrb[15].mxu0  ;;  %v1263_v14 = vpop.f32.mrb[15].mxu1 }
 0x13a   : > { %vm1455_vm12 = vcmp.ge.f32.partialorder %v1043_v3, 0.0  ;;  %vm1509_vm13 = vcmp.ge.f32.partialorder %v1259_v4, 0.0 }
 0x13b   : > { %vm1456_vm14 = vcmp.ge.f32.partialorder %v1046_v11, 0.0  ;;  %v1564_v15 = vmul.f32 0.2, %v1046_v11  ;;  %vm1510_vm15 = vcmp.ge.f32.partialorder %v1262_v12, 0.0  ;;  %v1618_v16 = vmul.f32 0.2, %v1262_v12 }
 0x13c   : > { %v1671_v17 = vsel %vm1455_vm12, %v1043_v3, %v1563_v9  ;;  %v1725_v18 = vsel %vm1509_vm13, %v1259_v4, %v1617_v10 }
 0x13d   : > { %v1672_v19 = vsel %vm1456_vm14, %v1046_v11, %v1564_v15  ;;  %v1726_v20 = vsel %vm1510_vm15, %v1262_v12, %v1618_v16 }
 0x13e   : > { %v1050_v21 = vpop.f32.mrb[16].mxu0  ;;  %v1266_v22 = vpop.f32.mrb[16].mxu1  ;;  %v3163_v23 = vpack.c.bf16 %v1672_v19, %v1671_v17  ;;  %v3298_v24 = vpack.c.bf16 %v1726_v20, %v1725_v18 }
 0x13f   : > { %v1051_v25 = vadd.f32 %v4108_v61, %v1050_v21  ;;  %v1267_v26 = vadd.f32 %v4108_v61, %v1266_v22  ;;  %v1052_v27 = vpop.f32.mrb[17].mxu0  ;;  %v1268_v28 = vpop.f32.mrb[17].mxu1 }
 0x140   : > { %v1053_v29 = vpop.f32.mrb[18].mxu0  ;;  %v1269_v30 = vpop.f32.mrb[18].mxu1  ;;  %3417 = vst [vmem:[%s4117_s12 + $0x18] sm:$0xff] %v3163_v23   ;;  %3444 = vst [vmem:[%s4117_s12 + $0xf0] sm:$0xff] %v3298_v24  }
 0x141   : > { %v1565_v31 = vmul.f32 0.2, %v1051_v25  ;;  %v1619_v32 = vmul.f32 0.2, %v1267_v26  ;;  %v1054_v33 = vadd.f32 %v4108_v61, %v1053_v29  ;;  %v1270_v34 = vadd.f32 %v4108_v61, %v1269_v30  ;;  %v1055_v35 = vpop.f32.mrb[19].mxu0  ;;  %v1271_v36 = vpop.f32.mrb[19].mxu1 }
 0x142   : > { %vm1457_vm0 = vcmp.ge.f32.partialorder %v1051_v25, 0.0  ;;  %vm1511_vm1 = vcmp.ge.f32.partialorder %v1267_v26, 0.0 }
 0x143   : > { %vm1458_vm2 = vcmp.ge.f32.partialorder %v1054_v33, 0.0  ;;  %v1566_v37 = vmul.f32 0.2, %v1054_v33  ;;  %vm1512_vm3 = vcmp.ge.f32.partialorder %v1270_v34, 0.0  ;;  %v1620_v38 = vmul.f32 0.2, %v1270_v34 }
 0x144   : > { %v1673_v39 = vsel %vm1457_vm0, %v1051_v25, %v1565_v31  ;;  %v1727_v40 = vsel %vm1511_vm1, %v1267_v26, %v1619_v32 }
 0x145   : > { %v1674_v41 = vsel %vm1458_vm2, %v1054_v33, %v1566_v37  ;;  %v1728_v42 = vsel %vm1512_vm3, %v1270_v34, %v1620_v38 }
 0x146   : > { %v1058_v43 = vpop.f32.mrb[20].mxu0  ;;  %v1274_v44 = vpop.f32.mrb[20].mxu1  ;;  %v3168_v45 = vpack.c.bf16 %v1674_v41, %v1673_v39  ;;  %v3303_v46 = vpack.c.bf16 %v1728_v42, %v1727_v40 }
 0x147   : > { %v1059_v47 = vadd.f32 %v4108_v61, %v1058_v43  ;;  %v1275_v48 = vadd.f32 %v4108_v61, %v1274_v44  ;;  %v1060_v49 = vpop.f32.mrb[21].mxu0  ;;  %v1276_v50 = vpop.f32.mrb[21].mxu1 }
 0x148   : > { %v1061_v51 = vpop.f32.mrb[22].mxu0  ;;  %v1277_v52 = vpop.f32.mrb[22].mxu1  ;;  %3418 = vst [vmem:[%s4117_s12 + $0x20] sm:$0xff] %v3168_v45   ;;  %3445 = vst [vmem:[%s4117_s12 + $0xf8] sm:$0xff] %v3303_v46  }
 0x149   : > { %v1567_v53 = vmul.f32 0.2, %v1059_v47  ;;  %v1621_v54 = vmul.f32 0.2, %v1275_v48  ;;  %v1062_v55 = vadd.f32 %v4108_v61, %v1061_v51  ;;  %v1278_v56 = vadd.f32 %v4108_v61, %v1277_v52  ;;  %v1063_v57 = vpop.f32.mrb[23].mxu0  ;;  %v1279_v58 = vpop.f32.mrb[23].mxu1 }
 0x14a   : > { %vm1459_vm4 = vcmp.ge.f32.partialorder %v1059_v47, 0.0  ;;  %vm1513_vm5 = vcmp.ge.f32.partialorder %v1275_v48, 0.0 }
 0x14b   : > { %vm1460_vm6 = vcmp.ge.f32.partialorder %v1062_v55, 0.0  ;;  %v1568_v59 = vmul.f32 0.2, %v1062_v55  ;;  %vm1514_vm7 = vcmp.ge.f32.partialorder %v1278_v56, 0.0  ;;  %v1622_v60 = vmul.f32 0.2, %v1278_v56 }
 0x14c   : > { %v1675_v62 = vsel %vm1459_vm4, %v1059_v47, %v1567_v53  ;;  %v1729_v63 = vsel %vm1513_vm5, %v1275_v48, %v1621_v54 }
 0x14d   : > { %v1676_v0 = vsel %vm1460_vm6, %v1062_v55, %v1568_v59  ;;  %v1730_v1 = vsel %vm1514_vm7, %v1278_v56, %v1622_v60 }
 0x14e   : > { %v1066_v2 = vpop.f32.mrb[24].mxu0  ;;  %v1282_v3 = vpop.f32.mrb[24].mxu1  ;;  %v3173_v4 = vpack.c.bf16 %v1676_v0, %v1675_v62  ;;  %v3308_v5 = vpack.c.bf16 %v1730_v1, %v1729_v63 }
 0x14f   : > { %v1067_v6 = vadd.f32 %v4108_v61, %v1066_v2  ;;  %v1283_v7 = vadd.f32 %v4108_v61, %v1282_v3  ;;  %v1068_v8 = vpop.f32.mrb[25].mxu0  ;;  %v1284_v9 = vpop.f32.mrb[25].mxu1 }
 0x150   : > { %v1069_v10 = vpop.f32.mrb[26].mxu0  ;;  %v1285_v11 = vpop.f32.mrb[26].mxu1  ;;  %3419 = vst [vmem:[%s4117_s12 + $0x28] sm:$0xff] %v3173_v4   ;;  %3446 = vst [vmem:[%s4117_s12 + $0x100] sm:$0xff] %v3308_v5  }
 0x151   : > { %v1569_v12 = vmul.f32 0.2, %v1067_v6  ;;  %v1623_v13 = vmul.f32 0.2, %v1283_v7  ;;  %v1070_v14 = vadd.f32 %v4108_v61, %v1069_v10  ;;  %v1286_v15 = vadd.f32 %v4108_v61, %v1285_v11  ;;  %v1071_v16 = vpop.f32.mrb[27].mxu0  ;;  %v1287_v17 = vpop.f32.mrb[27].mxu1 }
 0x152   : > { %vm1461_vm8 = vcmp.ge.f32.partialorder %v1067_v6, 0.0  ;;  %vm1515_vm9 = vcmp.ge.f32.partialorder %v1283_v7, 0.0 }
 0x153   : > { %vm1462_vm10 = vcmp.ge.f32.partialorder %v1070_v14, 0.0  ;;  %v1570_v18 = vmul.f32 0.2, %v1070_v14  ;;  %vm1516_vm11 = vcmp.ge.f32.partialorder %v1286_v15, 0.0  ;;  %v1624_v19 = vmul.f32 0.2, %v1286_v15 }
 0x154   : > { %v1677_v20 = vsel %vm1461_vm8, %v1067_v6, %v1569_v12  ;;  %v1731_v21 = vsel %vm1515_vm9, %v1283_v7, %v1623_v13 }
 0x155   : > { %v1678_v22 = vsel %vm1462_vm10, %v1070_v14, %v1570_v18  ;;  %v1732_v23 = vsel %vm1516_vm11, %v1286_v15, %v1624_v19 }
 0x156   : > { %v1074_v24 = vpop.f32.mrb[28].mxu0  ;;  %v1290_v25 = vpop.f32.mrb[28].mxu1  ;;  %v3178_v26 = vpack.c.bf16 %v1678_v22, %v1677_v20  ;;  %v3313_v27 = vpack.c.bf16 %v1732_v23, %v1731_v21 }
 0x157   : > { %v1075_v28 = vadd.f32 %v4108_v61, %v1074_v24  ;;  %v1291_v29 = vadd.f32 %v4108_v61, %v1290_v25  ;;  %v1076_v30 = vpop.f32.mrb[29].mxu0  ;;  %v1292_v31 = vpop.f32.mrb[29].mxu1 }
 0x158   : > { %v1077_v32 = vpop.f32.mrb[30].mxu0  ;;  %v1293_v33 = vpop.f32.mrb[30].mxu1  ;;  %3420 = vst [vmem:[%s4117_s12 + $0x30] sm:$0xff] %v3178_v26   ;;  %3447 = vst [vmem:[%s4117_s12 + $0x108] sm:$0xff] %v3313_v27  }
 0x159   : > { %v1571_v34 = vmul.f32 0.2, %v1075_v28  ;;  %v1625_v35 = vmul.f32 0.2, %v1291_v29  ;;  %v1078_v36 = vadd.f32 %v4108_v61, %v1077_v32  ;;  %v1294_v37 = vadd.f32 %v4108_v61, %v1293_v33  ;;  %v1079_v38 = vpop.f32.mrb[31].mxu0  ;;  %v1295_v39 = vpop.f32.mrb[31].mxu1 }
 0x15a   : > { %vm1463_vm12 = vcmp.ge.f32.partialorder %v1075_v28, 0.0  ;;  %vm1517_vm13 = vcmp.ge.f32.partialorder %v1291_v29, 0.0 }
 0x15b   : > { %vm1464_vm14 = vcmp.ge.f32.partialorder %v1078_v36, 0.0  ;;  %v1572_v40 = vmul.f32 0.2, %v1078_v36  ;;  %vm1518_vm15 = vcmp.ge.f32.partialorder %v1294_v37, 0.0  ;;  %v1626_v41 = vmul.f32 0.2, %v1294_v37 }
 0x15c   : > { %v1679_v42 = vsel %vm1463_vm12, %v1075_v28, %v1571_v34  ;;  %v1733_v43 = vsel %vm1517_vm13, %v1291_v29, %v1625_v35 }
 0x15d   : > { %v1680_v44 = vsel %vm1464_vm14, %v1078_v36, %v1572_v40  ;;  %v1734_v45 = vsel %vm1518_vm15, %v1294_v37, %v1626_v41 }
 0x15e   : > { %v1082_v46 = vpop.f32.mrb[32].mxu0  ;;  %v1298_v47 = vpop.f32.mrb[32].mxu1  ;;  %v3183_v48 = vpack.c.bf16 %v1680_v44, %v1679_v42  ;;  %v3318_v49 = vpack.c.bf16 %v1734_v45, %v1733_v43 }
 0x15f   : > { %v1083_v50 = vadd.f32 %v4108_v61, %v1082_v46  ;;  %v1299_v51 = vadd.f32 %v4108_v61, %v1298_v47  ;;  %v1084_v52 = vpop.f32.mrb[33].mxu0  ;;  %v1300_v53 = vpop.f32.mrb[33].mxu1 }
 0x160   : > { %v1085_v54 = vpop.f32.mrb[34].mxu0  ;;  %v1301_v55 = vpop.f32.mrb[34].mxu1  ;;  %3421 = vst [vmem:[%s4117_s12 + $0x38] sm:$0xff] %v3183_v48   ;;  %3448 = vst [vmem:[%s4117_s12 + $0x110] sm:$0xff] %v3318_v49  }
 0x161   : > { %v1573_v56 = vmul.f32 0.2, %v1083_v50  ;;  %v1627_v57 = vmul.f32 0.2, %v1299_v51  ;;  %v1086_v58 = vadd.f32 %v4108_v61, %v1085_v54  ;;  %v1302_v59 = vadd.f32 %v4108_v61, %v1301_v55  ;;  %v1087_v60 = vpop.f32.mrb[35].mxu0  ;;  %v1303_v62 = vpop.f32.mrb[35].mxu1 }
 0x162   : > { %vm1465_vm0 = vcmp.ge.f32.partialorder %v1083_v50, 0.0  ;;  %vm1519_vm1 = vcmp.ge.f32.partialorder %v1299_v51, 0.0 }
 0x163   : > { %vm1466_vm2 = vcmp.ge.f32.partialorder %v1086_v58, 0.0  ;;  %v1574_v63 = vmul.f32 0.2, %v1086_v58  ;;  %vm1520_vm3 = vcmp.ge.f32.partialorder %v1302_v59, 0.0  ;;  %v1628_v0 = vmul.f32 0.2, %v1302_v59 }
 0x164   : > { %v1681_v1 = vsel %vm1465_vm0, %v1083_v50, %v1573_v56  ;;  %v1735_v2 = vsel %vm1519_vm1, %v1299_v51, %v1627_v57 }
 0x165   : > { %v1682_v3 = vsel %vm1466_vm2, %v1086_v58, %v1574_v63  ;;  %v1736_v4 = vsel %vm1520_vm3, %v1302_v59, %v1628_v0 }
 0x166   : > { %v1090_v5 = vpop.f32.mrb[36].mxu0  ;;  %v1306_v6 = vpop.f32.mrb[36].mxu1  ;;  %v3188_v7 = vpack.c.bf16 %v1682_v3, %v1681_v1  ;;  %v3323_v8 = vpack.c.bf16 %v1736_v4, %v1735_v2 }
 0x167   : > { %v1091_v9 = vadd.f32 %v4108_v61, %v1090_v5  ;;  %v1307_v10 = vadd.f32 %v4108_v61, %v1306_v6  ;;  %v1092_v11 = vpop.f32.mrb[37].mxu0  ;;  %v1308_v12 = vpop.f32.mrb[37].mxu1 }
 0x168   : > { %v1093_v13 = vpop.f32.mrb[38].mxu0  ;;  %v1309_v14 = vpop.f32.mrb[38].mxu1  ;;  %3422 = vst [vmem:[%s4117_s12 + $0x40] sm:$0xff] %v3188_v7   ;;  %3449 = vst [vmem:[%s4117_s12 + $0x118] sm:$0xff] %v3323_v8  }
 0x169   : > { %v1575_v15 = vmul.f32 0.2, %v1091_v9  ;;  %v1629_v16 = vmul.f32 0.2, %v1307_v10  ;;  %v1094_v17 = vadd.f32 %v4108_v61, %v1093_v13  ;;  %v1310_v18 = vadd.f32 %v4108_v61, %v1309_v14  ;;  %v1095_v19 = vpop.f32.mrb[39].mxu0  ;;  %v1311_v20 = vpop.f32.mrb[39].mxu1 }
 0x16a   : > { %vm1467_vm4 = vcmp.ge.f32.partialorder %v1091_v9, 0.0  ;;  %vm1521_vm5 = vcmp.ge.f32.partialorder %v1307_v10, 0.0 }
 0x16b   : > { %vm1468_vm6 = vcmp.ge.f32.partialorder %v1094_v17, 0.0  ;;  %v1576_v21 = vmul.f32 0.2, %v1094_v17  ;;  %vm1522_vm7 = vcmp.ge.f32.partialorder %v1310_v18, 0.0  ;;  %v1630_v22 = vmul.f32 0.2, %v1310_v18 }
 0x16c   : > { %v1683_v23 = vsel %vm1467_vm4, %v1091_v9, %v1575_v15  ;;  %v1737_v24 = vsel %vm1521_vm5, %v1307_v10, %v1629_v16 }
 0x16d   : > { %v1684_v25 = vsel %vm1468_vm6, %v1094_v17, %v1576_v21  ;;  %v1738_v26 = vsel %vm1522_vm7, %v1310_v18, %v1630_v22 }
 0x16e   : > { %v1098_v27 = vpop.f32.mrb[40].mxu0  ;;  %v1314_v28 = vpop.f32.mrb[40].mxu1  ;;  %v3193_v29 = vpack.c.bf16 %v1684_v25, %v1683_v23  ;;  %v3328_v30 = vpack.c.bf16 %v1738_v26, %v1737_v24 }
 0x16f   : > { %v1099_v31 = vadd.f32 %v4108_v61, %v1098_v27  ;;  %v1315_v32 = vadd.f32 %v4108_v61, %v1314_v28  ;;  %v1100_v33 = vpop.f32.mrb[41].mxu0  ;;  %v1316_v34 = vpop.f32.mrb[41].mxu1 }
 0x170   : > { %v1101_v35 = vpop.f32.mrb[42].mxu0  ;;  %v1317_v36 = vpop.f32.mrb[42].mxu1  ;;  %3423 = vst [vmem:[%s4117_s12 + $0x48] sm:$0xff] %v3193_v29   ;;  %3450 = vst [vmem:[%s4117_s12 + $0x120] sm:$0xff] %v3328_v30  }
 0x171   : > { %v1577_v37 = vmul.f32 0.2, %v1099_v31  ;;  %v1631_v38 = vmul.f32 0.2, %v1315_v32  ;;  %v1102_v39 = vadd.f32 %v4108_v61, %v1101_v35  ;;  %v1318_v40 = vadd.f32 %v4108_v61, %v1317_v36  ;;  %v1103_v41 = vpop.f32.mrb[43].mxu0  ;;  %v1319_v42 = vpop.f32.mrb[43].mxu1 }
 0x172   : > { %vm1469_vm8 = vcmp.ge.f32.partialorder %v1099_v31, 0.0  ;;  %vm1523_vm9 = vcmp.ge.f32.partialorder %v1315_v32, 0.0 }
 0x173   : > { %vm1470_vm10 = vcmp.ge.f32.partialorder %v1102_v39, 0.0  ;;  %v1578_v43 = vmul.f32 0.2, %v1102_v39  ;;  %vm1524_vm11 = vcmp.ge.f32.partialorder %v1318_v40, 0.0  ;;  %v1632_v44 = vmul.f32 0.2, %v1318_v40 }
 0x174   : > { %v1685_v45 = vsel %vm1469_vm8, %v1099_v31, %v1577_v37  ;;  %v1739_v46 = vsel %vm1523_vm9, %v1315_v32, %v1631_v38 }
 0x175   : > { %v1686_v47 = vsel %vm1470_vm10, %v1102_v39, %v1578_v43  ;;  %v1740_v48 = vsel %vm1524_vm11, %v1318_v40, %v1632_v44 }
 0x176   : > { %v1106_v49 = vpop.f32.mrb[44].mxu0  ;;  %v1322_v50 = vpop.f32.mrb[44].mxu1  ;;  %v3198_v51 = vpack.c.bf16 %v1686_v47, %v1685_v45  ;;  %v3333_v52 = vpack.c.bf16 %v1740_v48, %v1739_v46 }
 0x177   : > { %v1107_v53 = vadd.f32 %v4108_v61, %v1106_v49  ;;  %v1323_v54 = vadd.f32 %v4108_v61, %v1322_v50  ;;  %v1108_v55 = vpop.f32.mrb[45].mxu0  ;;  %v1324_v56 = vpop.f32.mrb[45].mxu1 }
 0x178   : > { %v1109_v57 = vpop.f32.mrb[46].mxu0  ;;  %v1325_v58 = vpop.f32.mrb[46].mxu1  ;;  %3424 = vst [vmem:[%s4117_s12 + $0x50] sm:$0xff] %v3198_v51   ;;  %3451 = vst [vmem:[%s4117_s12 + $0x128] sm:$0xff] %v3333_v52  }
 0x179   : > { %v1579_v59 = vmul.f32 0.2, %v1107_v53  ;;  %v1633_v60 = vmul.f32 0.2, %v1323_v54  ;;  %v1110_v62 = vadd.f32 %v4108_v61, %v1109_v57  ;;  %v1326_v63 = vadd.f32 %v4108_v61, %v1325_v58  ;;  %v1111_v0 = vpop.f32.mrb[47].mxu0  ;;  %v1327_v1 = vpop.f32.mrb[47].mxu1 }
 0x17a   : > { %vm1471_vm12 = vcmp.ge.f32.partialorder %v1107_v53, 0.0  ;;  %vm1525_vm13 = vcmp.ge.f32.partialorder %v1323_v54, 0.0 }
 0x17b   : > { %vm1472_vm14 = vcmp.ge.f32.partialorder %v1110_v62, 0.0  ;;  %v1580_v2 = vmul.f32 0.2, %v1110_v62  ;;  %vm1526_vm15 = vcmp.ge.f32.partialorder %v1326_v63, 0.0  ;;  %v1634_v3 = vmul.f32 0.2, %v1326_v63 }
 0x17c   : > { %v1687_v4 = vsel %vm1471_vm12, %v1107_v53, %v1579_v59  ;;  %v1741_v5 = vsel %vm1525_vm13, %v1323_v54, %v1633_v60 }
 0x17d   : > { %v1688_v6 = vsel %vm1472_vm14, %v1110_v62, %v1580_v2  ;;  %v1742_v7 = vsel %vm1526_vm15, %v1326_v63, %v1634_v3 }
 0x17e   : > { %v1114_v8 = vpop.f32.mrb[48].mxu0  ;;  %v1330_v9 = vpop.f32.mrb[48].mxu1  ;;  %v3203_v10 = vpack.c.bf16 %v1688_v6, %v1687_v4  ;;  %v3338_v11 = vpack.c.bf16 %v1742_v7, %v1741_v5 }
 0x17f   : > { %v1115_v12 = vadd.f32 %v4108_v61, %v1114_v8  ;;  %v1331_v13 = vadd.f32 %v4108_v61, %v1330_v9  ;;  %v1116_v14 = vpop.f32.mrb[49].mxu0  ;;  %v1332_v15 = vpop.f32.mrb[49].mxu1 }
 0x180   : > { %v1117_v16 = vpop.f32.mrb[50].mxu0  ;;  %v1333_v17 = vpop.f32.mrb[50].mxu1  ;;  %3425 = vst [vmem:[%s4117_s12 + $0x58] sm:$0xff] %v3203_v10   ;;  %3452 = vst [vmem:[%s4117_s12 + $0x130] sm:$0xff] %v3338_v11  }
 0x181   : > { %v1581_v18 = vmul.f32 0.2, %v1115_v12  ;;  %v1635_v19 = vmul.f32 0.2, %v1331_v13  ;;  %v1118_v20 = vadd.f32 %v4108_v61, %v1117_v16  ;;  %v1334_v21 = vadd.f32 %v4108_v61, %v1333_v17  ;;  %v1119_v22 = vpop.f32.mrb[51].mxu0  ;;  %v1335_v23 = vpop.f32.mrb[51].mxu1 }
 0x182   : > { %vm1473_vm0 = vcmp.ge.f32.partialorder %v1115_v12, 0.0  ;;  %vm1527_vm1 = vcmp.ge.f32.partialorder %v1331_v13, 0.0 }
 0x183   : > { %vm1474_vm2 = vcmp.ge.f32.partialorder %v1118_v20, 0.0  ;;  %v1582_v24 = vmul.f32 0.2, %v1118_v20  ;;  %vm1528_vm3 = vcmp.ge.f32.partialorder %v1334_v21, 0.0  ;;  %v1636_v25 = vmul.f32 0.2, %v1334_v21 }
 0x184   : > { %v1689_v26 = vsel %vm1473_vm0, %v1115_v12, %v1581_v18  ;;  %v1743_v27 = vsel %vm1527_vm1, %v1331_v13, %v1635_v19 }
 0x185   : > { %v1690_v28 = vsel %vm1474_vm2, %v1118_v20, %v1582_v24  ;;  %v1744_v29 = vsel %vm1528_vm3, %v1334_v21, %v1636_v25 }
 0x186   : > { %v1122_v30 = vpop.f32.mrb[52].mxu0  ;;  %v1338_v31 = vpop.f32.mrb[52].mxu1  ;;  %v3208_v32 = vpack.c.bf16 %v1690_v28, %v1689_v26  ;;  %v3343_v33 = vpack.c.bf16 %v1744_v29, %v1743_v27 }
 0x187   : > { %v1123_v34 = vadd.f32 %v4108_v61, %v1122_v30  ;;  %v1339_v35 = vadd.f32 %v4108_v61, %v1338_v31  ;;  %v1124_v36 = vpop.f32.mrb[53].mxu0  ;;  %v1340_v37 = vpop.f32.mrb[53].mxu1 }
 0x188   : > { %v1125_v38 = vpop.f32.mrb[54].mxu0  ;;  %v1341_v39 = vpop.f32.mrb[54].mxu1  ;;  %3426 = vst [vmem:[%s4117_s12 + $0x60] sm:$0xff] %v3208_v32   ;;  %3453 = vst [vmem:[%s4117_s12 + $0x138] sm:$0xff] %v3343_v33  }
 0x189   : > { %v1583_v40 = vmul.f32 0.2, %v1123_v34  ;;  %v1637_v41 = vmul.f32 0.2, %v1339_v35  ;;  %v1126_v42 = vadd.f32 %v4108_v61, %v1125_v38  ;;  %v1342_v43 = vadd.f32 %v4108_v61, %v1341_v39  ;;  %v1127_v44 = vpop.f32.mrb[55].mxu0  ;;  %v1343_v45 = vpop.f32.mrb[55].mxu1 }
 0x18a   : > { %vm1475_vm4 = vcmp.ge.f32.partialorder %v1123_v34, 0.0  ;;  %vm1529_vm5 = vcmp.ge.f32.partialorder %v1339_v35, 0.0 }
 0x18b   : > { %vm1476_vm6 = vcmp.ge.f32.partialorder %v1126_v42, 0.0  ;;  %v1584_v46 = vmul.f32 0.2, %v1126_v42  ;;  %vm1530_vm7 = vcmp.ge.f32.partialorder %v1342_v43, 0.0  ;;  %v1638_v47 = vmul.f32 0.2, %v1342_v43 }
 0x18c   : > { %v1691_v48 = vsel %vm1475_vm4, %v1123_v34, %v1583_v40  ;;  %v1745_v49 = vsel %vm1529_vm5, %v1339_v35, %v1637_v41 }
 0x18d   : > { %v1692_v50 = vsel %vm1476_vm6, %v1126_v42, %v1584_v46  ;;  %v1746_v51 = vsel %vm1530_vm7, %v1342_v43, %v1638_v47 }
 0x18e   : > { %v1130_v52 = vpop.f32.mrb[56].mxu0  ;;  %v1346_v53 = vpop.f32.mrb[56].mxu1  ;;  %v3213_v54 = vpack.c.bf16 %v1692_v50, %v1691_v48  ;;  %v3348_v55 = vpack.c.bf16 %v1746_v51, %v1745_v49 }
 0x18f   : > { %v1131_v56 = vadd.f32 %v4108_v61, %v1130_v52  ;;  %v1347_v57 = vadd.f32 %v4108_v61, %v1346_v53  ;;  %v1132_v58 = vpop.f32.mrb[57].mxu0  ;;  %v1348_v59 = vpop.f32.mrb[57].mxu1 }
 0x190   : > { %v1133_v60 = vpop.f32.mrb[58].mxu0  ;;  %v1349_v62 = vpop.f32.mrb[58].mxu1  ;;  %3427 = vst [vmem:[%s4117_s12 + $0x68] sm:$0xff] %v3213_v54   ;;  %3454 = vst [vmem:[%s4117_s12 + $0x140] sm:$0xff] %v3348_v55  }
 0x191   : > { %v1585_v63 = vmul.f32 0.2, %v1131_v56  ;;  %v1639_v0 = vmul.f32 0.2, %v1347_v57  ;;  %v1134_v1 = vadd.f32 %v4108_v61, %v1133_v60  ;;  %v1350_v2 = vadd.f32 %v4108_v61, %v1349_v62  ;;  %v1135_v3 = vpop.f32.mrb[59].mxu0  ;;  %v1351_v4 = vpop.f32.mrb[59].mxu1 }
 0x192   : > { %vm1477_vm8 = vcmp.ge.f32.partialorder %v1131_v56, 0.0  ;;  %vm1531_vm9 = vcmp.ge.f32.partialorder %v1347_v57, 0.0 }
 0x193   : > { %vm1478_vm10 = vcmp.ge.f32.partialorder %v1134_v1, 0.0  ;;  %v1586_v5 = vmul.f32 0.2, %v1134_v1  ;;  %vm1532_vm11 = vcmp.ge.f32.partialorder %v1350_v2, 0.0  ;;  %v1640_v6 = vmul.f32 0.2, %v1350_v2 }
 0x194   : > { %v1693_v7 = vsel %vm1477_vm8, %v1131_v56, %v1585_v63  ;;  %v1747_v8 = vsel %vm1531_vm9, %v1347_v57, %v1639_v0 }
 0x195   : > { %v1694_v9 = vsel %vm1478_vm10, %v1134_v1, %v1586_v5  ;;  %v1748_v10 = vsel %vm1532_vm11, %v1350_v2, %v1640_v6 }
 0x196   : > { %v1138_v11 = vpop.f32.mrb[60].mxu0  ;;  %v1354_v12 = vpop.f32.mrb[60].mxu1  ;;  %v3218_v13 = vpack.c.bf16 %v1694_v9, %v1693_v7  ;;  %v3353_v14 = vpack.c.bf16 %v1748_v10, %v1747_v8 }
 0x197   : > { %v1139_v15 = vadd.f32 %v4108_v61, %v1138_v11  ;;  %v1355_v16 = vadd.f32 %v4108_v61, %v1354_v12  ;;  %v1140_v17 = vpop.f32.mrb[61].mxu0  ;;  %v1356_v18 = vpop.f32.mrb[61].mxu1 }
 0x198   : > { %v1141_v19 = vpop.f32.mrb[62].mxu0  ;;  %v1357_v20 = vpop.f32.mrb[62].mxu1  ;;  %3428 = vst [vmem:[%s4117_s12 + $0x70] sm:$0xff] %v3218_v13   ;;  %3455 = vst [vmem:[%s4117_s12 + $0x148] sm:$0xff] %v3353_v14  }
 0x199   : > { %v1587_v21 = vmul.f32 0.2, %v1139_v15  ;;  %v1641_v22 = vmul.f32 0.2, %v1355_v16  ;;  %v1142_v23 = vadd.f32 %v4108_v61, %v1141_v19  ;;  %v1358_v24 = vadd.f32 %v4108_v61, %v1357_v20  ;;  %v1143_v25 = vpop.f32.mrb[63].mxu0  ;;  %v1359_v26 = vpop.f32.mrb[63].mxu1 }
 0x19a   : > { %vm1479_vm12 = vcmp.ge.f32.partialorder %v1139_v15, 0.0  ;;  %vm1533_vm13 = vcmp.ge.f32.partialorder %v1355_v16, 0.0  ;;  %v4226_v26 = vld [vmem:[%s4481_s2] ss:$0 sm:$0xff] }
 0x19b   : > { %vm1480_vm14 = vcmp.ge.f32.partialorder %v1142_v23, 0.0  ;;  %v1588_v27 = vmul.f32 0.2, %v1142_v23  ;;  %vm1534_vm15 = vcmp.ge.f32.partialorder %v1358_v24, 0.0  ;;  %v1642_v28 = vmul.f32 0.2, %v1358_v24 }
 0x19c   : > { %v1695_v29 = vsel %vm1479_vm12, %v1139_v15, %v1587_v21  ;;  %v1749_v30 = vsel %vm1533_vm13, %v1355_v16, %v1641_v22 }
 0x19d   : > { %v1696_v31 = vsel %vm1480_vm14, %v1142_v23, %v1588_v27  ;;  %v1750_v32 = vsel %vm1534_vm15, %v1358_v24, %v1642_v28 }
 0x19e   : > { %v1146_v33 = vpop.f32.mrb[64].mxu0  ;;  %v1362_v34 = vpop.f32.mrb[64].mxu1  ;;  %v3223_v35 = vpack.c.bf16 %v1696_v31, %v1695_v29  ;;  %v3358_v36 = vpack.c.bf16 %v1750_v32, %v1749_v30 }
 0x19f   : > { %v1147_v37 = vadd.f32 %v4108_v61, %v1146_v33  ;;  %v1363_v38 = vadd.f32 %v4108_v61, %v1362_v34  ;;  %v1148_v39 = vpop.f32.mrb[65].mxu0  ;;  %v1364_v40 = vpop.f32.mrb[65].mxu1 }
 0x1a0   : > { %v1149_v41 = vpop.f32.mrb[66].mxu0  ;;  %v1365_v42 = vpop.f32.mrb[66].mxu1  ;;  %3429 = vst [vmem:[%s4117_s12 + $0x78] sm:$0xff] %v3223_v35   ;;  %3456 = vst [vmem:[%s4117_s12 + $0x150] sm:$0xff] %v3358_v36  }
 0x1a1   : > { %v1589_v43 = vmul.f32 0.2, %v1147_v37  ;;  %v1643_v44 = vmul.f32 0.2, %v1363_v38  ;;  %v1150_v45 = vadd.f32 %v4108_v61, %v1149_v41  ;;  %v1366_v46 = vadd.f32 %v4108_v61, %v1365_v42  ;;  %v1151_v47 = vpop.f32.mrb[67].mxu0  ;;  %v1367_v48 = vpop.f32.mrb[67].mxu1 }
 0x1a2   : > { %vm1481_vm0 = vcmp.ge.f32.partialorder %v1147_v37, 0.0  ;;  %vm1535_vm1 = vcmp.ge.f32.partialorder %v1363_v38, 0.0 }
 0x1a3   : > { %vm1482_vm2 = vcmp.ge.f32.partialorder %v1150_v45, 0.0  ;;  %v1590_v49 = vmul.f32 0.2, %v1150_v45  ;;  %vm1536_vm3 = vcmp.ge.f32.partialorder %v1366_v46, 0.0  ;;  %v1644_v50 = vmul.f32 0.2, %v1366_v46 }
 0x1a4   : > { %v1697_v51 = vsel %vm1481_vm0, %v1147_v37, %v1589_v43  ;;  %v1751_v52 = vsel %vm1535_vm1, %v1363_v38, %v1643_v44 }
 0x1a5   : > { %v1698_v53 = vsel %vm1482_vm2, %v1150_v45, %v1590_v49  ;;  %v1752_v54 = vsel %vm1536_vm3, %v1366_v46, %v1644_v50 }
 0x1a6   : > { %v1154_v55 = vpop.f32.mrb[68].mxu0  ;;  %v1370_v56 = vpop.f32.mrb[68].mxu1  ;;  %v3228_v57 = vpack.c.bf16 %v1698_v53, %v1697_v51  ;;  %v3363_v58 = vpack.c.bf16 %v1752_v54, %v1751_v52 }
 0x1a7   : > { %v1155_v59 = vadd.f32 %v4108_v61, %v1154_v55  ;;  %v1371_v60 = vadd.f32 %v4108_v61, %v1370_v56  ;;  %v1156_v62 = vpop.f32.mrb[69].mxu0  ;;  %v1372_v63 = vpop.f32.mrb[69].mxu1 }
 0x1a8   : > { %v1157_v0 = vpop.f32.mrb[70].mxu0  ;;  %v1373_v1 = vpop.f32.mrb[70].mxu1  ;;  %3430 = vst [vmem:[%s4117_s12 + $0x80] sm:$0xff] %v3228_v57   ;;  %3457 = vst [vmem:[%s4117_s12 + $0x158] sm:$0xff] %v3363_v58  }
 0x1a9   : > { %v1591_v2 = vmul.f32 0.2, %v1155_v59  ;;  %v1645_v3 = vmul.f32 0.2, %v1371_v60  ;;  %v1158_v4 = vadd.f32 %v4108_v61, %v1157_v0  ;;  %v1374_v5 = vadd.f32 %v4108_v61, %v1373_v1  ;;  %v1159_v6 = vpop.f32.mrb[71].mxu0  ;;  %v1375_v7 = vpop.f32.mrb[71].mxu1 }
 0x1aa   : > { %vm1483_vm4 = vcmp.ge.f32.partialorder %v1155_v59, 0.0  ;;  %vm1537_vm5 = vcmp.ge.f32.partialorder %v1371_v60, 0.0 }
 0x1ab   : > { %vm1484_vm6 = vcmp.ge.f32.partialorder %v1158_v4, 0.0  ;;  %v1592_v8 = vmul.f32 0.2, %v1158_v4  ;;  %vm1538_vm7 = vcmp.ge.f32.partialorder %v1374_v5, 0.0  ;;  %v1646_v9 = vmul.f32 0.2, %v1374_v5 }
 0x1ac   : > { %v1699_v10 = vsel %vm1483_vm4, %v1155_v59, %v1591_v2  ;;  %v1753_v11 = vsel %vm1537_vm5, %v1371_v60, %v1645_v3 }
 0x1ad   : > { %v1700_v12 = vsel %vm1484_vm6, %v1158_v4, %v1592_v8  ;;  %v1754_v13 = vsel %vm1538_vm7, %v1374_v5, %v1646_v9 }
 0x1ae   : > { %v1162_v14 = vpop.f32.mrb[72].mxu0  ;;  %v1378_v15 = vpop.f32.mrb[72].mxu1  ;;  %v3233_v16 = vpack.c.bf16 %v1700_v12, %v1699_v10  ;;  %v3368_v17 = vpack.c.bf16 %v1754_v13, %v1753_v11 }
 0x1af   : > { %v1163_v18 = vadd.f32 %v4108_v61, %v1162_v14  ;;  %v1379_v19 = vadd.f32 %v4108_v61, %v1378_v15  ;;  %v1164_v20 = vpop.f32.mrb[73].mxu0  ;;  %v1380_v21 = vpop.f32.mrb[73].mxu1 }
 0x1b0   : > { %v1165_v22 = vpop.f32.mrb[74].mxu0  ;;  %v1381_v23 = vpop.f32.mrb[74].mxu1  ;;  %3431 = vst [vmem:[%s4117_s12 + $0x88] sm:$0xff] %v3233_v16   ;;  %3458 = vst [vmem:[%s4117_s12 + $0x160] sm:$0xff] %v3368_v17  }
 0x1b1   : > { %v1593_v24 = vmul.f32 0.2, %v1163_v18  ;;  %v1647_v25 = vmul.f32 0.2, %v1379_v19  ;;  %v1166_v27 = vadd.f32 %v4226_v26, %v1165_v22  ;;  %v1382_v28 = vadd.f32 %v4226_v26, %v1381_v23  ;;  %v1167_v29 = vpop.f32.mrb[75].mxu0  ;;  %v1383_v30 = vpop.f32.mrb[75].mxu1 }
 0x1b2   : > { %vm1485_vm8 = vcmp.ge.f32.partialorder %v1163_v18, 0.0  ;;  %vm1539_vm9 = vcmp.ge.f32.partialorder %v1379_v19, 0.0 }
 0x1b3   : > { %vm1486_vm10 = vcmp.ge.f32.partialorder %v1166_v27, 0.0  ;;  %v1594_v61 = vmul.f32 0.2, %v1166_v27  ;;  %vm1540_vm11 = vcmp.ge.f32.partialorder %v1382_v28, 0.0  ;;  %v1648_v31 = vmul.f32 0.2, %v1382_v28 }
 0x1b4   : > { %v1701_v32 = vsel %vm1485_vm8, %v1163_v18, %v1593_v24  ;;  %v1755_v33 = vsel %vm1539_vm9, %v1379_v19, %v1647_v25 }
 0x1b5   : > { %v1702_v34 = vsel %vm1486_vm10, %v1166_v27, %v1594_v61  ;;  %v1756_v35 = vsel %vm1540_vm11, %v1382_v28, %v1648_v31 }
 0x1b6   : > { %v1170_v36 = vpop.f32.mrb[76].mxu0  ;;  %v1386_v37 = vpop.f32.mrb[76].mxu1  ;;  %v3238_v38 = vpack.c.bf16 %v1702_v34, %v1701_v32  ;;  %v3373_v39 = vpack.c.bf16 %v1756_v35, %v1755_v33 }
 0x1b7   : > { %v1171_v40 = vadd.f32 %v4226_v26, %v1170_v36  ;;  %v1387_v41 = vadd.f32 %v4226_v26, %v1386_v37  ;;  %v1172_v42 = vpop.f32.mrb[77].mxu0  ;;  %v1388_v43 = vpop.f32.mrb[77].mxu1 }
 0x1b8   : > { %v1173_v44 = vpop.f32.mrb[78].mxu0  ;;  %v1389_v45 = vpop.f32.mrb[78].mxu1  ;;  %3432 = vst [vmem:[%s4117_s12 + $0x90] sm:$0xff] %v3238_v38   ;;  %3459 = vst [vmem:[%s4117_s12 + $0x168] sm:$0xff] %v3373_v39  }
 0x1b9   : > { %v1595_v46 = vmul.f32 0.2, %v1171_v40  ;;  %v1649_v47 = vmul.f32 0.2, %v1387_v41  ;;  %v1174_v48 = vadd.f32 %v4226_v26, %v1173_v44  ;;  %v1390_v49 = vadd.f32 %v4226_v26, %v1389_v45  ;;  %v1175_v50 = vpop.f32.mrb[79].mxu0  ;;  %v1391_v51 = vpop.f32.mrb[79].mxu1 }
 0x1ba   : > { %vm1487_vm12 = vcmp.ge.f32.partialorder %v1171_v40, 0.0  ;;  %vm1541_vm13 = vcmp.ge.f32.partialorder %v1387_v41, 0.0 }
 0x1bb   : > { %vm1488_vm14 = vcmp.ge.f32.partialorder %v1174_v48, 0.0  ;;  %v1596_v52 = vmul.f32 0.2, %v1174_v48  ;;  %vm1542_vm15 = vcmp.ge.f32.partialorder %v1390_v49, 0.0  ;;  %v1650_v53 = vmul.f32 0.2, %v1390_v49 }
 0x1bc   : > { %v1703_v54 = vsel %vm1487_vm12, %v1171_v40, %v1595_v46  ;;  %v1757_v55 = vsel %vm1541_vm13, %v1387_v41, %v1649_v47 }
 0x1bd   : > { %v1704_v56 = vsel %vm1488_vm14, %v1174_v48, %v1596_v52  ;;  %v1758_v57 = vsel %vm1542_vm15, %v1390_v49, %v1650_v53 }
 0x1be   : > { %v1178_v58 = vpop.f32.mrb[80].mxu0  ;;  %v1394_v59 = vpop.f32.mrb[80].mxu1  ;;  %v3243_v60 = vpack.c.bf16 %v1704_v56, %v1703_v54  ;;  %v3378_v62 = vpack.c.bf16 %v1758_v57, %v1757_v55 }
 0x1bf   : > { %v1179_v63 = vadd.f32 %v4226_v26, %v1178_v58  ;;  %v1395_v0 = vadd.f32 %v4226_v26, %v1394_v59  ;;  %v1180_v1 = vpop.f32.mrb[81].mxu0  ;;  %v1396_v2 = vpop.f32.mrb[81].mxu1 }
 0x1c0   : > { %v1181_v3 = vpop.f32.mrb[82].mxu0  ;;  %v1397_v4 = vpop.f32.mrb[82].mxu1  ;;  %3433 = vst [vmem:[%s4117_s12 + $0x98] sm:$0xff] %v3243_v60   ;;  %3460 = vst [vmem:[%s4117_s12 + $0x170] sm:$0xff] %v3378_v62  }
 0x1c1   : > { %v1597_v5 = vmul.f32 0.2, %v1179_v63  ;;  %v1651_v6 = vmul.f32 0.2, %v1395_v0  ;;  %v1182_v7 = vadd.f32 %v4226_v26, %v1181_v3  ;;  %v1398_v8 = vadd.f32 %v4226_v26, %v1397_v4  ;;  %v1183_v9 = vpop.f32.mrb[83].mxu0  ;;  %v1399_v10 = vpop.f32.mrb[83].mxu1 }
 0x1c2   : > { %vm1489_vm0 = vcmp.ge.f32.partialorder %v1179_v63, 0.0  ;;  %vm1543_vm1 = vcmp.ge.f32.partialorder %v1395_v0, 0.0 }
 0x1c3   : > { %vm1490_vm2 = vcmp.ge.f32.partialorder %v1182_v7, 0.0  ;;  %v1598_v11 = vmul.f32 0.2, %v1182_v7  ;;  %vm1544_vm3 = vcmp.ge.f32.partialorder %v1398_v8, 0.0  ;;  %v1652_v12 = vmul.f32 0.2, %v1398_v8 }
 0x1c4   : > { %v1705_v13 = vsel %vm1489_vm0, %v1179_v63, %v1597_v5  ;;  %v1759_v14 = vsel %vm1543_vm1, %v1395_v0, %v1651_v6 }
 0x1c5   : > { %v1706_v15 = vsel %vm1490_vm2, %v1182_v7, %v1598_v11  ;;  %v1760_v16 = vsel %vm1544_vm3, %v1398_v8, %v1652_v12 }
 0x1c6   : > { %v1186_v17 = vpop.f32.mrb[84].mxu0  ;;  %v1402_v18 = vpop.f32.mrb[84].mxu1  ;;  %v3248_v19 = vpack.c.bf16 %v1706_v15, %v1705_v13  ;;  %v3383_v20 = vpack.c.bf16 %v1760_v16, %v1759_v14 }
 0x1c7   : > { %v1187_v21 = vadd.f32 %v4226_v26, %v1186_v17  ;;  %v1403_v22 = vadd.f32 %v4226_v26, %v1402_v18  ;;  %v1188_v23 = vpop.f32.mrb[85].mxu0  ;;  %v1404_v24 = vpop.f32.mrb[85].mxu1 }
 0x1c8   : > { %v1189_v25 = vpop.f32.mrb[86].mxu0  ;;  %v1405_v27 = vpop.f32.mrb[86].mxu1  ;;  %3434 = vst [vmem:[%s4117_s12 + $0xa0] sm:$0xff] %v3248_v19   ;;  %3461 = vst [vmem:[%s4117_s12 + $0x178] sm:$0xff] %v3383_v20  }
 0x1c9   : > { %v1599_v28 = vmul.f32 0.2, %v1187_v21  ;;  %v1653_v29 = vmul.f32 0.2, %v1403_v22  ;;  %v1190_v30 = vadd.f32 %v4226_v26, %v1189_v25  ;;  %v1406_v61 = vadd.f32 %v4226_v26, %v1405_v27  ;;  %v1191_v31 = vpop.f32.mrb[87].mxu0  ;;  %v1407_v32 = vpop.f32.mrb[87].mxu1 }
 0x1ca   : > { %vm1491_vm4 = vcmp.ge.f32.partialorder %v1187_v21, 0.0  ;;  %vm1545_vm5 = vcmp.ge.f32.partialorder %v1403_v22, 0.0 }
 0x1cb   : > { %vm1492_vm6 = vcmp.ge.f32.partialorder %v1190_v30, 0.0  ;;  %v1600_v33 = vmul.f32 0.2, %v1190_v30  ;;  %vm1546_vm7 = vcmp.ge.f32.partialorder %v1406_v61, 0.0  ;;  %v1654_v34 = vmul.f32 0.2, %v1406_v61 }
 0x1cc   : > { %v1707_v35 = vsel %vm1491_vm4, %v1187_v21, %v1599_v28  ;;  %v1761_v36 = vsel %vm1545_vm5, %v1403_v22, %v1653_v29 }
 0x1cd   : > { %v1708_v37 = vsel %vm1492_vm6, %v1190_v30, %v1600_v33  ;;  %v1762_v38 = vsel %vm1546_vm7, %v1406_v61, %v1654_v34 }
 0x1ce   : > { %v1194_v39 = vpop.f32.mrb[88].mxu0  ;;  %v1410_v40 = vpop.f32.mrb[88].mxu1  ;;  %v3253_v41 = vpack.c.bf16 %v1708_v37, %v1707_v35  ;;  %v3388_v42 = vpack.c.bf16 %v1762_v38, %v1761_v36 }
 0x1cf   : > { %v1195_v43 = vadd.f32 %v4226_v26, %v1194_v39  ;;  %v1411_v44 = vadd.f32 %v4226_v26, %v1410_v40  ;;  %v1196_v45 = vpop.f32.mrb[89].mxu0  ;;  %v1412_v46 = vpop.f32.mrb[89].mxu1 }
 0x1d0   : > { %v1197_v47 = vpop.f32.mrb[90].mxu0  ;;  %v1413_v48 = vpop.f32.mrb[90].mxu1  ;;  %3435 = vst [vmem:[%s4117_s12 + $0xa8] sm:$0xff] %v3253_v41   ;;  %3462 = vst [vmem:[%s4117_s12 + $0x180] sm:$0xff] %v3388_v42  }
 0x1d1   : > { %v1601_v49 = vmul.f32 0.2, %v1195_v43  ;;  %v1655_v50 = vmul.f32 0.2, %v1411_v44  ;;  %v1198_v51 = vadd.f32 %v4226_v26, %v1197_v47  ;;  %v1414_v52 = vadd.f32 %v4226_v26, %v1413_v48  ;;  %v1199_v53 = vpop.f32.mrb[91].mxu0  ;;  %v1415_v54 = vpop.f32.mrb[91].mxu1 }
 0x1d2   : > { %vm1493_vm8 = vcmp.ge.f32.partialorder %v1195_v43, 0.0  ;;  %vm1547_vm9 = vcmp.ge.f32.partialorder %v1411_v44, 0.0 }
 0x1d3   : > { %vm1494_vm10 = vcmp.ge.f32.partialorder %v1198_v51, 0.0  ;;  %v1602_v55 = vmul.f32 0.2, %v1198_v51  ;;  %vm1548_vm11 = vcmp.ge.f32.partialorder %v1414_v52, 0.0  ;;  %v1656_v56 = vmul.f32 0.2, %v1414_v52 }
 0x1d4   : > { %v1709_v57 = vsel %vm1493_vm8, %v1195_v43, %v1601_v49  ;;  %v1763_v58 = vsel %vm1547_vm9, %v1411_v44, %v1655_v50 }
 0x1d5   : > { %v1710_v59 = vsel %vm1494_vm10, %v1198_v51, %v1602_v55  ;;  %v1764_v60 = vsel %vm1548_vm11, %v1414_v52, %v1656_v56 }
 0x1d6   : > { %v1202_v62 = vpop.f32.mrb[92].mxu0  ;;  %v1418_v63 = vpop.f32.mrb[92].mxu1  ;;  %v3258_v0 = vpack.c.bf16 %v1710_v59, %v1709_v57  ;;  %v3393_v1 = vpack.c.bf16 %v1764_v60, %v1763_v58 }
 0x1d7   : > { %v1203_v2 = vadd.f32 %v4226_v26, %v1202_v62  ;;  %v1419_v3 = vadd.f32 %v4226_v26, %v1418_v63  ;;  %v1204_v4 = vpop.f32.mrb[93].mxu0  ;;  %v1420_v5 = vpop.f32.mrb[93].mxu1 }
 0x1d8   : > { %v1205_v6 = vpop.f32.mrb[94].mxu0  ;;  %v1421_v7 = vpop.f32.mrb[94].mxu1  ;;  %3436 = vst [vmem:[%s4117_s12 + $0xb0] sm:$0xff] %v3258_v0   ;;  %3463 = vst [vmem:[%s4117_s12 + $0x188] sm:$0xff] %v3393_v1  }
 0x1d9   : > { %v1603_v8 = vmul.f32 0.2, %v1203_v2  ;;  %v1657_v9 = vmul.f32 0.2, %v1419_v3  ;;  %v1206_v10 = vadd.f32 %v4226_v26, %v1205_v6  ;;  %v1422_v11 = vadd.f32 %v4226_v26, %v1421_v7  ;;  %v1207_v12 = vpop.f32.mrb[95].mxu0  ;;  %v1423_v13 = vpop.f32.mrb[95].mxu1 }
 0x1da   : > { %vm1495_vm12 = vcmp.ge.f32.partialorder %v1203_v2, 0.0  ;;  %vm1549_vm13 = vcmp.ge.f32.partialorder %v1419_v3, 0.0 }
 0x1db   : > { %vm1496_vm14 = vcmp.ge.f32.partialorder %v1206_v10, 0.0  ;;  %v1604_v14 = vmul.f32 0.2, %v1206_v10  ;;  %vm1550_vm15 = vcmp.ge.f32.partialorder %v1422_v11, 0.0  ;;  %v1658_v15 = vmul.f32 0.2, %v1422_v11 }
 0x1dc   : > { %v1711_v16 = vsel %vm1495_vm12, %v1203_v2, %v1603_v8  ;;  %v1765_v17 = vsel %vm1549_vm13, %v1419_v3, %v1657_v9 }
 0x1dd   : > { %v1712_v18 = vsel %vm1496_vm14, %v1206_v10, %v1604_v14  ;;  %v1766_v19 = vsel %vm1550_vm15, %v1422_v11, %v1658_v15 }
 0x1de   : > { %v1210_v20 = vpop.f32.mrb[96].mxu0  ;;  %v1426_v21 = vpop.f32.mrb[96].mxu1  ;;  %v3263_v22 = vpack.c.bf16 %v1712_v18, %v1711_v16  ;;  %v3398_v23 = vpack.c.bf16 %v1766_v19, %v1765_v17 }
 0x1df   : > { %v1211_v24 = vadd.f32 %v4226_v26, %v1210_v20  ;;  %v1427_v25 = vadd.f32 %v4226_v26, %v1426_v21  ;;  %v1212_v27 = vpop.f32.mrb[97].mxu0  ;;  %v1428_v28 = vpop.f32.mrb[97].mxu1 }
 0x1e0   : > { %v1213_v29 = vpop.f32.mrb[98].mxu0  ;;  %v1429_v30 = vpop.f32.mrb[98].mxu1  ;;  %3437 = vst [vmem:[%s4117_s12 + $0xb8] sm:$0xff] %v3263_v22   ;;  %3464 = vst [vmem:[%s4117_s12 + $0x190] sm:$0xff] %v3398_v23  }
 0x1e1   : > { %v1605_v61 = vmul.f32 0.2, %v1211_v24  ;;  %v1659_v31 = vmul.f32 0.2, %v1427_v25  ;;  %v1214_v32 = vadd.f32 %v4226_v26, %v1213_v29  ;;  %v1430_v33 = vadd.f32 %v4226_v26, %v1429_v30  ;;  %v1215_v34 = vpop.f32.mrb[99].mxu0  ;;  %v1431_v35 = vpop.f32.mrb[99].mxu1 }
 0x1e2   : > { %vm1497_vm0 = vcmp.ge.f32.partialorder %v1211_v24, 0.0  ;;  %vm1551_vm1 = vcmp.ge.f32.partialorder %v1427_v25, 0.0 }
 0x1e3   : > { %vm1498_vm2 = vcmp.ge.f32.partialorder %v1214_v32, 0.0  ;;  %v1606_v36 = vmul.f32 0.2, %v1214_v32  ;;  %vm1552_vm3 = vcmp.ge.f32.partialorder %v1430_v33, 0.0  ;;  %v1660_v37 = vmul.f32 0.2, %v1430_v33 }
 0x1e4   : > { %v1713_v38 = vsel %vm1497_vm0, %v1211_v24, %v1605_v61  ;;  %v1767_v39 = vsel %vm1551_vm1, %v1427_v25, %v1659_v31 }
 0x1e5   : > { %v1714_v40 = vsel %vm1498_vm2, %v1214_v32, %v1606_v36  ;;  %v1768_v41 = vsel %vm1552_vm3, %v1430_v33, %v1660_v37 }
 0x1e6   : > { %v1218_v42 = vpop.f32.mrb[100].mxu0  ;;  %v1434_v43 = vpop.f32.mrb[100].mxu1  ;;  %v3268_v44 = vpack.c.bf16 %v1714_v40, %v1713_v38  ;;  %v3403_v45 = vpack.c.bf16 %v1768_v41, %v1767_v39 }
 0x1e7   : > { %v1219_v46 = vadd.f32 %v4226_v26, %v1218_v42  ;;  %v1435_v47 = vadd.f32 %v4226_v26, %v1434_v43  ;;  %v1220_v48 = vpop.f32.mrb[101].mxu0  ;;  %v1436_v49 = vpop.f32.mrb[101].mxu1 }
 0x1e8   : > { %v1221_v50 = vpop.f32.mrb[102].mxu0  ;;  %v1437_v51 = vpop.f32.mrb[102].mxu1  ;;  %3438 = vst [vmem:[%s4117_s12 + $0xc0] sm:$0xff] %v3268_v44   ;;  %3465 = vst [vmem:[%s4117_s12 + $0x198] sm:$0xff] %v3403_v45  }
 0x1e9   : > { %v1607_v52 = vmul.f32 0.2, %v1219_v46  ;;  %v1661_v53 = vmul.f32 0.2, %v1435_v47  ;;  %v1222_v54 = vadd.f32 %v4226_v26, %v1221_v50  ;;  %v1438_v55 = vadd.f32 %v4226_v26, %v1437_v51  ;;  %v1223_v56 = vpop.f32.mrb[103].mxu0  ;;  %v1439_v57 = vpop.f32.mrb[103].mxu1 }
 0x1ea   : > { %vm1499_vm4 = vcmp.ge.f32.partialorder %v1219_v46, 0.0  ;;  %vm1553_vm5 = vcmp.ge.f32.partialorder %v1435_v47, 0.0 }
 0x1eb   : > { %vm1500_vm6 = vcmp.ge.f32.partialorder %v1222_v54, 0.0  ;;  %v1608_v58 = vmul.f32 0.2, %v1222_v54  ;;  %vm1554_vm7 = vcmp.ge.f32.partialorder %v1438_v55, 0.0  ;;  %v1662_v59 = vmul.f32 0.2, %v1438_v55 }
 0x1ec   : > { %v1715_v60 = vsel %vm1499_vm4, %v1219_v46, %v1607_v52  ;;  %v1769_v62 = vsel %vm1553_vm5, %v1435_v47, %v1661_v53 }
 0x1ed   : > { %v1716_v63 = vsel %vm1500_vm6, %v1222_v54, %v1608_v58  ;;  %v1770_v0 = vsel %vm1554_vm7, %v1438_v55, %v1662_v59 }
 0x1ee   : > { %v1226_v1 = vpop.f32.mrb[104].mxu0  ;;  %v1442_v2 = vpop.f32.mrb[104].mxu1  ;;  %v3273_v3 = vpack.c.bf16 %v1716_v63, %v1715_v60  ;;  %v3408_v4 = vpack.c.bf16 %v1770_v0, %v1769_v62 }
 0x1ef   : > { %v1227_v5 = vadd.f32 %v4226_v26, %v1226_v1  ;;  %v1443_v6 = vadd.f32 %v4226_v26, %v1442_v2  ;;  %v1228_v7 = vpop.f32.mrb[105].mxu0  ;;  %v1444_v8 = vpop.f32.mrb[105].mxu1 }
 0x1f0   : > { %v1229_v9 = vpop.f32.mrb[106].mxu0  ;;  %v1445_v10 = vpop.f32.mrb[106].mxu1  ;;  %3439 = vst [vmem:[%s4117_s12 + $0xc8] sm:$0xff] %v3273_v3   ;;  %3466 = vst [vmem:[%s4117_s12 + $0x1a0] sm:$0xff] %v3408_v4  }
 0x1f1   : > { %v1609_v11 = vmul.f32 0.2, %v1227_v5  ;;  %v1663_v12 = vmul.f32 0.2, %v1443_v6  ;;  %v1230_v13 = vadd.f32 %v4226_v26, %v1229_v9  ;;  %v1446_v14 = vadd.f32 %v4226_v26, %v1445_v10  ;;  %v1231_v15 = vpop.f32.mrb[107].mxu0  ;;  %v1447_v16 = vpop.f32.mrb[107].mxu1 }
 0x1f2   : > { %vm1501_vm8 = vcmp.ge.f32.partialorder %v1227_v5, 0.0  ;;  %vm1555_vm9 = vcmp.ge.f32.partialorder %v1443_v6, 0.0  ;;  %2319 = sbr.rel (!%p3903_p4) target bundleno = 596 (0x254), region = 36 }
 0x1f3   : > { %vm1502_vm10 = vcmp.ge.f32.partialorder %v1230_v13, 0.0  ;;  %v1610_v17 = vmul.f32 0.2, %v1230_v13  ;;  %vm1556_vm11 = vcmp.ge.f32.partialorder %v1446_v14, 0.0  ;;  %v1664_v18 = vmul.f32 0.2, %v1446_v14 }
 0x1f4   : > { %v1717_v19 = vsel %vm1501_vm8, %v1227_v5, %v1609_v11  ;;  %v1771_v20 = vsel %vm1555_vm9, %v1443_v6, %v1663_v12 }
 0x1f5   : > { %v1718_v21 = vsel %vm1502_vm10, %v1230_v13, %v1610_v17  ;;  %v1772_v22 = vsel %vm1556_vm11, %v1446_v14, %v1664_v18 }
 0x1f6   : > { %v3278_v23 = vpack.c.bf16 %v1718_v21, %v1717_v19  ;;  %v3413_v24 = vpack.c.bf16 %v1772_v22, %v1771_v20 }
 0x1f8   : > { %3440 = vst [vmem:[%s4117_s12 + $0xd0] sm:$0xff] %v3278_v23   ;;  %3467 = vst [vmem:[%s4117_s12 + $0x1a8] sm:$0xff] %v3413_v24  }
 0x1f9   : > { %s4491_s25 = smov (!%p2322_p8, %s2321_s25), 108 }
 0x1fa   : > { %s3018_s30 = sshll.u32 %s4491_s25, 6 }
 0x1fb   : > { %p3021_p9 = scmp.eq.s32.totalorder %s3018_s30, 0 }
 0x1fc   : > { %s4293_s4 = sshrl.u32 (!%p3021_p9), %s4491_s25, 6 }
 0x1fd   : > { %2330 = sbr.rel (%p3021_p9) target bundleno = 596 (0x254), region = 40  ;;  %p3022_p10 = scmp.le.s32.totalorder (!%p3021_p9), %s4293_s4, 0 }
 0x204   : > { %2735 = sbr.rel (%p3022_p10) target bundleno = 575 (0x23f), region = 112  ;;  %s4484_s15 = smov (!%p3022_p10), %s4287_s29 }
 0x205   : > { %s4485_s20 = smov (!%p3022_p10), %s4117_s12  ;;  %s4302_s23 = smov (!%p3022_p10), 0  }
 0x206   : > { %s4304_s5 = smov (!%p3022_p10), 0  }
 0x20b LB: >> { %v2346_v26 = vld [vmem:[%s3831_s20] sm:$0xf]  ;;  %v2348_v25 = vld [vmem:[%s3831_s20 + $0x4] sm:$0xf]  ;;  %v2350_v27 = vld [vmem:[%s3831_s20 + $0x8] sm:$0xf]  ;;  %s3839_s5 = sphi %s4304_s5, %s2340_s5   ;;  %s3835_s23 = sphi %s4302_s23, %s4486_s23   ;;  %s3831_s20 = sphi %s4485_s20, %s2479_s20   ;;  %s3827_s15 = sphi %s4484_s15, %s2480_s15  }
 0x20c   : >> { %2347 = vst [vmem:[%s3827_s15] sm:$0xf] %v2346_v26  ;;  %2349 = vst [vmem:[%s3827_s15 + $0x4] sm:$0xf] %v2348_v25  ;;  %v2352_v28 = vld [vmem:[%s3831_s20 + $0xc] sm:$0xf]  ;;  %s2474_s6 = sadd.s32 1, %s3835_s23 }
 0x20d   : >> { %2351 = vst [vmem:[%s3827_s15 + $0x8] sm:$0xf] %v2350_v27  ;;  %v2354_v29 = vld [vmem:[%s3831_s20 + $0x10] sm:$0xf]  ;;  %v2356_v30 = vld [vmem:[%s3831_s20 + $0x14] sm:$0xf]  ;;  %p2475_p11 = scmp.ge.s32.totalorder %s2474_s6, %s4293_s4 }
 0x20e   : >> { %2353 = vst [vmem:[%s3827_s15 + $0xc] sm:$0xf] %v2352_v28  ;;  %2355 = vst [vmem:[%s3827_s15 + $0x10] sm:$0xf] %v2354_v29  ;;  %v2358_v61 = vld [vmem:[%s3831_s20 + $0x18] sm:$0xf] }
 0x20f   : >> { %2357 = vst [vmem:[%s3827_s15 + $0x14] sm:$0xf] %v2356_v30  ;;  %v2360_v31 = vld [vmem:[%s3831_s20 + $0x1c] sm:$0xf]  ;;  %v2362_v32 = vld [vmem:[%s3831_s20 + $0x20] sm:$0xf] }
 0x210   : >> { %2359 = vst [vmem:[%s3827_s15 + $0x18] sm:$0xf] %v2358_v61  ;;  %2361 = vst [vmem:[%s3827_s15 + $0x1c] sm:$0xf] %v2360_v31  ;;  %v2364_v33 = vld [vmem:[%s3831_s20 + $0x24] sm:$0xf] }
 0x211   : >> { %2363 = vst [vmem:[%s3827_s15 + $0x20] sm:$0xf] %v2362_v32  ;;  %v2366_v34 = vld [vmem:[%s3831_s20 + $0x28] sm:$0xf]  ;;  %v2368_v35 = vld [vmem:[%s3831_s20 + $0x2c] sm:$0xf] }
 0x212   : >> { %2365 = vst [vmem:[%s3827_s15 + $0x24] sm:$0xf] %v2364_v33  ;;  %2367 = vst [vmem:[%s3827_s15 + $0x28] sm:$0xf] %v2366_v34  ;;  %v2370_v36 = vld [vmem:[%s3831_s20 + $0x30] sm:$0xf] }
 0x213   : >> { %2369 = vst [vmem:[%s3827_s15 + $0x2c] sm:$0xf] %v2368_v35  ;;  %v2372_v37 = vld [vmem:[%s3831_s20 + $0x34] sm:$0xf]  ;;  %v2374_v38 = vld [vmem:[%s3831_s20 + $0x38] sm:$0xf] }
 0x214   : >> { %2371 = vst [vmem:[%s3827_s15 + $0x30] sm:$0xf] %v2370_v36  ;;  %2373 = vst [vmem:[%s3827_s15 + $0x34] sm:$0xf] %v2372_v37  ;;  %v2376_v39 = vld [vmem:[%s3831_s20 + $0x3c] sm:$0xf] }
 0x215   : >> { %2375 = vst [vmem:[%s3827_s15 + $0x38] sm:$0xf] %v2374_v38  ;;  %v2378_v40 = vld [vmem:[%s3831_s20 + $0x40] sm:$0xf]  ;;  %v2380_v41 = vld [vmem:[%s3831_s20 + $0x44] sm:$0xf] }
 0x216   : >> { %2377 = vst [vmem:[%s3827_s15 + $0x3c] sm:$0xf] %v2376_v39  ;;  %2379 = vst [vmem:[%s3827_s15 + $0x40] sm:$0xf] %v2378_v40  ;;  %v2382_v42 = vld [vmem:[%s3831_s20 + $0x48] sm:$0xf] }
 0x217   : >> { %2381 = vst [vmem:[%s3827_s15 + $0x44] sm:$0xf] %v2380_v41  ;;  %v2384_v43 = vld [vmem:[%s3831_s20 + $0x4c] sm:$0xf]  ;;  %v2386_v44 = vld [vmem:[%s3831_s20 + $0x50] sm:$0xf] }
 0x218   : >> { %2383 = vst [vmem:[%s3827_s15 + $0x48] sm:$0xf] %v2382_v42  ;;  %2385 = vst [vmem:[%s3827_s15 + $0x4c] sm:$0xf] %v2384_v43  ;;  %v2388_v45 = vld [vmem:[%s3831_s20 + $0x54] sm:$0xf] }
 0x219   : >> { %2387 = vst [vmem:[%s3827_s15 + $0x50] sm:$0xf] %v2386_v44  ;;  %v2390_v46 = vld [vmem:[%s3831_s20 + $0x58] sm:$0xf]  ;;  %v2392_v47 = vld [vmem:[%s3831_s20 + $0x5c] sm:$0xf] }
 0x21a   : >> { %2389 = vst [vmem:[%s3827_s15 + $0x54] sm:$0xf] %v2388_v45  ;;  %2391 = vst [vmem:[%s3827_s15 + $0x58] sm:$0xf] %v2390_v46  ;;  %v2394_v48 = vld [vmem:[%s3831_s20 + $0x60] sm:$0xf] }
 0x21b   : >> { %2393 = vst [vmem:[%s3827_s15 + $0x5c] sm:$0xf] %v2392_v47  ;;  %v2396_v49 = vld [vmem:[%s3831_s20 + $0x64] sm:$0xf]  ;;  %v2398_v50 = vld [vmem:[%s3831_s20 + $0x68] sm:$0xf] }
 0x21c   : >> { %2395 = vst [vmem:[%s3827_s15 + $0x60] sm:$0xf] %v2394_v48  ;;  %2397 = vst [vmem:[%s3827_s15 + $0x64] sm:$0xf] %v2396_v49  ;;  %v2400_v51 = vld [vmem:[%s3831_s20 + $0x6c] sm:$0xf] }
 0x21d   : >> { %2399 = vst [vmem:[%s3827_s15 + $0x68] sm:$0xf] %v2398_v50  ;;  %v2402_v52 = vld [vmem:[%s3831_s20 + $0x70] sm:$0xf]  ;;  %v2404_v53 = vld [vmem:[%s3831_s20 + $0x74] sm:$0xf] }
 0x21e   : >> { %2401 = vst [vmem:[%s3827_s15 + $0x6c] sm:$0xf] %v2400_v51  ;;  %2403 = vst [vmem:[%s3827_s15 + $0x70] sm:$0xf] %v2402_v52  ;;  %v2406_v54 = vld [vmem:[%s3831_s20 + $0x78] sm:$0xf] }
 0x21f   : >> { %2405 = vst [vmem:[%s3827_s15 + $0x74] sm:$0xf] %v2404_v53  ;;  %v2408_v55 = vld [vmem:[%s3831_s20 + $0x7c] sm:$0xf]  ;;  %v2410_v56 = vld [vmem:[%s3831_s20 + $0x80] sm:$0xf] }
 0x220   : >> { %2407 = vst [vmem:[%s3827_s15 + $0x78] sm:$0xf] %v2406_v54  ;;  %2409 = vst [vmem:[%s3827_s15 + $0x7c] sm:$0xf] %v2408_v55  ;;  %v2412_v57 = vld [vmem:[%s3831_s20 + $0x84] sm:$0xf] }
 0x221   : >> { %2411 = vst [vmem:[%s3827_s15 + $0x80] sm:$0xf] %v2410_v56  ;;  %v2414_v58 = vld [vmem:[%s3831_s20 + $0x88] sm:$0xf]  ;;  %v2416_v59 = vld [vmem:[%s3831_s20 + $0x8c] sm:$0xf] }
 0x222   : >> { %2413 = vst [vmem:[%s3827_s15 + $0x84] sm:$0xf] %v2412_v57  ;;  %2415 = vst [vmem:[%s3827_s15 + $0x88] sm:$0xf] %v2414_v58  ;;  %v2418_v60 = vld [vmem:[%s3831_s20 + $0x90] sm:$0xf] }
 0x223   : >> { %2417 = vst [vmem:[%s3827_s15 + $0x8c] sm:$0xf] %v2416_v59  ;;  %v2420_v62 = vld [vmem:[%s3831_s20 + $0x94] sm:$0xf]  ;;  %v2422_v63 = vld [vmem:[%s3831_s20 + $0x98] sm:$0xf] }
 0x224   : >> { %2419 = vst [vmem:[%s3827_s15 + $0x90] sm:$0xf] %v2418_v60  ;;  %2421 = vst [vmem:[%s3827_s15 + $0x94] sm:$0xf] %v2420_v62  ;;  %v2424_v0 = vld [vmem:[%s3831_s20 + $0x9c] sm:$0xf] }
 0x225   : >> { %2423 = vst [vmem:[%s3827_s15 + $0x98] sm:$0xf] %v2422_v63  ;;  %v2426_v1 = vld [vmem:[%s3831_s20 + $0xa0] sm:$0xf]  ;;  %v2428_v2 = vld [vmem:[%s3831_s20 + $0xa4] sm:$0xf] }
 0x226   : >> { %2425 = vst [vmem:[%s3827_s15 + $0x9c] sm:$0xf] %v2424_v0  ;;  %2427 = vst [vmem:[%s3827_s15 + $0xa0] sm:$0xf] %v2426_v1  ;;  %v2430_v3 = vld [vmem:[%s3831_s20 + $0xa8] sm:$0xf] }
 0x227   : >> { %2429 = vst [vmem:[%s3827_s15 + $0xa4] sm:$0xf] %v2428_v2  ;;  %v2432_v4 = vld [vmem:[%s3831_s20 + $0xac] sm:$0xf]  ;;  %v2434_v5 = vld [vmem:[%s3831_s20 + $0xb0] sm:$0xf] }
 0x228   : >> { %2431 = vst [vmem:[%s3827_s15 + $0xa8] sm:$0xf] %v2430_v3  ;;  %2433 = vst [vmem:[%s3827_s15 + $0xac] sm:$0xf] %v2432_v4  ;;  %v2436_v6 = vld [vmem:[%s3831_s20 + $0xb4] sm:$0xf] }
 0x229   : >> { %2435 = vst [vmem:[%s3827_s15 + $0xb0] sm:$0xf] %v2434_v5  ;;  %v2438_v7 = vld [vmem:[%s3831_s20 + $0xb8] sm:$0xf]  ;;  %v2440_v8 = vld [vmem:[%s3831_s20 + $0xbc] sm:$0xf] }
 0x22a   : >> { %2437 = vst [vmem:[%s3827_s15 + $0xb4] sm:$0xf] %v2436_v6  ;;  %2439 = vst [vmem:[%s3827_s15 + $0xb8] sm:$0xf] %v2438_v7  ;;  %v2442_v9 = vld [vmem:[%s3831_s20 + $0xc0] sm:$0xf] }
 0x22b   : >> { %2441 = vst [vmem:[%s3827_s15 + $0xbc] sm:$0xf] %v2440_v8  ;;  %v2444_v10 = vld [vmem:[%s3831_s20 + $0xc4] sm:$0xf]  ;;  %v2446_v11 = vld [vmem:[%s3831_s20 + $0xc8] sm:$0xf] }
 0x22c   : >> { %2443 = vst [vmem:[%s3827_s15 + $0xc0] sm:$0xf] %v2442_v9  ;;  %2445 = vst [vmem:[%s3827_s15 + $0xc4] sm:$0xf] %v2444_v10  ;;  %v2448_v12 = vld [vmem:[%s3831_s20 + $0xcc] sm:$0xf] }
 0x22d   : >> { %2447 = vst [vmem:[%s3827_s15 + $0xc8] sm:$0xf] %v2446_v11  ;;  %v2450_v13 = vld [vmem:[%s3831_s20 + $0xd0] sm:$0xf]  ;;  %v2452_v14 = vld [vmem:[%s3831_s20 + $0xd4] sm:$0xf] }
 0x22e   : >> { %2449 = vst [vmem:[%s3827_s15 + $0xcc] sm:$0xf] %v2448_v12  ;;  %2451 = vst [vmem:[%s3827_s15 + $0xd0] sm:$0xf] %v2450_v13  ;;  %v2454_v15 = vld [vmem:[%s3831_s20 + $0xd8] sm:$0xf] }
 0x22f   : >> { %2453 = vst [vmem:[%s3827_s15 + $0xd4] sm:$0xf] %v2452_v14  ;;  %v2456_v16 = vld [vmem:[%s3831_s20 + $0xdc] sm:$0xf]  ;;  %v2458_v17 = vld [vmem:[%s3831_s20 + $0xe0] sm:$0xf] }
 0x230   : >> { %2455 = vst [vmem:[%s3827_s15 + $0xd8] sm:$0xf] %v2454_v15  ;;  %2457 = vst [vmem:[%s3827_s15 + $0xdc] sm:$0xf] %v2456_v16  ;;  %v2460_v18 = vld [vmem:[%s3831_s20 + $0xe4] sm:$0xf] }
 0x231   : >> { %2459 = vst [vmem:[%s3827_s15 + $0xe0] sm:$0xf] %v2458_v17  ;;  %v2462_v19 = vld [vmem:[%s3831_s20 + $0xe8] sm:$0xf]  ;;  %v2464_v20 = vld [vmem:[%s3831_s20 + $0xec] sm:$0xf] }
 0x232   : >> { %2461 = vst [vmem:[%s3827_s15 + $0xe4] sm:$0xf] %v2460_v18  ;;  %2463 = vst [vmem:[%s3827_s15 + $0xe8] sm:$0xf] %v2462_v19  ;;  %v2466_v21 = vld [vmem:[%s3831_s20 + $0xf0] sm:$0xf] }
 0x233   : >> { %2465 = vst [vmem:[%s3827_s15 + $0xec] sm:$0xf] %v2464_v20  ;;  %v2468_v22 = vld [vmem:[%s3831_s20 + $0xf4] sm:$0xf]  ;;  %v2470_v23 = vld [vmem:[%s3831_s20 + $0xf8] sm:$0xf] }
 0x234   : >> { %2467 = vst [vmem:[%s3827_s15 + $0xf0] sm:$0xf] %v2466_v21  ;;  %2469 = vst [vmem:[%s3827_s15 + $0xf4] sm:$0xf] %v2468_v22  ;;  %v2472_v24 = vld [vmem:[%s3831_s20 + $0xfc] sm:$0xf] }
 0x235   : >> { %2471 = vst [vmem:[%s3827_s15 + $0xf8] sm:$0xf] %v2470_v23  ;;  %2473 = vst [vmem:[%s3827_s15 + $0xfc] sm:$0xf] %v2472_v24  ;;  %s4493_s6 = smov (%p2475_p11, %s2474_s6), 0  ;;  %s2340_s5 = sadd.s32 1, %s3839_s5  }
 0x236   : >> { %s3023_s7 = sshll.u32 %s4493_s6, 8  ;;  %p2339_p12 = scmp.ge.s32.totalorder %s2340_s5, %s4293_s4 }
 0x237   : >> { %s2479_s20 = scalar_lea.vmem %s4117_s12, %s3023_s7 [#allocation2]   ;;  %s2480_s15 = scalar_lea.vmem %s4287_s29, %s3023_s7  }
 0x238   : >> { %s4486_s23 = smov %s4493_s6  ;;  %2342 = sbr.rel (!%p2339_p12) target bundleno = 523 (0x20b), region = 118 }
 0x23f PF: > { %s4461_s8 = sand.u32 63, %s4491_s25   ;;  %s3143_s10 = sshll.u32 %s4293_s4, 8 }
 0x240   : > { %s2485_s11 = scalar_lea.vmem %s4117_s12, %s3143_s10 [#allocation2]   ;;  %s2487_s14 = scalar_lea.vmem %s4287_s29, %s3143_s10  }
 0x241   : > { %p3028_p13 = scmp.le.s32.totalorder %s4461_s8, 0 }
 0x242   : > { %s3841_s17 = smov (!%p3028_p13), %s2487_s14   ;;  %s3845_s18 = smov (!%p3028_p13), %s2485_s11  }
 0x243   : > { %2749 = sbr.rel (%p3028_p13) target bundleno = 596 (0x254), region = 123  ;;  %s3849_s21 = smov (!%p3028_p13), 0  }
 0x244   : > { %s3853_s22 = smov (!%p3028_p13), 0  }
 0x24a LB: >> { %v2497_v26 = vld [vmem:[%s3847_s18] sm:$0xf]  ;;  %s2499_s9 = sadd.s32 1, %s3851_s21  ;;  %s2491_s22 = sadd.s32 1, %s3855_s22   ;;  %s3855_s22 = sphi %s3853_s22, %s2491_s22   ;;  %s3851_s21 = sphi %s3849_s21, %s3850_s21   ;;  %s3847_s18 = sphi %s3845_s18, %s2504_s18   ;;  %s3843_s17 = sphi %s3841_s17, %s2505_s17  }
 0x24b   : >> { %2498 = vst [vmem:[%s3843_s17] sm:$0xf] %v2497_v26  ;;  %p2500_p0 = scmp.ge.s32.totalorder %s2499_s9, %s4461_s8  ;;  %p2490_p1 = scmp.ge.s32.totalorder %s2491_s22, %s4461_s8 }
 0x24d   : >> { %s4495_s9 = smov (%p2500_p0, %s2499_s9), 0  ;;  %2493 = sbr.rel (!%p2490_p1) target bundleno = 586 (0x24a), region = 129 }
 0x24e   : >> { %s3029_s12 = sshll.u32 %s4495_s9, 2  ;;  %s3850_s21 = smov %s4495_s9  }
 0x24f   : >> { %s2504_s18 = scalar_lea.vmem %s2485_s11, %s3029_s12 [#allocation2]   ;;  %s2505_s17 = scalar_lea.vmem %s2487_s14, %s3029_s12  }
 0x254 PF: > { %p10_p2 = scmp.ge.s32.totalorder %s3893_s16, 4   ;;  %s4487_s12 = smov %s3819_s13 }
 0x255   : > { %s4488_s13 = smov %s3901_s19  ;;  %s4489_s14 = smov %s3893_s16 }
 0x256   :  { %12 = sbr.rel (!%p10_p2) target bundleno = 2 (0x2), region = 140 }

// kernel: discriminator_forward.5
= control target key start
LH: loop header
LB: loop body
LE: loop exit
PB: predicated region body
PF: predicated region fallthrough
CT: control target
= control target key end

     0   :  { %s7843_s12 = smov 0   ;;  %s7845_s13 = smov 0   ;;  %s9633_s0 = inlined_call_operand.vmem [shape: bf16[216,4096], index: 0, kind: input, shape index: {}]   ;;  %s9634_s1 = inlined_call_operand.vmem [shape: bf16[4096,128], index: 1, kind: input, shape index: {}]   ;;  %s9635_s2 = inlined_call_operand.vmem [shape: f32[1,128], index: 2, kind: input, shape index: {}]   ;;  %s9636_s3 = inlined_call_operand.vmem [shape: bf16[216,128], index: 3, kind: output, shape index: {}]  }
   0x1   :  { %s7847_s14 = smov 0  }
   0x2 LB: > { %s7856_s15 = sadd.s32 4294967295, %s7789_s14   ;;  %s7858_s16 = sadd.s32 1, %s7789_s14   ;;  %s7789_s14 = sphi %s7847_s14, %s9643_s14   ;;  %s7785_s13 = sphi %s7845_s13, %s9642_s13   ;;  %s7781_s12 = sphi %s7843_s12, %s9641_s12  }
   0x3   : > { %s85_s17 = ssub.s32 %s7789_s14, %s7858_s16  ;;  %s88_s18 = sadd.s32 1, %s7785_s13 }
   0x4   : > { %p86_p0 = scmp.eq.s32.totalorder %s85_s17, 0  ;;  %p98_p1 = scmp.ne.s32.totalorder %s7785_s13, %s7781_s12 }
   0x5   : > { %p99_p2 = scmp.eq.s32.totalorder %s7856_s15, 1  ;;  %p5749_p3 = scmp.ge.s32.totalorder %s7789_s14, 1 }
   0x6   : > { %s7866_s19 = scalar_select %p86_p0, %s7785_s13, %s88_s18  }
   0x7   : > { %p7868_p4 = por %p99_p2, %p98_p1  ;;  %p149_p5 = scmp.lt.s32.totalorder %s7789_s14, 3 }
   0x9   : > { %p150_p6 = pnand %p5749_p3, %p149_p5 }
   0xa   : > { %v7479_v0 = vld [vmem:[%s9634_s1 + $0x40] sm:$0xff] (!%p150_p6)   ;;  %v7483_v4 = vld [vmem:[%s9634_s1 + $0x48] sm:$0xff] (!%p150_p6)   ;;  %v7487_v8 = vld [vmem:[%s9634_s1 + $0x50] sm:$0xff] (!%p150_p6)   ;;  %s7921_s5 = sshll.u32 (!%p150_p6), %s7856_s15, 4 }
   0xb   : > { %153 = sbr.rel (%p150_p6) target bundleno = 834 (0x342), region = 32  ;;  %v7480_v1 = vld [vmem:[%s9634_s1 + $0xc0] sm:$0xff] (!%p150_p6)   ;;  %6367 = vmatprep.subr.bf16.mxu0 (!%p150_p6), %v7479_v0  ;;  %v7484_v5 = vld [vmem:[%s9634_s1 + $0xc8] sm:$0xff] (!%p150_p6)   ;;  %v7488_v9 = vld [vmem:[%s9634_s1 + $0xd0] sm:$0xff] (!%p150_p6)   ;;  %p184_p7 = scmp.lt.s32.totalorder (!%p150_p6), %s7921_s5, 26 }
   0xc   : > { %v7481_v2 = vld [vmem:[%s9634_s1] sm:$0xff] (!%p150_p6)   ;;  %6431 = vmatprep.subr.bf16.mxu1 (!%p150_p6), %v7480_v1  ;;  %v7485_v6 = vld [vmem:[%s9634_s1 + $0x8] sm:$0xff] (!%p150_p6)   ;;  %v7489_v10 = vld [vmem:[%s9634_s1 + $0x10] sm:$0xff] (!%p150_p6)  }
   0xd   : > { %v7482_v3 = vld [vmem:[%s9634_s1 + $0x80] sm:$0xff] (!%p150_p6)   ;;  %6368 = vmatpush3.bf16.msra.mxu0 (!%p150_p6), %v7481_v2  ;;  %v7486_v7 = vld [vmem:[%s9634_s1 + $0x88] sm:$0xff] (!%p150_p6)   ;;  %v7490_v11 = vld [vmem:[%s9634_s1 + $0x90] sm:$0xff] (!%p150_p6)  }
   0xe   : > { %6432 = vmatpush3.bf16.msra.mxu1 (!%p150_p6), %v7482_v3  ;;  %6369 = vmatprep.subr.bf16.mxu0 (!%p150_p6), %v7483_v4  ;;  %v7491_v12 = vld [vmem:[%s9634_s1 + $0x58] sm:$0xff] (!%p150_p6)   ;;  %v7495_v16 = vld [vmem:[%s9634_s1 + $0x60] sm:$0xff] (!%p150_p6)   ;;  %v7499_v20 = vld [vmem:[%s9634_s1 + $0x68] sm:$0xff] (!%p150_p6)  }
   0xf   : > { %6433 = vmatprep.subr.bf16.mxu1 (!%p150_p6), %v7484_v5  ;;  %v7492_v13 = vld [vmem:[%s9634_s1 + $0xd8] sm:$0xff] (!%p150_p6)   ;;  %v7496_v17 = vld [vmem:[%s9634_s1 + $0xe0] sm:$0xff] (!%p150_p6)   ;;  %v7500_v21 = vld [vmem:[%s9634_s1 + $0xe8] sm:$0xff] (!%p150_p6)  }
  0x10   : > { %v7493_v14 = vld [vmem:[%s9634_s1 + $0x18] sm:$0xff] (!%p150_p6)   ;;  %v7497_v18 = vld [vmem:[%s9634_s1 + $0x20] sm:$0xff] (!%p150_p6)   ;;  %v7501_v22 = vld [vmem:[%s9634_s1 + $0x28] sm:$0xff] (!%p150_p6)  }
  0x11   : > { %6370 = vmatpush3.bf16.msra.mxu0 (!%p150_p6), %v7485_v6  ;;  %v7494_v15 = vld [vmem:[%s9634_s1 + $0x98] sm:$0xff] (!%p150_p6)   ;;  %v7498_v19 = vld [vmem:[%s9634_s1 + $0xa0] sm:$0xff] (!%p150_p6)   ;;  %v7502_v23 = vld [vmem:[%s9634_s1 + $0xa8] sm:$0xff] (!%p150_p6)  }
  0x12   : > { %6434 = vmatpush3.bf16.msra.mxu1 %v7486_v7  ;;  %6371 = vmatprep.subr.bf16.mxu0 %v7487_v8  ;;  %s185_s26 = scalar_select %p184_p7, %s7921_s5, 26  ;;  %v7503_v24 = vld [vmem:[%s9634_s1 + $0x70] sm:$0xff]   ;;  %v7507_v28 = vld [vmem:[%s9634_s1 + $0x78] sm:$0xff]   ;;  %v7511_v40 = vld [vmem:[%s9634_s1 + $0x140] sm:$0xff]  }
  0x13   : > { %6435 = vmatprep.subr.bf16.mxu1 %v7488_v9  ;;  %v7504_v25 = vld [vmem:[%s9634_s1 + $0xf0] sm:$0xff]   ;;  %v7508_v29 = vld [vmem:[%s9634_s1 + $0xf8] sm:$0xff]   ;;  %v7512_v41 = vld [vmem:[%s9634_s1 + $0x100] sm:$0xff]   ;;  %s5480_s23 = ssub.s32 (%p7868_p4), 27, %s7921_s5  ;;  %s6317_s25 = sshll.u32 (%p7868_p4), %s7856_s15, 6 }
  0x14   : > { %v7505_v26 = vld [vmem:[%s9634_s1 + $0x30] sm:$0xff]   ;;  %s6300_s9 = sshll.u32 %s185_s26, 7  ;;  %v7509_v30 = vld [vmem:[%s9634_s1 + $0x38] sm:$0xff]   ;;  %v7513_v42 = vld [vmem:[%s9634_s1 + $0x1c0] sm:$0xff]   ;;  %p5481_p8 = scmp.lt.s32.totalorder (%p7868_p4), %s5480_s23, 16 }
  0x15   : > { %6372 = vmatpush3.bf16.msra.mxu0 %v7489_v10  ;;  %v7506_v27 = vld [vmem:[%s9634_s1 + $0xb0] sm:$0xff]   ;;  %s7970_s24 = scalar_lea.vmem %s9633_s0, %s6300_s9  ;;  %v7510_v31 = vld [vmem:[%s9634_s1 + $0xb8] sm:$0xff]   ;;  %v7514_v43 = vld [vmem:[%s9634_s1 + $0x180] sm:$0xff]   ;;  %s9537_s28 = scalar_lea.vmem (%p7868_p4), %s9636_s3, %s6317_s25  }
  0x16   : > { %6436 = vmatpush3.bf16.msra.mxu1 %v7490_v11  ;;  %6373 = vmatprep.subr.bf16.mxu0 %v7491_v12  ;;  %v201_v32 = vld [vmem:[%s7970_s24] sm:$0xff]  ;;  %v202_v34 = vld [vmem:[%s7970_s24 + $0x8] sm:$0xff]  ;;  %v7519_v62 = vld [vmem:[%s9634_s1 + $0x150] sm:$0xff]  }
  0x17   : > { %6437 = vmatprep.subr.bf16.mxu1 %v7492_v13  ;;  %v217_v33 = vld [vmem:[%s7970_s24 + $0x80] sm:$0xff]  ;;  %v218_v37 = vld [vmem:[%s7970_s24 + $0x88] sm:$0xff]  ;;  %v7520_v63 = vld [vmem:[%s9634_s1 + $0x110] sm:$0xff]  }
  0x18   : > { %v5755_v35 = vcombine.low %v201_v32, %v217_v33  ;;  %v5756_v36 = vcombine.high %v201_v32, %v217_v33  ;;  %v5757_v38 = vcombine.low %v202_v34, %v218_v37  ;;  %v5758_v39 = vcombine.high %v202_v34, %v218_v37  ;;  %v233_v44 = vld [vmem:[%s7970_s24 + $0x100] sm:$0xff]  ;;  %v234_v47 = vld [vmem:[%s7970_s24 + $0x108] sm:$0xff]  ;;  %v7521_v0 = vld [vmem:[%s9634_s1 + $0x1d0] sm:$0xff]  }
  0x19   : > { %6374 = vmatpush3.bf16.msra.mxu0 %v7493_v14  ;;  %v249_v45 = vld [vmem:[%s7970_s24 + $0x180] sm:$0xff]  ;;  %v250_v48 = vld [vmem:[%s7970_s24 + $0x188] sm:$0xff]  ;;  %v7522_v1 = vld [vmem:[%s9634_s1 + $0x190] sm:$0xff]  }
  0x1a   : > { %6438 = vmatpush3.bf16.msra.mxu1 %v7494_v15  ;;  %6375 = vmatprep.subr.bf16.mxu0 %v7495_v16  ;;  %v5788_v46 = vcombine.high %v233_v44, %v249_v45  ;;  %v5790_v49 = vcombine.high %v234_v47, %v250_v48  ;;  %v7515_v50 = vld [vmem:[%s9634_s1 + $0x148] sm:$0xff]   ;;  %v5787_v51 = vcombine.low %v233_v44, %v249_v45  ;;  %v265_v56 = vld [vmem:[%s7970_s24 + $0x200] sm:$0xff]  ;;  %v7523_v10 = vld [vmem:[%s9634_s1 + $0x158] sm:$0xff]  }
  0x1b   : > { %6439 = vmatprep.subr.bf16.mxu1 %v7496_v17  ;;  %3824 = vmatprep.mubr.bf16.mxu0 %v5756_v36  ;;  %v7516_v52 = vld [vmem:[%s9634_s1 + $0x108] sm:$0xff]   ;;  %v5789_v53 = vcombine.low %v234_v47, %v250_v48  ;;  %v281_v57 = vld [vmem:[%s7970_s24 + $0x280] sm:$0xff]  ;;  %v7524_v11 = vld [vmem:[%s9634_s1 + $0x118] sm:$0xff]  }
  0x1c   : > { %3921 = vmatprep.mubr.bf16.mxu1 %v5758_v39  ;;  %v7517_v54 = vld [vmem:[%s9634_s1 + $0x1c8] sm:$0xff]   ;;  %v5820_v60 = vcombine.high %v265_v56, %v281_v57  ;;  %v5819_v2 = vcombine.low %v265_v56, %v281_v57  ;;  %v297_v3 = vld [vmem:[%s7970_s24 + $0x300] sm:$0xff]  ;;  %v7525_v12 = vld [vmem:[%s9634_s1 + $0x1d8] sm:$0xff]  }
  0x1d   : > { %6376 = vmatpush3.bf16.msra.mxu0 %v7497_v18  ;;  %v7518_v55 = vld [vmem:[%s9634_s1 + $0x188] sm:$0xff]   ;;  %v313_v4 = vld [vmem:[%s7970_s24 + $0x380] sm:$0xff]  ;;  %v7526_v13 = vld [vmem:[%s9634_s1 + $0x198] sm:$0xff]  }
  0x1e   : > { %6440 = vmatpush3.bf16.msra.mxu1 %v7498_v19  ;;  %6377 = vmatprep.subr.bf16.mxu0 %v7499_v20  ;;  %v266_v58 = vld [vmem:[%s7970_s24 + $0x208] sm:$0xff]  ;;  %v5852_v7 = vcombine.high %v297_v3, %v313_v4  ;;  %v329_v14 = vld [vmem:[%s7970_s24 + $0x400] sm:$0xff]  ;;  %v5851_v19 = vcombine.low %v297_v3, %v313_v4  ;;  %v7536_v39 = vld [vmem:[%s9634_s1 + $0x130] sm:$0xff]  }
  0x1f   : > { %6441 = vmatprep.subr.bf16.mxu1 %v7500_v21  ;;  %v282_v59 = vld [vmem:[%s7970_s24 + $0x288] sm:$0xff]  ;;  %v345_v15 = vld [vmem:[%s7970_s24 + $0x480] sm:$0xff]  ;;  %v7540_v48 = vld [vmem:[%s9634_s1 + $0x138] sm:$0xff]  }
  0x20   : > { %v5822_v61 = vcombine.high %v266_v58, %v282_v59  ;;  %v298_v5 = vld [vmem:[%s7970_s24 + $0x308] sm:$0xff]  ;;  %v5821_v6 = vcombine.low %v266_v58, %v282_v59  ;;  %v7527_v18 = vld [vmem:[%s9634_s1 + $0x160] sm:$0xff]   ;;  %v5883_v34 = vcombine.low %v329_v14, %v345_v15  ;;  %v220_v3 = vld [vmem:[%s7970_s24 + $0x98] sm:$0xff] }
  0x21   : > { %6378 = vmatpush3.bf16.msra.mxu0 %v7501_v22  ;;  %v314_v8 = vld [vmem:[%s7970_s24 + $0x388] sm:$0xff]  ;;  %v7528_v20 = vld [vmem:[%s9634_s1 + $0x120] sm:$0xff]   ;;  %v5884_v22 = vcombine.high %v329_v14, %v345_v15 }
  0x22   : > { %6442 = vmatpush3.bf16.msra.mxu1 %v7502_v23  ;;  %6379 = vmatprep.subr.bf16.mxu0 %v7503_v24  ;;  %v5854_v9 = vcombine.high %v298_v5, %v314_v8  ;;  %v330_v16 = vld [vmem:[%s7970_s24 + $0x408] sm:$0xff]  ;;  %v5853_v21 = vcombine.low %v298_v5, %v314_v8  ;;  %v7529_v23 = vld [vmem:[%s9634_s1 + $0x1e0] sm:$0xff]   ;;  %v235_v8 = vld [vmem:[%s7970_s24 + $0x110] sm:$0xff] }
  0x23   : > { %6443 = vmatprep.subr.bf16.mxu1 %v7504_v25  ;;  %v346_v17 = vld [vmem:[%s7970_s24 + $0x488] sm:$0xff]  ;;  %v7530_v25 = vld [vmem:[%s9634_s1 + $0x1a0] sm:$0xff]  }
  0x24   : > { %v5886_v24 = vcombine.high %v330_v16, %v346_v17  ;;  %v7533_v32 = vld [vmem:[%s9634_s1 + $0x1e8] sm:$0xff]   ;;  %v7543_v56 = vld [vmem:[%s9634_s1 + $0x240] sm:$0xff]  }
  0x25   : > { %6380 = vmatpush3.bf16.msra.mxu0 %v7505_v26  ;;  %v361_v26 = vld [vmem:[%s7970_s24 + $0x500] sm:$0xff]  ;;  %v7534_v33 = vld [vmem:[%s9634_s1 + $0x1a8] sm:$0xff]  }
  0x26   : > { %6444 = vmatpush3.bf16.msra.mxu1 %v7506_v27  ;;  %6381 = vmatprep.subr.bf16.mxu0 %v7507_v28  ;;  %v377_v27 = vld [vmem:[%s7970_s24 + $0x580] sm:$0xff]  ;;  %v7531_v28 = vld [vmem:[%s9634_s1 + $0x168] sm:$0xff]  }
  0x27   : > { %6445 = vmatprep.subr.bf16.mxu1 %v7508_v29  ;;  %v362_v29 = vld [vmem:[%s7970_s24 + $0x508] sm:$0xff]  ;;  %v5916_v36 = vcombine.high %v361_v26, %v377_v27  ;;  %v5915_v47 = vcombine.low %v361_v26, %v377_v27  ;;  %v7545_v58 = vld [vmem:[%s9634_s1 + $0x2c0] sm:$0xff]   ;;  %v7551_v26 = vld [vmem:[%s9634_s1 + $0x250] sm:$0xff]  }
  0x28   : > { %v394_v44 = vld [vmem:[%s7970_s24 + $0x608] sm:$0xff]  ;;  %v7546_v15 = vld [vmem:[%s9634_s1 + $0x280] sm:$0xff]   ;;  %v7553_v27 = vld [vmem:[%s9634_s1 + $0x2d0] sm:$0xff]  }
  0x29   : > { %6382 = vmatpush3.bf16.msra.mxu0 %v7509_v30  ;;  %v378_v30 = vld [vmem:[%s7970_s24 + $0x588] sm:$0xff] }
  0x2a   : > { %6446 = vmatpush3.bf16.msra.mxu1 %v7510_v31  ;;  %6495 = vmatprep.subr.bf16.mxu0 %v7511_v40  ;;  %v7532_v31 = vld [vmem:[%s9634_s1 + $0x128] sm:$0xff]   ;;  %v5918_v37 = vcombine.high %v362_v29, %v378_v30  ;;  %v7537_v40 = vld [vmem:[%s9634_s1 + $0x1f0] sm:$0xff]  }
  0x2b   : > { %6559 = vmatprep.subr.bf16.mxu1 %v7513_v42  ;;  %v409_v42 = vld [vmem:[%s7970_s24 + $0x680] sm:$0xff]  ;;  %v410_v45 = vld [vmem:[%s7970_s24 + $0x688] sm:$0xff] }
  0x2c   : > { %3825 = vmatmul.mubr.bf16.vlgmr.msra.gmra.mrb[0].mxu0 %v5755_v35  ;;  %v5885_v35 = vcombine.low %v330_v16, %v346_v17  ;;  %v426_v57 = vld [vmem:[%s7970_s24 + $0x708] sm:$0xff] }
  0x2d   : > { %3922 = vmatmul.mubr.bf16.vlgmr.msra.gmra.mrb[0].mxu1 %v5757_v38  ;;  %6496 = vmatpush3.bf16.msra.mxu0 %v7512_v41  ;;  %v7535_v38 = vld [vmem:[%s9634_s1 + $0x170] sm:$0xff]   ;;  %v393_v41 = vld [vmem:[%s7970_s24 + $0x600] sm:$0xff]  ;;  %v442_v59 = vld [vmem:[%s7970_s24 + $0x788] sm:$0xff] }
  0x2e   : > { %6560 = vmatpush3.bf16.msra.mxu1 %v7514_v43  ;;  %3832 = vmatprep.mubr.bf16.mxu0 %v5788_v46  ;;  %v7538_v43 = vld [vmem:[%s9634_s1 + $0x1b0] sm:$0xff]   ;;  %v7539_v46 = vld [vmem:[%s9634_s1 + $0x178] sm:$0xff]   ;;  %v5981_v5 = vcombine.low %v426_v57, %v442_v59  ;;  %v7547_v17 = vld [vmem:[%s9634_s1 + $0x248] sm:$0xff]  }
  0x2f   : > { %3929 = vmatprep.mubr.bf16.mxu1 %v5790_v49  ;;  %6497 = vmatprep.subr.bf16.mxu0 %v7515_v50  ;;  %v5917_v49 = vcombine.low %v362_v29, %v378_v30  ;;  %v5948_v50 = vcombine.high %v393_v41, %v409_v42 }
  0x30   : > { %6561 = vmatprep.subr.bf16.mxu1 %v7517_v54  ;;  %v425_v54 = vld [vmem:[%s7970_s24 + $0x700] sm:$0xff] }
  0x31   : > { %6498 = vmatpush3.bf16.msra.mxu0 %v7516_v52  ;;  %v5950_v52 = vcombine.high %v394_v44, %v410_v45 }
  0x32   : > { %6562 = vmatpush3.bf16.msra.mxu1 %v7518_v55  ;;  %6499 = vmatprep.subr.bf16.mxu0 %v7519_v62  ;;  %v441_v55 = vld [vmem:[%s7970_s24 + $0x780] sm:$0xff] }
  0x33   : > { %6563 = vmatprep.subr.bf16.mxu1 %v7521_v0  ;;  %v5980_v62 = vcombine.high %v425_v54, %v441_v55  ;;  %v203_v0 = vld [vmem:[%s7970_s24 + $0x10] sm:$0xff]  ;;  %v5979_v4 = vcombine.low %v425_v54, %v441_v55  ;;  %v332_v54 = vld [vmem:[%s7970_s24 + $0x418] sm:$0xff] }
  0x34   : > { %3833 = vmatmul.mubr.bf16.gmra.mrb[4].mxu0 %v5787_v51  ;;  %v7541_v51 = vld [vmem:[%s9634_s1 + $0x1f8] sm:$0xff]  }
  0x35   : > { %3930 = vmatmul.mubr.bf16.gmra.mrb[4].mxu1 %v5789_v53  ;;  %3840 = vmatprep.mubr.bf16.mxu0 %v5820_v60  ;;  %v7542_v53 = vld [vmem:[%s9634_s1 + $0x1b8] sm:$0xff]   ;;  %v5947_v60 = vcombine.low %v393_v41, %v409_v42  ;;  %v7559_v42 = vld [vmem:[%s9634_s1 + $0x260] sm:$0xff]  }
  0x36   : > { %3937 = vmatprep.mubr.bf16.mxu1 %v5822_v61  ;;  %6500 = vmatpush3.bf16.msra.mxu0 %v7520_v63  ;;  %v5949_v61 = vcombine.low %v394_v44, %v410_v45  ;;  %v5982_v63 = vcombine.high %v426_v57, %v442_v59  ;;  %v7558_v41 = vld [vmem:[%s9634_s1 + $0x298] sm:$0xff]   ;;  %v7561_v44 = vld [vmem:[%s9634_s1 + $0x2e0] sm:$0xff]   ;;  %v7566_v57 = vld [vmem:[%s9634_s1 + $0x2a8] sm:$0xff]  }
  0x37   : > { %6564 = vmatpush3.bf16.msra.mxu1 %v7522_v1  ;;  %6501 = vmatprep.subr.bf16.mxu0 %v7523_v10  ;;  %v219_v1 = vld [vmem:[%s7970_s24 + $0x90] sm:$0xff]  ;;  %v348_v55 = vld [vmem:[%s7970_s24 + $0x498] sm:$0xff] }
  0x38   : > { %6565 = vmatprep.subr.bf16.mxu1 %v7525_v12  ;;  %v5759_v10 = vcombine.low %v203_v0, %v219_v1  ;;  %v236_v12 = vld [vmem:[%s7970_s24 + $0x118] sm:$0xff] }
  0x3a   : > { %6502 = vmatpush3.bf16.msra.mxu0 %v7524_v11  ;;  %v7544_v11 = vld [vmem:[%s9634_s1 + $0x200] sm:$0xff]  }
  0x3b   : > { %6566 = vmatpush3.bf16.msra.mxu1 %v7526_v13  ;;  %6503 = vmatprep.subr.bf16.mxu0 %v7527_v18  ;;  %v252_v13 = vld [vmem:[%s7970_s24 + $0x198] sm:$0xff] }
  0x3c   : > { %3841 = vmatmul.mubr.bf16.gmra.mrb[8].mxu0 %v5819_v2  ;;  %6567 = vmatprep.subr.bf16.mxu1 %v7529_v23  ;;  %v204_v2 = vld [vmem:[%s7970_s24 + $0x18] sm:$0xff]  ;;  %v5794_v18 = vcombine.high %v236_v12, %v252_v13  ;;  %v283_v23 = vld [vmem:[%s7970_s24 + $0x290] sm:$0xff]  ;;  %v5793_v29 = vcombine.low %v236_v12, %v252_v13  ;;  %v7577_v12 = vld [vmem:[%s9634_s1 + $0x3c0] sm:$0xff]   ;;  %v5889_v13 = vcombine.low %v332_v54, %v348_v55 }
  0x3d   : > { %3938 = vmatmul.mubr.bf16.gmra.mrb[8].mxu1 %v5821_v6  ;;  %3848 = vmatprep.mubr.bf16.mxu0 %v5852_v7  ;;  %v5760_v6 = vcombine.high %v203_v0, %v219_v1  ;;  %v5762_v7 = vcombine.high %v204_v2, %v220_v3  ;;  %v5761_v14 = vcombine.low %v204_v2, %v220_v3  ;;  %v7568_v0 = vld [vmem:[%s9634_s1 + $0x230] sm:$0xff]   ;;  %v7571_v2 = vld [vmem:[%s9634_s1 + $0x278] sm:$0xff]  }
  0x3e   : > { %3945 = vmatprep.mubr.bf16.mxu1 %v5854_v9  ;;  %6504 = vmatpush3.bf16.msra.mxu0 %v7528_v20  ;;  %v251_v9 = vld [vmem:[%s7970_s24 + $0x190] sm:$0xff]  ;;  %v7549_v20 = vld [vmem:[%s9634_s1 + $0x2c8] sm:$0xff]  }
  0x3f   : > { %6568 = vmatpush3.bf16.msra.mxu1 %v7530_v25  ;;  %6505 = vmatprep.subr.bf16.mxu0 %v7531_v28  ;;  %v5792_v16 = vcombine.high %v235_v8, %v251_v9  ;;  %v284_v25 = vld [vmem:[%s7970_s24 + $0x298] sm:$0xff]  ;;  %v5791_v28 = vcombine.low %v235_v8, %v251_v9  ;;  %v7570_v1 = vld [vmem:[%s9634_s1 + $0x2b0] sm:$0xff]  }
  0x40   : > { %6569 = vmatprep.subr.bf16.mxu1 %v7533_v32  ;;  %v7552_v32 = vld [vmem:[%s9634_s1 + $0x210] sm:$0xff]   ;;  %v7572_v8 = vld [vmem:[%s9634_s1 + $0x238] sm:$0xff]  }
  0x41   : > { %v363_v3 = vld [vmem:[%s7970_s24 + $0x510] sm:$0xff]  ;;  %v7574_v9 = vld [vmem:[%s9634_s1 + $0x2b8] sm:$0xff]  }
  0x42   : > { %6506 = vmatpush3.bf16.msra.mxu0 %v7532_v31 }
  0x43   : > { %6570 = vmatpush3.bf16.msra.mxu1 %v7534_v33  ;;  %6507 = vmatprep.subr.bf16.mxu0 %v7535_v38  ;;  %v7554_v33 = vld [vmem:[%s9634_s1 + $0x290] sm:$0xff]   ;;  %v300_v38 = vld [vmem:[%s7970_s24 + $0x318] sm:$0xff] }
  0x44   : > { %3849 = vmatmul.mubr.bf16.gmra.mrb[12].mxu0 %v5851_v19  ;;  %6571 = vmatprep.subr.bf16.mxu1 %v7537_v40  ;;  %v7548_v19 = vld [vmem:[%s9634_s1 + $0x208] sm:$0xff]   ;;  %v7556_v40 = vld [vmem:[%s9634_s1 + $0x218] sm:$0xff]  }
  0x45   : > { %3946 = vmatmul.mubr.bf16.gmra.mrb[12].mxu1 %v5853_v21  ;;  %3856 = vmatprep.mubr.bf16.mxu0 %v5884_v22  ;;  %v7550_v21 = vld [vmem:[%s9634_s1 + $0x288] sm:$0xff]   ;;  %v267_v22 = vld [vmem:[%s7970_s24 + $0x210] sm:$0xff] }
  0x46   : > { %3953 = vmatprep.mubr.bf16.mxu1 %v5886_v24  ;;  %6508 = vmatpush3.bf16.msra.mxu0 %v7536_v39  ;;  %v268_v24 = vld [vmem:[%s7970_s24 + $0x218] sm:$0xff]  ;;  %v5824_v30 = vcombine.high %v267_v22, %v283_v23 }
  0x47   : > { %6572 = vmatpush3.bf16.msra.mxu1 %v7538_v43  ;;  %6509 = vmatprep.subr.bf16.mxu0 %v7539_v46  ;;  %v5826_v31 = vcombine.high %v268_v24, %v284_v25  ;;  %v316_v39 = vld [vmem:[%s7970_s24 + $0x398] sm:$0xff]  ;;  %v5823_v43 = vcombine.low %v267_v22, %v283_v23  ;;  %v5825_v45 = vcombine.low %v268_v24, %v284_v25  ;;  %v427_v24 = vld [vmem:[%s7970_s24 + $0x710] sm:$0xff] }
  0x48   : > { %6573 = vmatprep.subr.bf16.mxu1 %v7541_v51  ;;  %v331_v51 = vld [vmem:[%s7970_s24 + $0x410] sm:$0xff] }
  0x49   : > { %v443_v25 = vld [vmem:[%s7970_s24 + $0x790] sm:$0xff] }
  0x4a   : > { %6510 = vmatpush3.bf16.msra.mxu0 %v7540_v48  ;;  %v5858_v48 = vcombine.high %v300_v38, %v316_v39 }
  0x4b   : > { %6574 = vmatpush3.bf16.msra.mxu1 %v7542_v53  ;;  %6623 = vmatprep.subr.bf16.mxu0 %v7543_v56  ;;  %v347_v53 = vld [vmem:[%s7970_s24 + $0x490] sm:$0xff]  ;;  %v7564_v56 = vld [vmem:[%s9634_s1 + $0x228] sm:$0xff]  }
  0x4c   : > { %3857 = vmatmul.mubr.bf16.gmra.mrb[16].mxu0 %v5883_v34  ;;  %6687 = vmatprep.subr.bf16.mxu1 %v7545_v58  ;;  %v7555_v34 = vld [vmem:[%s9634_s1 + $0x258] sm:$0xff]   ;;  %v7567_v58 = vld [vmem:[%s9634_s1 + $0x270] sm:$0xff]  }
  0x4d   : > { %3954 = vmatmul.mubr.bf16.gmra.mrb[16].mxu1 %v5885_v35  ;;  %3864 = vmatprep.mubr.bf16.mxu0 %v5916_v36  ;;  %v299_v35 = vld [vmem:[%s7970_s24 + $0x310] sm:$0xff] }
  0x4e   : > { %3961 = vmatprep.mubr.bf16.mxu1 %v5918_v37  ;;  %v315_v36 = vld [vmem:[%s7970_s24 + $0x390] sm:$0xff]  ;;  %v7557_v37 = vld [vmem:[%s9634_s1 + $0x2d8] sm:$0xff]  }
  0x4f   : > { %v5856_v46 = vcombine.high %v299_v35, %v315_v36  ;;  %v5855_v59 = vcombine.low %v299_v35, %v315_v36  ;;  %v222_v35 = vld [vmem:[%s7970_s24 + $0xa8] sm:$0xff]  ;;  %v5983_v36 = vcombine.low %v427_v24, %v443_v25 }
  0x54   : > { %3865 = vmatmul.mubr.bf16.gmra.mrb[20].mxu0 %v5915_v47  ;;  %v7560_v47 = vld [vmem:[%s9634_s1 + $0x220] sm:$0xff]  }
  0x55   : > { %3962 = vmatmul.mubr.bf16.gmra.mrb[20].mxu1 %v5917_v49  ;;  %3872 = vmatprep.mubr.bf16.mxu0 %v5948_v50  ;;  %v7562_v49 = vld [vmem:[%s9634_s1 + $0x2a0] sm:$0xff]   ;;  %v7563_v50 = vld [vmem:[%s9634_s1 + $0x268] sm:$0xff]  }
  0x56   : > { %3969 = vmatprep.mubr.bf16.mxu1 %v5950_v52  ;;  %v7565_v52 = vld [vmem:[%s9634_s1 + $0x2e8] sm:$0xff]  }
  0x5c   : > { %3873 = vmatmul.mubr.bf16.gmra.mrb[24].mxu0 %v5947_v60  ;;  %v7569_v60 = vld [vmem:[%s9634_s1 + $0x2f0] sm:$0xff]  }
  0x5d   : > { %3970 = vmatmul.mubr.bf16.gmra.mrb[24].mxu1 %v5949_v61  ;;  %3880 = vmatprep.mubr.bf16.mxu0 %v5980_v62  ;;  %v5857_v61 = vcombine.low %v300_v38, %v316_v39  ;;  %v5888_v62 = vcombine.high %v331_v51, %v347_v53 }
  0x5e   : > { %3977 = vmatprep.mubr.bf16.mxu1 %v5982_v63  ;;  %v5890_v63 = vcombine.high %v332_v54, %v348_v55  ;;  %v269_v54 = vld [vmem:[%s7970_s24 + $0x220] sm:$0xff] }
  0x5f   : > { %v285_v55 = vld [vmem:[%s7970_s24 + $0x2a0] sm:$0xff] }
  0x64   : > { %3881 = vmatmul.mubr.bf16.gmra.mrb[28].mxu0 %v5979_v4  ;;  %v379_v4 = vld [vmem:[%s7970_s24 + $0x590] sm:$0xff] }
  0x65   : > { %3978 = vmatmul.mubr.bf16.gmra.mrb[28].mxu1 %v5981_v5  ;;  %4018 = vmatprep.mubr.bf16.mxu0 %v5760_v6  ;;  %v7573_v5 = vld [vmem:[%s9634_s1 + $0x2f8] sm:$0xff]  }
  0x66   : > { %4115 = vmatprep.mubr.bf16.mxu1 %v5762_v7  ;;  %v364_v6 = vld [vmem:[%s7970_s24 + $0x518] sm:$0xff] }
  0x67   : > { %v380_v7 = vld [vmem:[%s7970_s24 + $0x598] sm:$0xff] }
  0x6c   : > { %4019 = vmatmul.mubr.bf16.vlgmr.msra.gmra.mrb[32].mxu0 %v5759_v10  ;;  %v7575_v10 = vld [vmem:[%s9634_s1 + $0x340] sm:$0xff]  }
  0x6d   : > { %4116 = vmatmul.mubr.bf16.vlgmr.msra.gmra.mrb[32].mxu1 %v5761_v14  ;;  %6624 = vmatpush3.bf16.msra.mxu0 %v7544_v11  ;;  %v5887_v11 = vcombine.low %v331_v51, %v347_v53  ;;  %v5920_v14 = vcombine.high %v363_v3, %v379_v4  ;;  %v7580_v51 = vld [vmem:[%s9634_s1 + $0x308] sm:$0xff]  }
  0x6e   : > { %6688 = vmatpush3.bf16.msra.mxu1 %v7546_v15  ;;  %4026 = vmatprep.mubr.bf16.mxu0 %v5792_v16  ;;  %v5922_v15 = vcombine.high %v364_v6, %v380_v7  ;;  %v395_v16 = vld [vmem:[%s7970_s24 + $0x610] sm:$0xff]  ;;  %v7582_v53 = vld [vmem:[%s9634_s1 + $0x388] sm:$0xff]  }
  0x6f   : > { %4123 = vmatprep.mubr.bf16.mxu1 %v5794_v18  ;;  %6625 = vmatprep.subr.bf16.mxu0 %v7547_v17  ;;  %v411_v17 = vld [vmem:[%s7970_s24 + $0x690] sm:$0xff]  ;;  %v396_v18 = vld [vmem:[%s7970_s24 + $0x618] sm:$0xff] }
  0x70   : > { %6689 = vmatprep.subr.bf16.mxu1 %v7549_v20  ;;  %v5919_v20 = vcombine.low %v363_v3, %v379_v4  ;;  %v5952_v22 = vcombine.high %v395_v16, %v411_v17  ;;  %v301_v3 = vld [vmem:[%s7970_s24 + $0x320] sm:$0xff] }
  0x71   : > { %6626 = vmatpush3.bf16.msra.mxu0 %v7548_v19  ;;  %v412_v19 = vld [vmem:[%s7970_s24 + $0x698] sm:$0xff]  ;;  %v317_v4 = vld [vmem:[%s7970_s24 + $0x3a0] sm:$0xff] }
  0x72   : > { %6690 = vmatpush3.bf16.msra.mxu1 %v7550_v21  ;;  %6627 = vmatprep.subr.bf16.mxu0 %v7551_v26  ;;  %v5921_v21 = vcombine.low %v364_v6, %v380_v7  ;;  %v5954_v23 = vcombine.high %v396_v18, %v412_v19  ;;  %v428_v26 = vld [vmem:[%s7970_s24 + $0x718] sm:$0xff]  ;;  %v302_v6 = vld [vmem:[%s7970_s24 + $0x328] sm:$0xff] }
  0x73   : > { %6691 = vmatprep.subr.bf16.mxu1 %v7553_v27  ;;  %v444_v27 = vld [vmem:[%s7970_s24 + $0x798] sm:$0xff]  ;;  %v318_v7 = vld [vmem:[%s7970_s24 + $0x3a8] sm:$0xff] }
  0x74   : > { %4027 = vmatmul.mubr.bf16.gmra.mrb[36].mxu0 %v5791_v28  ;;  %v5951_v28 = vcombine.low %v395_v16, %v411_v17  ;;  %v5862_v16 = vcombine.high %v302_v6, %v318_v7  ;;  %v7594_v17 = vld [vmem:[%s9634_s1 + $0x3a0] sm:$0xff]  }
  0x75   : > { %4124 = vmatmul.mubr.bf16.gmra.mrb[36].mxu1 %v5793_v29  ;;  %4034 = vmatprep.mubr.bf16.mxu0 %v5824_v30  ;;  %v5953_v29 = vcombine.low %v396_v18, %v412_v19  ;;  %v5984_v30 = vcombine.high %v427_v24, %v443_v25  ;;  %v7595_v18 = vld [vmem:[%s9634_s1 + $0x368] sm:$0xff]   ;;  %v333_v19 = vld [vmem:[%s7970_s24 + $0x420] sm:$0xff] }
  0x76   : > { %4131 = vmatprep.mubr.bf16.mxu1 %v5826_v31  ;;  %6628 = vmatpush3.bf16.msra.mxu0 %v7552_v32  ;;  %v5986_v31 = vcombine.high %v428_v26, %v444_v27  ;;  %v205_v32 = vld [vmem:[%s7970_s24 + $0x20] sm:$0xff]  ;;  %v7596_v24 = vld [vmem:[%s9634_s1 + $0x328] sm:$0xff]  }
  0x77   : > { %6692 = vmatpush3.bf16.msra.mxu1 %v7554_v33  ;;  %6629 = vmatprep.subr.bf16.mxu0 %v7555_v34  ;;  %v221_v33 = vld [vmem:[%s7970_s24 + $0xa0] sm:$0xff]  ;;  %v206_v34 = vld [vmem:[%s7970_s24 + $0x28] sm:$0xff] }
  0x78   : > { %6693 = vmatprep.subr.bf16.mxu1 %v7557_v37  ;;  %v5985_v37 = vcombine.low %v428_v26, %v444_v27  ;;  %v5764_v38 = vcombine.high %v205_v32, %v221_v33  ;;  %v5766_v39 = vcombine.high %v206_v34, %v222_v35  ;;  %v7598_v25 = vld [vmem:[%s9634_s1 + $0x3a8] sm:$0xff]   ;;  %v7599_v26 = vld [vmem:[%s9634_s1 + $0x370] sm:$0xff]   ;;  %v5859_v27 = vcombine.low %v301_v3, %v317_v4 }
  0x7a   : > { %6630 = vmatpush3.bf16.msra.mxu0 %v7556_v40  ;;  %v237_v40 = vld [vmem:[%s7970_s24 + $0x120] sm:$0xff] }
  0x7b   : > { %6694 = vmatpush3.bf16.msra.mxu1 %v7558_v41  ;;  %6631 = vmatprep.subr.bf16.mxu0 %v7559_v42  ;;  %v253_v41 = vld [vmem:[%s7970_s24 + $0x1a0] sm:$0xff]  ;;  %v5763_v42 = vcombine.low %v205_v32, %v221_v33  ;;  %v7600_v32 = vld [vmem:[%s9634_s1 + $0x330] sm:$0xff]  }
  0x7c   : > { %4035 = vmatmul.mubr.bf16.gmra.mrb[40].mxu0 %v5823_v43  ;;  %6695 = vmatprep.subr.bf16.mxu1 %v7561_v44  ;;  %v7576_v43 = vld [vmem:[%s9634_s1 + $0x300] sm:$0xff]   ;;  %v238_v44 = vld [vmem:[%s7970_s24 + $0x128] sm:$0xff]  ;;  %v7602_v33 = vld [vmem:[%s9634_s1 + $0x3b0] sm:$0xff]  }
  0x7d   : > { %4132 = vmatmul.mubr.bf16.gmra.mrb[40].mxu1 %v5825_v45  ;;  %4042 = vmatprep.mubr.bf16.mxu0 %v5856_v46  ;;  %v254_v45 = vld [vmem:[%s7970_s24 + $0x1a8] sm:$0xff]  ;;  %v5765_v46 = vcombine.low %v206_v34, %v222_v35  ;;  %v7603_v34 = vld [vmem:[%s9634_s1 + $0x378] sm:$0xff]   ;;  %v365_v35 = vld [vmem:[%s7970_s24 + $0x520] sm:$0xff] }
  0x7e   : > { %4139 = vmatprep.mubr.bf16.mxu1 %v5858_v48  ;;  %6632 = vmatpush3.bf16.msra.mxu0 %v7560_v47  ;;  %v7578_v47 = vld [vmem:[%s9634_s1 + $0x380] sm:$0xff]   ;;  %v5796_v48 = vcombine.high %v237_v40, %v253_v41 }
  0x7f   : > { %6696 = vmatpush3.bf16.msra.mxu1 %v7562_v49  ;;  %6633 = vmatprep.subr.bf16.mxu0 %v7563_v50  ;;  %v7579_v49 = vld [vmem:[%s9634_s1 + $0x348] sm:$0xff]   ;;  %v5798_v50 = vcombine.high %v238_v44, %v254_v45 }
  0x80   : > { %6697 = vmatprep.subr.bf16.mxu1 %v7565_v52  ;;  %v7581_v52 = vld [vmem:[%s9634_s1 + $0x3c8] sm:$0xff]  }
  0x82   : > { %6634 = vmatpush3.bf16.msra.mxu0 %v7564_v56  ;;  %v270_v56 = vld [vmem:[%s7970_s24 + $0x228] sm:$0xff] }
  0x83   : > { %6698 = vmatpush3.bf16.msra.mxu1 %v7566_v57  ;;  %6635 = vmatprep.subr.bf16.mxu0 %v7567_v58  ;;  %v286_v57 = vld [vmem:[%s7970_s24 + $0x2a8] sm:$0xff]  ;;  %v7583_v58 = vld [vmem:[%s9634_s1 + $0x350] sm:$0xff]  }
  0x84   : > { %4043 = vmatmul.mubr.bf16.gmra.mrb[44].mxu0 %v5855_v59  ;;  %6699 = vmatprep.subr.bf16.mxu1 %v7569_v60  ;;  %v7585_v59 = vld [vmem:[%s9634_s1 + $0x3d0] sm:$0xff]   ;;  %v5795_v60 = vcombine.low %v237_v40, %v253_v41  ;;  %v7604_v40 = vld [vmem:[%s9634_s1 + $0x338] sm:$0xff]  }
  0x85   : > { %4140 = vmatmul.mubr.bf16.gmra.mrb[44].mxu1 %v5857_v61  ;;  %4050 = vmatprep.mubr.bf16.mxu0 %v5888_v62  ;;  %v5797_v61 = vcombine.low %v238_v44, %v254_v45  ;;  %v5828_v62 = vcombine.high %v269_v54, %v285_v55  ;;  %v7606_v41 = vld [vmem:[%s9634_s1 + $0x3b8] sm:$0xff]   ;;  %v7609_v44 = vld [vmem:[%s9634_s1 + $0x4c0] sm:$0xff]  }
  0x86   : > { %4147 = vmatprep.mubr.bf16.mxu1 %v5890_v63  ;;  %6636 = vmatpush3.bf16.msra.mxu0 %v7568_v0  ;;  %v5830_v63 = vcombine.high %v270_v56, %v286_v57  ;;  %v7584_v0 = vld [vmem:[%s9634_s1 + $0x310] sm:$0xff]  }
  0x87   : > { %6700 = vmatpush3.bf16.msra.mxu1 %v7570_v1  ;;  %6637 = vmatprep.subr.bf16.mxu0 %v7571_v2  ;;  %v7586_v1 = vld [vmem:[%s9634_s1 + $0x390] sm:$0xff]   ;;  %v7587_v2 = vld [vmem:[%s9634_s1 + $0x358] sm:$0xff]  }
  0x88   : > { %6701 = vmatprep.subr.bf16.mxu1 %v7573_v5  ;;  %v7589_v5 = vld [vmem:[%s9634_s1 + $0x3d8] sm:$0xff]  }
  0x8a   : > { %6638 = vmatpush3.bf16.msra.mxu0 %v7572_v8  ;;  %v7588_v8 = vld [vmem:[%s9634_s1 + $0x318] sm:$0xff]  }
  0x8b   : > { %6702 = vmatpush3.bf16.msra.mxu1 %v7574_v9  ;;  %6751 = vmatprep.subr.bf16.mxu0 %v7575_v10  ;;  %v7590_v9 = vld [vmem:[%s9634_s1 + $0x398] sm:$0xff]   ;;  %v7591_v10 = vld [vmem:[%s9634_s1 + $0x360] sm:$0xff]  }
  0x8c   : > { %4051 = vmatmul.mubr.bf16.gmra.mrb[48].mxu0 %v5887_v11  ;;  %6815 = vmatprep.subr.bf16.mxu1 %v7577_v12  ;;  %v5827_v11 = vcombine.low %v269_v54, %v285_v55  ;;  %v7593_v12 = vld [vmem:[%s9634_s1 + $0x3e0] sm:$0xff]  }
  0x8d   : > { %4148 = vmatmul.mubr.bf16.gmra.mrb[48].mxu1 %v5889_v13  ;;  %4058 = vmatprep.mubr.bf16.mxu0 %v5920_v14  ;;  %v5829_v13 = vcombine.low %v270_v56, %v286_v57  ;;  %v5860_v14 = vcombine.high %v301_v3, %v317_v4  ;;  %v429_v56 = vld [vmem:[%s7970_s24 + $0x720] sm:$0xff]  ;;  %v224_v3 = vld [vmem:[%s7970_s24 + $0xb8] sm:$0xff] }
  0x8e   : > { %4155 = vmatprep.mubr.bf16.mxu1 %v5922_v15  ;;  %v7592_v15 = vld [vmem:[%s9634_s1 + $0x320] sm:$0xff]  }
  0x8f   : > { %v445_v57 = vld [vmem:[%s7970_s24 + $0x7a0] sm:$0xff] }
  0x90   : > { %v5987_v4 = vcombine.low %v429_v56, %v445_v57 }
  0x94   : > { %4059 = vmatmul.mubr.bf16.gmra.mrb[52].mxu0 %v5919_v20  ;;  %v7597_v20 = vld [vmem:[%s9634_s1 + $0x3e8] sm:$0xff]  }
  0x95   : > { %4156 = vmatmul.mubr.bf16.gmra.mrb[52].mxu1 %v5921_v21  ;;  %4066 = vmatprep.mubr.bf16.mxu0 %v5952_v22  ;;  %v349_v21 = vld [vmem:[%s7970_s24 + $0x4a0] sm:$0xff]  ;;  %v334_v22 = vld [vmem:[%s7970_s24 + $0x428] sm:$0xff] }
  0x96   : > { %4163 = vmatprep.mubr.bf16.mxu1 %v5954_v23  ;;  %v350_v23 = vld [vmem:[%s7970_s24 + $0x4a8] sm:$0xff] }
  0x97   : > { %v5893_v45 = vcombine.low %v334_v22, %v350_v23 }
  0x9c   : > { %4067 = vmatmul.mubr.bf16.gmra.mrb[56].mxu0 %v5951_v28  ;;  %v7601_v28 = vld [vmem:[%s9634_s1 + $0x3f0] sm:$0xff]  }
  0x9d   : > { %4164 = vmatmul.mubr.bf16.gmra.mrb[56].mxu1 %v5953_v29  ;;  %4074 = vmatprep.mubr.bf16.mxu0 %v5984_v30  ;;  %v5861_v29 = vcombine.low %v302_v6, %v318_v7  ;;  %v5892_v30 = vcombine.high %v333_v19, %v349_v21 }
  0x9e   : > { %4171 = vmatprep.mubr.bf16.mxu1 %v5986_v31  ;;  %v5894_v31 = vcombine.high %v334_v22, %v350_v23  ;;  %v271_v22 = vld [vmem:[%s7970_s24 + $0x230] sm:$0xff] }
  0x9f   : > { %v287_v23 = vld [vmem:[%s7970_s24 + $0x2b0] sm:$0xff] }
  0xa4   : > { %4075 = vmatmul.mubr.bf16.gmra.mrb[60].mxu0 %v5983_v36  ;;  %v381_v36 = vld [vmem:[%s7970_s24 + $0x5a0] sm:$0xff] }
  0xa5   : > { %4172 = vmatmul.mubr.bf16.gmra.mrb[60].mxu1 %v5985_v37  ;;  %4212 = vmatprep.mubr.bf16.mxu0 %v5764_v38  ;;  %v7605_v37 = vld [vmem:[%s9634_s1 + $0x3f8] sm:$0xff]   ;;  %v366_v38 = vld [vmem:[%s7970_s24 + $0x528] sm:$0xff] }
  0xa6   : > { %4309 = vmatprep.mubr.bf16.mxu1 %v5766_v39  ;;  %v382_v39 = vld [vmem:[%s7970_s24 + $0x5a8] sm:$0xff] }
  0xac   : > { %4213 = vmatmul.mubr.bf16.vlgmr.msra.gmra.mrb[64].mxu0 %v5763_v42  ;;  %v7607_v42 = vld [vmem:[%s9634_s1 + $0x440] sm:$0xff]  }
  0xad   : > { %4310 = vmatmul.mubr.bf16.vlgmr.msra.gmra.mrb[64].mxu1 %v5765_v46  ;;  %6752 = vmatpush3.bf16.msra.mxu0 %v7576_v43  ;;  %v5891_v43 = vcombine.low %v333_v19, %v349_v21  ;;  %v5924_v46 = vcombine.high %v365_v35, %v381_v36  ;;  %v7612_v19 = vld [vmem:[%s9634_s1 + $0x408] sm:$0xff]  }
  0xae   : > { %6816 = vmatpush3.bf16.msra.mxu1 %v7578_v47  ;;  %4220 = vmatprep.mubr.bf16.mxu0 %v5796_v48  ;;  %v5926_v47 = vcombine.high %v366_v38, %v382_v39  ;;  %v397_v48 = vld [vmem:[%s7970_s24 + $0x620] sm:$0xff]  ;;  %v7614_v21 = vld [vmem:[%s9634_s1 + $0x488] sm:$0xff]  }
  0xaf   : > { %4317 = vmatprep.mubr.bf16.mxu1 %v5798_v50  ;;  %6753 = vmatprep.subr.bf16.mxu0 %v7579_v49  ;;  %v413_v49 = vld [vmem:[%s7970_s24 + $0x6a0] sm:$0xff]  ;;  %v398_v50 = vld [vmem:[%s7970_s24 + $0x628] sm:$0xff] }
  0xb0   : > { %6817 = vmatprep.subr.bf16.mxu1 %v7581_v52  ;;  %v5923_v52 = vcombine.low %v365_v35, %v381_v36  ;;  %v5956_v54 = vcombine.high %v397_v48, %v413_v49  ;;  %v8414_v35 = vld [vmem:[%s7970_s24 + $0x330] sm:$0xff] }
  0xb1   : > { %6754 = vmatpush3.bf16.msra.mxu0 %v7580_v51  ;;  %v414_v51 = vld [vmem:[%s7970_s24 + $0x6a8] sm:$0xff]  ;;  %v8417_v36 = vld [vmem:[%s7970_s24 + $0x3b0] sm:$0xff] }
  0xb2   : > { %6818 = vmatpush3.bf16.msra.mxu1 %v7582_v53  ;;  %6755 = vmatprep.subr.bf16.mxu0 %v7583_v58  ;;  %v5925_v53 = vcombine.low %v366_v38, %v382_v39  ;;  %v5958_v55 = vcombine.high %v398_v50, %v414_v51  ;;  %v430_v58 = vld [vmem:[%s7970_s24 + $0x728] sm:$0xff]  ;;  %v8423_v38 = vld [vmem:[%s7970_s24 + $0x338] sm:$0xff] }
  0xb3   : > { %6819 = vmatprep.subr.bf16.mxu1 %v7585_v59  ;;  %v446_v59 = vld [vmem:[%s7970_s24 + $0x7a8] sm:$0xff]  ;;  %v8426_v39 = vld [vmem:[%s7970_s24 + $0x3b8] sm:$0xff] }
  0xb4   : > { %4221 = vmatmul.mubr.bf16.gmra.mrb[68].mxu0 %v5795_v60  ;;  %v5955_v60 = vcombine.low %v397_v48, %v413_v49  ;;  %v5866_v48 = vcombine.high %v8423_v38, %v8426_v39  ;;  %v7626_v49 = vld [vmem:[%s9634_s1 + $0x4a0] sm:$0xff]  }
  0xb5   : > { %4318 = vmatmul.mubr.bf16.gmra.mrb[68].mxu1 %v5797_v61  ;;  %4228 = vmatprep.mubr.bf16.mxu0 %v5828_v62  ;;  %v5957_v61 = vcombine.low %v398_v50, %v414_v51  ;;  %v5988_v62 = vcombine.high %v429_v56, %v445_v57  ;;  %v7627_v50 = vld [vmem:[%s9634_s1 + $0x468] sm:$0xff]   ;;  %v8454_v51 = vld [vmem:[%s7970_s24 + $0x430] sm:$0xff]  ;;  %v8471_v56 = vld [vmem:[%s9635_s2] ss:$0 sm:$0xff] }
  0xb6   : > { %4325 = vmatprep.mubr.bf16.mxu1 %v5830_v63  ;;  %6756 = vmatpush3.bf16.msra.mxu0 %v7584_v0  ;;  %v5990_v63 = vcombine.high %v430_v58, %v446_v59  ;;  %v207_v0 = vld [vmem:[%s7970_s24 + $0x30] sm:$0xff]  ;;  %v7628_v57 = vld [vmem:[%s9634_s1 + $0x428] sm:$0xff]  }
  0xb7   : > { %6820 = vmatpush3.bf16.msra.mxu1 %v7586_v1  ;;  %6757 = vmatprep.subr.bf16.mxu0 %v7587_v2  ;;  %v223_v1 = vld [vmem:[%s7970_s24 + $0xb0] sm:$0xff]  ;;  %v208_v2 = vld [vmem:[%s7970_s24 + $0x38] sm:$0xff] }
  0xb8   : > { %6821 = vmatprep.subr.bf16.mxu1 %v7589_v5  ;;  %v5989_v5 = vcombine.low %v430_v58, %v446_v59  ;;  %v5768_v6 = vcombine.high %v207_v0, %v223_v1  ;;  %v5770_v7 = vcombine.high %v208_v2, %v224_v3  ;;  %v7630_v58 = vld [vmem:[%s9634_s1 + $0x4a8] sm:$0xff]   ;;  %v7631_v59 = vld [vmem:[%s9634_s1 + $0x470] sm:$0xff]  }
  0xba   : > { %6758 = vmatpush3.bf16.msra.mxu0 %v7588_v8  ;;  %v239_v8 = vld [vmem:[%s7970_s24 + $0x130] sm:$0xff] }
  0xbb   : > { %6822 = vmatpush3.bf16.msra.mxu1 %v7590_v9  ;;  %6759 = vmatprep.subr.bf16.mxu0 %v7591_v10  ;;  %v255_v9 = vld [vmem:[%s7970_s24 + $0x1b0] sm:$0xff]  ;;  %v5767_v10 = vcombine.low %v207_v0, %v223_v1  ;;  %v5863_v0 = vcombine.low %v8414_v35, %v8417_v36 }
  0xbc   : > { %4229 = vmatmul.mubr.bf16.gmra.mrb[72].mxu0 %v5827_v11  ;;  %6823 = vmatprep.subr.bf16.mxu1 %v7593_v12  ;;  %v240_v11 = vld [vmem:[%s7970_s24 + $0x138] sm:$0xff] }
  0xbd   : > { %4326 = vmatmul.mubr.bf16.gmra.mrb[72].mxu1 %v5829_v13  ;;  %4236 = vmatprep.mubr.bf16.mxu0 %v5860_v14  ;;  %v256_v12 = vld [vmem:[%s7970_s24 + $0x1b8] sm:$0xff]  ;;  %v5769_v13 = vcombine.low %v208_v2, %v224_v3  ;;  %v7608_v14 = vld [vmem:[%s9634_s1 + $0x400] sm:$0xff]  }
  0xbe   : > { %4333 = vmatprep.mubr.bf16.mxu1 %v5862_v16  ;;  %6760 = vmatpush3.bf16.msra.mxu0 %v7592_v15  ;;  %v7610_v15 = vld [vmem:[%s9634_s1 + $0x480] sm:$0xff]   ;;  %v5800_v16 = vcombine.high %v239_v8, %v255_v9 }
  0xbf   : > { %6824 = vmatpush3.bf16.msra.mxu1 %v7594_v17  ;;  %6761 = vmatprep.subr.bf16.mxu0 %v7595_v18  ;;  %v7611_v17 = vld [vmem:[%s9634_s1 + $0x448] sm:$0xff]   ;;  %v5802_v18 = vcombine.high %v240_v11, %v256_v12 }
  0xc0   : > { %6825 = vmatprep.subr.bf16.mxu1 %v7597_v20  ;;  %v7613_v20 = vld [vmem:[%s9634_s1 + $0x4c8] sm:$0xff]  }
  0xc2   : > { %6762 = vmatpush3.bf16.msra.mxu0 %v7596_v24  ;;  %v272_v24 = vld [vmem:[%s7970_s24 + $0x238] sm:$0xff] }
  0xc3   : > { %6826 = vmatpush3.bf16.msra.mxu1 %v7598_v25  ;;  %6763 = vmatprep.subr.bf16.mxu0 %v7599_v26  ;;  %v288_v25 = vld [vmem:[%s7970_s24 + $0x2b8] sm:$0xff]  ;;  %v7615_v26 = vld [vmem:[%s9634_s1 + $0x450] sm:$0xff]  }
  0xc4   : > { %4237 = vmatmul.mubr.bf16.gmra.mrb[76].mxu0 %v5859_v27  ;;  %6827 = vmatprep.subr.bf16.mxu1 %v7601_v28  ;;  %v7617_v27 = vld [vmem:[%s9634_s1 + $0x4d0] sm:$0xff]   ;;  %v5799_v28 = vcombine.low %v239_v8, %v255_v9 }
  0xc5   : > { %4334 = vmatmul.mubr.bf16.gmra.mrb[76].mxu1 %v5861_v29  ;;  %4244 = vmatprep.mubr.bf16.mxu0 %v5892_v30  ;;  %v5801_v29 = vcombine.low %v240_v11, %v256_v12  ;;  %v5832_v30 = vcombine.high %v271_v22, %v287_v23 }
  0xc6   : > { %4341 = vmatprep.mubr.bf16.mxu1 %v5894_v31  ;;  %6764 = vmatpush3.bf16.msra.mxu0 %v7600_v32  ;;  %v5834_v31 = vcombine.high %v272_v24, %v288_v25  ;;  %v7616_v32 = vld [vmem:[%s9634_s1 + $0x410] sm:$0xff]  }
  0xc7   : > { %6828 = vmatpush3.bf16.msra.mxu1 %v7602_v33  ;;  %6765 = vmatprep.subr.bf16.mxu0 %v7603_v34  ;;  %v7618_v33 = vld [vmem:[%s9634_s1 + $0x490] sm:$0xff]   ;;  %v7619_v34 = vld [vmem:[%s9634_s1 + $0x458] sm:$0xff]  }
  0xc8   : > { %6829 = vmatprep.subr.bf16.mxu1 %v7605_v37  ;;  %v7621_v37 = vld [vmem:[%s9634_s1 + $0x4d8] sm:$0xff]  }
  0xca   : > { %6766 = vmatpush3.bf16.msra.mxu0 %v7604_v40  ;;  %v7620_v40 = vld [vmem:[%s9634_s1 + $0x418] sm:$0xff]  }
  0xcb   : > { %6830 = vmatpush3.bf16.msra.mxu1 %v7606_v41  ;;  %6879 = vmatprep.subr.bf16.mxu0 %v7607_v42  ;;  %v7622_v41 = vld [vmem:[%s9634_s1 + $0x498] sm:$0xff]   ;;  %v7623_v42 = vld [vmem:[%s9634_s1 + $0x460] sm:$0xff]  }
  0xcc   : > { %4245 = vmatmul.mubr.bf16.gmra.mrb[80].mxu0 %v5891_v43  ;;  %6943 = vmatprep.subr.bf16.mxu1 %v7609_v44  ;;  %v5831_v43 = vcombine.low %v271_v22, %v287_v23  ;;  %v7625_v44 = vld [vmem:[%s9634_s1 + $0x4e0] sm:$0xff]   ;;  %v8519_v23 = vld [vmem:[%s7970_s24 + $0x538] sm:$0xff] }
  0xcd   : > { %4342 = vmatmul.mubr.bf16.gmra.mrb[80].mxu1 %v5893_v45  ;;  %4252 = vmatprep.mubr.bf16.mxu0 %v5924_v46  ;;  %v5833_v45 = vcombine.low %v272_v24, %v288_v25  ;;  %v5864_v46 = vcombine.high %v8414_v35, %v8417_v36  ;;  %v384_v24 = vld [vmem:[%s7970_s24 + $0x5b8] sm:$0xff] }
  0xce   : > { %4349 = vmatprep.mubr.bf16.mxu1 %v5926_v47  ;;  %v7624_v47 = vld [vmem:[%s9634_s1 + $0x420] sm:$0xff]   ;;  %v7638_v25 = vld [vmem:[%s9634_s1 + $0x4b8] sm:$0xff]  }
  0xd4   : > { %4253 = vmatmul.mubr.bf16.gmra.mrb[84].mxu0 %v5923_v52  ;;  %v8457_v52 = vld [vmem:[%s7970_s24 + $0x4b0] sm:$0xff] }
  0xd5   : > { %4350 = vmatmul.mubr.bf16.gmra.mrb[84].mxu1 %v5925_v53  ;;  %4260 = vmatprep.mubr.bf16.mxu0 %v5956_v54  ;;  %v7629_v53 = vld [vmem:[%s9634_s1 + $0x4e8] sm:$0xff]   ;;  %v8463_v54 = vld [vmem:[%s7970_s24 + $0x438] sm:$0xff] }
  0xd6   : > { %4357 = vmatprep.mubr.bf16.mxu1 %v5958_v55  ;;  %v8466_v55 = vld [vmem:[%s7970_s24 + $0x4b8] sm:$0xff] }
  0xd7   : > { %v5897_v36 = vcombine.low %v8463_v54, %v8466_v55 }
  0xdc   : > { %4261 = vmatmul.mubr.bf16.gmra.mrb[88].mxu0 %v5955_v60 }
  0xdd   : > { %4358 = vmatmul.mubr.bf16.gmra.mrb[88].mxu1 %v5957_v61  ;;  %4268 = vmatprep.mubr.bf16.mxu0 %v5988_v62  ;;  %v7633_v61 = vld [vmem:[%s9634_s1 + $0x4f0] sm:$0xff]  }
  0xde   : > { %4365 = vmatprep.mubr.bf16.mxu1 %v5990_v63 }
  0xe4   : > { %4269 = vmatmul.mubr.bf16.gmra.mrb[92].mxu0 %v5987_v4  ;;  %v5865_v4 = vcombine.low %v8423_v38, %v8426_v39 }
  0xe5   : > { %4366 = vmatmul.mubr.bf16.gmra.mrb[92].mxu1 %v5989_v5  ;;  %4406 = vmatprep.mubr.bf16.mxu0 %v5768_v6  ;;  %v5896_v5 = vcombine.high %v8454_v51, %v8457_v52  ;;  %v7632_v6 = vld [vmem:[%s9634_s1 + $0x430] sm:$0xff]  }
  0xe6   : > { %4503 = vmatprep.mubr.bf16.mxu1 %v5770_v7 }
  0xec   : > { %4407 = vmatmul.mubr.bf16.vlgmr.msra.gmra.mrb[96].mxu0 %v5767_v10  ;;  %v5898_v10 = vcombine.high %v8463_v54, %v8466_v55 }
  0xed   : > { %4504 = vmatmul.mubr.bf16.vlgmr.msra.gmra.mrb[96].mxu1 %v5769_v13  ;;  %6880 = vmatpush3.bf16.msra.mxu0 %v7608_v14  ;;  %v7634_v14 = vld [vmem:[%s9634_s1 + $0x4b0] sm:$0xff]  }
  0xee   : > { %6944 = vmatpush3.bf16.msra.mxu1 %v7610_v15  ;;  %4414 = vmatprep.mubr.bf16.mxu0 %v5800_v16  ;;  %v7635_v15 = vld [vmem:[%s9634_s1 + $0x478] sm:$0xff]  }
  0xef   : > { %4511 = vmatprep.mubr.bf16.mxu1 %v5802_v18  ;;  %6881 = vmatprep.subr.bf16.mxu0 %v7611_v17  ;;  %v8504_v17 = vld [vmem:[%s7970_s24 + $0x530] sm:$0xff] }
  0xf0   : > { %6945 = vmatprep.subr.bf16.mxu1 %v7613_v20  ;;  %v8507_v18 = vld [vmem:[%s7970_s24 + $0x5b0] sm:$0xff]  ;;  %v7637_v20 = vld [vmem:[%s9634_s1 + $0x4f8] sm:$0xff]  }
  0xf1   : > { %6882 = vmatpush3.bf16.msra.mxu0 %v7612_v19  ;;  %v7636_v19 = vld [vmem:[%s9634_s1 + $0x438] sm:$0xff]  }
  0xf2   : > { %6946 = vmatpush3.bf16.msra.mxu1 %v7614_v21  ;;  %6883 = vmatprep.subr.bf16.mxu0 %v7615_v26  ;;  %v7639_v26 = vld [vmem:[%s9634_s1 + $0x540] sm:$0xff]  }
  0xf3   : > { %6947 = vmatprep.subr.bf16.mxu1 %v7617_v27 }
  0xf4   : > { %4415 = vmatmul.mubr.bf16.gmra.mrb[100].mxu0 %v5799_v28 }
  0xf5   : > { %4512 = vmatmul.mubr.bf16.gmra.mrb[100].mxu1 %v5801_v29  ;;  %4422 = vmatprep.mubr.bf16.mxu0 %v5832_v30  ;;  %v7641_v29 = vld [vmem:[%s9634_s1 + $0x5c0] sm:$0xff]  }
  0xf6   : > { %4519 = vmatprep.mubr.bf16.mxu1 %v5834_v31  ;;  %6884 = vmatpush3.bf16.msra.mxu0 %v7616_v32  ;;  %v5895_v32 = vcombine.low %v8454_v51, %v8457_v52  ;;  %v400_v52 = vld [vmem:[%s7970_s24 + $0x638] sm:$0xff] }
  0xf7   : > { %6948 = vmatpush3.bf16.msra.mxu1 %v7618_v33  ;;  %6885 = vmatprep.subr.bf16.mxu0 %v7619_v34 }
  0xf8   : > { %6949 = vmatprep.subr.bf16.mxu1 %v7621_v37  ;;  %v5928_v37 = vcombine.high %v8504_v17, %v8507_v18 }
  0xfa   : > { %6886 = vmatpush3.bf16.msra.mxu0 %v7620_v40 }
  0xfb   : > { %6950 = vmatpush3.bf16.msra.mxu1 %v7622_v41  ;;  %6887 = vmatprep.subr.bf16.mxu0 %v7623_v42  ;;  %v5930_v41 = vcombine.high %v8519_v23, %v384_v24 }
  0xfc   : > { %4423 = vmatmul.mubr.bf16.gmra.mrb[104].mxu0 %v5831_v43  ;;  %6951 = vmatprep.subr.bf16.mxu1 %v7625_v44 }
  0xfd   : > { %4520 = vmatmul.mubr.bf16.gmra.mrb[104].mxu1 %v5833_v45  ;;  %4430 = vmatprep.mubr.bf16.mxu0 %v5864_v46 }
  0xfe   : > { %4527 = vmatprep.mubr.bf16.mxu1 %v5866_v48  ;;  %6888 = vmatpush3.bf16.msra.mxu0 %v7624_v47  ;;  %v399_v48 = vld [vmem:[%s7970_s24 + $0x630] sm:$0xff] }
  0xff   : > { %v6383_v60 = vpop.f32.mrb[0].mxu0  ;;  %6952 = vmatpush3.bf16.msra.mxu1 %v7626_v49  ;;  %6889 = vmatprep.subr.bf16.mxu0 %v7627_v50  ;;  %v415_v49 = vld [vmem:[%s7970_s24 + $0x6b0] sm:$0xff] }
 0x100   : > { %v6447_v62 = vpop.f32.mrb[0].mxu1  ;;  %v6384_v63 = vpop.f32.mrb[1].mxu0  ;;  %6953 = vmatprep.subr.bf16.mxu1 %v7629_v53  ;;  %v416_v53 = vld [vmem:[%s7970_s24 + $0x6b8] sm:$0xff] }
 0x101   : > { %v6385_v1 = vadd.f32 %v6384_v63, %v6383_v60  ;;  %v6448_v2 = vpop.f32.mrb[1].mxu1  ;;  %v6386_v3 = vpop.f32.mrb[2].mxu0 }
 0x102   : > { %v6449_v7 = vadd.f32 %v6448_v2, %v6447_v62  ;;  %v6450_v8 = vpop.f32.mrb[2].mxu1  ;;  %v6387_v9 = vpop.f32.mrb[3].mxu0  ;;  %6890 = vmatpush3.bf16.msra.mxu0 %v7628_v57  ;;  %v5927_v57 = vcombine.low %v8504_v17, %v8507_v18  ;;  %v5960_v62 = vcombine.high %v399_v48, %v415_v49  ;;  %v5962_v2 = vcombine.high %v400_v52, %v416_v53 }
 0x103   : > { %v3827_v11 = vadd.f32 %v6385_v1, %v8471_v56  ;;  %v6388_v12 = vadd.f32 %v6387_v9, %v6386_v3  ;;  %v6451_v13 = vpop.f32.mrb[3].mxu1  ;;  %6954 = vmatpush3.bf16.msra.mxu1 %v7630_v58  ;;  %6891 = vmatprep.subr.bf16.mxu0 %v7631_v59  ;;  %v431_v9 = vld [vmem:[%s7970_s24 + $0x730] sm:$0xff]  ;;  %v5959_v17 = vcombine.low %v399_v48, %v415_v49 }
 0x104   : > { %v6452_v16 = vadd.f32 %v6451_v13, %v6450_v8  ;;  %4431 = vmatmul.mubr.bf16.gmra.mrb[108].mxu0 %v5863_v0  ;;  %6955 = vmatprep.subr.bf16.mxu1 %v7633_v61  ;;  %v5929_v61 = vcombine.low %v8519_v23, %v384_v24 }
 0x105   : > { %v8515_v21 = vadd.f32 %v6449_v7, %v3827_v11  ;;  %v3830_v22 = vadd.f32 %v6388_v12, %v8471_v56  ;;  %4528 = vmatmul.mubr.bf16.gmra.mrb[108].mxu1 %v5865_v4  ;;  %4438 = vmatprep.mubr.bf16.mxu0 %v5896_v5  ;;  %v432_v11 = vld [vmem:[%s7970_s24 + $0x738] sm:$0xff] }
 0x106   : > { %4535 = vmatprep.mubr.bf16.mxu1 %v5898_v10  ;;  %6892 = vmatpush3.bf16.msra.mxu0 %v7632_v6  ;;  %v447_v10 = vld [vmem:[%s7970_s24 + $0x7b0] sm:$0xff] }
 0x107   : > { %v8528_v27 = vadd.f32 %v6452_v16, %v3830_v22  ;;  %v6389_v28 = vpop.f32.mrb[4].mxu0  ;;  %6956 = vmatpush3.bf16.msra.mxu1 %v7634_v14  ;;  %6893 = vmatprep.subr.bf16.mxu0 %v7635_v15  ;;  %v448_v14 = vld [vmem:[%s7970_s24 + $0x7b8] sm:$0xff]  ;;  %v5961_v22 = vcombine.low %v400_v52, %v416_v53  ;;  %v5992_v23 = vcombine.high %v431_v9, %v447_v10 }
 0x108   : > { %v6453_v30 = vpop.f32.mrb[4].mxu1  ;;  %v6390_v31 = vpop.f32.mrb[5].mxu0  ;;  %6957 = vmatprep.subr.bf16.mxu1 %v7637_v20  ;;  %v5993_v48 = vcombine.low %v432_v11, %v448_v14 }
 0x109   : > { %v6391_v33 = vadd.f32 %v6390_v31, %v6389_v28  ;;  %v6454_v34 = vpop.f32.mrb[5].mxu1  ;;  %v6392_v35 = vpop.f32.mrb[6].mxu0  ;;  %v5994_v28 = vcombine.high %v432_v11, %v448_v14 }
 0x10a   : > { %v6455_v38 = vadd.f32 %v6454_v34, %v6453_v30  ;;  %v6456_v39 = vpop.f32.mrb[6].mxu1  ;;  %v6393_v40 = vpop.f32.mrb[7].mxu0  ;;  %6894 = vmatpush3.bf16.msra.mxu0 %v7636_v19 }
 0x10b   : > { %v3835_v42 = vadd.f32 %v6391_v33, %v8471_v56  ;;  %v6394_v43 = vadd.f32 %v6393_v40, %v6392_v35  ;;  %v6457_v44 = vpop.f32.mrb[7].mxu1  ;;  %6958 = vmatpush3.bf16.msra.mxu1 %v7638_v25  ;;  %7007 = vmatprep.subr.bf16.mxu0 %v7639_v26  ;;  %v209_v35 = vld [vmem:[%s7970_s24 + $0x40] sm:$0xff]  ;;  %v226_v40 = vld [vmem:[%s7970_s24 + $0xc8] sm:$0xff] }
 0x10c   : > { %v6458_v45 = vadd.f32 %v6457_v44, %v6456_v39  ;;  %4439 = vmatmul.mubr.bf16.gmra.mrb[112].mxu0 %v5895_v32  ;;  %7071 = vmatprep.subr.bf16.mxu1 %v7641_v29  ;;  %v210_v39 = vld [vmem:[%s7970_s24 + $0x48] sm:$0xff] }
 0x10d   : > { %v8541_v46 = vadd.f32 %v6455_v38, %v3835_v42  ;;  %v3838_v47 = vadd.f32 %v6394_v43, %v8471_v56  ;;  %4536 = vmatmul.mubr.bf16.gmra.mrb[112].mxu1 %v5897_v36  ;;  %4446 = vmatprep.mubr.bf16.mxu0 %v5928_v37  ;;  %v225_v36 = vld [vmem:[%s7970_s24 + $0xc0] sm:$0xff]  ;;  %v5991_v43 = vcombine.low %v431_v9, %v447_v10  ;;  %v8595_v9 = vld [vmem:[%s7970_s24 + $0x1c8] sm:$0xff] }
 0x10e   : > { %4543 = vmatprep.mubr.bf16.mxu1 %v5930_v41  ;;  %v5772_v49 = vcombine.high %v209_v35, %v225_v36  ;;  %v5773_v14 = vcombine.low %v210_v39, %v226_v40 }
 0x10f   : > { %v8546_v50 = vadd.f32 %v6458_v45, %v3838_v47  ;;  %v6395_v51 = vpop.f32.mrb[8].mxu0 }
 0x110   : > { %v6459_v54 = vpop.f32.mrb[8].mxu1  ;;  %v6396_v55 = vpop.f32.mrb[9].mxu0 }
 0x111   : > { %v6397_v58 = vadd.f32 %v6396_v55, %v6395_v51  ;;  %v6460_v59 = vpop.f32.mrb[9].mxu1  ;;  %v6398_v60 = vpop.f32.mrb[10].mxu0 }
 0x112   : > { %v6461_v63 = vadd.f32 %v6460_v59, %v6459_v54  ;;  %v6462_v0 = vpop.f32.mrb[10].mxu1  ;;  %v6399_v1 = vpop.f32.mrb[11].mxu0  ;;  %v5774_v54 = vcombine.high %v210_v39, %v226_v40  ;;  %v8629_v39 = vld [vmem:[%s7970_s24 + $0x248] sm:$0xff] }
 0x113   : > { %v3843_v3 = vadd.f32 %v6397_v58, %v8471_v56  ;;  %v6400_v4 = vadd.f32 %v6399_v1, %v6398_v60  ;;  %v6463_v5 = vpop.f32.mrb[11].mxu1  ;;  %v7640_v1 = vld [vmem:[%s9634_s1 + $0x500] sm:$0xff]   ;;  %v8632_v40 = vld [vmem:[%s7970_s24 + $0x2c8] sm:$0xff] }
 0x114   : > { %v6464_v6 = vadd.f32 %v6463_v5, %v6462_v0  ;;  %4447 = vmatmul.mubr.bf16.gmra.mrb[116].mxu0 %v5927_v57  ;;  %v5771_v5 = vcombine.low %v209_v35, %v225_v36 }
 0x115   : > { %v8554_v7 = vadd.f32 %v6461_v63, %v3843_v3  ;;  %v3846_v8 = vadd.f32 %v6400_v4, %v8471_v56  ;;  %4544 = vmatmul.mubr.bf16.gmra.mrb[116].mxu1 %v5929_v61  ;;  %4454 = vmatprep.mubr.bf16.mxu0 %v5960_v62  ;;  %v8578_v62 = vld [vmem:[%s7970_s24 + $0x140] sm:$0xff] }
 0x116   : > { %4551 = vmatprep.mubr.bf16.mxu1 %v5962_v2  ;;  %v8586_v2 = vld [vmem:[%s7970_s24 + $0x1c0] sm:$0xff] }
 0x117   : > { %v8560_v12 = vadd.f32 %v6464_v6, %v3846_v8  ;;  %v6401_v13 = vpop.f32.mrb[12].mxu0  ;;  %v7642_v6 = vld [vmem:[%s9634_s1 + $0x580] sm:$0xff]   ;;  %v8592_v8 = vld [vmem:[%s7970_s24 + $0x148] sm:$0xff] }
 0x118   : > { %v6465_v15 = vpop.f32.mrb[12].mxu1  ;;  %v6402_v16 = vpop.f32.mrb[13].mxu0 }
 0x119   : > { %v6403_v18 = vadd.f32 %v6402_v16, %v6401_v13  ;;  %v6466_v19 = vpop.f32.mrb[13].mxu1  ;;  %v6404_v20 = vpop.f32.mrb[14].mxu0 }
 0x11a   : > { %v6467_v24 = vadd.f32 %v6466_v19, %v6465_v15  ;;  %v6468_v25 = vpop.f32.mrb[14].mxu1  ;;  %v6405_v26 = vpop.f32.mrb[15].mxu0 }
 0x11b   : > { %v3851_v29 = vadd.f32 %v6403_v18, %v8471_v56  ;;  %v6406_v30 = vadd.f32 %v6405_v26, %v6404_v20  ;;  %v6469_v31 = vpop.f32.mrb[15].mxu1  ;;  %v5804_v18 = vcombine.high %v8578_v62, %v8586_v2  ;;  %v7645_v26 = vld [vmem:[%s9634_s1 + $0x5c8] sm:$0xff]  }
 0x11c   : > { %v6470_v32 = vadd.f32 %v6469_v31, %v6468_v25  ;;  %4455 = vmatmul.mubr.bf16.gmra.mrb[120].mxu0 %v5959_v17  ;;  %v7644_v25 = vld [vmem:[%s9634_s1 + $0x508] sm:$0xff]   ;;  %v8618_v31 = vld [vmem:[%s7970_s24 + $0x2c0] sm:$0xff] }
 0x11d   : > { %v8564_v33 = vadd.f32 %v6467_v24, %v3851_v29  ;;  %v3854_v34 = vadd.f32 %v6406_v30, %v8471_v56  ;;  %4552 = vmatmul.mubr.bf16.gmra.mrb[120].mxu1 %v5961_v22  ;;  %4462 = vmatprep.mubr.bf16.mxu0 %v5992_v23  ;;  %v5806_v23 = vcombine.high %v8592_v8, %v8595_v9  ;;  %v7643_v24 = vld [vmem:[%s9634_s1 + $0x548] sm:$0xff]   ;;  %v8615_v30 = vld [vmem:[%s7970_s24 + $0x240] sm:$0xff] }
 0x11e   : > { %4559 = vmatprep.mubr.bf16.mxu1 %v5994_v28  ;;  %v7646_v29 = vld [vmem:[%s9634_s1 + $0x588] sm:$0xff]  }
 0x11f   : > { %v8569_v37 = vadd.f32 %v6470_v32, %v3854_v34  ;;  %v6407_v38 = vpop.f32.mrb[16].mxu0  ;;  %v7647_v32 = vld [vmem:[%s9634_s1 + $0x550] sm:$0xff]  }
 0x120   : > { %v6471_v41 = vpop.f32.mrb[16].mxu1  ;;  %v6408_v42 = vpop.f32.mrb[17].mxu0 }
 0x121   : > { %v6409_v44 = vadd.f32 %v6408_v42, %v6407_v38  ;;  %v6472_v45 = vpop.f32.mrb[17].mxu1  ;;  %v6410_v47 = vpop.f32.mrb[18].mxu0 }
 0x122   : > { %v6473_v51 = vadd.f32 %v6472_v45, %v6471_v41  ;;  %v6474_v52 = vpop.f32.mrb[18].mxu1  ;;  %v6411_v53 = vpop.f32.mrb[19].mxu0  ;;  %v7649_v41 = vld [vmem:[%s9634_s1 + $0x5d0] sm:$0xff]  }
 0x123   : > { %v3859_v55 = vadd.f32 %v6409_v44, %v8471_v56  ;;  %v6412_v57 = vadd.f32 %v6411_v53, %v6410_v47  ;;  %v6475_v58 = vpop.f32.mrb[19].mxu1  ;;  %v5803_v44 = vcombine.low %v8578_v62, %v8586_v2 }
 0x124   : > { %v6476_v59 = vadd.f32 %v6475_v58, %v6474_v52  ;;  %4463 = vmatmul.mubr.bf16.gmra.mrb[124].mxu0 %v5991_v43  ;;  %v7648_v52 = vld [vmem:[%s9634_s1 + $0x510] sm:$0xff]  }
 0x125   : > { %v8574_v60 = vadd.f32 %v6473_v51, %v3859_v55  ;;  %v3862_v61 = vadd.f32 %v6412_v57, %v8471_v56  ;;  %4560 = vmatmul.mubr.bf16.gmra.mrb[124].mxu1 %v5993_v48  ;;  %4600 = vmatprep.mubr.bf16.mxu0 %v5772_v49  ;;  %v5805_v49 = vcombine.low %v8592_v8, %v8595_v9  ;;  %v7650_v58 = vld [vmem:[%s9634_s1 + $0x590] sm:$0xff]   ;;  %v8671_v9 = vld [vmem:[%s7970_s24 + $0x348] sm:$0xff] }
 0x126   : > { %4697 = vmatprep.mubr.bf16.mxu1 %v5774_v54  ;;  %v5836_v51 = vcombine.high %v8615_v30, %v8618_v31  ;;  %v5838_v57 = vcombine.high %v8629_v39, %v8632_v40 }
 0x127   : > { %v8580_v63 = vadd.f32 %v6476_v59, %v3862_v61  ;;  %v6413_v0 = vpop.f32.mrb[20].mxu0  ;;  %v7651_v59 = vld [vmem:[%s9634_s1 + $0x558] sm:$0xff]  }
 0x128   : > { %v6477_v3 = vpop.f32.mrb[20].mxu1  ;;  %v6414_v4 = vpop.f32.mrb[21].mxu0 }
 0x129   : > { %v6415_v10 = vadd.f32 %v6414_v4, %v6413_v0  ;;  %v6478_v11 = vpop.f32.mrb[21].mxu1  ;;  %v6416_v13 = vpop.f32.mrb[22].mxu0  ;;  %v8662_v4 = vld [vmem:[%s7970_s24 + $0x3c0] sm:$0xff] }
 0x12a   : > { %v6479_v15 = vadd.f32 %v6478_v11, %v6477_v3  ;;  %v6480_v16 = vpop.f32.mrb[22].mxu1  ;;  %v6417_v17 = vpop.f32.mrb[23].mxu0  ;;  %v8659_v3 = vld [vmem:[%s7970_s24 + $0x340] sm:$0xff] }
 0x12b   : > { %v3867_v19 = vadd.f32 %v6415_v10, %v8471_v56  ;;  %v6418_v20 = vadd.f32 %v6417_v17, %v6416_v13  ;;  %v6481_v22 = vpop.f32.mrb[23].mxu1  ;;  %v8676_v13 = vld [vmem:[%s7970_s24 + $0x3c8] sm:$0xff] }
 0x12c   : > { %v6482_v28 = vadd.f32 %v6481_v22, %v6480_v16  ;;  %4601 = vmatmul.mubr.bf16.vlgmr.msra.gmra.mrb[128].mxu0 %v5771_v5  ;;  %v7652_v5 = vld [vmem:[%s9634_s1 + $0x518] sm:$0xff]  }
 0x12d   : > { %v8623_v34 = vadd.f32 %v6479_v15, %v3867_v19  ;;  %v3870_v35 = vadd.f32 %v6418_v20, %v8471_v56  ;;  %4698 = vmatmul.mubr.bf16.vlgmr.msra.gmra.mrb[128].mxu1 %v5773_v14  ;;  %7008 = vmatpush3.bf16.msra.mxu0 %v7640_v1  ;;  %v7653_v1 = vld [vmem:[%s9634_s1 + $0x5d8] sm:$0xff]   ;;  %v7655_v15 = vld [vmem:[%s9634_s1 + $0x560] sm:$0xff]  }
 0x12e   : > { %7072 = vmatpush3.bf16.msra.mxu1 %v7642_v6  ;;  %4608 = vmatprep.mubr.bf16.mxu0 %v5804_v18  ;;  %v7654_v14 = vld [vmem:[%s9634_s1 + $0x598] sm:$0xff]   ;;  %v5835_v18 = vcombine.low %v8615_v30, %v8618_v31  ;;  %v7657_v19 = vld [vmem:[%s9634_s1 + $0x5e0] sm:$0xff]   ;;  %v5870_v31 = vcombine.high %v8671_v9, %v8676_v13 }
 0x12f   : > { %v8626_v36 = vadd.f32 %v6482_v28, %v3870_v35  ;;  %v6419_v38 = vpop.f32.mrb[24].mxu0  ;;  %4705 = vmatprep.mubr.bf16.mxu1 %v5806_v23  ;;  %7009 = vmatprep.subr.bf16.mxu0 %v7643_v24  ;;  %v5837_v24 = vcombine.low %v8629_v39, %v8632_v40  ;;  %v7659_v35 = vld [vmem:[%s9634_s1 + $0x568] sm:$0xff]  }
 0x130   : > { %v6483_v42 = vpop.f32.mrb[24].mxu1  ;;  %v6420_v43 = vpop.f32.mrb[25].mxu0  ;;  %7073 = vmatprep.subr.bf16.mxu1 %v7645_v26  ;;  %v7656_v26 = vld [vmem:[%s9634_s1 + $0x520] sm:$0xff]  }
 0x131   : > { %v6421_v45 = vadd.f32 %v6420_v43, %v6419_v38  ;;  %v6484_v47 = vpop.f32.mrb[25].mxu1  ;;  %v6422_v48 = vpop.f32.mrb[26].mxu0  ;;  %7010 = vmatpush3.bf16.msra.mxu0 %v7644_v25  ;;  %v5868_v25 = vcombine.high %v8659_v3, %v8662_v4  ;;  %v8709_v43 = vld [vmem:[%s7970_s24 + $0x440] sm:$0xff] }
 0x132   : > { %v6485_v53 = vadd.f32 %v6484_v47, %v6483_v42  ;;  %v6486_v54 = vpop.f32.mrb[26].mxu1  ;;  %v6423_v55 = vpop.f32.mrb[27].mxu0  ;;  %7074 = vmatpush3.bf16.msra.mxu1 %v7646_v29  ;;  %7011 = vmatprep.subr.bf16.mxu0 %v7647_v32  ;;  %v7658_v32 = vld [vmem:[%s9634_s1 + $0x5a0] sm:$0xff]  }
 0x133   : > { %v3875_v61 = vadd.f32 %v6421_v45, %v8471_v56  ;;  %v6424_v62 = vadd.f32 %v6423_v55, %v6422_v48  ;;  %v6487_v0 = vpop.f32.mrb[27].mxu1  ;;  %7075 = vmatprep.subr.bf16.mxu1 %v7649_v41  ;;  %v7661_v41 = vld [vmem:[%s9634_s1 + $0x5e8] sm:$0xff]  }
 0x134   : > { %v6488_v2 = vadd.f32 %v6487_v0, %v6486_v54  ;;  %4609 = vmatmul.mubr.bf16.gmra.mrb[132].mxu0 %v5803_v44  ;;  %v8712_v44 = vld [vmem:[%s7970_s24 + $0x4c0] sm:$0xff]  ;;  %v7660_v45 = vld [vmem:[%s9634_s1 + $0x528] sm:$0xff]  }
 0x135   : > { %v8667_v6 = vadd.f32 %v6485_v53, %v3875_v61  ;;  %v3878_v8 = vadd.f32 %v6424_v62, %v8471_v56  ;;  %4706 = vmatmul.mubr.bf16.gmra.mrb[132].mxu1 %v5805_v49  ;;  %4616 = vmatprep.mubr.bf16.mxu0 %v5836_v51  ;;  %v8721_v49 = vld [vmem:[%s7970_s24 + $0x448] sm:$0xff] }
 0x136   : > { %4713 = vmatprep.mubr.bf16.mxu1 %v5838_v57  ;;  %7012 = vmatpush3.bf16.msra.mxu0 %v7648_v52  ;;  %v8726_v53 = vld [vmem:[%s7970_s24 + $0x4c8] sm:$0xff] }
 0x137   : > { %v8673_v10 = vadd.f32 %v6488_v2, %v3878_v8  ;;  %v6425_v11 = vpop.f32.mrb[28].mxu0  ;;  %7076 = vmatpush3.bf16.msra.mxu1 %v7650_v58  ;;  %7013 = vmatprep.subr.bf16.mxu0 %v7651_v59  ;;  %v7662_v54 = vld [vmem:[%s9634_s1 + $0x5a8] sm:$0xff]   ;;  %v5867_v58 = vcombine.low %v8659_v3, %v8662_v4  ;;  %v7665_v59 = vld [vmem:[%s9634_s1 + $0x5f0] sm:$0xff]   ;;  %v5900_v2 = vcombine.high %v8709_v43, %v8712_v44 }
 0x138   : > { %v6489_v16 = vpop.f32.mrb[28].mxu1  ;;  %v6426_v17 = vpop.f32.mrb[29].mxu0  ;;  %7077 = vmatprep.subr.bf16.mxu1 %v7653_v1  ;;  %v5869_v1 = vcombine.low %v8671_v9, %v8676_v13  ;;  %v7666_v9 = vld [vmem:[%s9634_s1 + $0x5b0] sm:$0xff]   ;;  %v7667_v13 = vld [vmem:[%s9634_s1 + $0x578] sm:$0xff]  }
 0x139   : > { %v6427_v20 = vadd.f32 %v6426_v17, %v6425_v11  ;;  %v6490_v22 = vpop.f32.mrb[29].mxu1  ;;  %v6428_v23 = vpop.f32.mrb[30].mxu0  ;;  %v5902_v11 = vcombine.high %v8721_v49, %v8726_v53  ;;  %v7669_v17 = vld [vmem:[%s9634_s1 + $0x5f8] sm:$0xff]  }
 0x13a   : > { %v6491_v28 = vadd.f32 %v6490_v22, %v6489_v16  ;;  %v6492_v29 = vpop.f32.mrb[30].mxu1  ;;  %v6429_v30 = vpop.f32.mrb[31].mxu0  ;;  %7014 = vmatpush3.bf16.msra.mxu0 %v7652_v5  ;;  %v7664_v5 = vld [vmem:[%s9634_s1 + $0x530] sm:$0xff]  }
 0x13b   : > { %v3883_v38 = vadd.f32 %v6427_v20, %v8471_v56  ;;  %v6430_v39 = vadd.f32 %v6429_v30, %v6428_v23  ;;  %v6493_v40 = vpop.f32.mrb[31].mxu1  ;;  %7078 = vmatpush3.bf16.msra.mxu1 %v7654_v14  ;;  %7015 = vmatprep.subr.bf16.mxu0 %v7655_v15  ;;  %v8762_v20 = vld [vmem:[%s7970_s24 + $0x5c0] sm:$0xff] }
 0x13c   : > { %v6494_v42 = vadd.f32 %v6493_v40, %v6492_v29  ;;  %4617 = vmatmul.mubr.bf16.gmra.mrb[136].mxu0 %v5835_v18  ;;  %7079 = vmatprep.subr.bf16.mxu1 %v7657_v19  ;;  %v8759_v19 = vld [vmem:[%s7970_s24 + $0x540] sm:$0xff]  ;;  %v7670_v29 = vld [vmem:[%s9634_s1 + $0x5b8] sm:$0xff]  }
 0x13d   : > { %v8717_v47 = vadd.f32 %v6491_v28, %v3883_v38  ;;  %v3886_v48 = vadd.f32 %v6430_v39, %v8471_v56  ;;  %4714 = vmatmul.mubr.bf16.gmra.mrb[136].mxu1 %v5837_v24  ;;  %4624 = vmatprep.mubr.bf16.mxu0 %v5868_v25  ;;  %v7663_v56 = vld [vmem:[%s9634_s1 + $0x570] sm:$0xff]   ;;  %v8771_v24 = vld [vmem:[%s7970_s24 + $0x548] sm:$0xff] }
 0x13e   : > { %4721 = vmatprep.mubr.bf16.mxu1 %v5870_v31  ;;  %7016 = vmatpush3.bf16.msra.mxu0 %v7656_v26  ;;  %v386_v28 = vld [vmem:[%s7970_s24 + $0x5c8] sm:$0xff] }
 0x13f   : > { %v8723_v51 = vadd.f32 %v6494_v42, %v3886_v48  ;;  %v6511_v52 = vpop.f32.mrb[32].mxu0  ;;  %7080 = vmatpush3.bf16.msra.mxu1 %v7658_v32  ;;  %7017 = vmatprep.subr.bf16.mxu0 %v7659_v35  ;;  %v5899_v32 = vcombine.low %v8709_v43, %v8712_v44  ;;  %v7673_v35 = vld [vmem:[%s9634_s1 + $0x6c0] sm:$0xff]   ;;  %v5932_v42 = vcombine.high %v8759_v19, %v8762_v20 }
 0x140   : > { %v6575_v55 = vpop.f32.mrb[32].mxu1  ;;  %v6512_v57 = vpop.f32.mrb[33].mxu0  ;;  %7081 = vmatprep.subr.bf16.mxu1 %v7661_v41  ;;  %v5901_v41 = vcombine.low %v8721_v49, %v8726_v53  ;;  %v5934_v43 = vcombine.high %v8771_v24, %v386_v28  ;;  %v401_v49 = vld [vmem:[%s7970_s24 + $0x640] sm:$0xff] }
 0x141   : > { %v6513_v61 = vadd.f32 %v6512_v57, %v6511_v52  ;;  %v6576_v62 = vpop.f32.mrb[33].mxu1  ;;  %v6514_v0 = vpop.f32.mrb[34].mxu0  ;;  %v417_v53 = vld [vmem:[%s7970_s24 + $0x6c0] sm:$0xff] }
 0x142   : > { %v6577_v3 = vadd.f32 %v6576_v62, %v6575_v55  ;;  %v6578_v4 = vpop.f32.mrb[34].mxu1  ;;  %v6515_v8 = vpop.f32.mrb[35].mxu0  ;;  %7018 = vmatpush3.bf16.msra.mxu0 %v7660_v45  ;;  %v418_v62 = vld [vmem:[%s7970_s24 + $0x6c8] sm:$0xff] }
 0x143   : > { %v4021_v14 = vadd.f32 %v6513_v61, %v8515_v21  ;;  %v6516_v15 = vadd.f32 %v6515_v8, %v6514_v0  ;;  %v6579_v16 = vpop.f32.mrb[35].mxu1  ;;  %7082 = vmatpush3.bf16.msra.mxu1 %v7662_v54  ;;  %7019 = vmatprep.subr.bf16.mxu0 %v7663_v56  ;;  %v7668_v21 = vld [vmem:[%s9634_s1 + $0x538] sm:$0xff]   ;;  %v402_v61 = vld [vmem:[%s7970_s24 + $0x648] sm:$0xff]  ;;  %v5933_v8 = vcombine.low %v8771_v24, %v386_v28 }
 0x144   : > { %v6580_v18 = vadd.f32 %v6579_v16, %v6578_v4  ;;  %4625 = vmatmul.mubr.bf16.gmra.mrb[140].mxu0 %v5867_v58  ;;  %7083 = vmatprep.subr.bf16.mxu1 %v7665_v59  ;;  %v434_v28 = vld [vmem:[%s7970_s24 + $0x748] sm:$0xff] }
 0x145   : > { %v8767_v22 = vadd.f32 %v6577_v3, %v4021_v14  ;;  %v4024_v23 = vadd.f32 %v6516_v15, %v8528_v27  ;;  %4722 = vmatmul.mubr.bf16.gmra.mrb[140].mxu1 %v5869_v1  ;;  %4632 = vmatprep.mubr.bf16.mxu0 %v5900_v2  ;;  %v7671_v27 = vld [vmem:[%s9634_s1 + $0x640] sm:$0xff]   ;;  %v5931_v2 = vcombine.low %v8759_v19, %v8762_v20 }
 0x146   : > { %4729 = vmatprep.mubr.bf16.mxu1 %v5902_v11  ;;  %7020 = vmatpush3.bf16.msra.mxu0 %v7664_v5  ;;  %v5966_v14 = vcombine.high %v402_v61, %v418_v62 }
 0x147   : > { %v8773_v25 = vadd.f32 %v6580_v18, %v4024_v23  ;;  %v6517_v26 = vpop.f32.mrb[36].mxu0  ;;  %7084 = vmatpush3.bf16.msra.mxu1 %v7666_v9  ;;  %7021 = vmatprep.subr.bf16.mxu0 %v7667_v13  ;;  %v449_v23 = vld [vmem:[%s7970_s24 + $0x7c0] sm:$0xff] }
 0x148   : > { %v6581_v30 = vpop.f32.mrb[36].mxu1  ;;  %v6518_v31 = vpop.f32.mrb[37].mxu0  ;;  %7085 = vmatprep.subr.bf16.mxu1 %v7669_v17 }
 0x149   : > { %v6519_v38 = vadd.f32 %v6518_v31, %v6517_v26  ;;  %v6582_v39 = vpop.f32.mrb[37].mxu1  ;;  %v6520_v40 = vpop.f32.mrb[38].mxu0 }
 0x14a   : > { %v6583_v45 = vadd.f32 %v6582_v39, %v6581_v30  ;;  %v6584_v48 = vpop.f32.mrb[38].mxu1  ;;  %v6521_v52 = vpop.f32.mrb[39].mxu0  ;;  %7022 = vmatpush3.bf16.msra.mxu0 %v7668_v21  ;;  %v433_v21 = vld [vmem:[%s7970_s24 + $0x740] sm:$0xff]  ;;  %v5963_v30 = vcombine.low %v401_v49, %v417_v53 }
 0x14b   : > { %v4029_v44 = vadd.f32 %v6519_v38, %v8541_v46  ;;  %v6522_v54 = vadd.f32 %v6521_v52, %v6520_v40  ;;  %v6585_v56 = vpop.f32.mrb[39].mxu1  ;;  %7086 = vmatpush3.bf16.msra.mxu1 %v7670_v29  ;;  %7135 = vmatprep.subr.bf16.mxu0 %v7671_v27  ;;  %v450_v29 = vld [vmem:[%s7970_s24 + $0x7c8] sm:$0xff]  ;;  %v5965_v38 = vcombine.low %v402_v61, %v418_v62 }
 0x14c   : > { %v6586_v55 = vadd.f32 %v6585_v56, %v6584_v48  ;;  %4633 = vmatmul.mubr.bf16.gmra.mrb[144].mxu0 %v5899_v32  ;;  %7199 = vmatprep.subr.bf16.mxu1 %v7673_v35  ;;  %v5996_v39 = vcombine.high %v433_v21, %v449_v23  ;;  %v211_v56 = vld [vmem:[%s7970_s24 + $0x50] sm:$0xff]  ;;  %v5995_v62 = vcombine.low %v433_v21, %v449_v23 }
 0x14d   : > { %v8795_v57 = vadd.f32 %v6583_v45, %v4029_v44  ;;  %v4032_v58 = vadd.f32 %v6522_v54, %v8546_v50  ;;  %4730 = vmatmul.mubr.bf16.gmra.mrb[144].mxu1 %v5901_v41  ;;  %4640 = vmatprep.mubr.bf16.mxu0 %v5932_v42  ;;  %v5964_v50 = vcombine.high %v401_v49, %v417_v53  ;;  %v8835_v21 = vld [vmem:[%s7970_s24 + $0x1d0] sm:$0xff] }
 0x14e   : > { %4737 = vmatprep.mubr.bf16.mxu1 %v5934_v43  ;;  %v5998_v42 = vcombine.high %v434_v28, %v450_v29 }
 0x14f   : > { %v8798_v59 = vadd.f32 %v6586_v55, %v4032_v58  ;;  %v6523_v46 = vpop.f32.mrb[40].mxu0  ;;  %v227_v55 = vld [vmem:[%s7970_s24 + $0xd0] sm:$0xff]  ;;  %v212_v58 = vld [vmem:[%s7970_s24 + $0x58] sm:$0xff] }
 0x150   : > { %v6587_v0 = vpop.f32.mrb[40].mxu1  ;;  %v6524_v1 = vpop.f32.mrb[41].mxu0 }
 0x151   : > { %v6525_v5 = vadd.f32 %v6524_v1, %v6523_v46  ;;  %v6588_v3 = vpop.f32.mrb[41].mxu1  ;;  %v6526_v4 = vpop.f32.mrb[42].mxu0  ;;  %v228_v46 = vld [vmem:[%s7970_s24 + $0xd8] sm:$0xff] }
 0x152   : > { %v6589_v11 = vadd.f32 %v6588_v3, %v6587_v0  ;;  %v6590_v9 = vpop.f32.mrb[42].mxu1  ;;  %v6527_v13 = vpop.f32.mrb[43].mxu0  ;;  %v5776_v3 = vcombine.high %v211_v56, %v227_v55 }
 0x153   : > { %v4037_v15 = vadd.f32 %v6525_v5, %v8554_v7  ;;  %v6528_v16 = vadd.f32 %v6527_v13, %v6526_v4  ;;  %v6591_v17 = vpop.f32.mrb[43].mxu1  ;;  %v5997_v5 = vcombine.low %v434_v28, %v450_v29  ;;  %v8838_v28 = vld [vmem:[%s7970_s24 + $0x158] sm:$0xff] }
 0x154   : > { %v6592_v18 = vadd.f32 %v6591_v17, %v6590_v9  ;;  %4641 = vmatmul.mubr.bf16.gmra.mrb[148].mxu0 %v5931_v2  ;;  %v8841_v29 = vld [vmem:[%s7970_s24 + $0x1d8] sm:$0xff] }
 0x155   : > { %v8806_v19 = vadd.f32 %v6589_v11, %v4037_v15  ;;  %v4040_v20 = vadd.f32 %v6528_v16, %v8560_v12  ;;  %4738 = vmatmul.mubr.bf16.gmra.mrb[148].mxu1 %v5933_v8  ;;  %4648 = vmatprep.mubr.bf16.mxu0 %v5964_v50  ;;  %v5778_v50 = vcombine.high %v212_v58, %v228_v46 }
 0x156   : > { %4745 = vmatprep.mubr.bf16.mxu1 %v5966_v14 }
 0x157   : > { %v8811_v24 = vadd.f32 %v6592_v18, %v4040_v20  ;;  %v6529_v26 = vpop.f32.mrb[44].mxu0  ;;  %v8832_v20 = vld [vmem:[%s7970_s24 + $0x150] sm:$0xff] }
 0x158   : > { %v6593_v27 = vpop.f32.mrb[44].mxu1  ;;  %v6530_v7 = vpop.f32.mrb[45].mxu0 }
 0x159   : > { %v6531_v31 = vadd.f32 %v6530_v7, %v6529_v26  ;;  %v6594_v32 = vpop.f32.mrb[45].mxu1  ;;  %v6532_v35 = vpop.f32.mrb[46].mxu0  ;;  %v5775_v26 = vcombine.low %v211_v56, %v227_v55  ;;  %v7676_v56 = vld [vmem:[%s9634_s1 + $0x608] sm:$0xff]  }
 0x15a   : > { %v6595_v12 = vadd.f32 %v6594_v32, %v6593_v27  ;;  %v6596_v40 = vpop.f32.mrb[46].mxu1  ;;  %v6533_v41 = vpop.f32.mrb[47].mxu0  ;;  %v7678_v55 = vld [vmem:[%s9634_s1 + $0x688] sm:$0xff]  }
 0x15b   : > { %v4045_v45 = vadd.f32 %v6531_v31, %v8564_v33  ;;  %v6534_v48 = vadd.f32 %v6533_v41, %v6532_v35  ;;  %v6597_v52 = vpop.f32.mrb[47].mxu1  ;;  %v7672_v31 = vld [vmem:[%s9634_s1 + $0x600] sm:$0xff]  }
 0x15c   : > { %v6598_v43 = vadd.f32 %v6597_v52, %v6596_v40  ;;  %4649 = vmatmul.mubr.bf16.gmra.mrb[152].mxu0 %v5963_v30  ;;  %v5777_v30 = vcombine.low %v212_v58, %v228_v46  ;;  %v8873_v58 = vld [vmem:[%s7970_s24 + $0x2d0] sm:$0xff] }
 0x15d   : > { %v8816_v44 = vadd.f32 %v6595_v12, %v4045_v45  ;;  %v4048_v54 = vadd.f32 %v6534_v48, %v8569_v37  ;;  %4746 = vmatmul.mubr.bf16.gmra.mrb[152].mxu1 %v5965_v38  ;;  %4656 = vmatprep.mubr.bf16.mxu0 %v5996_v39  ;;  %v7674_v39 = vld [vmem:[%s9634_s1 + $0x680] sm:$0xff]   ;;  %v5808_v12 = vcombine.high %v8832_v20, %v8835_v21  ;;  %v7675_v48 = vld [vmem:[%s9634_s1 + $0x648] sm:$0xff]  }
 0x15e   : > { %4753 = vmatprep.mubr.bf16.mxu1 %v5998_v42  ;;  %v5810_v45 = vcombine.high %v8838_v28, %v8841_v29 }
 0x15f   : > { %v8821_v49 = vadd.f32 %v6598_v43, %v4048_v54  ;;  %v6535_v53 = vpop.f32.mrb[48].mxu0  ;;  %v7677_v43 = vld [vmem:[%s9634_s1 + $0x6c8] sm:$0xff]  }
 0x160   : > { %v6599_v61 = vpop.f32.mrb[48].mxu1  ;;  %v6536_v33 = vpop.f32.mrb[49].mxu0 }
 0x161   : > { %v6537_v0 = vadd.f32 %v6536_v33, %v6535_v53  ;;  %v6600_v1 = vpop.f32.mrb[49].mxu1  ;;  %v6538_v2 = vpop.f32.mrb[50].mxu0  ;;  %v8870_v53 = vld [vmem:[%s7970_s24 + $0x250] sm:$0xff]  ;;  %v8881_v33 = vld [vmem:[%s7970_s24 + $0x258] sm:$0xff] }
 0x162   : > { %v6601_v4 = vadd.f32 %v6600_v1, %v6599_v61  ;;  %v6602_v37 = vpop.f32.mrb[50].mxu1  ;;  %v6539_v8 = vpop.f32.mrb[51].mxu0 }
 0x163   : > { %v4053_v11 = vadd.f32 %v6537_v0, %v8574_v60  ;;  %v6540_v9 = vadd.f32 %v6539_v8, %v6538_v2  ;;  %v6603_v13 = vpop.f32.mrb[51].mxu1  ;;  %v7681_v0 = vld [vmem:[%s9634_s1 + $0x6d0] sm:$0xff]   ;;  %v5809_v8 = vcombine.low %v8838_v28, %v8841_v29 }
 0x164   : > { %v6604_v14 = vadd.f32 %v6603_v13, %v6602_v37  ;;  %4657 = vmatmul.mubr.bf16.gmra.mrb[156].mxu0 %v5995_v62  ;;  %v8884_v62 = vld [vmem:[%s7970_s24 + $0x2d8] sm:$0xff] }
 0x165   : > { %v8826_v15 = vadd.f32 %v6601_v4, %v4053_v11  ;;  %v4056_v16 = vadd.f32 %v6540_v9, %v8580_v63  ;;  %4754 = vmatmul.mubr.bf16.gmra.mrb[156].mxu1 %v5997_v5  ;;  %4794 = vmatprep.mubr.bf16.mxu0 %v5776_v3  ;;  %v5807_v5 = vcombine.low %v8832_v20, %v8835_v21 }
 0x166   : > { %4891 = vmatprep.mubr.bf16.mxu1 %v5778_v50  ;;  %v5840_v50 = vcombine.high %v8870_v53, %v8873_v58 }
 0x167   : > { %v8829_v17 = vadd.f32 %v6604_v14, %v4056_v16  ;;  %v6541_v18 = vpop.f32.mrb[52].mxu0  ;;  %v5842_v14 = vcombine.high %v8881_v33, %v8884_v62  ;;  %v7680_v16 = vld [vmem:[%s9634_s1 + $0x610] sm:$0xff]  }
 0x168   : > { %v6605_v60 = vpop.f32.mrb[52].mxu1  ;;  %v6542_v23 = vpop.f32.mrb[53].mxu0 }
 0x169   : > { %v6543_v27 = vadd.f32 %v6542_v23, %v6541_v18  ;;  %v6606_v7 = vpop.f32.mrb[53].mxu1  ;;  %v6544_v63 = vpop.f32.mrb[54].mxu0  ;;  %v7683_v23 = vld [vmem:[%s9634_s1 + $0x658] sm:$0xff]  }
 0x16a   : > { %v6607_v32 = vadd.f32 %v6606_v7, %v6605_v60  ;;  %v6608_v35 = vpop.f32.mrb[54].mxu1  ;;  %v6545_v38 = vpop.f32.mrb[55].mxu0  ;;  %v7682_v60 = vld [vmem:[%s9634_s1 + $0x690] sm:$0xff]  }
 0x16b   : > { %v4061_v40 = vadd.f32 %v6543_v27, %v8623_v34  ;;  %v6546_v41 = vadd.f32 %v6545_v38, %v6544_v63  ;;  %v6609_v42 = vpop.f32.mrb[55].mxu1  ;;  %v8914_v27 = vld [vmem:[%s7970_s24 + $0x350] sm:$0xff]  ;;  %v8920_v63 = vld [vmem:[%s7970_s24 + $0x358] sm:$0xff]  ;;  %v7687_v38 = vld [vmem:[%s9634_s1 + $0x660] sm:$0xff]  }
 0x16c   : > { %v6610_v52 = vadd.f32 %v6609_v42, %v6608_v35  ;;  %4795 = vmatmul.mubr.bf16.vlgmr.msra.gmra.mrb[160].mxu0 %v5775_v26  ;;  %v8917_v7 = vld [vmem:[%s7970_s24 + $0x3d0] sm:$0xff]  ;;  %v8928_v35 = vld [vmem:[%s7970_s24 + $0x3d8] sm:$0xff] }
 0x16d   : > { %v8860_v54 = vadd.f32 %v6607_v32, %v4061_v40  ;;  %v4064_v34 = vadd.f32 %v6546_v41, %v8626_v36  ;;  %4892 = vmatmul.mubr.bf16.vlgmr.msra.gmra.mrb[160].mxu1 %v5777_v30  ;;  %7136 = vmatpush3.bf16.msra.mxu0 %v7672_v31  ;;  %v7679_v36 = vld [vmem:[%s9634_s1 + $0x650] sm:$0xff]   ;;  %v7684_v30 = vld [vmem:[%s9634_s1 + $0x618] sm:$0xff]   ;;  %v5839_v40 = vcombine.low %v8870_v53, %v8873_v58  ;;  %v7689_v41 = vld [vmem:[%s9634_s1 + $0x6e0] sm:$0xff]  }
 0x16e   : > { %7200 = vmatpush3.bf16.msra.mxu1 %v7674_v39  ;;  %4802 = vmatprep.mubr.bf16.mxu0 %v5808_v12  ;;  %v5874_v53 = vcombine.high %v8920_v63, %v8928_v35  ;;  %v7688_v58 = vld [vmem:[%s9634_s1 + $0x620] sm:$0xff]  }
 0x16f   : > { %v8878_v46 = vadd.f32 %v6610_v52, %v4064_v34  ;;  %v6547_v61 = vpop.f32.mrb[56].mxu0  ;;  %4899 = vmatprep.mubr.bf16.mxu1 %v5810_v45  ;;  %7137 = vmatprep.subr.bf16.mxu0 %v7675_v48  ;;  %v5841_v52 = vcombine.low %v8881_v33, %v8884_v62  ;;  %v7690_v62 = vld [vmem:[%s9634_s1 + $0x6a0] sm:$0xff]  }
 0x170   : > { %v6611_v1 = vpop.f32.mrb[56].mxu1  ;;  %v6548_v2 = vpop.f32.mrb[57].mxu0  ;;  %7201 = vmatprep.subr.bf16.mxu1 %v7677_v43  ;;  %v5872_v43 = vcombine.high %v8914_v27, %v8917_v7 }
 0x171   : > { %v6549_v3 = vadd.f32 %v6548_v2, %v6547_v61  ;;  %v6612_v4 = vpop.f32.mrb[57].mxu1  ;;  %v6550_v37 = vpop.f32.mrb[58].mxu0  ;;  %7138 = vmatpush3.bf16.msra.mxu0 %v7676_v56 }
 0x172   : > { %v6613_v11 = vadd.f32 %v6612_v4, %v6611_v1  ;;  %v6614_v9 = vpop.f32.mrb[58].mxu1  ;;  %v6551_v13 = vpop.f32.mrb[59].mxu0  ;;  %7202 = vmatpush3.bf16.msra.mxu1 %v7678_v55  ;;  %7139 = vmatprep.subr.bf16.mxu0 %v7679_v36  ;;  %v8967_v4 = vld [vmem:[%s7970_s24 + $0x4d0] sm:$0xff] }
 0x173   : > { %v4069_v18 = vadd.f32 %v6549_v3, %v8667_v6  ;;  %v6552_v20 = vadd.f32 %v6551_v13, %v6550_v37  ;;  %v6615_v21 = vpop.f32.mrb[59].mxu1  ;;  %7203 = vmatprep.subr.bf16.mxu1 %v7681_v0  ;;  %v7685_v6 = vld [vmem:[%s9634_s1 + $0x6d8] sm:$0xff]   ;;  %v7691_v0 = vld [vmem:[%s9634_s1 + $0x668] sm:$0xff]   ;;  %v8964_v3 = vld [vmem:[%s7970_s24 + $0x450] sm:$0xff] }
 0x174   : > { %v6616_v26 = vadd.f32 %v6615_v21, %v6614_v9  ;;  %4803 = vmatmul.mubr.bf16.gmra.mrb[164].mxu0 %v5807_v5  ;;  %v8970_v37 = vld [vmem:[%s7970_s24 + $0x458] sm:$0xff]  ;;  %v7695_v13 = vld [vmem:[%s9634_s1 + $0x670] sm:$0xff]  }
 0x175   : > { %v8910_v28 = vadd.f32 %v6613_v11, %v4069_v18  ;;  %v4072_v29 = vadd.f32 %v6552_v20, %v8673_v10  ;;  %4900 = vmatmul.mubr.bf16.gmra.mrb[164].mxu1 %v5809_v8  ;;  %4810 = vmatprep.mubr.bf16.mxu0 %v5840_v50  ;;  %v7686_v10 = vld [vmem:[%s9634_s1 + $0x698] sm:$0xff]   ;;  %v7692_v8 = vld [vmem:[%s9634_s1 + $0x628] sm:$0xff]   ;;  %v5871_v18 = vcombine.low %v8914_v27, %v8917_v7  ;;  %v7697_v20 = vld [vmem:[%s9634_s1 + $0x6f0] sm:$0xff]  }
 0x176   : > { %4907 = vmatprep.mubr.bf16.mxu1 %v5842_v14  ;;  %7140 = vmatpush3.bf16.msra.mxu0 %v7680_v16  ;;  %v8978_v9 = vld [vmem:[%s7970_s24 + $0x4d8] sm:$0xff]  ;;  %v7696_v7 = vld [vmem:[%s9634_s1 + $0x630] sm:$0xff]  }
 0x177   : > { %v8925_v31 = vadd.f32 %v6616_v26, %v4072_v29  ;;  %v6553_v32 = vpop.f32.mrb[60].mxu0  ;;  %7204 = vmatpush3.bf16.msra.mxu1 %v7682_v60  ;;  %7141 = vmatprep.subr.bf16.mxu0 %v7683_v23  ;;  %v5873_v26 = vcombine.low %v8920_v63, %v8928_v35  ;;  %v5906_v27 = vcombine.high %v8970_v37, %v8978_v9  ;;  %v7698_v35 = vld [vmem:[%s9634_s1 + $0x6b0] sm:$0xff]  }
 0x178   : > { %v6617_v39 = vpop.f32.mrb[60].mxu1  ;;  %v6554_v12 = vpop.f32.mrb[61].mxu0  ;;  %7205 = vmatprep.subr.bf16.mxu1 %v7685_v6  ;;  %v5904_v6 = vcombine.high %v8964_v3, %v8967_v4 }
 0x179   : > { %v6555_v42 = vadd.f32 %v6554_v12, %v6553_v32  ;;  %v6618_v45 = vpop.f32.mrb[61].mxu1  ;;  %v6556_v48 = vpop.f32.mrb[62].mxu0 }
 0x17a   : > { %v6619_v34 = vadd.f32 %v6618_v45, %v6617_v39  ;;  %v6620_v56 = vpop.f32.mrb[62].mxu1  ;;  %v6557_v55 = vpop.f32.mrb[63].mxu0  ;;  %7142 = vmatpush3.bf16.msra.mxu0 %v7684_v30  ;;  %v7699_v39 = vld [vmem:[%s9634_s1 + $0x678] sm:$0xff]   ;;  %v387_v45 = vld [vmem:[%s7970_s24 + $0x5d0] sm:$0xff] }
 0x17b   : > { %v4077_v36 = vadd.f32 %v6555_v42, %v8717_v47  ;;  %v6558_v61 = vadd.f32 %v6557_v55, %v6556_v48  ;;  %v6621_v33 = vpop.f32.mrb[63].mxu1  ;;  %7206 = vmatpush3.bf16.msra.mxu1 %v7686_v10  ;;  %7143 = vmatprep.subr.bf16.mxu0 %v7687_v38  ;;  %v7693_v47 = vld [vmem:[%s9634_s1 + $0x6e8] sm:$0xff]   ;;  %v9014_v42 = vld [vmem:[%s7970_s24 + $0x550] sm:$0xff]  ;;  %v9018_v48 = vld [vmem:[%s7970_s24 + $0x558] sm:$0xff] }
 0x17c   : > { %v6622_v1 = vadd.f32 %v6621_v33, %v6620_v56  ;;  %4811 = vmatmul.mubr.bf16.gmra.mrb[168].mxu0 %v5839_v40  ;;  %7207 = vmatprep.subr.bf16.mxu1 %v7689_v41  ;;  %v388_v56 = vld [vmem:[%s7970_s24 + $0x5d8] sm:$0xff]  ;;  %v7703_v55 = vld [vmem:[%s9634_s1 + $0x740] sm:$0xff]  }
 0x17d   : > { %v8960_v2 = vadd.f32 %v6619_v34, %v4077_v36  ;;  %v4080_v5 = vadd.f32 %v6558_v61, %v8723_v51  ;;  %4908 = vmatmul.mubr.bf16.gmra.mrb[168].mxu1 %v5841_v52  ;;  %4818 = vmatprep.mubr.bf16.mxu0 %v5872_v43  ;;  %v7694_v51 = vld [vmem:[%s9634_s1 + $0x6a8] sm:$0xff]   ;;  %v7700_v52 = vld [vmem:[%s9634_s1 + $0x638] sm:$0xff]   ;;  %v5903_v36 = vcombine.low %v8964_v3, %v8967_v4  ;;  %v7705_v61 = vld [vmem:[%s9634_s1 + $0x7c0] sm:$0xff]  }
 0x17e   : > { %4915 = vmatprep.mubr.bf16.mxu1 %v5874_v53  ;;  %7144 = vmatpush3.bf16.msra.mxu0 %v7688_v58 }
 0x17f   : > { %v8975_v50 = vadd.f32 %v6622_v1, %v4080_v5  ;;  %v6639_v11 = vpop.f32.mrb[64].mxu0  ;;  %7208 = vmatpush3.bf16.msra.mxu1 %v7690_v62  ;;  %7145 = vmatprep.subr.bf16.mxu0 %v7691_v0  ;;  %v5905_v1 = vcombine.low %v8970_v37, %v8978_v9 }
 0x180   : > { %v6703_v14 = vpop.f32.mrb[64].mxu1  ;;  %v6640_v16 = vpop.f32.mrb[65].mxu0  ;;  %7209 = vmatprep.subr.bf16.mxu1 %v7693_v47  ;;  %v5936_v47 = vcombine.high %v9014_v42, %v387_v45 }
 0x181   : > { %v6641_v21 = vadd.f32 %v6640_v16, %v6639_v11  ;;  %v6704_v60 = vpop.f32.mrb[65].mxu1  ;;  %v6642_v23 = vpop.f32.mrb[66].mxu0  ;;  %v403_v16 = vld [vmem:[%s7970_s24 + $0x650] sm:$0xff] }
 0x182   : > { %v6705_v29 = vadd.f32 %v6704_v60, %v6703_v14  ;;  %v6706_v30 = vpop.f32.mrb[66].mxu1  ;;  %v6643_v32 = vpop.f32.mrb[67].mxu0  ;;  %7146 = vmatpush3.bf16.msra.mxu0 %v7692_v8  ;;  %v420_v60 = vld [vmem:[%s7970_s24 + $0x6d8] sm:$0xff] }
 0x183   : > { %v4215_v10 = vadd.f32 %v6641_v21, %v8767_v22  ;;  %v6644_v38 = vadd.f32 %v6643_v32, %v6642_v23  ;;  %v6707_v63 = vpop.f32.mrb[67].mxu1  ;;  %7210 = vmatpush3.bf16.msra.mxu1 %v7694_v51  ;;  %7147 = vmatprep.subr.bf16.mxu0 %v7695_v13  ;;  %v7701_v22 = vld [vmem:[%s9634_s1 + $0x6f8] sm:$0xff]   ;;  %v5938_v51 = vcombine.high %v9018_v48, %v388_v56 }
 0x184   : > { %v6708_v12 = vadd.f32 %v6707_v63, %v6706_v30  ;;  %4819 = vmatmul.mubr.bf16.gmra.mrb[172].mxu0 %v5871_v18  ;;  %7211 = vmatprep.subr.bf16.mxu1 %v7697_v20  ;;  %v419_v18 = vld [vmem:[%s7970_s24 + $0x6d0] sm:$0xff]  ;;  %v404_v21 = vld [vmem:[%s7970_s24 + $0x658] sm:$0xff] }
 0x185   : > { %v9010_v40 = vadd.f32 %v6705_v29, %v4215_v10  ;;  %v4218_v41 = vadd.f32 %v6644_v38, %v8773_v25  ;;  %4916 = vmatmul.mubr.bf16.gmra.mrb[172].mxu1 %v5873_v26  ;;  %4826 = vmatprep.mubr.bf16.mxu0 %v5904_v6  ;;  %v7702_v25 = vld [vmem:[%s9634_s1 + $0x6b8] sm:$0xff]   ;;  %v5935_v6 = vcombine.low %v9014_v42, %v387_v45  ;;  %v435_v45 = vld [vmem:[%s7970_s24 + $0x750] sm:$0xff] }
 0x186   : > { %4923 = vmatprep.mubr.bf16.mxu1 %v5906_v27  ;;  %7148 = vmatpush3.bf16.msra.mxu0 %v7696_v7  ;;  %v5937_v27 = vcombine.low %v9018_v48, %v388_v56  ;;  %v5970_v63 = vcombine.high %v404_v21, %v420_v60  ;;  %v451_v48 = vld [vmem:[%s7970_s24 + $0x7d0] sm:$0xff]  ;;  %v436_v56 = vld [vmem:[%s7970_s24 + $0x758] sm:$0xff] }
 0x187   : > { %v9023_v43 = vadd.f32 %v6708_v12, %v4218_v41  ;;  %v6645_v34 = vpop.f32.mrb[68].mxu0  ;;  %7212 = vmatpush3.bf16.msra.mxu1 %v7698_v35  ;;  %7149 = vmatprep.subr.bf16.mxu0 %v7699_v39 }
 0x188   : > { %v6709_v53 = vpop.f32.mrb[68].mxu1  ;;  %v6646_v58 = vpop.f32.mrb[69].mxu0  ;;  %7213 = vmatprep.subr.bf16.mxu1 %v7701_v22 }
 0x189   : > { %v6647_v33 = vadd.f32 %v6646_v58, %v6645_v34  ;;  %v6710_v62 = vpop.f32.mrb[69].mxu1  ;;  %v6648_v0 = vpop.f32.mrb[70].mxu0 }
 0x18a   : > { %v6711_v5 = vadd.f32 %v6710_v62, %v6709_v53  ;;  %v6712_v8 = vpop.f32.mrb[70].mxu1  ;;  %v6649_v11 = vpop.f32.mrb[71].mxu0  ;;  %7150 = vmatpush3.bf16.msra.mxu0 %v7700_v52  ;;  %v5967_v53 = vcombine.low %v403_v16, %v419_v18  ;;  %v6000_v62 = vcombine.high %v435_v45, %v451_v48 }
 0x18b   : > { %v4223_v3 = vadd.f32 %v6647_v33, %v8795_v57  ;;  %v6650_v4 = vadd.f32 %v6649_v11, %v6648_v0  ;;  %v6713_v13 = vpop.f32.mrb[71].mxu1  ;;  %7214 = vmatpush3.bf16.msra.mxu1 %v7702_v25  ;;  %7263 = vmatprep.subr.bf16.mxu0 %v7703_v55  ;;  %v452_v25 = vld [vmem:[%s7970_s24 + $0x7d8] sm:$0xff]  ;;  %v5969_v33 = vcombine.low %v404_v21, %v420_v60 }
 0x18c   : > { %v6714_v14 = vadd.f32 %v6713_v13, %v6712_v8  ;;  %4827 = vmatmul.mubr.bf16.gmra.mrb[176].mxu0 %v5903_v36  ;;  %7327 = vmatprep.subr.bf16.mxu1 %v7705_v61  ;;  %v213_v13 = vld [vmem:[%s7970_s24 + $0x60] sm:$0xff]  ;;  %v5999_v60 = vcombine.low %v435_v45, %v451_v48 }
 0x18d   : > { %v9042_v37 = vadd.f32 %v6711_v5, %v4223_v3  ;;  %v4226_v9 = vadd.f32 %v6650_v4, %v8798_v59  ;;  %4924 = vmatmul.mubr.bf16.gmra.mrb[176].mxu1 %v5905_v1  ;;  %4834 = vmatprep.mubr.bf16.mxu0 %v5936_v47  ;;  %v5968_v59 = vcombine.high %v403_v16, %v419_v18  ;;  %v214_v18 = vld [vmem:[%s7970_s24 + $0x68] sm:$0xff]  ;;  %v9083_v45 = vld [vmem:[%s7970_s24 + $0x1e0] sm:$0xff] }
 0x18e   : > { %4931 = vmatprep.mubr.bf16.mxu1 %v5938_v51  ;;  %v6002_v47 = vcombine.high %v436_v56, %v452_v25 }
 0x18f   : > { %v9047_v20 = vadd.f32 %v6714_v14, %v4226_v9  ;;  %v6651_v57 = vpop.f32.mrb[72].mxu0  ;;  %v229_v14 = vld [vmem:[%s7970_s24 + $0xe0] sm:$0xff] }
 0x190   : > { %v6715_v23 = vpop.f32.mrb[72].mxu1  ;;  %v6652_v26 = vpop.f32.mrb[73].mxu0 }
 0x191   : > { %v6653_v29 = vadd.f32 %v6652_v26, %v6651_v57  ;;  %v6716_v30 = vpop.f32.mrb[73].mxu1  ;;  %v6654_v32 = vpop.f32.mrb[74].mxu0  ;;  %v230_v57 = vld [vmem:[%s7970_s24 + $0xe8] sm:$0xff] }
 0x192   : > { %v6717_v7 = vadd.f32 %v6716_v30, %v6715_v23  ;;  %v6718_v10 = vpop.f32.mrb[74].mxu1  ;;  %v6655_v38 = vpop.f32.mrb[75].mxu0  ;;  %v5780_v30 = vcombine.high %v213_v13, %v229_v14 }
 0x193   : > { %v4231_v35 = vadd.f32 %v6653_v29, %v8806_v19  ;;  %v6656_v39 = vadd.f32 %v6655_v38, %v6654_v32  ;;  %v6719_v12 = vpop.f32.mrb[75].mxu1  ;;  %v6001_v29 = vcombine.low %v436_v56, %v452_v25  ;;  %v9086_v56 = vld [vmem:[%s7970_s24 + $0x168] sm:$0xff] }
 0x194   : > { %v6720_v22 = vadd.f32 %v6719_v12, %v6718_v10  ;;  %4835 = vmatmul.mubr.bf16.gmra.mrb[180].mxu0 %v5935_v6  ;;  %v9089_v25 = vld [vmem:[%s7970_s24 + $0x1e8] sm:$0xff] }
 0x195   : > { %v9054_v41 = vadd.f32 %v6717_v7, %v4231_v35  ;;  %v4234_v42 = vadd.f32 %v6656_v39, %v8811_v24  ;;  %4932 = vmatmul.mubr.bf16.gmra.mrb[180].mxu1 %v5937_v27  ;;  %4842 = vmatprep.mubr.bf16.mxu0 %v5968_v59  ;;  %v5782_v59 = vcombine.high %v214_v18, %v230_v57 }
 0x196   : > { %4939 = vmatprep.mubr.bf16.mxu1 %v5970_v63 }
 0x197   : > { %v9059_v52 = vadd.f32 %v6720_v22, %v4234_v42  ;;  %v6657_v34 = vpop.f32.mrb[76].mxu0  ;;  %v9080_v42 = vld [vmem:[%s7970_s24 + $0x160] sm:$0xff] }
 0x198   : > { %v6721_v55 = vpop.f32.mrb[76].mxu1  ;;  %v6658_v19 = vpop.f32.mrb[77].mxu0 }
 0x199   : > { %v6659_v58 = vadd.f32 %v6658_v19, %v6657_v34  ;;  %v6722_v36 = vpop.f32.mrb[77].mxu1  ;;  %v6660_v61 = vpop.f32.mrb[78].mxu0  ;;  %v5779_v34 = vcombine.low %v213_v13, %v229_v14  ;;  %v7708_v13 = vld [vmem:[%s9634_s1 + $0x708] sm:$0xff]  }
 0x19a   : > { %v6723_v24 = vadd.f32 %v6722_v36, %v6721_v55  ;;  %v6724_v0 = vpop.f32.mrb[78].mxu1  ;;  %v6661_v1 = vpop.f32.mrb[79].mxu0  ;;  %v7710_v14 = vld [vmem:[%s9634_s1 + $0x788] sm:$0xff]  }
 0x19b   : > { %v4239_v5 = vadd.f32 %v6659_v58, %v8816_v44  ;;  %v6662_v8 = vadd.f32 %v6661_v1, %v6660_v61  ;;  %v6725_v11 = vpop.f32.mrb[79].mxu1  ;;  %v7704_v58 = vld [vmem:[%s9634_s1 + $0x700] sm:$0xff]  }
 0x19c   : > { %v6726_v51 = vadd.f32 %v6725_v11, %v6724_v0  ;;  %4843 = vmatmul.mubr.bf16.gmra.mrb[184].mxu0 %v5967_v53  ;;  %v5781_v53 = vcombine.low %v214_v18, %v230_v57  ;;  %v9121_v18 = vld [vmem:[%s7970_s24 + $0x2e0] sm:$0xff] }
 0x19d   : > { %v9064_v3 = vadd.f32 %v6723_v24, %v4239_v5  ;;  %v4242_v4 = vadd.f32 %v6662_v8, %v8821_v49  ;;  %4940 = vmatmul.mubr.bf16.gmra.mrb[184].mxu1 %v5969_v33  ;;  %4850 = vmatprep.mubr.bf16.mxu0 %v6000_v62  ;;  %v7706_v62 = vld [vmem:[%s9634_s1 + $0x780] sm:$0xff]   ;;  %v5812_v24 = vcombine.high %v9080_v42, %v9083_v45  ;;  %v7707_v8 = vld [vmem:[%s9634_s1 + $0x748] sm:$0xff]  }
 0x19e   : > { %4947 = vmatprep.mubr.bf16.mxu1 %v6002_v47  ;;  %v5814_v5 = vcombine.high %v9086_v56, %v9089_v25 }
 0x19f   : > { %v9069_v9 = vadd.f32 %v6726_v51, %v4242_v4  ;;  %v6663_v16 = vpop.f32.mrb[80].mxu0  ;;  %v7709_v51 = vld [vmem:[%s9634_s1 + $0x7c8] sm:$0xff]  }
 0x1a0   : > { %v6727_v21 = vpop.f32.mrb[80].mxu1  ;;  %v6664_v44 = vpop.f32.mrb[81].mxu0 }
 0x1a1   : > { %v6665_v23 = vadd.f32 %v6664_v44, %v6663_v16  ;;  %v6728_v26 = vpop.f32.mrb[81].mxu1  ;;  %v6666_v6 = vpop.f32.mrb[82].mxu0  ;;  %v9118_v16 = vld [vmem:[%s7970_s24 + $0x260] sm:$0xff]  ;;  %v9129_v44 = vld [vmem:[%s7970_s24 + $0x268] sm:$0xff] }
 0x1a2   : > { %v6729_v32 = vadd.f32 %v6728_v26, %v6727_v21  ;;  %v6730_v49 = vpop.f32.mrb[82].mxu1  ;;  %v6667_v27 = vpop.f32.mrb[83].mxu0 }
 0x1a3   : > { %v4247_v7 = vadd.f32 %v6665_v23, %v8826_v15  ;;  %v6668_v10 = vadd.f32 %v6667_v27, %v6666_v6  ;;  %v6731_v38 = vpop.f32.mrb[83].mxu1  ;;  %v7713_v23 = vld [vmem:[%s9634_s1 + $0x7d0] sm:$0xff]   ;;  %v5813_v27 = vcombine.low %v9086_v56, %v9089_v25 }
 0x1a4   : > { %v6732_v63 = vadd.f32 %v6731_v38, %v6730_v49  ;;  %4851 = vmatmul.mubr.bf16.gmra.mrb[188].mxu0 %v5999_v60  ;;  %v9132_v60 = vld [vmem:[%s7970_s24 + $0x2e8] sm:$0xff] }
 0x1a5   : > { %v9074_v35 = vadd.f32 %v6729_v32, %v4247_v7  ;;  %v4250_v39 = vadd.f32 %v6668_v10, %v8829_v17  ;;  %4948 = vmatmul.mubr.bf16.gmra.mrb[188].mxu1 %v6001_v29  ;;  %4988 = vmatprep.mubr.bf16.mxu0 %v5780_v30  ;;  %v5811_v29 = vcombine.low %v9080_v42, %v9083_v45 }
 0x1a6   : > { %5085 = vmatprep.mubr.bf16.mxu1 %v5782_v59  ;;  %v5844_v59 = vcombine.high %v9118_v16, %v9121_v18 }
 0x1a7   : > { %v9077_v12 = vadd.f32 %v6732_v63, %v4250_v39  ;;  %v6669_v22 = vpop.f32.mrb[84].mxu0  ;;  %v5846_v63 = vcombine.high %v9129_v44, %v9132_v60  ;;  %v7712_v39 = vld [vmem:[%s9634_s1 + $0x710] sm:$0xff]  }
 0x1a8   : > { %v6733_v15 = vpop.f32.mrb[84].mxu1  ;;  %v6670_v48 = vpop.f32.mrb[85].mxu0 }
 0x1a9   : > { %v6671_v55 = vadd.f32 %v6670_v48, %v6669_v22  ;;  %v6734_v19 = vpop.f32.mrb[85].mxu1  ;;  %v6672_v17 = vpop.f32.mrb[86].mxu0  ;;  %v7715_v48 = vld [vmem:[%s9634_s1 + $0x758] sm:$0xff]  }
 0x1aa   : > { %v6735_v36 = vadd.f32 %v6734_v19, %v6733_v15  ;;  %v6736_v61 = vpop.f32.mrb[86].mxu1  ;;  %v6673_v33 = vpop.f32.mrb[87].mxu0  ;;  %v7714_v15 = vld [vmem:[%s9634_s1 + $0x790] sm:$0xff]   ;;  %v9165_v19 = vld [vmem:[%s7970_s24 + $0x3e0] sm:$0xff] }
 0x1ab   : > { %v4255_v0 = vadd.f32 %v6671_v55, %v8860_v54  ;;  %v6674_v1 = vadd.f32 %v6673_v33, %v6672_v17  ;;  %v6737_v47 = vpop.f32.mrb[87].mxu1  ;;  %v9162_v55 = vld [vmem:[%s7970_s24 + $0x360] sm:$0xff]  ;;  %v9168_v17 = vld [vmem:[%s7970_s24 + $0x368] sm:$0xff] }
 0x1ac   : > { %v6738_v11 = vadd.f32 %v6737_v47, %v6736_v61  ;;  %4989 = vmatmul.mubr.bf16.vlgmr.msra.gmra.mrb[192].mxu0 %v5779_v34  ;;  %v9176_v61 = vld [vmem:[%s7970_s24 + $0x3e8] sm:$0xff]  ;;  %v7719_v33 = vld [vmem:[%s9634_s1 + $0x760] sm:$0xff]  }
 0x1ad   : > { %v9108_v4 = vadd.f32 %v6735_v36, %v4255_v0  ;;  %v4258_v54 = vadd.f32 %v6674_v1, %v8878_v46  ;;  %5086 = vmatmul.mubr.bf16.vlgmr.msra.gmra.mrb[192].mxu1 %v5781_v53  ;;  %7264 = vmatpush3.bf16.msra.mxu0 %v7704_v58  ;;  %v7711_v46 = vld [vmem:[%s9634_s1 + $0x750] sm:$0xff]   ;;  %v7716_v53 = vld [vmem:[%s9634_s1 + $0x718] sm:$0xff]   ;;  %v5843_v0 = vcombine.low %v9118_v16, %v9121_v18  ;;  %v7721_v1 = vld [vmem:[%s9634_s1 + $0x7e0] sm:$0xff]  }
 0x1ae   : > { %7328 = vmatpush3.bf16.msra.mxu1 %v7706_v62  ;;  %4996 = vmatprep.mubr.bf16.mxu0 %v5812_v24  ;;  %v5878_v16 = vcombine.high %v9168_v17, %v9176_v61  ;;  %v7720_v18 = vld [vmem:[%s9634_s1 + $0x720] sm:$0xff]  }
 0x1af   : > { %v9126_v57 = vadd.f32 %v6738_v11, %v4258_v54  ;;  %v6675_v21 = vpop.f32.mrb[88].mxu0  ;;  %5093 = vmatprep.mubr.bf16.mxu1 %v5814_v5  ;;  %7265 = vmatprep.subr.bf16.mxu0 %v7707_v8  ;;  %v5845_v11 = vcombine.low %v9129_v44, %v9132_v60  ;;  %v7722_v60 = vld [vmem:[%s9634_s1 + $0x7a0] sm:$0xff]  }
 0x1b0   : > { %v6739_v26 = vpop.f32.mrb[88].mxu1  ;;  %v6676_v6 = vpop.f32.mrb[89].mxu0  ;;  %7329 = vmatprep.subr.bf16.mxu1 %v7709_v51  ;;  %v5876_v51 = vcombine.high %v9162_v55, %v9165_v19 }
 0x1b1   : > { %v6677_v30 = vadd.f32 %v6676_v6, %v6675_v21  ;;  %v6740_v32 = vpop.f32.mrb[89].mxu1  ;;  %v6678_v49 = vpop.f32.mrb[90].mxu0  ;;  %7266 = vmatpush3.bf16.msra.mxu0 %v7708_v13 }
 0x1b2   : > { %v6741_v7 = vadd.f32 %v6740_v32, %v6739_v26  ;;  %v6742_v10 = vpop.f32.mrb[90].mxu1  ;;  %v6679_v38 = vpop.f32.mrb[91].mxu0  ;;  %7330 = vmatpush3.bf16.msra.mxu1 %v7710_v14  ;;  %7267 = vmatprep.subr.bf16.mxu0 %v7711_v46  ;;  %v9215_v32 = vld [vmem:[%s7970_s24 + $0x4e0] sm:$0xff] }
 0x1b3   : > { %v4263_v22 = vadd.f32 %v6677_v30, %v8910_v28  ;;  %v6680_v42 = vadd.f32 %v6679_v38, %v6678_v49  ;;  %v6743_v45 = vpop.f32.mrb[91].mxu1  ;;  %7331 = vmatprep.subr.bf16.mxu1 %v7713_v23  ;;  %v7717_v28 = vld [vmem:[%s9634_s1 + $0x7d8] sm:$0xff]   ;;  %v7723_v23 = vld [vmem:[%s9634_s1 + $0x768] sm:$0xff]   ;;  %v9212_v30 = vld [vmem:[%s7970_s24 + $0x460] sm:$0xff] }
 0x1b4   : > { %v6744_v34 = vadd.f32 %v6743_v45, %v6742_v10  ;;  %4997 = vmatmul.mubr.bf16.gmra.mrb[196].mxu0 %v5811_v29  ;;  %v9218_v49 = vld [vmem:[%s7970_s24 + $0x468] sm:$0xff]  ;;  %v7727_v38 = vld [vmem:[%s9634_s1 + $0x770] sm:$0xff]  }
 0x1b5   : > { %v9158_v56 = vadd.f32 %v6741_v7, %v4263_v22  ;;  %v4266_v25 = vadd.f32 %v6680_v42, %v8925_v31  ;;  %5094 = vmatmul.mubr.bf16.gmra.mrb[196].mxu1 %v5813_v27  ;;  %5004 = vmatprep.mubr.bf16.mxu0 %v5844_v59  ;;  %v7718_v31 = vld [vmem:[%s9634_s1 + $0x798] sm:$0xff]   ;;  %v7724_v27 = vld [vmem:[%s9634_s1 + $0x728] sm:$0xff]   ;;  %v5875_v22 = vcombine.low %v9162_v55, %v9165_v19  ;;  %v7729_v42 = vld [vmem:[%s9634_s1 + $0x7f0] sm:$0xff]  }
 0x1b6   : > { %5101 = vmatprep.mubr.bf16.mxu1 %v5846_v63  ;;  %7268 = vmatpush3.bf16.msra.mxu0 %v7712_v39  ;;  %v9226_v10 = vld [vmem:[%s7970_s24 + $0x4e8] sm:$0xff]  ;;  %v7728_v19 = vld [vmem:[%s9634_s1 + $0x730] sm:$0xff]  }
 0x1b7   : > { %v9173_v58 = vadd.f32 %v6744_v34, %v4266_v25  ;;  %v6681_v36 = vpop.f32.mrb[92].mxu0  ;;  %7332 = vmatpush3.bf16.msra.mxu1 %v7714_v15  ;;  %7269 = vmatprep.subr.bf16.mxu0 %v7715_v48  ;;  %v5877_v34 = vcombine.low %v9168_v17, %v9176_v61  ;;  %v5910_v55 = vcombine.high %v9218_v49, %v9226_v10  ;;  %v7730_v61 = vld [vmem:[%s9634_s1 + $0x7b0] sm:$0xff]  }
 0x1b8   : > { %v6745_v62 = vpop.f32.mrb[92].mxu1  ;;  %v6682_v24 = vpop.f32.mrb[93].mxu0  ;;  %7333 = vmatprep.subr.bf16.mxu1 %v7717_v28  ;;  %v5908_v28 = vcombine.high %v9212_v30, %v9215_v32 }
 0x1b9   : > { %v6683_v47 = vadd.f32 %v6682_v24, %v6681_v36  ;;  %v6746_v5 = vpop.f32.mrb[93].mxu1  ;;  %v6684_v8 = vpop.f32.mrb[94].mxu0 }
 0x1ba   : > { %v6747_v54 = vadd.f32 %v6746_v5, %v6745_v62  ;;  %v6748_v13 = vpop.f32.mrb[94].mxu1  ;;  %v6685_v14 = vpop.f32.mrb[95].mxu0  ;;  %7270 = vmatpush3.bf16.msra.mxu0 %v7716_v53  ;;  %v7731_v62 = vld [vmem:[%s9634_s1 + $0x778] sm:$0xff]   ;;  %v389_v5 = vld [vmem:[%s7970_s24 + $0x5e0] sm:$0xff] }
 0x1bb   : > { %v4271_v46 = vadd.f32 %v6683_v47, %v8960_v2  ;;  %v6686_v21 = vadd.f32 %v6685_v14, %v6684_v8  ;;  %v6749_v44 = vpop.f32.mrb[95].mxu1  ;;  %7334 = vmatpush3.bf16.msra.mxu1 %v7718_v31  ;;  %7271 = vmatprep.subr.bf16.mxu0 %v7719_v33  ;;  %v7725_v2 = vld [vmem:[%s9634_s1 + $0x7e8] sm:$0xff]   ;;  %v373_v47 = vld [vmem:[%s7970_s24 + $0x560] sm:$0xff]  ;;  %v7732_v8 = vld [vmem:[%s9634_s1 + $0x738] sm:$0xff]  }
 0x1bc   : > { %v6750_v26 = vadd.f32 %v6749_v44, %v6748_v13  ;;  %5005 = vmatmul.mubr.bf16.gmra.mrb[200].mxu0 %v5843_v0  ;;  %7335 = vmatprep.subr.bf16.mxu1 %v7721_v1  ;;  %v390_v13 = vld [vmem:[%s7970_s24 + $0x5e8] sm:$0xff] }
 0x1bd   : > { %v9208_v6 = vadd.f32 %v6747_v54, %v4271_v46  ;;  %v4274_v29 = vadd.f32 %v6686_v21, %v8975_v50  ;;  %5102 = vmatmul.mubr.bf16.gmra.mrb[200].mxu1 %v5845_v11  ;;  %5012 = vmatprep.mubr.bf16.mxu0 %v5876_v51  ;;  %v7726_v50 = vld [vmem:[%s9634_s1 + $0x7a8] sm:$0xff]  }
 0x1be   : > { %5109 = vmatprep.mubr.bf16.mxu1 %v5878_v16  ;;  %7272 = vmatpush3.bf16.msra.mxu0 %v7720_v18  ;;  %v374_v54 = vld [vmem:[%s7970_s24 + $0x568] sm:$0xff]  ;;  %v5907_v18 = vcombine.low %v9212_v30, %v9215_v32 }
 0x1bf   : > { %v9223_v59 = vadd.f32 %v6750_v26, %v4274_v29  ;;  %v6767_v7 = vpop.f32.mrb[96].mxu0  ;;  %7336 = vmatpush3.bf16.msra.mxu1 %v7722_v60  ;;  %7273 = vmatprep.subr.bf16.mxu0 %v7723_v23  ;;  %v5909_v60 = vcombine.low %v9218_v49, %v9226_v10  ;;  %v5940_v23 = vcombine.high %v373_v47, %v389_v5  ;;  %v405_v10 = vld [vmem:[%s7970_s24 + $0x660] sm:$0xff] }
 0x1c0   : > { %v6831_v63 = vpop.f32.mrb[96].mxu1  ;;  %v6768_v39 = vpop.f32.mrb[97].mxu0  ;;  %7337 = vmatprep.subr.bf16.mxu1 %v7725_v2 }
 0x1c1   : > { %v6769_v45 = vadd.f32 %v6768_v39, %v6767_v7  ;;  %v6832_v15 = vpop.f32.mrb[97].mxu1  ;;  %v6770_v48 = vpop.f32.mrb[98].mxu0 }
 0x1c2   : > { %v6833_v25 = vadd.f32 %v6832_v15, %v6831_v63  ;;  %v6834_v53 = vpop.f32.mrb[98].mxu1  ;;  %v6771_v36 = vpop.f32.mrb[99].mxu0  ;;  %7274 = vmatpush3.bf16.msra.mxu0 %v7724_v27  ;;  %v5942_v27 = vcombine.high %v374_v54, %v390_v13  ;;  %v421_v63 = vld [vmem:[%s7970_s24 + $0x6e0] sm:$0xff] }
 0x1c3   : > { %v4409_v31 = vadd.f32 %v6769_v45, %v9010_v40  ;;  %v6772_v33 = vadd.f32 %v6771_v36, %v6770_v48  ;;  %v6835_v17 = vpop.f32.mrb[99].mxu1  ;;  %7338 = vmatpush3.bf16.msra.mxu1 %v7726_v50  ;;  %7275 = vmatprep.subr.bf16.mxu0 %v7727_v38  ;;  %v7733_v40 = vld [vmem:[%s9634_s1 + $0x7f8] sm:$0xff]   ;;  %v5939_v48 = vcombine.low %v373_v47, %v389_v5  ;;  %v453_v47 = vld [vmem:[%s7970_s24 + $0x7e0] sm:$0xff] }
 0x1c4   : > { %v6836_v24 = vadd.f32 %v6835_v17, %v6834_v53  ;;  %5013 = vmatmul.mubr.bf16.gmra.mrb[204].mxu0 %v5875_v22  ;;  %7339 = vmatprep.subr.bf16.mxu1 %v7729_v42  ;;  %v406_v42 = vld [vmem:[%s7970_s24 + $0x668] sm:$0xff]  ;;  %v5941_v53 = vcombine.low %v374_v54, %v390_v13  ;;  %v5972_v36 = vcombine.high %v405_v10, %v421_v63 }
 0x1c5   : > { %v9258_v0 = vadd.f32 %v6833_v25, %v4409_v31  ;;  %v4412_v1 = vadd.f32 %v6772_v33, %v9023_v43  ;;  %5110 = vmatmul.mubr.bf16.gmra.mrb[204].mxu1 %v5877_v34  ;;  %5020 = vmatprep.mubr.bf16.mxu0 %v5908_v28  ;;  %v7734_v43 = vld [vmem:[%s9634_s1 + $0x7b8] sm:$0xff]   ;;  %v454_v54 = vld [vmem:[%s7970_s24 + $0x7e8] sm:$0xff] }
 0x1c6   : > { %5117 = vmatprep.mubr.bf16.mxu1 %v5910_v55  ;;  %7276 = vmatpush3.bf16.msra.mxu0 %v7728_v19 }
 0x1c7   : > { %v9266_v11 = vadd.f32 %v6836_v24, %v4412_v1  ;;  %v6773_v51 = vpop.f32.mrb[100].mxu0  ;;  %7340 = vmatpush3.bf16.msra.mxu1 %v7730_v61  ;;  %7277 = vmatprep.subr.bf16.mxu0 %v7731_v62  ;;  %v437_v1 = vld [vmem:[%s7970_s24 + $0x760] sm:$0xff] }
 0x1c8   : > { %v6837_v14 = vpop.f32.mrb[100].mxu1  ;;  %v6774_v16 = vpop.f32.mrb[101].mxu0  ;;  %7341 = vmatprep.subr.bf16.mxu1 %v7733_v40 }
 0x1c9   : > { %v6775_v46 = vadd.f32 %v6774_v16, %v6773_v51  ;;  %v6838_v21 = vpop.f32.mrb[101].mxu1  ;;  %v6776_v44 = vpop.f32.mrb[102].mxu0  ;;  %v438_v51 = vld [vmem:[%s7970_s24 + $0x768] sm:$0xff] }
 0x1ca   : > { %v6839_v26 = vadd.f32 %v6838_v21, %v6837_v14  ;;  %v6840_v2 = vpop.f32.mrb[102].mxu1  ;;  %v6777_v29 = vpop.f32.mrb[103].mxu0  ;;  %7278 = vmatpush3.bf16.msra.mxu0 %v7732_v8  ;;  %v6004_v21 = vcombine.high %v437_v1, %v453_v47 }
 0x1cb   : > { %v4417_v7 = vadd.f32 %v6775_v46, %v9042_v37  ;;  %v6778_v30 = vadd.f32 %v6777_v29, %v6776_v44  ;;  %v6841_v32 = vpop.f32.mrb[103].mxu1  ;;  %7342 = vmatpush3.bf16.msra.mxu1 %v7734_v43  ;;  %v422_v37 = vld [vmem:[%s7970_s24 + $0x6e8] sm:$0xff]  ;;  %v5971_v43 = vcombine.low %v405_v10, %v421_v63  ;;  %v216_v63 = vld [vmem:[%s7970_s24 + $0x78] sm:$0xff] }
 0x1cc   : > { %v6842_v50 = vadd.f32 %v6841_v32, %v6840_v2  ;;  %5021 = vmatmul.mubr.bf16.gmra.mrb[208].mxu0 %v5907_v18  ;;  %v5974_v31 = vcombine.high %v406_v42, %v422_v37  ;;  %v5973_v46 = vcombine.low %v406_v42, %v422_v37  ;;  %v215_v32 = vld [vmem:[%s7970_s24 + $0x70] sm:$0xff]  ;;  %v6003_v37 = vcombine.low %v437_v1, %v453_v47  ;;  %v248_v47 = vld [vmem:[%s7970_s24 + $0x178] sm:$0xff] }
 0x1cd   : > { %v9278_v38 = vadd.f32 %v6839_v26, %v4417_v7  ;;  %v4420_v49 = vadd.f32 %v6778_v30, %v9047_v20  ;;  %5118 = vmatmul.mubr.bf16.gmra.mrb[208].mxu1 %v5909_v60  ;;  %5028 = vmatprep.mubr.bf16.mxu0 %v5940_v23  ;;  %v6006_v23 = vcombine.high %v438_v51, %v454_v54 }
 0x1ce   : > { %5125 = vmatprep.mubr.bf16.mxu1 %v5942_v27 }
 0x1cf   : > { %v9283_v39 = vadd.f32 %v6842_v50, %v4420_v49  ;;  %v6779_v22 = vpop.f32.mrb[104].mxu0  ;;  %v231_v50 = vld [vmem:[%s7970_s24 + $0xf0] sm:$0xff] }
 0x1d0   : > { %v6843_v45 = vpop.f32.mrb[104].mxu1  ;;  %v6780_v15 = vpop.f32.mrb[105].mxu0 }
 0x1d1   : > { %v6781_v34 = vadd.f32 %v6780_v15, %v6779_v22  ;;  %v6844_v28 = vpop.f32.mrb[105].mxu1  ;;  %v6782_v25 = vpop.f32.mrb[106].mxu0  ;;  %v232_v22 = vld [vmem:[%s7970_s24 + $0xf8] sm:$0xff] }
 0x1d2   : > { %v6845_v20 = vadd.f32 %v6844_v28, %v6843_v45  ;;  %v6846_v55 = vpop.f32.mrb[106].mxu1  ;;  %v6783_v19 = vpop.f32.mrb[107].mxu0  ;;  %v5784_v28 = vcombine.high %v215_v32, %v231_v50 }
 0x1d3   : > { %v4425_v33 = vadd.f32 %v6781_v34, %v9054_v41  ;;  %v6784_v17 = vadd.f32 %v6783_v19, %v6782_v25  ;;  %v6847_v61 = vpop.f32.mrb[107].mxu1  ;;  %v6005_v34 = vcombine.low %v438_v51, %v454_v54  ;;  %v5783_v54 = vcombine.low %v215_v32, %v231_v50  ;;  %v280_v50 = vld [vmem:[%s7970_s24 + $0x278] sm:$0xff] }
 0x1d4   : > { %v6848_v62 = vadd.f32 %v6847_v61, %v6846_v55  ;;  %5029 = vmatmul.mubr.bf16.gmra.mrb[212].mxu0 %v5939_v48  ;;  %v247_v61 = vld [vmem:[%s7970_s24 + $0x170] sm:$0xff] }
 0x1d5   : > { %v9288_v24 = vadd.f32 %v6845_v20, %v4425_v33  ;;  %v4428_v40 = vadd.f32 %v6784_v17, %v9059_v52  ;;  %5126 = vmatmul.mubr.bf16.gmra.mrb[212].mxu1 %v5941_v53  ;;  %5036 = vmatprep.mubr.bf16.mxu0 %v5972_v36  ;;  %v5786_v36 = vcombine.high %v216_v63, %v232_v22 }
 0x1d6   : > { %5133 = vmatprep.mubr.bf16.mxu1 %v5974_v31 }
 0x1d7   : > { %v9293_v5 = vadd.f32 %v6848_v62, %v4428_v40  ;;  %v6785_v8 = vpop.f32.mrb[108].mxu0  ;;  %v263_v62 = vld [vmem:[%s7970_s24 + $0x1f0] sm:$0xff] }
 0x1d8   : > { %v6849_v13 = vpop.f32.mrb[108].mxu1  ;;  %v6786_v41 = vpop.f32.mrb[109].mxu0 }
 0x1d9   : > { %v6787_v14 = vadd.f32 %v6786_v41, %v6785_v8  ;;  %v6850_v16 = vpop.f32.mrb[109].mxu1  ;;  %v6788_v18 = vpop.f32.mrb[110].mxu0  ;;  %v264_v8 = vld [vmem:[%s7970_s24 + $0x1f8] sm:$0xff] }
 0x1da   : > { %v6851_v52 = vadd.f32 %v6850_v16, %v6849_v13  ;;  %v6852_v44 = vpop.f32.mrb[110].mxu1  ;;  %v6789_v60 = vpop.f32.mrb[111].mxu0  ;;  %v5816_v16 = vcombine.high %v247_v61, %v263_v62 }
 0x1db   : > { %v4433_v26 = vadd.f32 %v6787_v14, %v9064_v3  ;;  %v6790_v2 = vadd.f32 %v6789_v60, %v6788_v18  ;;  %v6853_v29 = vpop.f32.mrb[111].mxu1  ;;  %v5785_v14 = vcombine.low %v216_v63, %v232_v22  ;;  %v5815_v22 = vcombine.low %v247_v61, %v263_v62  ;;  %v312_v62 = vld [vmem:[%s7970_s24 + $0x378] sm:$0xff] }
 0x1dc   : > { %v6854_v27 = vadd.f32 %v6853_v29, %v6852_v44  ;;  %5037 = vmatmul.mubr.bf16.gmra.mrb[216].mxu0 %v5971_v43  ;;  %v279_v29 = vld [vmem:[%s7970_s24 + $0x270] sm:$0xff] }
 0x1dd   : > { %v9298_v7 = vadd.f32 %v6851_v52, %v4433_v26  ;;  %v4436_v30 = vadd.f32 %v6790_v2, %v9069_v9  ;;  %5134 = vmatmul.mubr.bf16.gmra.mrb[216].mxu1 %v5973_v46  ;;  %5044 = vmatprep.mubr.bf16.mxu0 %v6004_v21  ;;  %v5818_v21 = vcombine.high %v248_v47, %v264_v8 }
 0x1de   : > { %5141 = vmatprep.mubr.bf16.mxu1 %v6006_v23 }
 0x1df   : > { %v9303_v49 = vadd.f32 %v6854_v27, %v4436_v30  ;;  %v6791_v10 = vpop.f32.mrb[112].mxu0  ;;  %v295_v27 = vld [vmem:[%s7970_s24 + $0x2f0] sm:$0xff] }
 0x1e0   : > { %v6855_v42 = vpop.f32.mrb[112].mxu1  ;;  %v6792_v3 = vpop.f32.mrb[113].mxu0 }
 0x1e1   : > { %v6793_v45 = vadd.f32 %v6792_v3, %v6791_v10  ;;  %v6856_v15 = vpop.f32.mrb[113].mxu1  ;;  %v6794_v48 = vpop.f32.mrb[114].mxu0  ;;  %v296_v10 = vld [vmem:[%s7970_s24 + $0x2f8] sm:$0xff] }
 0x1e2   : > { %v6857_v9 = vadd.f32 %v6856_v15, %v6855_v42  ;;  %v6858_v25 = vpop.f32.mrb[114].mxu1  ;;  %v6795_v53 = vpop.f32.mrb[115].mxu0  ;;  %v5848_v15 = vcombine.high %v279_v29, %v295_v27 }
 0x1e3   : > { %v4441_v20 = vadd.f32 %v6793_v45, %v9074_v35  ;;  %v6796_v55 = vadd.f32 %v6795_v53, %v6794_v48  ;;  %v6859_v19 = vpop.f32.mrb[115].mxu1  ;;  %v5817_v45 = vcombine.low %v248_v47, %v264_v8  ;;  %v5847_v8 = vcombine.low %v279_v29, %v295_v27  ;;  %v344_v27 = vld [vmem:[%s7970_s24 + $0x478] sm:$0xff] }
 0x1e4   : > { %v6860_v31 = vadd.f32 %v6859_v19, %v6858_v25  ;;  %5045 = vmatmul.mubr.bf16.gmra.mrb[220].mxu0 %v6003_v37  ;;  %v311_v19 = vld [vmem:[%s7970_s24 + $0x370] sm:$0xff] }
 0x1e5   : > { %v9308_v33 = vadd.f32 %v6857_v9, %v4441_v20  ;;  %v4444_v17 = vadd.f32 %v6796_v55, %v9077_v12  ;;  %5142 = vmatmul.mubr.bf16.gmra.mrb[220].mxu1 %v6005_v34  ;;  %5182 = vmatprep.mubr.bf16.mxu0 %v5784_v28  ;;  %v5850_v28 = vcombine.high %v280_v50, %v296_v10 }
 0x1e6   : > { %5279 = vmatprep.mubr.bf16.mxu1 %v5786_v36 }
 0x1e7   : > { %v9313_v40 = vadd.f32 %v6860_v31, %v4444_v17  ;;  %v6797_v1 = vpop.f32.mrb[116].mxu0  ;;  %v327_v31 = vld [vmem:[%s7970_s24 + $0x3f0] sm:$0xff] }
 0x1e8   : > { %v6861_v51 = vpop.f32.mrb[116].mxu1  ;;  %v6798_v35 = vpop.f32.mrb[117].mxu0 }
 0x1e9   : > { %v6799_v13 = vadd.f32 %v6798_v35, %v6797_v1  ;;  %v6862_v41 = vpop.f32.mrb[117].mxu1  ;;  %v6800_v43 = vpop.f32.mrb[118].mxu0  ;;  %v328_v1 = vld [vmem:[%s7970_s24 + $0x3f8] sm:$0xff] }
 0x1ea   : > { %v6863_v12 = vadd.f32 %v6862_v41, %v6861_v51  ;;  %v6864_v18 = vpop.f32.mrb[118].mxu1  ;;  %v6801_v46 = vpop.f32.mrb[119].mxu0  ;;  %v5880_v41 = vcombine.high %v311_v19, %v327_v31 }
 0x1eb   : > { %v4449_v52 = vadd.f32 %v6799_v13, %v9108_v4  ;;  %v6802_v44 = vadd.f32 %v6801_v46, %v6800_v43  ;;  %v6865_v60 = vpop.f32.mrb[119].mxu1  ;;  %v5849_v13 = vcombine.low %v280_v50, %v296_v10  ;;  %v5879_v10 = vcombine.low %v311_v19, %v327_v31  ;;  %v376_v31 = vld [vmem:[%s7970_s24 + $0x578] sm:$0xff] }
 0x1ec   : > { %v6866_v23 = vadd.f32 %v6865_v60, %v6864_v18  ;;  %5183 = vmatmul.mubr.bf16.vlgmr.msra.gmra.mrb[224].mxu0 %v5783_v54  ;;  %v343_v60 = vld [vmem:[%s7970_s24 + $0x470] sm:$0xff] }
 0x1ed   : > { %v9318_v26 = vadd.f32 %v6863_v12, %v4449_v52  ;;  %v4452_v2 = vadd.f32 %v6802_v44, %v9126_v57  ;;  %5280 = vmatmul.mubr.bf16.vlgmr.msra.gmra.mrb[224].mxu1 %v5785_v14  ;;  %5190 = vmatprep.mubr.bf16.mxu0 %v5816_v16  ;;  %v5882_v16 = vcombine.high %v312_v62, %v328_v1 }
 0x1ee   : > { %5287 = vmatprep.mubr.bf16.mxu1 %v5818_v21 }
 0x1ef   : > { %v9323_v30 = vadd.f32 %v6866_v23, %v4452_v2  ;;  %v6803_v32 = vpop.f32.mrb[120].mxu0  ;;  %v359_v23 = vld [vmem:[%s7970_s24 + $0x4f0] sm:$0xff] }
 0x1f0   : > { %v6867_v63 = vpop.f32.mrb[120].mxu1  ;;  %v6804_v4 = vpop.f32.mrb[121].mxu0 }
 0x1f1   : > { %v6805_v42 = vadd.f32 %v6804_v4, %v6803_v32  ;;  %v6868_v3 = vpop.f32.mrb[121].mxu1  ;;  %v6806_v37 = vpop.f32.mrb[122].mxu0  ;;  %v360_v32 = vld [vmem:[%s7970_s24 + $0x4f8] sm:$0xff] }
 0x1f2   : > { %v6869_v57 = vadd.f32 %v6868_v3, %v6867_v63  ;;  %v6870_v48 = vpop.f32.mrb[122].mxu1  ;;  %v6807_v34 = vpop.f32.mrb[123].mxu0  ;;  %v5912_v3 = vcombine.high %v343_v60, %v359_v23 }
 0x1f3   : > { %v4457_v9 = vadd.f32 %v6805_v42, %v9158_v56  ;;  %v6808_v25 = vadd.f32 %v6807_v34, %v6806_v37  ;;  %v6871_v53 = vpop.f32.mrb[123].mxu1  ;;  %v5881_v42 = vcombine.low %v312_v62, %v328_v1  ;;  %v5911_v1 = vcombine.low %v343_v60, %v359_v23  ;;  %v408_v23 = vld [vmem:[%s7970_s24 + $0x678] sm:$0xff] }
 0x1f4   : > { %v6872_v36 = vadd.f32 %v6871_v53, %v6870_v48  ;;  %5191 = vmatmul.mubr.bf16.gmra.mrb[228].mxu0 %v5815_v22  ;;  %v375_v53 = vld [vmem:[%s7970_s24 + $0x570] sm:$0xff] }
 0x1f5   : > { %v9328_v20 = vadd.f32 %v6869_v57, %v4457_v9  ;;  %v4460_v55 = vadd.f32 %v6808_v25, %v9173_v58  ;;  %5288 = vmatmul.mubr.bf16.gmra.mrb[228].mxu1 %v5817_v45  ;;  %5198 = vmatprep.mubr.bf16.mxu0 %v5848_v15  ;;  %v5914_v15 = vcombine.high %v344_v27, %v360_v32 }
 0x1f6   : > { %5295 = vmatprep.mubr.bf16.mxu1 %v5850_v28 }
 0x1f7   : > { %v9333_v17 = vadd.f32 %v6872_v36, %v4460_v55  ;;  %v6809_v61 = vpop.f32.mrb[124].mxu0  ;;  %v391_v36 = vld [vmem:[%s7970_s24 + $0x5f0] sm:$0xff] }
 0x1f8   : > { %v6873_v47 = vpop.f32.mrb[124].mxu1  ;;  %v6810_v56 = vpop.f32.mrb[125].mxu0 }
 0x1f9   : > { %v6811_v51 = vadd.f32 %v6810_v56, %v6809_v61  ;;  %v6874_v35 = vpop.f32.mrb[125].mxu1  ;;  %v6812_v54 = vpop.f32.mrb[126].mxu0  ;;  %v392_v61 = vld [vmem:[%s7970_s24 + $0x5f8] sm:$0xff] }
 0x1fa   : > { %v6875_v58 = vadd.f32 %v6874_v35, %v6873_v47  ;;  %v6876_v43 = vpop.f32.mrb[126].mxu1  ;;  %v6813_v14 = vpop.f32.mrb[127].mxu0  ;;  %v5944_v35 = vcombine.high %v375_v53, %v391_v36 }
 0x1fb   : > { %v4465_v12 = vadd.f32 %v6811_v51, %v9208_v6  ;;  %v6814_v18 = vadd.f32 %v6813_v14, %v6812_v54  ;;  %v6877_v46 = vpop.f32.mrb[127].mxu1  ;;  %v5913_v51 = vcombine.low %v344_v27, %v360_v32  ;;  %v5943_v32 = vcombine.low %v375_v53, %v391_v36  ;;  %v440_v36 = vld [vmem:[%s7970_s24 + $0x778] sm:$0xff] }
 0x1fc   : > { %v6878_v21 = vadd.f32 %v6877_v46, %v6876_v43  ;;  %5199 = vmatmul.mubr.bf16.gmra.mrb[232].mxu0 %v5847_v8  ;;  %v407_v46 = vld [vmem:[%s7970_s24 + $0x670] sm:$0xff] }
 0x1fd   : > { %v9338_v52 = vadd.f32 %v6875_v58, %v4465_v12  ;;  %v4468_v44 = vadd.f32 %v6814_v18, %v9223_v59  ;;  %5296 = vmatmul.mubr.bf16.gmra.mrb[232].mxu1 %v5849_v13  ;;  %5206 = vmatprep.mubr.bf16.mxu0 %v5880_v41  ;;  %v5946_v41 = vcombine.high %v376_v31, %v392_v61 }
 0x1fe   : > { %5303 = vmatprep.mubr.bf16.mxu1 %v5882_v16 }
 0x1ff   : > { %v9343_v2 = vadd.f32 %v6878_v21, %v4468_v44  ;;  %v6895_v29 = vpop.f32.mrb[128].mxu0  ;;  %v423_v21 = vld [vmem:[%s7970_s24 + $0x6f0] sm:$0xff] }
 0x200   : > { %v6959_v50 = vpop.f32.mrb[128].mxu1  ;;  %v6896_v6 = vpop.f32.mrb[129].mxu0 }
 0x201   : > { %v6897_v63 = vadd.f32 %v6896_v6, %v6895_v29  ;;  %v6960_v4 = vpop.f32.mrb[129].mxu1  ;;  %v6898_v22 = vpop.f32.mrb[130].mxu0  ;;  %v424_v29 = vld [vmem:[%s7970_s24 + $0x6f8] sm:$0xff] }
 0x202   : > { %v6961_v59 = vadd.f32 %v6960_v4, %v6959_v50  ;;  %v6962_v37 = vpop.f32.mrb[130].mxu1  ;;  %v6899_v45 = vpop.f32.mrb[131].mxu0  ;;  %v5976_v4 = vcombine.high %v407_v46, %v423_v21 }
 0x203   : > { %v4603_v57 = vadd.f32 %v6897_v63, %v9258_v0  ;;  %v6900_v48 = vadd.f32 %v6899_v45, %v6898_v22  ;;  %v6963_v34 = vpop.f32.mrb[131].mxu1  ;;  %v5945_v63 = vcombine.low %v376_v31, %v392_v61  ;;  %v5975_v61 = vcombine.low %v407_v46, %v423_v21 }
 0x204   : > { %v6964_v28 = vadd.f32 %v6963_v34, %v6962_v37  ;;  %5207 = vmatmul.mubr.bf16.gmra.mrb[236].mxu0 %v5879_v10  ;;  %v439_v34 = vld [vmem:[%s7970_s24 + $0x770] sm:$0xff] }
 0x205   : > { %v9348_v9 = vadd.f32 %v6961_v59, %v4603_v57  ;;  %v4606_v25 = vadd.f32 %v6900_v48, %v9266_v11  ;;  %5304 = vmatmul.mubr.bf16.gmra.mrb[236].mxu1 %v5881_v42  ;;  %5214 = vmatprep.mubr.bf16.mxu0 %v5912_v3  ;;  %v5978_v3 = vcombine.high %v408_v23, %v424_v29 }
 0x206   : > { %5311 = vmatprep.mubr.bf16.mxu1 %v5914_v15 }
 0x207   : > { %v9353_v55 = vadd.f32 %v6964_v28, %v4606_v25  ;;  %v6901_v19 = vpop.f32.mrb[132].mxu0  ;;  %v455_v28 = vld [vmem:[%s7970_s24 + $0x7f0] sm:$0xff] }
 0x208   : > { %v6965_v62 = vpop.f32.mrb[132].mxu1  ;;  %v6902_v0 = vpop.f32.mrb[133].mxu0  ;;  %v6007_v21 = vcombine.low %v439_v34, %v455_v28 }
 0x209   : > { %v6903_v47 = vadd.f32 %v6902_v0, %v6901_v19  ;;  %v6966_v56 = vpop.f32.mrb[133].mxu1  ;;  %v6904_v8 = vpop.f32.mrb[134].mxu0  ;;  %v456_v19 = vld [vmem:[%s7970_s24 + $0x7f8] sm:$0xff]  ;;  %s175_s24 = sand.u32 1, %s7781_s12  }
 0x20a   : > { %v6967_v11 = vadd.f32 %v6966_v56, %v6965_v62  ;;  %v6968_v54 = vpop.f32.mrb[134].mxu1  ;;  %v6905_v13 = vpop.f32.mrb[135].mxu0  ;;  %v6008_v56 = vcombine.high %v439_v34, %v455_v28  ;;  %s5750_s22 = sshll.u32 %s175_s24, 6 }
 0x20b   : > { %v4611_v58 = vadd.f32 %v6903_v47, %v9278_v38  ;;  %v6906_v43 = vadd.f32 %v6905_v13, %v6904_v8  ;;  %v6969_v14 = vpop.f32.mrb[135].mxu1  ;;  %v5977_v47 = vcombine.low %v408_v23, %v424_v29  ;;  %v6009_v29 = vcombine.low %v440_v36, %v456_v19  ;;  %s9508_s12 = scalar_lea.vmem [#allocation2], %s5750_s22  }
 0x20c   : > { %v6970_v16 = vadd.f32 %v6969_v14, %v6968_v54  ;;  %5215 = vmatmul.mubr.bf16.gmra.mrb[240].mxu0 %v5911_v1 }
 0x20d   : > { %v9358_v12 = vadd.f32 %v6967_v11, %v4611_v58  ;;  %v4614_v18 = vadd.f32 %v6906_v43, %v9283_v39  ;;  %5312 = vmatmul.mubr.bf16.gmra.mrb[240].mxu1 %v5913_v51  ;;  %5222 = vmatprep.mubr.bf16.mxu0 %v5944_v35  ;;  %v6010_v35 = vcombine.high %v440_v36, %v456_v19 }
 0x20e   : > { %5319 = vmatprep.mubr.bf16.mxu1 %v5946_v41 }
 0x20f   : > { %v9363_v44 = vadd.f32 %v6970_v16, %v4614_v18  ;;  %v6907_v60 = vpop.f32.mrb[136].mxu0 }
 0x210   : > { %v6971_v27 = vpop.f32.mrb[136].mxu1  ;;  %v6908_v38 = vpop.f32.mrb[137].mxu0 }
 0x211   : > { %v6909_v50 = vadd.f32 %v6908_v38, %v6907_v60  ;;  %v6972_v6 = vpop.f32.mrb[137].mxu1  ;;  %v6910_v10 = vpop.f32.mrb[138].mxu0 }
 0x212   : > { %v6973_v39 = vadd.f32 %v6972_v6, %v6971_v27  ;;  %v6974_v22 = vpop.f32.mrb[138].mxu1  ;;  %v6911_v42 = vpop.f32.mrb[139].mxu0 }
 0x213   : > { %v4619_v59 = vadd.f32 %v6909_v50, %v9288_v24  ;;  %v6912_v37 = vadd.f32 %v6911_v42, %v6910_v10  ;;  %v6975_v45 = vpop.f32.mrb[139].mxu1 }
 0x214   : > { %v6976_v15 = vadd.f32 %v6975_v45, %v6974_v22  ;;  %5223 = vmatmul.mubr.bf16.gmra.mrb[244].mxu0 %v5943_v32 }
 0x215   : > { %v9368_v57 = vadd.f32 %v6973_v39, %v4619_v59  ;;  %v4622_v48 = vadd.f32 %v6912_v37, %v9293_v5  ;;  %5320 = vmatmul.mubr.bf16.gmra.mrb[244].mxu1 %v5945_v63  ;;  %5230 = vmatprep.mubr.bf16.mxu0 %v5976_v4 }
 0x216   : > { %5327 = vmatprep.mubr.bf16.mxu1 %v5978_v3 }
 0x217   : > { %v9373_v25 = vadd.f32 %v6976_v15, %v4622_v48  ;;  %v6913_v53 = vpop.f32.mrb[140].mxu0 }
 0x218   : > { %v6977_v31 = vpop.f32.mrb[140].mxu1  ;;  %v6914_v24 = vpop.f32.mrb[141].mxu0 }
 0x219   : > { %v6915_v62 = vadd.f32 %v6914_v24, %v6913_v53  ;;  %v6978_v0 = vpop.f32.mrb[141].mxu1  ;;  %v6916_v1 = vpop.f32.mrb[142].mxu0 }
 0x21a   : > { %v6979_v8 = vadd.f32 %v6978_v0, %v6977_v31  ;;  %v6980_v5 = vpop.f32.mrb[142].mxu1  ;;  %v6917_v51 = vpop.f32.mrb[143].mxu0 }
 0x21b   : > { %v4627_v11 = vadd.f32 %v6915_v62, %v9298_v7  ;;  %v6918_v54 = vadd.f32 %v6917_v51, %v6916_v1  ;;  %v6981_v13 = vpop.f32.mrb[143].mxu1 }
 0x21c   : > { %v6982_v41 = vadd.f32 %v6981_v13, %v6980_v5  ;;  %5231 = vmatmul.mubr.bf16.gmra.mrb[248].mxu0 %v5975_v61 }
 0x21d   : > { %v9378_v58 = vadd.f32 %v6979_v8, %v4627_v11  ;;  %v4630_v43 = vadd.f32 %v6918_v54, %v9303_v49  ;;  %5328 = vmatmul.mubr.bf16.gmra.mrb[248].mxu1 %v5977_v47  ;;  %5238 = vmatprep.mubr.bf16.mxu0 %v6008_v56 }
 0x21e   : > { %5335 = vmatprep.mubr.bf16.mxu1 %v6010_v35 }
 0x21f   : > { %v9381_v14 = vadd.f32 %v6982_v41, %v4630_v43  ;;  %v6919_v16 = vpop.f32.mrb[144].mxu0 }
 0x220   : > { %v6983_v18 = vpop.f32.mrb[144].mxu1  ;;  %v6920_v46 = vpop.f32.mrb[145].mxu0 }
 0x221   : > { %v6921_v60 = vadd.f32 %v6920_v46, %v6919_v16  ;;  %v6984_v23 = vpop.f32.mrb[145].mxu1  ;;  %v6922_v7 = vpop.f32.mrb[146].mxu0 }
 0x222   : > { %v6985_v27 = vadd.f32 %v6984_v23, %v6983_v18  ;;  %v6986_v38 = vpop.f32.mrb[146].mxu1  ;;  %v6923_v32 = vpop.f32.mrb[147].mxu0 }
 0x223   : > { %v4635_v50 = vadd.f32 %v6921_v60, %v9308_v33  ;;  %v6924_v6 = vadd.f32 %v6923_v32, %v6922_v7  ;;  %v6987_v49 = vpop.f32.mrb[147].mxu1 }
 0x224   : > { %v6988_v10 = vadd.f32 %v6987_v49, %v6986_v38  ;;  %5239 = vmatmul.mubr.bf16.gmra.mrb[252].mxu0 %v6007_v21 }
 0x225   : > { %v9384_v63 = vadd.f32 %v6985_v27, %v4635_v50  ;;  %v4638_v4 = vadd.f32 %v6924_v6, %v9313_v40  ;;  %5336 = vmatmul.mubr.bf16.gmra.mrb[252].mxu1 %v6009_v29 }
 0x227   : > { %v9387_v39 = vadd.f32 %v6988_v10, %v4638_v4  ;;  %v6925_v22 = vpop.f32.mrb[148].mxu0 }
 0x228   : > { %v6989_v42 = vpop.f32.mrb[148].mxu1  ;;  %v6926_v3 = vpop.f32.mrb[149].mxu0 }
 0x229   : > { %v6927_v59 = vadd.f32 %v6926_v3, %v6925_v22  ;;  %v6990_v37 = vpop.f32.mrb[149].mxu1  ;;  %v6928_v45 = vpop.f32.mrb[150].mxu0 }
 0x22a   : > { %v6991_v15 = vadd.f32 %v6990_v37, %v6989_v42  ;;  %v6992_v48 = vpop.f32.mrb[150].mxu1  ;;  %v6929_v33 = vpop.f32.mrb[151].mxu0 }
 0x22b   : > { %v4643_v34 = vadd.f32 %v6927_v59, %v9318_v26  ;;  %v6930_v28 = vadd.f32 %v6929_v33, %v6928_v45  ;;  %v6993_v53 = vpop.f32.mrb[151].mxu1 }
 0x22c   : > { %v6994_v36 = vadd.f32 %v6993_v53, %v6992_v48 }
 0x22d   : > { %v9390_v19 = vadd.f32 %v6991_v15, %v4643_v34  ;;  %v4646_v40 = vadd.f32 %v6930_v28, %v9323_v30 }
 0x22f   : > { %v9393_v31 = vadd.f32 %v6994_v36, %v4646_v40  ;;  %v6931_v24 = vpop.f32.mrb[152].mxu0 }
 0x230   : > { %v6995_v61 = vpop.f32.mrb[152].mxu1  ;;  %v6932_v62 = vpop.f32.mrb[153].mxu0 }
 0x231   : > { %v6933_v0 = vadd.f32 %v6932_v62, %v6931_v24  ;;  %v6996_v1 = vpop.f32.mrb[153].mxu1  ;;  %v6934_v47 = vpop.f32.mrb[154].mxu0 }
 0x232   : > { %v6997_v56 = vadd.f32 %v6996_v1, %v6995_v61  ;;  %v6998_v8 = vpop.f32.mrb[154].mxu1  ;;  %v6935_v5 = vpop.f32.mrb[155].mxu0 }
 0x233   : > { %v4651_v26 = vadd.f32 %v6933_v0, %v9328_v20  ;;  %v6936_v51 = vadd.f32 %v6935_v5, %v6934_v47  ;;  %v6999_v35 = vpop.f32.mrb[155].mxu1 }
 0x234   : > { %v7000_v11 = vadd.f32 %v6999_v35, %v6998_v8 }
 0x235   : > { %v9396_v54 = vadd.f32 %v6997_v56, %v4651_v26  ;;  %v4654_v30 = vadd.f32 %v6936_v51, %v9333_v17 }
 0x237   : > { %v9399_v13 = vadd.f32 %v7000_v11, %v4654_v30  ;;  %v6937_v41 = vpop.f32.mrb[156].mxu0 }
 0x238   : > { %v7001_v43 = vpop.f32.mrb[156].mxu1  ;;  %v6938_v16 = vpop.f32.mrb[157].mxu0 }
 0x239   : > { %v6939_v18 = vadd.f32 %v6938_v16, %v6937_v41  ;;  %v7002_v46 = vpop.f32.mrb[157].mxu1  ;;  %v6940_v21 = vpop.f32.mrb[158].mxu0 }
 0x23a   : > { %v7003_v60 = vadd.f32 %v7002_v46, %v7001_v43  ;;  %v7004_v23 = vpop.f32.mrb[158].mxu1  ;;  %v6941_v7 = vpop.f32.mrb[159].mxu0 }
 0x23b   : > { %v4659_v20 = vadd.f32 %v6939_v18, %v9338_v52  ;;  %v6942_v29 = vadd.f32 %v6941_v7, %v6940_v21  ;;  %v7005_v27 = vpop.f32.mrb[159].mxu1 }
 0x23c   : > { %v7006_v38 = vadd.f32 %v7005_v27, %v7004_v23 }
 0x23d   : > { %v9402_v32 = vadd.f32 %v7003_v60, %v4659_v20  ;;  %v4662_v17 = vadd.f32 %v6942_v29, %v9343_v2 }
 0x23f   : > { %v9405_v50 = vadd.f32 %v7006_v38, %v4662_v17  ;;  %v7023_v6 = vpop.f32.mrb[160].mxu0 }
 0x240   : > { %v7087_v49 = vpop.f32.mrb[160].mxu1  ;;  %v7024_v10 = vpop.f32.mrb[161].mxu0 }
 0x241   : > { %v7025_v4 = vadd.f32 %v7024_v10, %v7023_v6  ;;  %v7088_v22 = vpop.f32.mrb[161].mxu1  ;;  %v7026_v42 = vpop.f32.mrb[162].mxu0 }
 0x242   : > { %v7089_v3 = vadd.f32 %v7088_v22, %v7087_v49  ;;  %v7090_v59 = vpop.f32.mrb[162].mxu1  ;;  %v7027_v37 = vpop.f32.mrb[163].mxu0 }
 0x243   : > { %v4797_v52 = vadd.f32 %v7025_v4, %v9348_v9  ;;  %v7028_v45 = vadd.f32 %v7027_v37, %v7026_v42  ;;  %v7091_v15 = vpop.f32.mrb[163].mxu1 }
 0x244   : > { %v7092_v48 = vadd.f32 %v7091_v15, %v7090_v59 }
 0x245   : > { %v9408_v33 = vadd.f32 %v7089_v3, %v4797_v52  ;;  %v4800_v2 = vadd.f32 %v7028_v45, %v9353_v55 }
 0x247   : > { %v9411_v34 = vadd.f32 %v7092_v48, %v4800_v2  ;;  %v7029_v28 = vpop.f32.mrb[164].mxu0 }
 0x248   : > { %v7093_v53 = vpop.f32.mrb[164].mxu1  ;;  %v7030_v36 = vpop.f32.mrb[165].mxu0 }
 0x249   : > { %v7031_v40 = vadd.f32 %v7030_v36, %v7029_v28  ;;  %v7094_v24 = vpop.f32.mrb[165].mxu1  ;;  %v7032_v61 = vpop.f32.mrb[166].mxu0 }
 0x24a   : > { %v7095_v62 = vadd.f32 %v7094_v24, %v7093_v53  ;;  %v7096_v0 = vpop.f32.mrb[166].mxu1  ;;  %v7033_v1 = vpop.f32.mrb[167].mxu0 }
 0x24b   : > { %v4805_v9 = vadd.f32 %v7031_v40, %v9358_v12  ;;  %v7034_v47 = vadd.f32 %v7033_v1, %v7032_v61  ;;  %v7097_v56 = vpop.f32.mrb[167].mxu1 }
 0x24c   : > { %v7098_v8 = vadd.f32 %v7097_v56, %v7096_v0 }
 0x24d   : > { %v9414_v5 = vadd.f32 %v7095_v62, %v4805_v9  ;;  %v4808_v55 = vadd.f32 %v7034_v47, %v9363_v44 }
 0x24f   : > { %v9417_v26 = vadd.f32 %v7098_v8, %v4808_v55  ;;  %v7035_v51 = vpop.f32.mrb[168].mxu0 }
 0x250   : > { %v7099_v35 = vpop.f32.mrb[168].mxu1  ;;  %v7036_v11 = vpop.f32.mrb[169].mxu0 }
 0x251   : > { %v7037_v30 = vadd.f32 %v7036_v11, %v7035_v51  ;;  %v7100_v41 = vpop.f32.mrb[169].mxu1  ;;  %v7038_v43 = vpop.f32.mrb[170].mxu0 }
 0x252   : > { %v7101_v16 = vadd.f32 %v7100_v41, %v7099_v35  ;;  %v7102_v18 = vpop.f32.mrb[170].mxu1  ;;  %v7039_v46 = vpop.f32.mrb[171].mxu0 }
 0x253   : > { %v4813_v12 = vadd.f32 %v7037_v30, %v9368_v57  ;;  %v7040_v21 = vadd.f32 %v7039_v46, %v7038_v43  ;;  %v7103_v60 = vpop.f32.mrb[171].mxu1 }
 0x254   : > { %v7104_v23 = vadd.f32 %v7103_v60, %v7102_v18 }
 0x255   : > { %v9420_v7 = vadd.f32 %v7101_v16, %v4813_v12  ;;  %v4816_v44 = vadd.f32 %v7040_v21, %v9373_v25 }
 0x257   : > { %v9423_v20 = vadd.f32 %v7104_v23, %v4816_v44  ;;  %v7041_v29 = vpop.f32.mrb[172].mxu0 }
 0x258   : > { %v7105_v27 = vpop.f32.mrb[172].mxu1  ;;  %v7042_v38 = vpop.f32.mrb[173].mxu0 }
 0x259   : > { %v7043_v17 = vadd.f32 %v7042_v38, %v7041_v29  ;;  %v7106_v6 = vpop.f32.mrb[173].mxu1  ;;  %v7044_v49 = vpop.f32.mrb[174].mxu0 }
 0x25a   : > { %v7107_v10 = vadd.f32 %v7106_v6, %v7105_v27  ;;  %v7108_v4 = vpop.f32.mrb[174].mxu1  ;;  %v7045_v22 = vpop.f32.mrb[175].mxu0 }
 0x25b   : > { %v4821_v57 = vadd.f32 %v7043_v17, %v9378_v58  ;;  %v7046_v42 = vadd.f32 %v7045_v22, %v7044_v49  ;;  %v7109_v3 = vpop.f32.mrb[175].mxu1 }
 0x25c   : > { %v7110_v59 = vadd.f32 %v7109_v3, %v7108_v4 }
 0x25d   : > { %v9426_v37 = vadd.f32 %v7107_v10, %v4821_v57  ;;  %v4824_v25 = vadd.f32 %v7046_v42, %v9381_v14 }
 0x25f   : > { %v9429_v52 = vadd.f32 %v7110_v59, %v4824_v25  ;;  %v7047_v45 = vpop.f32.mrb[176].mxu0 }
 0x260   : > { %v7111_v15 = vpop.f32.mrb[176].mxu1  ;;  %v7048_v48 = vpop.f32.mrb[177].mxu0 }
 0x261   : > { %v7049_v2 = vadd.f32 %v7048_v48, %v7047_v45  ;;  %v7112_v28 = vpop.f32.mrb[177].mxu1  ;;  %v7050_v53 = vpop.f32.mrb[178].mxu0 }
 0x262   : > { %v7113_v36 = vadd.f32 %v7112_v28, %v7111_v15  ;;  %v7114_v40 = vpop.f32.mrb[178].mxu1  ;;  %v7051_v24 = vpop.f32.mrb[179].mxu0 }
 0x263   : > { %v4829_v58 = vadd.f32 %v7049_v2, %v9384_v63  ;;  %v7052_v61 = vadd.f32 %v7051_v24, %v7050_v53  ;;  %v7115_v62 = vpop.f32.mrb[179].mxu1 }
 0x264   : > { %v7116_v0 = vadd.f32 %v7115_v62, %v7114_v40 }
 0x265   : > { %v9432_v1 = vadd.f32 %v7113_v36, %v4829_v58  ;;  %v4832_v14 = vadd.f32 %v7052_v61, %v9387_v39 }
 0x267   : > { %v9435_v9 = vadd.f32 %v7116_v0, %v4832_v14  ;;  %v7053_v47 = vpop.f32.mrb[180].mxu0 }
 0x268   : > { %v7117_v56 = vpop.f32.mrb[180].mxu1  ;;  %v7054_v8 = vpop.f32.mrb[181].mxu0 }
 0x269   : > { %v7055_v55 = vadd.f32 %v7054_v8, %v7053_v47  ;;  %v7118_v51 = vpop.f32.mrb[181].mxu1  ;;  %v7056_v35 = vpop.f32.mrb[182].mxu0 }
 0x26a   : > { %v7119_v11 = vadd.f32 %v7118_v51, %v7117_v56  ;;  %v7120_v30 = vpop.f32.mrb[182].mxu1  ;;  %v7057_v41 = vpop.f32.mrb[183].mxu0 }
 0x26b   : > { %v4837_v63 = vadd.f32 %v7055_v55, %v9390_v19  ;;  %v7058_v43 = vadd.f32 %v7057_v41, %v7056_v35  ;;  %v7121_v16 = vpop.f32.mrb[183].mxu1 }
 0x26c   : > { %v7122_v18 = vadd.f32 %v7121_v16, %v7120_v30 }
 0x26d   : > { %v9438_v46 = vadd.f32 %v7119_v11, %v4837_v63  ;;  %v4840_v39 = vadd.f32 %v7058_v43, %v9393_v31 }
 0x26f   : > { %v9441_v12 = vadd.f32 %v7122_v18, %v4840_v39  ;;  %v7059_v21 = vpop.f32.mrb[184].mxu0 }
 0x270   : > { %v7123_v60 = vpop.f32.mrb[184].mxu1  ;;  %v7060_v23 = vpop.f32.mrb[185].mxu0 }
 0x271   : > { %v7061_v44 = vadd.f32 %v7060_v23, %v7059_v21  ;;  %v7124_v29 = vpop.f32.mrb[185].mxu1  ;;  %v7062_v27 = vpop.f32.mrb[186].mxu0 }
 0x272   : > { %v7125_v38 = vadd.f32 %v7124_v29, %v7123_v60  ;;  %v7126_v17 = vpop.f32.mrb[186].mxu1  ;;  %v7063_v6 = vpop.f32.mrb[187].mxu0 }
 0x273   : > { %v4845_v19 = vadd.f32 %v7061_v44, %v9396_v54  ;;  %v7064_v49 = vadd.f32 %v7063_v6, %v7062_v27  ;;  %v7127_v10 = vpop.f32.mrb[187].mxu1 }
 0x274   : > { %v7128_v4 = vadd.f32 %v7127_v10, %v7126_v17 }
 0x275   : > { %v9444_v22 = vadd.f32 %v7125_v38, %v4845_v19  ;;  %v4848_v31 = vadd.f32 %v7064_v49, %v9399_v13 }
 0x277   : > { %v9447_v57 = vadd.f32 %v7128_v4, %v4848_v31  ;;  %v7065_v42 = vpop.f32.mrb[188].mxu0 }
 0x278   : > { %v7129_v3 = vpop.f32.mrb[188].mxu1  ;;  %v7066_v59 = vpop.f32.mrb[189].mxu0 }
 0x279   : > { %v7067_v25 = vadd.f32 %v7066_v59, %v7065_v42  ;;  %v7130_v45 = vpop.f32.mrb[189].mxu1  ;;  %v7068_v15 = vpop.f32.mrb[190].mxu0 }
 0x27a   : > { %v7131_v48 = vadd.f32 %v7130_v45, %v7129_v3  ;;  %v7132_v2 = vpop.f32.mrb[190].mxu1  ;;  %v7069_v28 = vpop.f32.mrb[191].mxu0 }
 0x27b   : > { %v4853_v54 = vadd.f32 %v7067_v25, %v9402_v32  ;;  %v7070_v53 = vadd.f32 %v7069_v28, %v7068_v15  ;;  %v7133_v36 = vpop.f32.mrb[191].mxu1 }
 0x27c   : > { %v7134_v40 = vadd.f32 %v7133_v36, %v7132_v2 }
 0x27d   : > { %v9450_v24 = vadd.f32 %v7131_v48, %v4853_v54  ;;  %v4856_v13 = vadd.f32 %v7070_v53, %v9405_v50 }
 0x27f   : > { %v9453_v58 = vadd.f32 %v7134_v40, %v4856_v13  ;;  %v7151_v61 = vpop.f32.mrb[192].mxu0 }
 0x280   : > { %v7215_v62 = vpop.f32.mrb[192].mxu1  ;;  %v7152_v0 = vpop.f32.mrb[193].mxu0 }
 0x281   : > { %v7153_v14 = vadd.f32 %v7152_v0, %v7151_v61  ;;  %v7216_v47 = vpop.f32.mrb[193].mxu1  ;;  %v7154_v56 = vpop.f32.mrb[194].mxu0 }
 0x282   : > { %v7217_v8 = vadd.f32 %v7216_v47, %v7215_v62  ;;  %v7218_v55 = vpop.f32.mrb[194].mxu1  ;;  %v7155_v51 = vpop.f32.mrb[195].mxu0 }
 0x283   : > { %v4991_v32 = vadd.f32 %v7153_v14, %v9408_v33  ;;  %v7156_v35 = vadd.f32 %v7155_v51, %v7154_v56  ;;  %v7219_v11 = vpop.f32.mrb[195].mxu1 }
 0x284   : > { %v7220_v30 = vadd.f32 %v7219_v11, %v7218_v55 }
 0x285   : > { %v9456_v41 = vadd.f32 %v7217_v8, %v4991_v32  ;;  %v4994_v50 = vadd.f32 %v7156_v35, %v9411_v34 }
 0x287   : > { %v9459_v63 = vadd.f32 %v7220_v30, %v4994_v50  ;;  %v7157_v43 = vpop.f32.mrb[196].mxu0 }
 0x288   : > { %v7221_v16 = vpop.f32.mrb[196].mxu1  ;;  %v7158_v18 = vpop.f32.mrb[197].mxu0 }
 0x289   : > { %v7159_v39 = vadd.f32 %v7158_v18, %v7157_v43  ;;  %v7222_v21 = vpop.f32.mrb[197].mxu1  ;;  %v7160_v60 = vpop.f32.mrb[198].mxu0 }
 0x28a   : > { %v7223_v23 = vadd.f32 %v7222_v21, %v7221_v16  ;;  %v7224_v44 = vpop.f32.mrb[198].mxu1  ;;  %v7161_v29 = vpop.f32.mrb[199].mxu0 }
 0x28b   : > { %v4999_v33 = vadd.f32 %v7159_v39, %v9414_v5  ;;  %v7162_v27 = vadd.f32 %v7161_v29, %v7160_v60  ;;  %v7225_v38 = vpop.f32.mrb[199].mxu1 }
 0x28c   : > { %v7226_v17 = vadd.f32 %v7225_v38, %v7224_v44 }
 0x28d   : > { %v9462_v6 = vadd.f32 %v7223_v23, %v4999_v33  ;;  %v5002_v34 = vadd.f32 %v7162_v27, %v9417_v26 }
 0x28f   : > { %v9465_v19 = vadd.f32 %v7226_v17, %v5002_v34  ;;  %v7163_v49 = vpop.f32.mrb[200].mxu0 }
 0x290   : > { %v7227_v10 = vpop.f32.mrb[200].mxu1  ;;  %v7164_v4 = vpop.f32.mrb[201].mxu0 }
 0x291   : > { %v7165_v31 = vadd.f32 %v7164_v4, %v7163_v49  ;;  %v7228_v42 = vpop.f32.mrb[201].mxu1  ;;  %v7166_v3 = vpop.f32.mrb[202].mxu0 }
 0x292   : > { %v7229_v59 = vadd.f32 %v7228_v42, %v7227_v10  ;;  %v7230_v25 = vpop.f32.mrb[202].mxu1  ;;  %v7167_v45 = vpop.f32.mrb[203].mxu0 }
 0x293   : > { %v5007_v5 = vadd.f32 %v7165_v31, %v9420_v7  ;;  %v7168_v15 = vadd.f32 %v7167_v45, %v7166_v3  ;;  %v7231_v48 = vpop.f32.mrb[203].mxu1 }
 0x294   : > { %v7232_v2 = vadd.f32 %v7231_v48, %v7230_v25 }
 0x295   : > { %v9468_v28 = vadd.f32 %v7229_v59, %v5007_v5  ;;  %v5010_v26 = vadd.f32 %v7168_v15, %v9423_v20 }
 0x297   : > { %v9471_v54 = vadd.f32 %v7232_v2, %v5010_v26  ;;  %v7169_v53 = vpop.f32.mrb[204].mxu0 }
 0x298   : > { %v7233_v36 = vpop.f32.mrb[204].mxu1  ;;  %v7170_v40 = vpop.f32.mrb[205].mxu0 }
 0x299   : > { %v7171_v13 = vadd.f32 %v7170_v40, %v7169_v53  ;;  %v7234_v61 = vpop.f32.mrb[205].mxu1  ;;  %v7172_v62 = vpop.f32.mrb[206].mxu0 }
 0x29a   : > { %v7235_v0 = vadd.f32 %v7234_v61, %v7233_v36  ;;  %v7236_v14 = vpop.f32.mrb[206].mxu1  ;;  %v7173_v47 = vpop.f32.mrb[207].mxu0 }
 0x29b   : > { %v5015_v7 = vadd.f32 %v7171_v13, %v9426_v37  ;;  %v7174_v56 = vadd.f32 %v7173_v47, %v7172_v62  ;;  %v7237_v8 = vpop.f32.mrb[207].mxu1 }
 0x29c   : > { %v7238_v55 = vadd.f32 %v7237_v8, %v7236_v14 }
 0x29d   : > { %v9474_v51 = vadd.f32 %v7235_v0, %v5015_v7  ;;  %v5018_v20 = vadd.f32 %v7174_v56, %v9429_v52 }
 0x29f   : > { %v9477_v32 = vadd.f32 %v7238_v55, %v5018_v20  ;;  %v7175_v35 = vpop.f32.mrb[208].mxu0 }
 0x2a0   : > { %v7239_v11 = vpop.f32.mrb[208].mxu1  ;;  %v7176_v30 = vpop.f32.mrb[209].mxu0 }
 0x2a1   : > { %v7177_v50 = vadd.f32 %v7176_v30, %v7175_v35  ;;  %v7240_v43 = vpop.f32.mrb[209].mxu1  ;;  %v7178_v16 = vpop.f32.mrb[210].mxu0 }
 0x2a2   : > { %v7241_v18 = vadd.f32 %v7240_v43, %v7239_v11  ;;  %v7242_v39 = vpop.f32.mrb[210].mxu1  ;;  %v7179_v21 = vpop.f32.mrb[211].mxu0 }
 0x2a3   : > { %v5023_v37 = vadd.f32 %v7177_v50, %v9432_v1  ;;  %v7180_v60 = vadd.f32 %v7179_v21, %v7178_v16  ;;  %v7243_v23 = vpop.f32.mrb[211].mxu1 }
 0x2a4   : > { %v7244_v44 = vadd.f32 %v7243_v23, %v7242_v39 }
 0x2a5   : > { %v9480_v29 = vadd.f32 %v7241_v18, %v5023_v37  ;;  %v5026_v52 = vadd.f32 %v7180_v60, %v9435_v9 }
 0x2a7   : > { %v9483_v33 = vadd.f32 %v7244_v44, %v5026_v52  ;;  %v7181_v27 = vpop.f32.mrb[212].mxu0 }
 0x2a8   : > { %v7245_v38 = vpop.f32.mrb[212].mxu1  ;;  %v7182_v17 = vpop.f32.mrb[213].mxu0 }
 0x2a9   : > { %v7183_v34 = vadd.f32 %v7182_v17, %v7181_v27  ;;  %v7246_v49 = vpop.f32.mrb[213].mxu1  ;;  %v7184_v10 = vpop.f32.mrb[214].mxu0 }
 0x2aa   : > { %v7247_v4 = vadd.f32 %v7246_v49, %v7245_v38  ;;  %v7248_v31 = vpop.f32.mrb[214].mxu1  ;;  %v7185_v42 = vpop.f32.mrb[215].mxu0 }
 0x2ab   : > { %v5031_v1 = vadd.f32 %v7183_v34, %v9438_v46  ;;  %v7186_v3 = vadd.f32 %v7185_v42, %v7184_v10  ;;  %v7249_v59 = vpop.f32.mrb[215].mxu1 }
 0x2ac   : > { %v7250_v25 = vadd.f32 %v7249_v59, %v7248_v31 }
 0x2ad   : > { %v9486_v45 = vadd.f32 %v7247_v4, %v5031_v1  ;;  %v5034_v9 = vadd.f32 %v7186_v3, %v9441_v12 }
 0x2af   : > { %v9489_v5 = vadd.f32 %v7250_v25, %v5034_v9  ;;  %v7187_v15 = vpop.f32.mrb[216].mxu0 }
 0x2b0   : > { %v7251_v48 = vpop.f32.mrb[216].mxu1  ;;  %v7188_v2 = vpop.f32.mrb[217].mxu0 }
 0x2b1   : > { %v7189_v26 = vadd.f32 %v7188_v2, %v7187_v15  ;;  %v7252_v53 = vpop.f32.mrb[217].mxu1  ;;  %v7190_v36 = vpop.f32.mrb[218].mxu0 }
 0x2b2   : > { %v7253_v40 = vadd.f32 %v7252_v53, %v7251_v48  ;;  %v7254_v13 = vpop.f32.mrb[218].mxu1  ;;  %v7191_v61 = vpop.f32.mrb[219].mxu0 }
 0x2b3   : > { %v5039_v46 = vadd.f32 %v7189_v26, %v9444_v22  ;;  %v7192_v62 = vadd.f32 %v7191_v61, %v7190_v36  ;;  %v7255_v0 = vpop.f32.mrb[219].mxu1 }
 0x2b4   : > { %v7256_v14 = vadd.f32 %v7255_v0, %v7254_v13 }
 0x2b5   : > { %v9492_v47 = vadd.f32 %v7253_v40, %v5039_v46  ;;  %v5042_v12 = vadd.f32 %v7192_v62, %v9447_v57 }
 0x2b7   : > { %v9495_v7 = vadd.f32 %v7256_v14, %v5042_v12  ;;  %v7193_v56 = vpop.f32.mrb[220].mxu0 }
 0x2b8   : > { %v7257_v8 = vpop.f32.mrb[220].mxu1  ;;  %v7194_v55 = vpop.f32.mrb[221].mxu0 }
 0x2b9   : > { %v7195_v20 = vadd.f32 %v7194_v55, %v7193_v56  ;;  %v7258_v35 = vpop.f32.mrb[221].mxu1  ;;  %v7196_v11 = vpop.f32.mrb[222].mxu0 }
 0x2ba   : > { %v7259_v30 = vadd.f32 %v7258_v35, %v7257_v8  ;;  %v7260_v50 = vpop.f32.mrb[222].mxu1  ;;  %v7197_v43 = vpop.f32.mrb[223].mxu0 }
 0x2bb   : > { %v5047_v22 = vadd.f32 %v7195_v20, %v9450_v24  ;;  %v7198_v16 = vadd.f32 %v7197_v43, %v7196_v11  ;;  %v7261_v18 = vpop.f32.mrb[223].mxu1 }
 0x2bc   : > { %v7262_v39 = vadd.f32 %v7261_v18, %v7260_v50 }
 0x2bd   : > { %v9498_v21 = vadd.f32 %v7259_v30, %v5047_v22  ;;  %v5050_v57 = vadd.f32 %v7198_v16, %v9453_v58 }
 0x2bf   : > { %v9501_v37 = vadd.f32 %v7262_v39, %v5050_v57  ;;  %v7279_v60 = vpop.f32.mrb[224].mxu0 }
 0x2c0   : > { %v7343_v23 = vpop.f32.mrb[224].mxu1  ;;  %v7280_v44 = vpop.f32.mrb[225].mxu0 }
 0x2c1   : > { %v7281_v52 = vadd.f32 %v7280_v44, %v7279_v60  ;;  %v7344_v27 = vpop.f32.mrb[225].mxu1  ;;  %v7282_v38 = vpop.f32.mrb[226].mxu0 }
 0x2c2   : > { %v7345_v17 = vadd.f32 %v7344_v27, %v7343_v23  ;;  %v7346_v34 = vpop.f32.mrb[226].mxu1  ;;  %v7283_v49 = vpop.f32.mrb[227].mxu0 }
 0x2c3   : > { %v5185_v24 = vadd.f32 %v7281_v52, %v9456_v41  ;;  %v7284_v10 = vadd.f32 %v7283_v49, %v7282_v38  ;;  %v7347_v4 = vpop.f32.mrb[227].mxu1 }
 0x2c4   : > { %v7348_v31 = vadd.f32 %v7347_v4, %v7346_v34 }
 0x2c5   : > { %v5282_v42 = vadd.f32 %v7345_v17, %v5185_v24  ;;  %v5188_v58 = vadd.f32 %v7284_v10, %v9459_v63 }
 0x2c7   : > { %v5360_v1 = vmul.f32 0.2, %v5282_v42  ;;  %v5285_v3 = vadd.f32 %v7348_v31, %v5188_v58  ;;  %v7285_v59 = vpop.f32.mrb[228].mxu0  ;;  %vm5344_vm0 = vcmp.ge.f32.partialorder %v5282_v42, 0.0 }
 0x2c8   : > { %v7349_v25 = vpop.f32.mrb[228].mxu1  ;;  %v7286_v9 = vpop.f32.mrb[229].mxu0 }
 0x2c9   : > { %vm5345_vm1 = vcmp.ge.f32.partialorder %v5285_v3, 0.0  ;;  %v5361_v15 = vmul.f32 0.2, %v5285_v3  ;;  %v7287_v48 = vadd.f32 %v7286_v9, %v7285_v59  ;;  %v7350_v2 = vpop.f32.mrb[229].mxu1  ;;  %v7288_v26 = vpop.f32.mrb[230].mxu0  ;;  %v5376_v40 = vsel %vm5344_vm0, %v5282_v42, %v5360_v1 }
 0x2ca   : > { %v7351_v41 = vadd.f32 %v7350_v2, %v7349_v25  ;;  %v7352_v53 = vpop.f32.mrb[230].mxu1  ;;  %v7289_v36 = vpop.f32.mrb[231].mxu0 }
 0x2cb   : > { %v5377_v13 = vsel %vm5345_vm1, %v5285_v3, %v5361_v15  ;;  %v5193_v63 = vadd.f32 %v7287_v48, %v9462_v6  ;;  %v7290_v61 = vadd.f32 %v7289_v36, %v7288_v26  ;;  %v7353_v46 = vpop.f32.mrb[231].mxu1 }
 0x2cc   : > { %v6323_v62 = vpack.c.bf16 %v5377_v13, %v5376_v40  ;;  %v7354_v0 = vadd.f32 %v7353_v46, %v7352_v53 }
 0x2cd   : > { %v5290_v14 = vadd.f32 %v7351_v41, %v5193_v63  ;;  %v5196_v12 = vadd.f32 %v7290_v61, %v9465_v19 }
 0x2ce   : > { %6324 = vst [vmem:[%s9508_s12] sm:$0xff] %v6323_v62  }
 0x2cf   : > { %v5362_v56 = vmul.f32 0.2, %v5290_v14  ;;  %v5293_v8 = vadd.f32 %v7354_v0, %v5196_v12  ;;  %v7291_v55 = vpop.f32.mrb[232].mxu0  ;;  %vm5346_vm2 = vcmp.ge.f32.partialorder %v5290_v14, 0.0 }
 0x2d0   : > { %v7355_v20 = vpop.f32.mrb[232].mxu1  ;;  %v7292_v35 = vpop.f32.mrb[233].mxu0 }
 0x2d1   : > { %vm5347_vm3 = vcmp.ge.f32.partialorder %v5293_v8, 0.0  ;;  %v5363_v11 = vmul.f32 0.2, %v5293_v8  ;;  %v7293_v6 = vadd.f32 %v7292_v35, %v7291_v55  ;;  %v7356_v30 = vpop.f32.mrb[233].mxu1  ;;  %v7294_v50 = vpop.f32.mrb[234].mxu0  ;;  %v5378_v19 = vsel %vm5346_vm2, %v5290_v14, %v5362_v56 }
 0x2d2   : > { %v7357_v43 = vadd.f32 %v7356_v30, %v7355_v20  ;;  %v7358_v22 = vpop.f32.mrb[234].mxu1  ;;  %v7295_v16 = vpop.f32.mrb[235].mxu0 }
 0x2d3   : > { %v5379_v18 = vsel %vm5347_vm3, %v5293_v8, %v5363_v11  ;;  %v5201_v39 = vadd.f32 %v7293_v6, %v9468_v28  ;;  %v7296_v57 = vadd.f32 %v7295_v16, %v7294_v50  ;;  %v7359_v60 = vpop.f32.mrb[235].mxu1 }
 0x2d4   : > { %v6328_v23 = vpack.c.bf16 %v5379_v18, %v5378_v19  ;;  %v7360_v44 = vadd.f32 %v7359_v60, %v7358_v22 }
 0x2d5   : > { %v5298_v52 = vadd.f32 %v7357_v43, %v5201_v39  ;;  %v5204_v27 = vadd.f32 %v7296_v57, %v9471_v54 }
 0x2d6   : > { %6360 = vst [vmem:[%s9508_s12 + $0x8] sm:$0xff] %v6328_v23  }
 0x2d7   : > { %v5364_v38 = vmul.f32 0.2, %v5298_v52  ;;  %v5301_v17 = vadd.f32 %v7360_v44, %v5204_v27  ;;  %v7297_v34 = vpop.f32.mrb[236].mxu0  ;;  %vm5348_vm4 = vcmp.ge.f32.partialorder %v5298_v52, 0.0 }
 0x2d8   : > { %v7361_v49 = vpop.f32.mrb[236].mxu1  ;;  %v7298_v24 = vpop.f32.mrb[237].mxu0 }
 0x2d9   : > { %vm5349_vm5 = vcmp.ge.f32.partialorder %v5301_v17, 0.0  ;;  %v5365_v10 = vmul.f32 0.2, %v5301_v17  ;;  %v7299_v4 = vadd.f32 %v7298_v24, %v7297_v34  ;;  %v7362_v31 = vpop.f32.mrb[237].mxu1  ;;  %v7300_v28 = vpop.f32.mrb[238].mxu0  ;;  %v5380_v3 = vsel %vm5348_vm4, %v5298_v52, %v5364_v38 }
 0x2da   : > { %v7363_v42 = vadd.f32 %v7362_v31, %v7361_v49  ;;  %v7364_v58 = vpop.f32.mrb[238].mxu1  ;;  %v7301_v1 = vpop.f32.mrb[239].mxu0 }
 0x2db   : > { %v5381_v59 = vsel %vm5349_vm5, %v5301_v17, %v5365_v10  ;;  %v5209_v54 = vadd.f32 %v7299_v4, %v9474_v51  ;;  %v7302_v25 = vadd.f32 %v7301_v1, %v7300_v28  ;;  %v7365_v9 = vpop.f32.mrb[239].mxu1 }
 0x2dc   : > { %v6333_v15 = vpack.c.bf16 %v5381_v59, %v5380_v3  ;;  %v7366_v48 = vadd.f32 %v7365_v9, %v7364_v58 }
 0x2dd   : > { %v5306_v2 = vadd.f32 %v7363_v42, %v5209_v54  ;;  %v5212_v26 = vadd.f32 %v7302_v25, %v9477_v32 }
 0x2de   : > { %6361 = vst [vmem:[%s9508_s12 + $0x10] sm:$0xff] %v6333_v15  }
 0x2df   : > { %v5366_v41 = vmul.f32 0.2, %v5306_v2  ;;  %v5309_v53 = vadd.f32 %v7366_v48, %v5212_v26  ;;  %v7303_v36 = vpop.f32.mrb[240].mxu0  ;;  %vm5350_vm6 = vcmp.ge.f32.partialorder %v5306_v2, 0.0 }
 0x2e0   : > { %v7367_v40 = vpop.f32.mrb[240].mxu1  ;;  %v7304_v13 = vpop.f32.mrb[241].mxu0 }
 0x2e1   : > { %vm5351_vm7 = vcmp.ge.f32.partialorder %v5309_v53, 0.0  ;;  %v5367_v63 = vmul.f32 0.2, %v5309_v53  ;;  %v7305_v61 = vadd.f32 %v7304_v13, %v7303_v36  ;;  %v7368_v46 = vpop.f32.mrb[241].mxu1  ;;  %v7306_v51 = vpop.f32.mrb[242].mxu0  ;;  %v5382_v12 = vsel %vm5350_vm6, %v5306_v2, %v5366_v41 }
 0x2e2   : > { %v7369_v62 = vadd.f32 %v7368_v46, %v7367_v40  ;;  %v7370_v0 = vpop.f32.mrb[242].mxu1  ;;  %v7307_v14 = vpop.f32.mrb[243].mxu0 }
 0x2e3   : > { %v5383_v56 = vsel %vm5351_vm7, %v5309_v53, %v5367_v63  ;;  %v5217_v32 = vadd.f32 %v7305_v61, %v9480_v29  ;;  %v7308_v8 = vadd.f32 %v7307_v14, %v7306_v51  ;;  %v7371_v55 = vpop.f32.mrb[243].mxu1 }
 0x2e4   : > { %v6338_v20 = vpack.c.bf16 %v5383_v56, %v5382_v12  ;;  %v7372_v35 = vadd.f32 %v7371_v55, %v7370_v0 }
 0x2e5   : > { %v5314_v11 = vadd.f32 %v7369_v62, %v5217_v32  ;;  %v5220_v6 = vadd.f32 %v7308_v8, %v9483_v33 }
 0x2e6   : > { %6362 = vst [vmem:[%s9508_s12 + $0x18] sm:$0xff] %v6338_v20  }
 0x2e7   : > { %v5368_v30 = vmul.f32 0.2, %v5314_v11  ;;  %v5317_v50 = vadd.f32 %v7372_v35, %v5220_v6  ;;  %v7309_v43 = vpop.f32.mrb[244].mxu0  ;;  %vm5352_vm8 = vcmp.ge.f32.partialorder %v5314_v11, 0.0 }
 0x2e8   : > { %v7373_v22 = vpop.f32.mrb[244].mxu1  ;;  %v7310_v16 = vpop.f32.mrb[245].mxu0 }
 0x2e9   : > { %vm5353_vm9 = vcmp.ge.f32.partialorder %v5317_v50, 0.0  ;;  %v5369_v19 = vmul.f32 0.2, %v5317_v50  ;;  %v7311_v18 = vadd.f32 %v7310_v16, %v7309_v43  ;;  %v7374_v39 = vpop.f32.mrb[245].mxu1  ;;  %v7312_v29 = vpop.f32.mrb[246].mxu0  ;;  %v5384_v44 = vsel %vm5352_vm8, %v5314_v11, %v5368_v30 }
 0x2ea   : > { %v7375_v57 = vadd.f32 %v7374_v39, %v7373_v22  ;;  %v7376_v60 = vpop.f32.mrb[246].mxu1  ;;  %v7313_v23 = vpop.f32.mrb[247].mxu0 }
 0x2eb   : > { %v5385_v52 = vsel %vm5353_vm9, %v5317_v50, %v5369_v19  ;;  %v5225_v33 = vadd.f32 %v7311_v18, %v9486_v45  ;;  %v7314_v27 = vadd.f32 %v7313_v23, %v7312_v29  ;;  %v7377_v38 = vpop.f32.mrb[247].mxu1 }
 0x2ec   : > { %v6343_v17 = vpack.c.bf16 %v5385_v52, %v5384_v44  ;;  %v7378_v34 = vadd.f32 %v7377_v38, %v7376_v60 }
 0x2ed   : > { %v5322_v49 = vadd.f32 %v7375_v57, %v5225_v33  ;;  %v5228_v24 = vadd.f32 %v7314_v27, %v9489_v5 }
 0x2ee   : > { %6363 = vst [vmem:[%s9508_s12 + $0x20] sm:$0xff] %v6343_v17  }
 0x2ef   : > { %v5370_v10 = vmul.f32 0.2, %v5322_v49  ;;  %v5325_v4 = vadd.f32 %v7378_v34, %v5228_v24  ;;  %v7315_v31 = vpop.f32.mrb[248].mxu0  ;;  %vm5354_vm10 = vcmp.ge.f32.partialorder %v5322_v49, 0.0 }
 0x2f0   : > { %v7379_v28 = vpop.f32.mrb[248].mxu1  ;;  %v7316_v42 = vpop.f32.mrb[249].mxu0 }
 0x2f1   : > { %vm5355_vm11 = vcmp.ge.f32.partialorder %v5325_v4, 0.0  ;;  %v5371_v58 = vmul.f32 0.2, %v5325_v4  ;;  %v7317_v1 = vadd.f32 %v7316_v42, %v7315_v31  ;;  %v7380_v3 = vpop.f32.mrb[249].mxu1  ;;  %v7318_v45 = vpop.f32.mrb[250].mxu0  ;;  %v5386_v9 = vsel %vm5354_vm10, %v5322_v49, %v5370_v10 }
 0x2f2   : > { %v7381_v59 = vadd.f32 %v7380_v3, %v7379_v28  ;;  %v7382_v54 = vpop.f32.mrb[250].mxu1  ;;  %v7319_v25 = vpop.f32.mrb[251].mxu0 }
 0x2f3   : > { %v5387_v15 = vsel %vm5355_vm11, %v5325_v4, %v5371_v58  ;;  %v5233_v5 = vadd.f32 %v7317_v1, %v9492_v47  ;;  %v7320_v48 = vadd.f32 %v7319_v25, %v7318_v45  ;;  %v7383_v2 = vpop.f32.mrb[251].mxu1 }
 0x2f4   : > { %v6348_v26 = vpack.c.bf16 %v5387_v15, %v5386_v9  ;;  %v7384_v41 = vadd.f32 %v7383_v2, %v7382_v54 }
 0x2f5   : > { %v5330_v53 = vadd.f32 %v7381_v59, %v5233_v5  ;;  %v5236_v36 = vadd.f32 %v7320_v48, %v9495_v7 }
 0x2f6   : > { %6364 = vst [vmem:[%s9508_s12 + $0x28] sm:$0xff] %v6348_v26  }
 0x2f7   : > { %v5372_v40 = vmul.f32 0.2, %v5330_v53  ;;  %v5333_v13 = vadd.f32 %v7384_v41, %v5236_v36  ;;  %v7321_v63 = vpop.f32.mrb[252].mxu0  ;;  %vm5356_vm12 = vcmp.ge.f32.partialorder %v5330_v53, 0.0 }
 0x2f8   : > { %v7385_v61 = vpop.f32.mrb[252].mxu1  ;;  %v7322_v46 = vpop.f32.mrb[253].mxu0 }
 0x2f9   : > { %vm5357_vm13 = vcmp.ge.f32.partialorder %v5333_v13, 0.0  ;;  %v5373_v51 = vmul.f32 0.2, %v5333_v13  ;;  %v7323_v62 = vadd.f32 %v7322_v46, %v7321_v63  ;;  %v7386_v0 = vpop.f32.mrb[253].mxu1  ;;  %v7324_v47 = vpop.f32.mrb[254].mxu0  ;;  %v5388_v32 = vsel %vm5356_vm12, %v5330_v53, %v5372_v40 }
 0x2fa   : > { %v7387_v14 = vadd.f32 %v7386_v0, %v7385_v61  ;;  %v7388_v12 = vpop.f32.mrb[254].mxu1  ;;  %v7325_v56 = vpop.f32.mrb[255].mxu0 }
 0x2fb   : > { %v5389_v8 = vsel %vm5357_vm13, %v5333_v13, %v5373_v51  ;;  %v5241_v7 = vadd.f32 %v7323_v62, %v9498_v21  ;;  %v7326_v55 = vadd.f32 %v7325_v56, %v7324_v47  ;;  %v7389_v20 = vpop.f32.mrb[255].mxu1 }
 0x2fc   : > { %v6353_v35 = vpack.c.bf16 %v5389_v8, %v5388_v32  ;;  %v7390_v11 = vadd.f32 %v7389_v20, %v7388_v12 }
 0x2fd   : > { %v5338_v6 = vadd.f32 %v7387_v14, %v5241_v7  ;;  %v5244_v30 = vadd.f32 %v7326_v55, %v9501_v37 }
 0x2fe   : > { %6365 = vst [vmem:[%s9508_s12 + $0x30] sm:$0xff] %v6353_v35  }
 0x2ff   : > { %v5374_v50 = vmul.f32 0.2, %v5338_v6  ;;  %v5341_v43 = vadd.f32 %v7390_v11, %v5244_v30  ;;  %vm5358_vm14 = vcmp.ge.f32.partialorder %v5338_v6, 0.0 }
 0x300   : > { %5478 = sbr.rel (!%p7868_p4) target bundleno = 834 (0x342), region = 36 }
 0x301   : > { %vm5359_vm15 = vcmp.ge.f32.partialorder %v5341_v43, 0.0  ;;  %v5375_v22 = vmul.f32 0.2, %v5341_v43  ;;  %v5390_v16 = vsel %vm5358_vm14, %v5338_v6, %v5374_v50 }
 0x303   : > { %v5391_v19 = vsel %vm5359_vm15, %v5341_v43, %v5375_v22 }
 0x304   : > { %v6358_v18 = vpack.c.bf16 %v5391_v19, %v5390_v16 }
 0x306   : > { %6366 = vst [vmem:[%s9508_s12 + $0x38] sm:$0xff] %v6358_v18  }
 0x307   : > { %s9645_s23 = smov (!%p5481_p8, %s5480_s23), 16 }
 0x308   : > { %s6285_s29 = sshll.u32 %s9645_s23, 6 }
 0x309   : > { %p6288_p9 = scmp.eq.s32.totalorder %s6285_s29, 0 }
 0x30a   : > { %s9543_s30 = sshrl.u32 (!%p6288_p9), %s9645_s23, 4 }
 0x30b   : > { %5489 = sbr.rel (%p6288_p9) target bundleno = 834 (0x342), region = 40  ;;  %p6289_p10 = scmp.le.s32.totalorder (!%p6288_p9), %s9543_s30, 0 }
 0x312   : > { %5702 = sbr.rel (%p6289_p10) target bundleno = 813 (0x32d), region = 112  ;;  %s9638_s15 = smov (!%p6289_p10), %s9537_s28 }
 0x313   : > { %s9639_s20 = smov (!%p6289_p10), %s9508_s12  ;;  %s9552_s5 = smov (!%p6289_p10), 0  }
 0x314   : > { %s9554_s4 = smov (!%p6289_p10), 0  }
 0x319 LB: >> { %v5505_v21 = vld [vmem:[%s7797_s20] sm:$0xf]  ;;  %v5507_v37 = vld [vmem:[%s7797_s20 + $0x4] sm:$0xf]  ;;  %v5509_v39 = vld [vmem:[%s7797_s20 + $0x8] sm:$0xf]  ;;  %s7805_s4 = sphi %s9554_s4, %s5499_s4   ;;  %s7801_s5 = sphi %s9552_s5, %s9640_s5   ;;  %s7797_s20 = sphi %s9639_s20, %s5542_s20   ;;  %s7793_s15 = sphi %s9638_s15, %s5543_s15  }
 0x31a   : >> { %5506 = vst [vmem:[%s7793_s15] sm:$0xf] %v5505_v21  ;;  %5508 = vst [vmem:[%s7793_s15 + $0x4] sm:$0xf] %v5507_v37  ;;  %v5511_v29 = vld [vmem:[%s7797_s20 + $0xc] sm:$0xf]  ;;  %s5537_s6 = sadd.s32 1, %s7801_s5 }
 0x31b   : >> { %5510 = vst [vmem:[%s7793_s15 + $0x8] sm:$0xf] %v5509_v39  ;;  %v5513_v57 = vld [vmem:[%s7797_s20 + $0x10] sm:$0xf]  ;;  %v5515_v60 = vld [vmem:[%s7797_s20 + $0x14] sm:$0xf]  ;;  %p5538_p11 = scmp.ge.s32.totalorder %s5537_s6, %s9543_s30 }
 0x31c   : >> { %5512 = vst [vmem:[%s7793_s15 + $0xc] sm:$0xf] %v5511_v29  ;;  %5514 = vst [vmem:[%s7793_s15 + $0x10] sm:$0xf] %v5513_v57  ;;  %v5517_v23 = vld [vmem:[%s7797_s20 + $0x18] sm:$0xf] }
 0x31d   : >> { %5516 = vst [vmem:[%s7793_s15 + $0x14] sm:$0xf] %v5515_v60  ;;  %v5519_v44 = vld [vmem:[%s7797_s20 + $0x1c] sm:$0xf]  ;;  %v5521_v52 = vld [vmem:[%s7797_s20 + $0x20] sm:$0xf] }
 0x31e   : >> { %5518 = vst [vmem:[%s7793_s15 + $0x18] sm:$0xf] %v5517_v23  ;;  %5520 = vst [vmem:[%s7793_s15 + $0x1c] sm:$0xf] %v5519_v44  ;;  %v5523_v33 = vld [vmem:[%s7797_s20 + $0x24] sm:$0xf] }
 0x31f   : >> { %5522 = vst [vmem:[%s7793_s15 + $0x20] sm:$0xf] %v5521_v52  ;;  %v5525_v27 = vld [vmem:[%s7797_s20 + $0x28] sm:$0xf]  ;;  %v5527_v38 = vld [vmem:[%s7797_s20 + $0x2c] sm:$0xf] }
 0x320   : >> { %5524 = vst [vmem:[%s7793_s15 + $0x24] sm:$0xf] %v5523_v33  ;;  %5526 = vst [vmem:[%s7793_s15 + $0x28] sm:$0xf] %v5525_v27  ;;  %v5529_v17 = vld [vmem:[%s7797_s20 + $0x30] sm:$0xf] }
 0x321   : >> { %5528 = vst [vmem:[%s7793_s15 + $0x2c] sm:$0xf] %v5527_v38  ;;  %v5531_v34 = vld [vmem:[%s7797_s20 + $0x34] sm:$0xf]  ;;  %v5533_v49 = vld [vmem:[%s7797_s20 + $0x38] sm:$0xf] }
 0x322   : >> { %5530 = vst [vmem:[%s7793_s15 + $0x30] sm:$0xf] %v5529_v17  ;;  %5532 = vst [vmem:[%s7793_s15 + $0x34] sm:$0xf] %v5531_v34  ;;  %v5535_v24 = vld [vmem:[%s7797_s20 + $0x3c] sm:$0xf] }
 0x323   : >> { %5534 = vst [vmem:[%s7793_s15 + $0x38] sm:$0xf] %v5533_v49  ;;  %5536 = vst [vmem:[%s7793_s15 + $0x3c] sm:$0xf] %v5535_v24  ;;  %s9647_s6 = smov (%p5538_p11, %s5537_s6), 0  ;;  %s5499_s4 = sadd.s32 1, %s7805_s4  }
 0x324   : >> { %s6290_s7 = sshll.u32 %s9647_s6, 6  ;;  %p5498_p12 = scmp.ge.s32.totalorder %s5499_s4, %s9543_s30 }
 0x325   : >> { %s5542_s20 = scalar_lea.vmem %s9508_s12, %s6290_s7 [#allocation2]   ;;  %s5543_s15 = scalar_lea.vmem %s9537_s28, %s6290_s7  }
 0x326   : >> { %s9640_s5 = smov %s9647_s6  ;;  %5501 = sbr.rel (!%p5498_p12) target bundleno = 793 (0x319), region = 118 }
 0x32d PF: > { %s9615_s8 = sand.u32 15, %s9645_s23   ;;  %s6318_s9 = sshll.u32 %s9543_s30, 6 }
 0x32e   : > { %s5548_s10 = scalar_lea.vmem %s9508_s12, %s6318_s9 [#allocation2]   ;;  %s5550_s11 = scalar_lea.vmem %s9537_s28, %s6318_s9  }
 0x32f   : > { %p6295_p13 = scmp.le.s32.totalorder %s9615_s8, 0 }
 0x330   : > { %s7807_s14 = smov (!%p6295_p13), %s5550_s11   ;;  %s7811_s17 = smov (!%p6295_p13), %s5548_s10  }
 0x331   : > { %5716 = sbr.rel (%p6295_p13) target bundleno = 834 (0x342), region = 123  ;;  %s7815_s18 = smov (!%p6295_p13), 0  }
 0x332   : > { %s7819_s21 = smov (!%p6295_p13), 0  }
 0x338 LB: >> { %v5560_v10 = vld [vmem:[%s7813_s17] sm:$0xf]  ;;  %s5562_s24 = sadd.s32 1, %s7817_s18  ;;  %s5554_s21 = sadd.s32 1, %s7821_s21   ;;  %s7821_s21 = sphi %s7819_s21, %s5554_s21   ;;  %s7817_s18 = sphi %s7815_s18, %s7816_s18   ;;  %s7813_s17 = sphi %s7811_s17, %s5567_s17   ;;  %s7809_s14 = sphi %s7807_s14, %s5568_s14  }
 0x339   : >> { %5561 = vst [vmem:[%s7809_s14] sm:$0xf] %v5560_v10  ;;  %p5563_p0 = scmp.ge.s32.totalorder %s5562_s24, %s9615_s8  ;;  %p5553_p1 = scmp.ge.s32.totalorder %s5554_s21, %s9615_s8 }
 0x33b   : >> { %s9649_s24 = smov (%p5563_p0, %s5562_s24), 0  ;;  %5556 = sbr.rel (!%p5553_p1) target bundleno = 824 (0x338), region = 129 }
 0x33c   : >> { %s6296_s22 = sshll.u32 %s9649_s24, 2  ;;  %s7816_s18 = smov %s9649_s24  }
 0x33d   : >> { %s5567_s17 = scalar_lea.vmem %s5548_s10, %s6296_s22 [#allocation2]   ;;  %s5568_s14 = scalar_lea.vmem %s5550_s11, %s6296_s22  }
 0x342 PF: > { %p10_p2 = scmp.ge.s32.totalorder %s7858_s16, 4   ;;  %s9641_s12 = smov %s7785_s13 }
 0x343   : > { %s9642_s13 = smov %s7866_s19  ;;  %s9643_s14 = smov %s7858_s16 }
 0x344   :  { %12 = sbr.rel (!%p10_p2) target bundleno = 2 (0x2), region = 140 }

// kernel: discriminator_forward.6
= control target key start
LH: loop header
LB: loop body
LE: loop exit
PB: predicated region body
PF: predicated region fallthrough
CT: control target
= control target key end

     0   :  { %s4734_s1 = inlined_call_operand.vmem [shape: bf16[4096,128], index: 1, kind: input, shape index: {}]   ;;  %s4735_s0 = inlined_call_operand.vmem [shape: bf16[16,4096], index: 0, kind: input, shape index: {}]   ;;  %s4736_s2 = inlined_call_operand.vmem [shape: f32[1,128], index: 2, kind: input, shape index: {}]   ;;  %s4737_s3 = inlined_call_operand.vmem [shape: bf16[16,128], index: 3, kind: output, shape index: {}]  }
   0x1   :  { %v3588_v0 = vld [vmem:[%s4734_s1 + $0x40] sm:$0xff]   ;;  %v3592_v4 = vld [vmem:[%s4734_s1 + $0x48] sm:$0xff]   ;;  %v3596_v8 = vld [vmem:[%s4734_s1 + $0x50] sm:$0xff]  }
   0x2   :  { %v3589_v1 = vld [vmem:[%s4734_s1 + $0xc0] sm:$0xff]   ;;  %3236 = vmatprep.subr.bf16.mxu0 %v3588_v0  ;;  %v3593_v5 = vld [vmem:[%s4734_s1 + $0xc8] sm:$0xff]   ;;  %v3597_v9 = vld [vmem:[%s4734_s1 + $0xd0] sm:$0xff]  }
   0x3   :  { %v3590_v2 = vld [vmem:[%s4734_s1] sm:$0xff]   ;;  %3258 = vmatprep.subr.bf16.mxu1 %v3589_v1  ;;  %v3594_v6 = vld [vmem:[%s4734_s1 + $0x8] sm:$0xff]   ;;  %v3598_v10 = vld [vmem:[%s4734_s1 + $0x10] sm:$0xff]  }
   0x4   :  { %v3591_v3 = vld [vmem:[%s4734_s1 + $0x80] sm:$0xff]   ;;  %3237 = vmatpush3.bf16.msra.mxu0 %v3590_v2  ;;  %v3595_v7 = vld [vmem:[%s4734_s1 + $0x88] sm:$0xff]   ;;  %v3599_v11 = vld [vmem:[%s4734_s1 + $0x90] sm:$0xff]  }
   0x5   :  { %3259 = vmatpush3.bf16.msra.mxu1 %v3591_v3  ;;  %3238 = vmatprep.subr.bf16.mxu0 %v3592_v4  ;;  %v3600_v12 = vld [vmem:[%s4734_s1 + $0x58] sm:$0xff]   ;;  %v3604_v16 = vld [vmem:[%s4734_s1 + $0x60] sm:$0xff]   ;;  %v3608_v20 = vld [vmem:[%s4734_s1 + $0x68] sm:$0xff]  }
   0x6   :  { %3260 = vmatprep.subr.bf16.mxu1 %v3593_v5  ;;  %v3601_v13 = vld [vmem:[%s4734_s1 + $0xd8] sm:$0xff]   ;;  %v3605_v17 = vld [vmem:[%s4734_s1 + $0xe0] sm:$0xff]   ;;  %v3609_v21 = vld [vmem:[%s4734_s1 + $0xe8] sm:$0xff]  }
   0x7   :  { %v3602_v14 = vld [vmem:[%s4734_s1 + $0x18] sm:$0xff]   ;;  %v3606_v18 = vld [vmem:[%s4734_s1 + $0x20] sm:$0xff]   ;;  %v3610_v22 = vld [vmem:[%s4734_s1 + $0x28] sm:$0xff]  }
   0x8   :  { %3239 = vmatpush3.bf16.msra.mxu0 %v3594_v6  ;;  %v3603_v15 = vld [vmem:[%s4734_s1 + $0x98] sm:$0xff]   ;;  %v3607_v19 = vld [vmem:[%s4734_s1 + $0xa0] sm:$0xff]   ;;  %v3611_v23 = vld [vmem:[%s4734_s1 + $0xa8] sm:$0xff]  }
   0x9   :  { %3261 = vmatpush3.bf16.msra.mxu1 %v3595_v7  ;;  %3240 = vmatprep.subr.bf16.mxu0 %v3596_v8  ;;  %v3612_v24 = vld [vmem:[%s4734_s1 + $0x70] sm:$0xff]   ;;  %v3616_v28 = vld [vmem:[%s4734_s1 + $0x78] sm:$0xff]   ;;  %v15_v32 = vld [vmem:[%s4735_s0] sm:$0xff] }
   0xa   :  { %3262 = vmatprep.subr.bf16.mxu1 %v3597_v9  ;;  %v3613_v25 = vld [vmem:[%s4734_s1 + $0xf0] sm:$0xff]   ;;  %v3617_v29 = vld [vmem:[%s4734_s1 + $0xf8] sm:$0xff]   ;;  %v31_v33 = vld [vmem:[%s4735_s0 + $0x80] sm:$0xff] }
   0xb   :  { %v3614_v26 = vld [vmem:[%s4734_s1 + $0x30] sm:$0xff]   ;;  %v3618_v30 = vld [vmem:[%s4734_s1 + $0x38] sm:$0xff]   ;;  %v16_v34 = vld [vmem:[%s4735_s0 + $0x8] sm:$0xff]  ;;  %v2939_v35 = vcombine.low %v15_v32, %v31_v33  ;;  %v2940_v36 = vcombine.high %v15_v32, %v31_v33 }
   0xc   :  { %3241 = vmatpush3.bf16.msra.mxu0 %v3598_v10  ;;  %v3615_v27 = vld [vmem:[%s4734_s1 + $0xb0] sm:$0xff]   ;;  %v3619_v31 = vld [vmem:[%s4734_s1 + $0xb8] sm:$0xff]   ;;  %v32_v37 = vld [vmem:[%s4735_s0 + $0x88] sm:$0xff] }
   0xd   :  { %3263 = vmatpush3.bf16.msra.mxu1 %v3599_v11  ;;  %3242 = vmatprep.subr.bf16.mxu0 %v3600_v12  ;;  %v2941_v38 = vcombine.low %v16_v34, %v32_v37  ;;  %v2942_v39 = vcombine.high %v16_v34, %v32_v37  ;;  %v3620_v40 = vld [vmem:[%s4734_s1 + $0x140] sm:$0xff]   ;;  %v3624_v44 = vld [vmem:[%s4734_s1 + $0x148] sm:$0xff]   ;;  %v3628_v48 = vld [vmem:[%s4734_s1 + $0x150] sm:$0xff]  }
   0xe   :  { %3264 = vmatprep.subr.bf16.mxu1 %v3601_v13  ;;  %2294 = vmatprep.mubr.bf16.mxu0 %v2940_v36  ;;  %v3621_v41 = vld [vmem:[%s4734_s1 + $0x1c0] sm:$0xff]   ;;  %v3625_v45 = vld [vmem:[%s4734_s1 + $0x1c8] sm:$0xff]   ;;  %v3629_v49 = vld [vmem:[%s4734_s1 + $0x1d0] sm:$0xff]  }
   0xf   :  { %2335 = vmatprep.mubr.bf16.mxu1 %v2942_v39  ;;  %v3622_v42 = vld [vmem:[%s4734_s1 + $0x100] sm:$0xff]   ;;  %v3626_v46 = vld [vmem:[%s4734_s1 + $0x108] sm:$0xff]   ;;  %v3630_v50 = vld [vmem:[%s4734_s1 + $0x110] sm:$0xff]  }
  0x10   :  { %3243 = vmatpush3.bf16.msra.mxu0 %v3602_v14  ;;  %v3623_v43 = vld [vmem:[%s4734_s1 + $0x180] sm:$0xff]   ;;  %v3627_v47 = vld [vmem:[%s4734_s1 + $0x188] sm:$0xff]   ;;  %v3631_v51 = vld [vmem:[%s4734_s1 + $0x190] sm:$0xff]  }
  0x11   :  { %3265 = vmatpush3.bf16.msra.mxu1 %v3603_v15  ;;  %3244 = vmatprep.subr.bf16.mxu0 %v3604_v16  ;;  %v3632_v52 = vld [vmem:[%s4734_s1 + $0x158] sm:$0xff]   ;;  %v3636_v56 = vld [vmem:[%s4734_s1 + $0x160] sm:$0xff]   ;;  %v3640_v60 = vld [vmem:[%s4734_s1 + $0x168] sm:$0xff]  }
  0x12   :  { %3266 = vmatprep.subr.bf16.mxu1 %v3605_v17  ;;  %v3633_v53 = vld [vmem:[%s4734_s1 + $0x1d8] sm:$0xff]   ;;  %v3637_v57 = vld [vmem:[%s4734_s1 + $0x1e0] sm:$0xff]   ;;  %v3641_v61 = vld [vmem:[%s4734_s1 + $0x1e8] sm:$0xff]  }
  0x13   :  { %v3634_v54 = vld [vmem:[%s4734_s1 + $0x118] sm:$0xff]   ;;  %v3638_v58 = vld [vmem:[%s4734_s1 + $0x120] sm:$0xff]   ;;  %v3642_v62 = vld [vmem:[%s4734_s1 + $0x128] sm:$0xff]  }
  0x14   :  { %3245 = vmatpush3.bf16.msra.mxu0 %v3606_v18  ;;  %v3635_v55 = vld [vmem:[%s4734_s1 + $0x198] sm:$0xff]   ;;  %v3639_v59 = vld [vmem:[%s4734_s1 + $0x1a0] sm:$0xff]   ;;  %v3643_v63 = vld [vmem:[%s4734_s1 + $0x1a8] sm:$0xff]  }
  0x15   :  { %3267 = vmatpush3.bf16.msra.mxu1 %v3607_v19  ;;  %3246 = vmatprep.subr.bf16.mxu0 %v3608_v20  ;;  %v3644_v0 = vld [vmem:[%s4734_s1 + $0x170] sm:$0xff]   ;;  %v3648_v4 = vld [vmem:[%s4734_s1 + $0x178] sm:$0xff]   ;;  %v3652_v16 = vld [vmem:[%s4734_s1 + $0x240] sm:$0xff]  }
  0x16   :  { %3268 = vmatprep.subr.bf16.mxu1 %v3609_v21  ;;  %v3645_v1 = vld [vmem:[%s4734_s1 + $0x1f0] sm:$0xff]   ;;  %v3649_v5 = vld [vmem:[%s4734_s1 + $0x1f8] sm:$0xff]   ;;  %v3653_v17 = vld [vmem:[%s4734_s1 + $0x2c0] sm:$0xff]  }
  0x17   :  { %v3646_v2 = vld [vmem:[%s4734_s1 + $0x130] sm:$0xff]   ;;  %v3650_v6 = vld [vmem:[%s4734_s1 + $0x138] sm:$0xff]   ;;  %v3654_v18 = vld [vmem:[%s4734_s1 + $0x200] sm:$0xff]  }
  0x18   :  { %3247 = vmatpush3.bf16.msra.mxu0 %v3610_v22  ;;  %v3647_v3 = vld [vmem:[%s4734_s1 + $0x1b0] sm:$0xff]   ;;  %v3651_v7 = vld [vmem:[%s4734_s1 + $0x1b8] sm:$0xff]   ;;  %v3655_v19 = vld [vmem:[%s4734_s1 + $0x280] sm:$0xff]  }
  0x19   :  { %3269 = vmatpush3.bf16.msra.mxu1 %v3611_v23  ;;  %3248 = vmatprep.subr.bf16.mxu0 %v3612_v24  ;;  %v17_v8 = vld [vmem:[%s4735_s0 + $0x10] sm:$0xff]  ;;  %v18_v12 = vld [vmem:[%s4735_s0 + $0x18] sm:$0xff]  ;;  %v3656_v20 = vld [vmem:[%s4734_s1 + $0x248] sm:$0xff]  }
  0x1a   :  { %3270 = vmatprep.subr.bf16.mxu1 %v3613_v25  ;;  %v33_v9 = vld [vmem:[%s4735_s0 + $0x90] sm:$0xff]  ;;  %v34_v13 = vld [vmem:[%s4735_s0 + $0x98] sm:$0xff]  ;;  %v3657_v21 = vld [vmem:[%s4734_s1 + $0x2c8] sm:$0xff]  }
  0x1b   :  { %v2943_v10 = vcombine.low %v17_v8, %v33_v9  ;;  %v2944_v11 = vcombine.high %v17_v8, %v33_v9  ;;  %v2945_v14 = vcombine.low %v18_v12, %v34_v13  ;;  %v2946_v15 = vcombine.high %v18_v12, %v34_v13  ;;  %v3658_v22 = vld [vmem:[%s4734_s1 + $0x208] sm:$0xff]   ;;  %v3660_v24 = vld [vmem:[%s4734_s1 + $0x250] sm:$0xff]   ;;  %v3668_v32 = vld [vmem:[%s4734_s1 + $0x260] sm:$0xff]  }
  0x1c   :  { %3249 = vmatpush3.bf16.msra.mxu0 %v3614_v26  ;;  %v3659_v23 = vld [vmem:[%s4734_s1 + $0x288] sm:$0xff]   ;;  %v3661_v25 = vld [vmem:[%s4734_s1 + $0x2d0] sm:$0xff]   ;;  %v3669_v33 = vld [vmem:[%s4734_s1 + $0x2e0] sm:$0xff]  }
  0x1d   :  { %3271 = vmatpush3.bf16.msra.mxu1 %v3615_v27  ;;  %3250 = vmatprep.subr.bf16.mxu0 %v3616_v28  ;;  %v3662_v26 = vld [vmem:[%s4734_s1 + $0x210] sm:$0xff]   ;;  %v3664_v28 = vld [vmem:[%s4734_s1 + $0x258] sm:$0xff]   ;;  %v3670_v34 = vld [vmem:[%s4734_s1 + $0x220] sm:$0xff]  }
  0x1e   :  { %3272 = vmatprep.subr.bf16.mxu1 %v3617_v29  ;;  %v3663_v27 = vld [vmem:[%s4734_s1 + $0x290] sm:$0xff]   ;;  %v3665_v29 = vld [vmem:[%s4734_s1 + $0x2d8] sm:$0xff]   ;;  %v3672_v36 = vld [vmem:[%s4734_s1 + $0x268] sm:$0xff]  }
  0x1f   :  { %v3673_v37 = vld [vmem:[%s4734_s1 + $0x2e8] sm:$0xff]   ;;  %v3700_v8 = vld [vmem:[%s4734_s1 + $0x360] sm:$0xff]  }
  0x20   :  { %3251 = vmatpush3.bf16.msra.mxu0 %v3618_v30  ;;  %v3666_v30 = vld [vmem:[%s4734_s1 + $0x218] sm:$0xff]   ;;  %v3675_v39 = vld [vmem:[%s4734_s1 + $0x2a8] sm:$0xff]   ;;  %v3701_v9 = vld [vmem:[%s4734_s1 + $0x3e0] sm:$0xff]  }
  0x21   :  { %3273 = vmatpush3.bf16.msra.mxu1 %v3619_v31  ;;  %3280 = vmatprep.subr.bf16.mxu0 %v3620_v40  ;;  %v3667_v31 = vld [vmem:[%s4734_s1 + $0x298] sm:$0xff]   ;;  %v3676_v40 = vld [vmem:[%s4734_s1 + $0x270] sm:$0xff]   ;;  %v3704_v12 = vld [vmem:[%s4734_s1 + $0x368] sm:$0xff]  }
  0x22   :  { %3302 = vmatprep.subr.bf16.mxu1 %v3621_v41  ;;  %v3677_v41 = vld [vmem:[%s4734_s1 + $0x2f0] sm:$0xff]   ;;  %v3705_v13 = vld [vmem:[%s4734_s1 + $0x3e8] sm:$0xff]  }
  0x23   :  { %2295 = vmatmul.mubr.bf16.vlgmr.msra.gmra.mrb[0].mxu0 %v2939_v35  ;;  %v3671_v35 = vld [vmem:[%s4734_s1 + $0x2a0] sm:$0xff]  }
  0x24   :  { %2336 = vmatmul.mubr.bf16.vlgmr.msra.gmra.mrb[0].mxu1 %v2941_v38  ;;  %3281 = vmatpush3.bf16.msra.mxu0 %v3622_v42  ;;  %v3674_v38 = vld [vmem:[%s4734_s1 + $0x228] sm:$0xff]   ;;  %v3678_v42 = vld [vmem:[%s4734_s1 + $0x230] sm:$0xff]  }
  0x25   :  { %3303 = vmatpush3.bf16.msra.mxu1 %v3623_v43  ;;  %3282 = vmatprep.subr.bf16.mxu0 %v3624_v44  ;;  %v3679_v43 = vld [vmem:[%s4734_s1 + $0x2b0] sm:$0xff]   ;;  %v3680_v44 = vld [vmem:[%s4734_s1 + $0x278] sm:$0xff]  }
  0x26   :  { %3304 = vmatprep.subr.bf16.mxu1 %v3625_v45  ;;  %2376 = vmatprep.mubr.bf16.mxu0 %v2944_v11  ;;  %v3681_v45 = vld [vmem:[%s4734_s1 + $0x2f8] sm:$0xff]   ;;  %v3703_v11 = vld [vmem:[%s4734_s1 + $0x3a0] sm:$0xff]  }
  0x27   :  { %2417 = vmatprep.mubr.bf16.mxu1 %v2946_v15  ;;  %v3707_v15 = vld [vmem:[%s4734_s1 + $0x3a8] sm:$0xff]  }
  0x28   :  { %3283 = vmatpush3.bf16.msra.mxu0 %v3626_v46  ;;  %v3682_v46 = vld [vmem:[%s4734_s1 + $0x238] sm:$0xff]  }
  0x29   :  { %3305 = vmatpush3.bf16.msra.mxu1 %v3627_v47  ;;  %3284 = vmatprep.subr.bf16.mxu0 %v3628_v48  ;;  %v3683_v47 = vld [vmem:[%s4734_s1 + $0x2b8] sm:$0xff]   ;;  %v19_v48 = vld [vmem:[%s4735_s0 + $0x20] sm:$0xff] }
  0x2a   :  { %3306 = vmatprep.subr.bf16.mxu1 %v3629_v49  ;;  %v35_v49 = vld [vmem:[%s4735_s0 + $0xa0] sm:$0xff] }
  0x2c   :  { %3285 = vmatpush3.bf16.msra.mxu0 %v3630_v50  ;;  %v20_v50 = vld [vmem:[%s4735_s0 + $0x28] sm:$0xff] }
  0x2d   :  { %3307 = vmatpush3.bf16.msra.mxu1 %v3631_v51  ;;  %3286 = vmatprep.subr.bf16.mxu0 %v3632_v52  ;;  %v36_v51 = vld [vmem:[%s4735_s0 + $0xa8] sm:$0xff]  ;;  %v2947_v52 = vcombine.low %v19_v48, %v35_v49 }
  0x2e   :  { %3308 = vmatprep.subr.bf16.mxu1 %v3633_v53  ;;  %v2948_v53 = vcombine.high %v19_v48, %v35_v49  ;;  %v3732_v48 = vld [vmem:[%s4734_s1 + $0x460] sm:$0xff]  }
  0x2f   :  { %v3733_v49 = vld [vmem:[%s4734_s1 + $0x4e0] sm:$0xff]  }
  0x30   :  { %3287 = vmatpush3.bf16.msra.mxu0 %v3634_v54  ;;  %v2949_v54 = vcombine.low %v20_v50, %v36_v51 }
  0x31   :  { %3309 = vmatpush3.bf16.msra.mxu1 %v3635_v55  ;;  %3288 = vmatprep.subr.bf16.mxu0 %v3636_v56  ;;  %v2950_v55 = vcombine.high %v20_v50, %v36_v51  ;;  %v3684_v56 = vld [vmem:[%s4734_s1 + $0x340] sm:$0xff]  }
  0x32   :  { %3310 = vmatprep.subr.bf16.mxu1 %v3637_v57  ;;  %v3685_v57 = vld [vmem:[%s4734_s1 + $0x3c0] sm:$0xff]  }
  0x33   :  { %v3734_v50 = vld [vmem:[%s4734_s1 + $0x420] sm:$0xff]  }
  0x34   :  { %3289 = vmatpush3.bf16.msra.mxu0 %v3638_v58  ;;  %v3686_v58 = vld [vmem:[%s4734_s1 + $0x300] sm:$0xff]  }
  0x35   :  { %3311 = vmatpush3.bf16.msra.mxu1 %v3639_v59  ;;  %3290 = vmatprep.subr.bf16.mxu0 %v3640_v60  ;;  %v3687_v59 = vld [vmem:[%s4734_s1 + $0x380] sm:$0xff]   ;;  %v3688_v60 = vld [vmem:[%s4734_s1 + $0x348] sm:$0xff]  }
  0x36   :  { %3312 = vmatprep.subr.bf16.mxu1 %v3641_v61  ;;  %v3689_v61 = vld [vmem:[%s4734_s1 + $0x3c8] sm:$0xff]   ;;  %v3735_v51 = vld [vmem:[%s4734_s1 + $0x4a0] sm:$0xff]  }
  0x38   :  { %3291 = vmatpush3.bf16.msra.mxu0 %v3642_v62  ;;  %v3690_v62 = vld [vmem:[%s4734_s1 + $0x308] sm:$0xff]  }
  0x39   :  { %3313 = vmatpush3.bf16.msra.mxu1 %v3643_v63  ;;  %3292 = vmatprep.subr.bf16.mxu0 %v3644_v0  ;;  %v3691_v63 = vld [vmem:[%s4734_s1 + $0x388] sm:$0xff]   ;;  %v3692_v0 = vld [vmem:[%s4734_s1 + $0x350] sm:$0xff]  }
  0x3a   :  { %3314 = vmatprep.subr.bf16.mxu1 %v3645_v1  ;;  %v3693_v1 = vld [vmem:[%s4734_s1 + $0x3d0] sm:$0xff]  }
  0x3c   :  { %3293 = vmatpush3.bf16.msra.mxu0 %v3646_v2  ;;  %v3694_v2 = vld [vmem:[%s4734_s1 + $0x310] sm:$0xff]  }
  0x3d   :  { %3315 = vmatpush3.bf16.msra.mxu1 %v3647_v3  ;;  %3294 = vmatprep.subr.bf16.mxu0 %v3648_v4  ;;  %v3695_v3 = vld [vmem:[%s4734_s1 + $0x390] sm:$0xff]   ;;  %v3696_v4 = vld [vmem:[%s4734_s1 + $0x358] sm:$0xff]  }
  0x3e   :  { %3316 = vmatprep.subr.bf16.mxu1 %v3649_v5  ;;  %v3697_v5 = vld [vmem:[%s4734_s1 + $0x3d8] sm:$0xff]  }
  0x40   :  { %3295 = vmatpush3.bf16.msra.mxu0 %v3650_v6  ;;  %v3698_v6 = vld [vmem:[%s4734_s1 + $0x318] sm:$0xff]  }
  0x41   :  { %3317 = vmatpush3.bf16.msra.mxu1 %v3651_v7  ;;  %3324 = vmatprep.subr.bf16.mxu0 %v3652_v16  ;;  %v3699_v7 = vld [vmem:[%s4734_s1 + $0x398] sm:$0xff]   ;;  %v3708_v16 = vld [vmem:[%s4734_s1 + $0x370] sm:$0xff]  }
  0x42   :  { %3346 = vmatprep.subr.bf16.mxu1 %v3653_v17  ;;  %v3709_v17 = vld [vmem:[%s4734_s1 + $0x3f0] sm:$0xff]  }
  0x43   :  { %2377 = vmatmul.mubr.bf16.vlgmr.msra.gmra.mrb[4].mxu0 %v2943_v10  ;;  %v3702_v10 = vld [vmem:[%s4734_s1 + $0x320] sm:$0xff]  }
  0x44   :  { %2418 = vmatmul.mubr.bf16.vlgmr.msra.gmra.mrb[4].mxu1 %v2945_v14  ;;  %3325 = vmatpush3.bf16.msra.mxu0 %v3654_v18  ;;  %v3706_v14 = vld [vmem:[%s4734_s1 + $0x328] sm:$0xff]   ;;  %v3710_v18 = vld [vmem:[%s4734_s1 + $0x330] sm:$0xff]  }
  0x45   :  { %3347 = vmatpush3.bf16.msra.mxu1 %v3655_v19  ;;  %3326 = vmatprep.subr.bf16.mxu0 %v3656_v20  ;;  %v3711_v19 = vld [vmem:[%s4734_s1 + $0x3b0] sm:$0xff]   ;;  %v3712_v20 = vld [vmem:[%s4734_s1 + $0x378] sm:$0xff]  }
  0x46   :  { %3348 = vmatprep.subr.bf16.mxu1 %v3657_v21  ;;  %2458 = vmatprep.mubr.bf16.mxu0 %v2948_v53  ;;  %v3713_v21 = vld [vmem:[%s4734_s1 + $0x3f8] sm:$0xff]   ;;  %v3737_v53 = vld [vmem:[%s4734_s1 + $0x4e8] sm:$0xff]  }
  0x47   :  { %2499 = vmatprep.mubr.bf16.mxu1 %v2950_v55  ;;  %v3739_v55 = vld [vmem:[%s4734_s1 + $0x4a8] sm:$0xff]  }
  0x48   :  { %3327 = vmatpush3.bf16.msra.mxu0 %v3658_v22  ;;  %v3714_v22 = vld [vmem:[%s4734_s1 + $0x338] sm:$0xff]  }
  0x49   :  { %3349 = vmatpush3.bf16.msra.mxu1 %v3659_v23  ;;  %3328 = vmatprep.subr.bf16.mxu0 %v3660_v24  ;;  %v3715_v23 = vld [vmem:[%s4734_s1 + $0x3b8] sm:$0xff]   ;;  %v21_v24 = vld [vmem:[%s4735_s0 + $0x30] sm:$0xff] }
  0x4a   :  { %3350 = vmatprep.subr.bf16.mxu1 %v3661_v25  ;;  %v37_v25 = vld [vmem:[%s4735_s0 + $0xb0] sm:$0xff] }
  0x4c   :  { %3329 = vmatpush3.bf16.msra.mxu0 %v3662_v26  ;;  %v22_v26 = vld [vmem:[%s4735_s0 + $0x38] sm:$0xff] }
  0x4d   :  { %3351 = vmatpush3.bf16.msra.mxu1 %v3663_v27  ;;  %3330 = vmatprep.subr.bf16.mxu0 %v3664_v28  ;;  %v2951_v27 = vcombine.low %v21_v24, %v37_v25  ;;  %v2952_v28 = vcombine.high %v21_v24, %v37_v25  ;;  %v3764_v24 = vld [vmem:[%s4734_s1 + $0x560] sm:$0xff]  }
  0x4e   :  { %3352 = vmatprep.subr.bf16.mxu1 %v3665_v29  ;;  %v38_v29 = vld [vmem:[%s4735_s0 + $0xb8] sm:$0xff]  ;;  %v3765_v25 = vld [vmem:[%s4734_s1 + $0x5e0] sm:$0xff]  }
  0x50   :  { %3331 = vmatpush3.bf16.msra.mxu0 %v3666_v30  ;;  %v2953_v30 = vcombine.low %v22_v26, %v38_v29 }
  0x51   :  { %3353 = vmatpush3.bf16.msra.mxu1 %v3667_v31  ;;  %3332 = vmatprep.subr.bf16.mxu0 %v3668_v32  ;;  %v2954_v31 = vcombine.high %v22_v26, %v38_v29  ;;  %v3716_v32 = vld [vmem:[%s4734_s1 + $0x440] sm:$0xff]   ;;  %v3769_v29 = vld [vmem:[%s4734_s1 + $0x5e8] sm:$0xff]  }
  0x52   :  { %3354 = vmatprep.subr.bf16.mxu1 %v3669_v33  ;;  %v3717_v33 = vld [vmem:[%s4734_s1 + $0x4c0] sm:$0xff]  }
  0x53   :  { %v3766_v26 = vld [vmem:[%s4734_s1 + $0x520] sm:$0xff]  }
  0x54   :  { %3333 = vmatpush3.bf16.msra.mxu0 %v3670_v34  ;;  %v3718_v34 = vld [vmem:[%s4734_s1 + $0x400] sm:$0xff]  }
  0x55   :  { %3355 = vmatpush3.bf16.msra.mxu1 %v3671_v35  ;;  %3334 = vmatprep.subr.bf16.mxu0 %v3672_v36  ;;  %v3719_v35 = vld [vmem:[%s4734_s1 + $0x480] sm:$0xff]   ;;  %v3720_v36 = vld [vmem:[%s4734_s1 + $0x448] sm:$0xff]  }
  0x56   :  { %3356 = vmatprep.subr.bf16.mxu1 %v3673_v37  ;;  %v3721_v37 = vld [vmem:[%s4734_s1 + $0x4c8] sm:$0xff]  }
  0x58   :  { %3335 = vmatpush3.bf16.msra.mxu0 %v3674_v38  ;;  %v3722_v38 = vld [vmem:[%s4734_s1 + $0x408] sm:$0xff]  }
  0x59   :  { %3357 = vmatpush3.bf16.msra.mxu1 %v3675_v39  ;;  %3336 = vmatprep.subr.bf16.mxu0 %v3676_v40  ;;  %v3723_v39 = vld [vmem:[%s4734_s1 + $0x488] sm:$0xff]   ;;  %v3724_v40 = vld [vmem:[%s4734_s1 + $0x450] sm:$0xff]  }
  0x5a   :  { %3358 = vmatprep.subr.bf16.mxu1 %v3677_v41  ;;  %v3725_v41 = vld [vmem:[%s4734_s1 + $0x4d0] sm:$0xff]  }
  0x5c   :  { %3337 = vmatpush3.bf16.msra.mxu0 %v3678_v42  ;;  %v3726_v42 = vld [vmem:[%s4734_s1 + $0x410] sm:$0xff]  }
  0x5d   :  { %3359 = vmatpush3.bf16.msra.mxu1 %v3679_v43  ;;  %3338 = vmatprep.subr.bf16.mxu0 %v3680_v44  ;;  %v3727_v43 = vld [vmem:[%s4734_s1 + $0x490] sm:$0xff]   ;;  %v3728_v44 = vld [vmem:[%s4734_s1 + $0x458] sm:$0xff]  }
  0x5e   :  { %3360 = vmatprep.subr.bf16.mxu1 %v3681_v45  ;;  %v3729_v45 = vld [vmem:[%s4734_s1 + $0x4d8] sm:$0xff]  }
  0x60   :  { %3339 = vmatpush3.bf16.msra.mxu0 %v3682_v46  ;;  %v3730_v46 = vld [vmem:[%s4734_s1 + $0x418] sm:$0xff]  }
  0x61   :  { %3361 = vmatpush3.bf16.msra.mxu1 %v3683_v47  ;;  %3368 = vmatprep.subr.bf16.mxu0 %v3684_v56  ;;  %v3731_v47 = vld [vmem:[%s4734_s1 + $0x498] sm:$0xff]   ;;  %v3740_v56 = vld [vmem:[%s4734_s1 + $0x470] sm:$0xff]  }
  0x62   :  { %3390 = vmatprep.subr.bf16.mxu1 %v3685_v57  ;;  %v3741_v57 = vld [vmem:[%s4734_s1 + $0x4f0] sm:$0xff]  }
  0x63   :  { %2459 = vmatmul.mubr.bf16.vlgmr.msra.gmra.mrb[8].mxu0 %v2947_v52  ;;  %v3736_v52 = vld [vmem:[%s4734_s1 + $0x468] sm:$0xff]  }
  0x64   :  { %2500 = vmatmul.mubr.bf16.vlgmr.msra.gmra.mrb[8].mxu1 %v2949_v54  ;;  %3369 = vmatpush3.bf16.msra.mxu0 %v3686_v58  ;;  %v3738_v54 = vld [vmem:[%s4734_s1 + $0x428] sm:$0xff]   ;;  %v3742_v58 = vld [vmem:[%s4734_s1 + $0x430] sm:$0xff]  }
  0x65   :  { %3391 = vmatpush3.bf16.msra.mxu1 %v3687_v59  ;;  %3370 = vmatprep.subr.bf16.mxu0 %v3688_v60  ;;  %v3743_v59 = vld [vmem:[%s4734_s1 + $0x4b0] sm:$0xff]   ;;  %v3744_v60 = vld [vmem:[%s4734_s1 + $0x478] sm:$0xff]  }
  0x66   :  { %3392 = vmatprep.subr.bf16.mxu1 %v3689_v61  ;;  %2540 = vmatprep.mubr.bf16.mxu0 %v2952_v28  ;;  %v3745_v61 = vld [vmem:[%s4734_s1 + $0x4f8] sm:$0xff]   ;;  %v3768_v28 = vld [vmem:[%s4734_s1 + $0x568] sm:$0xff]  }
  0x67   :  { %2581 = vmatprep.mubr.bf16.mxu1 %v2954_v31  ;;  %v3771_v31 = vld [vmem:[%s4734_s1 + $0x5a8] sm:$0xff]  }
  0x68   :  { %3371 = vmatpush3.bf16.msra.mxu0 %v3690_v62  ;;  %v3746_v62 = vld [vmem:[%s4734_s1 + $0x438] sm:$0xff]  }
  0x69   :  { %3393 = vmatpush3.bf16.msra.mxu1 %v3691_v63  ;;  %3372 = vmatprep.subr.bf16.mxu0 %v3692_v0  ;;  %v3747_v63 = vld [vmem:[%s4734_s1 + $0x4b8] sm:$0xff]   ;;  %v23_v0 = vld [vmem:[%s4735_s0 + $0x40] sm:$0xff] }
  0x6a   :  { %3394 = vmatprep.subr.bf16.mxu1 %v3693_v1  ;;  %v39_v1 = vld [vmem:[%s4735_s0 + $0xc0] sm:$0xff] }
  0x6c   :  { %3373 = vmatpush3.bf16.msra.mxu0 %v3694_v2  ;;  %v2955_v2 = vcombine.low %v23_v0, %v39_v1 }
  0x6d   :  { %3395 = vmatpush3.bf16.msra.mxu1 %v3695_v3  ;;  %3374 = vmatprep.subr.bf16.mxu0 %v3696_v4  ;;  %v2956_v3 = vcombine.high %v23_v0, %v39_v1  ;;  %v24_v4 = vld [vmem:[%s4735_s0 + $0x48] sm:$0xff]  ;;  %v3796_v0 = vld [vmem:[%s4734_s1 + $0x660] sm:$0xff]  }
  0x6e   :  { %3396 = vmatprep.subr.bf16.mxu1 %v3697_v5  ;;  %v40_v5 = vld [vmem:[%s4735_s0 + $0xc8] sm:$0xff]  ;;  %v3797_v1 = vld [vmem:[%s4734_s1 + $0x6e0] sm:$0xff]  }
  0x70   :  { %3375 = vmatpush3.bf16.msra.mxu0 %v3698_v6  ;;  %v2957_v6 = vcombine.low %v24_v4, %v40_v5 }
  0x71   :  { %3397 = vmatpush3.bf16.msra.mxu1 %v3699_v7  ;;  %3376 = vmatprep.subr.bf16.mxu0 %v3700_v8  ;;  %v2958_v7 = vcombine.high %v24_v4, %v40_v5  ;;  %v3748_v8 = vld [vmem:[%s4734_s1 + $0x540] sm:$0xff]   ;;  %v3800_v4 = vld [vmem:[%s4734_s1 + $0x668] sm:$0xff]  }
  0x72   :  { %3398 = vmatprep.subr.bf16.mxu1 %v3701_v9  ;;  %v3749_v9 = vld [vmem:[%s4734_s1 + $0x5c0] sm:$0xff]   ;;  %v3801_v5 = vld [vmem:[%s4734_s1 + $0x6e8] sm:$0xff]  }
  0x74   :  { %3377 = vmatpush3.bf16.msra.mxu0 %v3702_v10  ;;  %v3750_v10 = vld [vmem:[%s4734_s1 + $0x500] sm:$0xff]  }
  0x75   :  { %3399 = vmatpush3.bf16.msra.mxu1 %v3703_v11  ;;  %3378 = vmatprep.subr.bf16.mxu0 %v3704_v12  ;;  %v3751_v11 = vld [vmem:[%s4734_s1 + $0x580] sm:$0xff]   ;;  %v3752_v12 = vld [vmem:[%s4734_s1 + $0x548] sm:$0xff]  }
  0x76   :  { %3400 = vmatprep.subr.bf16.mxu1 %v3705_v13  ;;  %v3753_v13 = vld [vmem:[%s4734_s1 + $0x5c8] sm:$0xff]  }
  0x78   :  { %3379 = vmatpush3.bf16.msra.mxu0 %v3706_v14  ;;  %v3754_v14 = vld [vmem:[%s4734_s1 + $0x508] sm:$0xff]  }
  0x79   :  { %3401 = vmatpush3.bf16.msra.mxu1 %v3707_v15  ;;  %3380 = vmatprep.subr.bf16.mxu0 %v3708_v16  ;;  %v3755_v15 = vld [vmem:[%s4734_s1 + $0x588] sm:$0xff]   ;;  %v3756_v16 = vld [vmem:[%s4734_s1 + $0x550] sm:$0xff]  }
  0x7a   :  { %3402 = vmatprep.subr.bf16.mxu1 %v3709_v17  ;;  %v3757_v17 = vld [vmem:[%s4734_s1 + $0x5d0] sm:$0xff]  }
  0x7c   :  { %3381 = vmatpush3.bf16.msra.mxu0 %v3710_v18  ;;  %v3758_v18 = vld [vmem:[%s4734_s1 + $0x510] sm:$0xff]  }
  0x7d   :  { %3403 = vmatpush3.bf16.msra.mxu1 %v3711_v19  ;;  %3382 = vmatprep.subr.bf16.mxu0 %v3712_v20  ;;  %v3759_v19 = vld [vmem:[%s4734_s1 + $0x590] sm:$0xff]   ;;  %v3760_v20 = vld [vmem:[%s4734_s1 + $0x558] sm:$0xff]  }
  0x7e   :  { %3404 = vmatprep.subr.bf16.mxu1 %v3713_v21  ;;  %v3761_v21 = vld [vmem:[%s4734_s1 + $0x5d8] sm:$0xff]  }
  0x80   :  { %3383 = vmatpush3.bf16.msra.mxu0 %v3714_v22  ;;  %v3762_v22 = vld [vmem:[%s4734_s1 + $0x518] sm:$0xff]  }
  0x81   :  { %3405 = vmatpush3.bf16.msra.mxu1 %v3715_v23  ;;  %3412 = vmatprep.subr.bf16.mxu0 %v3716_v32  ;;  %v3763_v23 = vld [vmem:[%s4734_s1 + $0x598] sm:$0xff]   ;;  %v3772_v32 = vld [vmem:[%s4734_s1 + $0x570] sm:$0xff]  }
  0x82   :  { %3434 = vmatprep.subr.bf16.mxu1 %v3717_v33  ;;  %v3773_v33 = vld [vmem:[%s4734_s1 + $0x5f0] sm:$0xff]  }
  0x83   :  { %2541 = vmatmul.mubr.bf16.vlgmr.msra.gmra.mrb[12].mxu0 %v2951_v27  ;;  %v3767_v27 = vld [vmem:[%s4734_s1 + $0x5a0] sm:$0xff]  }
  0x84   :  { %2582 = vmatmul.mubr.bf16.vlgmr.msra.gmra.mrb[12].mxu1 %v2953_v30  ;;  %3413 = vmatpush3.bf16.msra.mxu0 %v3718_v34  ;;  %v3770_v30 = vld [vmem:[%s4734_s1 + $0x528] sm:$0xff]   ;;  %v3774_v34 = vld [vmem:[%s4734_s1 + $0x530] sm:$0xff]  }
  0x85   :  { %3435 = vmatpush3.bf16.msra.mxu1 %v3719_v35  ;;  %3414 = vmatprep.subr.bf16.mxu0 %v3720_v36  ;;  %v3775_v35 = vld [vmem:[%s4734_s1 + $0x5b0] sm:$0xff]   ;;  %v3776_v36 = vld [vmem:[%s4734_s1 + $0x578] sm:$0xff]  }
  0x86   :  { %3436 = vmatprep.subr.bf16.mxu1 %v3721_v37  ;;  %2622 = vmatprep.mubr.bf16.mxu0 %v2956_v3  ;;  %v3777_v37 = vld [vmem:[%s4734_s1 + $0x5f8] sm:$0xff]   ;;  %v3799_v3 = vld [vmem:[%s4734_s1 + $0x6a0] sm:$0xff]  }
  0x87   :  { %2663 = vmatprep.mubr.bf16.mxu1 %v2958_v7  ;;  %v3803_v7 = vld [vmem:[%s4734_s1 + $0x6a8] sm:$0xff]  }
  0x88   :  { %3415 = vmatpush3.bf16.msra.mxu0 %v3722_v38  ;;  %v3778_v38 = vld [vmem:[%s4734_s1 + $0x538] sm:$0xff]  }
  0x89   :  { %3437 = vmatpush3.bf16.msra.mxu1 %v3723_v39  ;;  %3416 = vmatprep.subr.bf16.mxu0 %v3724_v40  ;;  %v3779_v39 = vld [vmem:[%s4734_s1 + $0x5b8] sm:$0xff]   ;;  %v25_v40 = vld [vmem:[%s4735_s0 + $0x50] sm:$0xff] }
  0x8a   :  { %3438 = vmatprep.subr.bf16.mxu1 %v3725_v41  ;;  %v41_v41 = vld [vmem:[%s4735_s0 + $0xd0] sm:$0xff] }
  0x8c   :  { %3417 = vmatpush3.bf16.msra.mxu0 %v3726_v42  ;;  %v26_v42 = vld [vmem:[%s4735_s0 + $0x58] sm:$0xff] }
  0x8d   :  { %3439 = vmatpush3.bf16.msra.mxu1 %v3727_v43  ;;  %3418 = vmatprep.subr.bf16.mxu0 %v3728_v44  ;;  %v42_v43 = vld [vmem:[%s4735_s0 + $0xd8] sm:$0xff]  ;;  %v2959_v44 = vcombine.low %v25_v40, %v41_v41 }
  0x8e   :  { %3440 = vmatprep.subr.bf16.mxu1 %v3729_v45  ;;  %v2960_v45 = vcombine.high %v25_v40, %v41_v41  ;;  %v3827_v41 = vld [vmem:[%s4734_s1 + $0x798] sm:$0xff]  }
  0x90   :  { %3419 = vmatpush3.bf16.msra.mxu0 %v3730_v46  ;;  %v2961_v46 = vcombine.low %v26_v42, %v42_v43 }
  0x91   :  { %3441 = vmatpush3.bf16.msra.mxu1 %v3731_v47  ;;  %3420 = vmatprep.subr.bf16.mxu0 %v3732_v48  ;;  %v2962_v47 = vcombine.high %v26_v42, %v42_v43  ;;  %v3780_v48 = vld [vmem:[%s4734_s1 + $0x640] sm:$0xff]  }
  0x92   :  { %3442 = vmatprep.subr.bf16.mxu1 %v3733_v49  ;;  %v3781_v49 = vld [vmem:[%s4734_s1 + $0x6c0] sm:$0xff]  }
  0x93   :  { %v3828_v43 = vld [vmem:[%s4734_s1 + $0x760] sm:$0xff]  }
  0x94   :  { %3421 = vmatpush3.bf16.msra.mxu0 %v3734_v50  ;;  %v3782_v50 = vld [vmem:[%s4734_s1 + $0x600] sm:$0xff]  }
  0x95   :  { %3443 = vmatpush3.bf16.msra.mxu1 %v3735_v51  ;;  %3422 = vmatprep.subr.bf16.mxu0 %v3736_v52  ;;  %v3783_v51 = vld [vmem:[%s4734_s1 + $0x680] sm:$0xff]   ;;  %v3784_v52 = vld [vmem:[%s4734_s1 + $0x648] sm:$0xff]  }
  0x96   :  { %3444 = vmatprep.subr.bf16.mxu1 %v3737_v53  ;;  %v3785_v53 = vld [vmem:[%s4734_s1 + $0x6c8] sm:$0xff]  }
  0x98   :  { %3423 = vmatpush3.bf16.msra.mxu0 %v3738_v54  ;;  %v3786_v54 = vld [vmem:[%s4734_s1 + $0x608] sm:$0xff]  }
  0x99   :  { %3445 = vmatpush3.bf16.msra.mxu1 %v3739_v55  ;;  %3424 = vmatprep.subr.bf16.mxu0 %v3740_v56  ;;  %v3787_v55 = vld [vmem:[%s4734_s1 + $0x688] sm:$0xff]   ;;  %v3788_v56 = vld [vmem:[%s4734_s1 + $0x650] sm:$0xff]  }
  0x9a   :  { %3446 = vmatprep.subr.bf16.mxu1 %v3741_v57  ;;  %v3789_v57 = vld [vmem:[%s4734_s1 + $0x6d0] sm:$0xff]  }
  0x9c   :  { %3425 = vmatpush3.bf16.msra.mxu0 %v3742_v58  ;;  %v3790_v58 = vld [vmem:[%s4734_s1 + $0x610] sm:$0xff]  }
  0x9d   :  { %3447 = vmatpush3.bf16.msra.mxu1 %v3743_v59  ;;  %3426 = vmatprep.subr.bf16.mxu0 %v3744_v60  ;;  %v3791_v59 = vld [vmem:[%s4734_s1 + $0x690] sm:$0xff]   ;;  %v3792_v60 = vld [vmem:[%s4734_s1 + $0x658] sm:$0xff]  }
  0x9e   :  { %3448 = vmatprep.subr.bf16.mxu1 %v3745_v61  ;;  %v3793_v61 = vld [vmem:[%s4734_s1 + $0x6d8] sm:$0xff]  }
  0xa0   :  { %3427 = vmatpush3.bf16.msra.mxu0 %v3746_v62  ;;  %v3794_v62 = vld [vmem:[%s4734_s1 + $0x618] sm:$0xff]  }
  0xa1   :  { %3449 = vmatpush3.bf16.msra.mxu1 %v3747_v63  ;;  %3456 = vmatprep.subr.bf16.mxu0 %v3748_v8  ;;  %v3795_v63 = vld [vmem:[%s4734_s1 + $0x698] sm:$0xff]   ;;  %v3804_v8 = vld [vmem:[%s4734_s1 + $0x670] sm:$0xff]  }
  0xa2   :  { %3478 = vmatprep.subr.bf16.mxu1 %v3749_v9  ;;  %v3805_v9 = vld [vmem:[%s4734_s1 + $0x6f0] sm:$0xff]  }
  0xa3   :  { %2623 = vmatmul.mubr.bf16.vlgmr.msra.gmra.mrb[16].mxu0 %v2955_v2  ;;  %v3798_v2 = vld [vmem:[%s4734_s1 + $0x620] sm:$0xff]  }
  0xa4   :  { %2664 = vmatmul.mubr.bf16.vlgmr.msra.gmra.mrb[16].mxu1 %v2957_v6  ;;  %3457 = vmatpush3.bf16.msra.mxu0 %v3750_v10  ;;  %v3802_v6 = vld [vmem:[%s4734_s1 + $0x628] sm:$0xff]   ;;  %v3806_v10 = vld [vmem:[%s4734_s1 + $0x630] sm:$0xff]  }
  0xa5   :  { %3479 = vmatpush3.bf16.msra.mxu1 %v3751_v11  ;;  %3458 = vmatprep.subr.bf16.mxu0 %v3752_v12  ;;  %v3807_v11 = vld [vmem:[%s4734_s1 + $0x6b0] sm:$0xff]   ;;  %v3808_v12 = vld [vmem:[%s4734_s1 + $0x678] sm:$0xff]  }
  0xa6   :  { %3480 = vmatprep.subr.bf16.mxu1 %v3753_v13  ;;  %2704 = vmatprep.mubr.bf16.mxu0 %v2960_v45  ;;  %v3809_v13 = vld [vmem:[%s4734_s1 + $0x6f8] sm:$0xff]  }
  0xa7   :  { %2745 = vmatprep.mubr.bf16.mxu1 %v2962_v47 }
  0xa8   :  { %3459 = vmatpush3.bf16.msra.mxu0 %v3754_v14  ;;  %v3810_v14 = vld [vmem:[%s4734_s1 + $0x638] sm:$0xff]  }
  0xa9   :  { %3481 = vmatpush3.bf16.msra.mxu1 %v3755_v15  ;;  %3460 = vmatprep.subr.bf16.mxu0 %v3756_v16  ;;  %v3811_v15 = vld [vmem:[%s4734_s1 + $0x6b8] sm:$0xff]   ;;  %v27_v16 = vld [vmem:[%s4735_s0 + $0x60] sm:$0xff] }
  0xaa   :  { %3482 = vmatprep.subr.bf16.mxu1 %v3757_v17  ;;  %v43_v17 = vld [vmem:[%s4735_s0 + $0xe0] sm:$0xff] }
  0xac   :  { %3461 = vmatpush3.bf16.msra.mxu0 %v3758_v18  ;;  %v28_v18 = vld [vmem:[%s4735_s0 + $0x68] sm:$0xff] }
  0xad   :  { %3483 = vmatpush3.bf16.msra.mxu1 %v3759_v19  ;;  %3462 = vmatprep.subr.bf16.mxu0 %v3760_v20  ;;  %v2963_v19 = vcombine.low %v27_v16, %v43_v17  ;;  %v2964_v20 = vcombine.high %v27_v16, %v43_v17 }
  0xae   :  { %3484 = vmatprep.subr.bf16.mxu1 %v3761_v21  ;;  %v44_v21 = vld [vmem:[%s4735_s0 + $0xe8] sm:$0xff] }
  0xb0   :  { %3463 = vmatpush3.bf16.msra.mxu0 %v3762_v22  ;;  %v2965_v22 = vcombine.low %v28_v18, %v44_v21 }
  0xb1   :  { %3485 = vmatpush3.bf16.msra.mxu1 %v3763_v23  ;;  %3464 = vmatprep.subr.bf16.mxu0 %v3764_v24  ;;  %v2966_v23 = vcombine.high %v28_v18, %v44_v21  ;;  %v3812_v24 = vld [vmem:[%s4734_s1 + $0x740] sm:$0xff]  }
  0xb2   :  { %3486 = vmatprep.subr.bf16.mxu1 %v3765_v25  ;;  %v3813_v25 = vld [vmem:[%s4734_s1 + $0x7c0] sm:$0xff]  }
  0xb4   :  { %3465 = vmatpush3.bf16.msra.mxu0 %v3766_v26  ;;  %v3814_v26 = vld [vmem:[%s4734_s1 + $0x700] sm:$0xff]  }
  0xb5   :  { %3487 = vmatpush3.bf16.msra.mxu1 %v3767_v27  ;;  %3466 = vmatprep.subr.bf16.mxu0 %v3768_v28  ;;  %v3815_v27 = vld [vmem:[%s4734_s1 + $0x780] sm:$0xff]   ;;  %v3816_v28 = vld [vmem:[%s4734_s1 + $0x748] sm:$0xff]  }
  0xb6   :  { %3488 = vmatprep.subr.bf16.mxu1 %v3769_v29  ;;  %v3817_v29 = vld [vmem:[%s4734_s1 + $0x7c8] sm:$0xff]  }
  0xb8   :  { %3467 = vmatpush3.bf16.msra.mxu0 %v3770_v30  ;;  %v3818_v30 = vld [vmem:[%s4734_s1 + $0x708] sm:$0xff]  }
  0xb9   :  { %3489 = vmatpush3.bf16.msra.mxu1 %v3771_v31  ;;  %3468 = vmatprep.subr.bf16.mxu0 %v3772_v32  ;;  %v3819_v31 = vld [vmem:[%s4734_s1 + $0x788] sm:$0xff]   ;;  %v3820_v32 = vld [vmem:[%s4734_s1 + $0x750] sm:$0xff]  }
  0xba   :  { %3490 = vmatprep.subr.bf16.mxu1 %v3773_v33  ;;  %v3821_v33 = vld [vmem:[%s4734_s1 + $0x7d0] sm:$0xff]  }
  0xbc   :  { %3469 = vmatpush3.bf16.msra.mxu0 %v3774_v34  ;;  %v3822_v34 = vld [vmem:[%s4734_s1 + $0x710] sm:$0xff]  }
  0xbd   :  { %3491 = vmatpush3.bf16.msra.mxu1 %v3775_v35  ;;  %3470 = vmatprep.subr.bf16.mxu0 %v3776_v36  ;;  %v3823_v35 = vld [vmem:[%s4734_s1 + $0x790] sm:$0xff]   ;;  %v3824_v36 = vld [vmem:[%s4734_s1 + $0x758] sm:$0xff]  }
  0xbe   :  { %3492 = vmatprep.subr.bf16.mxu1 %v3777_v37  ;;  %v3825_v37 = vld [vmem:[%s4734_s1 + $0x7d8] sm:$0xff]  }
  0xc0   :  { %3471 = vmatpush3.bf16.msra.mxu0 %v3778_v38 }
  0xc1   :  { %3493 = vmatpush3.bf16.msra.mxu1 %v3779_v39  ;;  %3500 = vmatprep.subr.bf16.mxu0 %v3780_v48  ;;  %v3826_v39 = vld [vmem:[%s4734_s1 + $0x718] sm:$0xff]  }
  0xc2   :  { %3522 = vmatprep.subr.bf16.mxu1 %v3781_v49  ;;  %v3830_v49 = vld [vmem:[%s4734_s1 + $0x720] sm:$0xff]  }
  0xc3   :  { %2705 = vmatmul.mubr.bf16.vlgmr.msra.gmra.mrb[20].mxu0 %v2959_v44 }
  0xc4   :  { %2746 = vmatmul.mubr.bf16.vlgmr.msra.gmra.mrb[20].mxu1 %v2961_v46  ;;  %3501 = vmatpush3.bf16.msra.mxu0 %v3782_v50  ;;  %v3829_v46 = vld [vmem:[%s4734_s1 + $0x7e0] sm:$0xff]  }
  0xc5   :  { %3523 = vmatpush3.bf16.msra.mxu1 %v3783_v51  ;;  %3502 = vmatprep.subr.bf16.mxu0 %v3784_v52  ;;  %v3831_v51 = vld [vmem:[%s4734_s1 + $0x7a0] sm:$0xff]  }
  0xc6   :  { %3524 = vmatprep.subr.bf16.mxu1 %v3785_v53  ;;  %2786 = vmatprep.mubr.bf16.mxu0 %v2964_v20  ;;  %v2938_v52 = vld [vmem:[%s4736_s2] ss:$0 sm:$0xff] }
  0xc7   :  { %2827 = vmatprep.mubr.bf16.mxu1 %v2966_v23 }
  0xc8   :  { %3503 = vmatpush3.bf16.msra.mxu0 %v3786_v54 }
  0xc9   :  { %3525 = vmatpush3.bf16.msra.mxu1 %v3787_v55  ;;  %3504 = vmatprep.subr.bf16.mxu0 %v3788_v56  ;;  %v3832_v55 = vld [vmem:[%s4734_s1 + $0x768] sm:$0xff]  }
  0xca   :  { %3526 = vmatprep.subr.bf16.mxu1 %v3789_v57 }
  0xcc   :  { %3505 = vmatpush3.bf16.msra.mxu0 %v3790_v58  ;;  %v3833_v58 = vld [vmem:[%s4734_s1 + $0x7e8] sm:$0xff]  }
  0xcd   :  { %3527 = vmatpush3.bf16.msra.mxu1 %v3791_v59  ;;  %3506 = vmatprep.subr.bf16.mxu0 %v3792_v60 }
  0xce   :  { %3528 = vmatprep.subr.bf16.mxu1 %v3793_v61  ;;  %v3834_v61 = vld [vmem:[%s4734_s1 + $0x728] sm:$0xff]  }
  0xd0   :  { %3507 = vmatpush3.bf16.msra.mxu0 %v3794_v62 }
  0xd1   :  { %3529 = vmatpush3.bf16.msra.mxu1 %v3795_v63  ;;  %3508 = vmatprep.subr.bf16.mxu0 %v3796_v0  ;;  %v3835_v63 = vld [vmem:[%s4734_s1 + $0x7a8] sm:$0xff]  }
  0xd2   :  { %3530 = vmatprep.subr.bf16.mxu1 %v3797_v1  ;;  %v3836_v1 = vld [vmem:[%s4734_s1 + $0x770] sm:$0xff]  }
  0xd4   :  { %3509 = vmatpush3.bf16.msra.mxu0 %v3798_v2  ;;  %v3837_v2 = vld [vmem:[%s4734_s1 + $0x7f0] sm:$0xff]  }
  0xd5   :  { %3531 = vmatpush3.bf16.msra.mxu1 %v3799_v3  ;;  %3510 = vmatprep.subr.bf16.mxu0 %v3800_v4  ;;  %v3838_v3 = vld [vmem:[%s4734_s1 + $0x730] sm:$0xff]  }
  0xd6   :  { %3532 = vmatprep.subr.bf16.mxu1 %v3801_v5  ;;  %v3839_v4 = vld [vmem:[%s4734_s1 + $0x7b0] sm:$0xff]   ;;  %v3840_v5 = vld [vmem:[%s4734_s1 + $0x778] sm:$0xff]  }
  0xd8   :  { %3511 = vmatpush3.bf16.msra.mxu0 %v3802_v6  ;;  %v3841_v6 = vld [vmem:[%s4734_s1 + $0x7f8] sm:$0xff]  }
  0xd9   :  { %3533 = vmatpush3.bf16.msra.mxu1 %v3803_v7  ;;  %3512 = vmatprep.subr.bf16.mxu0 %v3804_v8  ;;  %v3842_v7 = vld [vmem:[%s4734_s1 + $0x738] sm:$0xff]  }
  0xda   :  { %3534 = vmatprep.subr.bf16.mxu1 %v3805_v9  ;;  %v3843_v8 = vld [vmem:[%s4734_s1 + $0x7b8] sm:$0xff]   ;;  %v29_v9 = vld [vmem:[%s4735_s0 + $0x70] sm:$0xff] }
  0xdc   :  { %3513 = vmatpush3.bf16.msra.mxu0 %v3806_v10  ;;  %v45_v10 = vld [vmem:[%s4735_s0 + $0xf0] sm:$0xff] }
  0xdd   :  { %3535 = vmatpush3.bf16.msra.mxu1 %v3807_v11  ;;  %3514 = vmatprep.subr.bf16.mxu0 %v3808_v12  ;;  %v30_v11 = vld [vmem:[%s4735_s0 + $0x78] sm:$0xff] }
  0xde   :  { %3536 = vmatprep.subr.bf16.mxu1 %v3809_v13  ;;  %v46_v12 = vld [vmem:[%s4735_s0 + $0xf8] sm:$0xff]  ;;  %v2967_v13 = vcombine.low %v29_v9, %v45_v10 }
  0xdf   :  { %v2970_v16 = vcombine.high %v30_v11, %v46_v12 }
  0xe0   :  { %3515 = vmatpush3.bf16.msra.mxu0 %v3810_v14  ;;  %v2968_v14 = vcombine.high %v29_v9, %v45_v10 }
  0xe1   :  { %3537 = vmatpush3.bf16.msra.mxu1 %v3811_v15  ;;  %3544 = vmatprep.subr.bf16.mxu0 %v3812_v24  ;;  %v2969_v15 = vcombine.low %v30_v11, %v46_v12 }
  0xe2   :  { %3566 = vmatprep.subr.bf16.mxu1 %v3813_v25 }
  0xe3   :  { %2787 = vmatmul.mubr.bf16.vlgmr.msra.gmra.mrb[24].mxu0 %v2963_v19 }
  0xe4   :  { %2828 = vmatmul.mubr.bf16.vlgmr.msra.gmra.mrb[24].mxu1 %v2965_v22  ;;  %3545 = vmatpush3.bf16.msra.mxu0 %v3814_v26 }
  0xe5   :  { %3567 = vmatpush3.bf16.msra.mxu1 %v3815_v27  ;;  %3546 = vmatprep.subr.bf16.mxu0 %v3816_v28 }
  0xe6   :  { %3568 = vmatprep.subr.bf16.mxu1 %v3817_v29  ;;  %2868 = vmatprep.mubr.bf16.mxu0 %v2968_v14 }
  0xe7   :  { %2909 = vmatprep.mubr.bf16.mxu1 %v2970_v16 }
  0xe8   :  { %3547 = vmatpush3.bf16.msra.mxu0 %v3818_v30 }
  0xe9   :  { %3569 = vmatpush3.bf16.msra.mxu1 %v3819_v31  ;;  %3548 = vmatprep.subr.bf16.mxu0 %v3820_v32 }
  0xea   :  { %3570 = vmatprep.subr.bf16.mxu1 %v3821_v33 }
  0xec   :  { %3549 = vmatpush3.bf16.msra.mxu0 %v3822_v34 }
  0xed   :  { %3571 = vmatpush3.bf16.msra.mxu1 %v3823_v35  ;;  %3550 = vmatprep.subr.bf16.mxu0 %v3824_v36 }
  0xee   :  { %3572 = vmatprep.subr.bf16.mxu1 %v3825_v37 }
  0xf0   :  { %3551 = vmatpush3.bf16.msra.mxu0 %v3826_v39 }
  0xf1   :  { %3573 = vmatpush3.bf16.msra.mxu1 %v3827_v41  ;;  %3552 = vmatprep.subr.bf16.mxu0 %v3828_v43 }
  0xf2   :  { %3574 = vmatprep.subr.bf16.mxu1 %v3829_v46 }
  0xf4   :  { %3553 = vmatpush3.bf16.msra.mxu0 %v3830_v49 }
  0xf5   :  { %3575 = vmatpush3.bf16.msra.mxu1 %v3831_v51  ;;  %3554 = vmatprep.subr.bf16.mxu0 %v3832_v55 }
  0xf6   :  { %v3252_v38 = vpop.f32.mrb[0].mxu0  ;;  %3576 = vmatprep.subr.bf16.mxu1 %v3833_v58 }
  0xf7   :  { %v3274_v40 = vpop.f32.mrb[0].mxu1  ;;  %v3253_v42 = vpop.f32.mrb[1].mxu0 }
  0xf8   :  { %v3254_v44 = vadd.f32 %v3253_v42, %v3252_v38  ;;  %v3275_v45 = vpop.f32.mrb[1].mxu1  ;;  %v3255_v48 = vpop.f32.mrb[2].mxu0  ;;  %3555 = vmatpush3.bf16.msra.mxu0 %v3834_v61 }
  0xf9   :  { %v3276_v47 = vadd.f32 %v3275_v45, %v3274_v40  ;;  %v3277_v50 = vpop.f32.mrb[2].mxu1  ;;  %v3256_v53 = vpop.f32.mrb[3].mxu0  ;;  %3577 = vmatpush3.bf16.msra.mxu1 %v3835_v63  ;;  %3556 = vmatprep.subr.bf16.mxu0 %v3836_v1 }
  0xfa   :  { %v2297_v54 = vadd.f32 %v3254_v44, %v2938_v52  ;;  %v3257_v56 = vadd.f32 %v3256_v53, %v3255_v48  ;;  %v3278_v57 = vpop.f32.mrb[3].mxu1  ;;  %3578 = vmatprep.subr.bf16.mxu1 %v3837_v2 }
  0xfb   :  { %v3279_v59 = vadd.f32 %v3278_v57, %v3277_v50 }
  0xfc   :  { %v2338_v60 = vadd.f32 %v3276_v47, %v2297_v54  ;;  %v2300_v62 = vadd.f32 %v3257_v56, %v2938_v52  ;;  %3557 = vmatpush3.bf16.msra.mxu0 %v3838_v3 }
  0xfd   :  { %3579 = vmatpush3.bf16.msra.mxu1 %v3839_v4  ;;  %3558 = vmatprep.subr.bf16.mxu0 %v3840_v5 }
  0xfe   :  { %v2341_v0 = vadd.f32 %v3279_v59, %v2300_v62  ;;  %3580 = vmatprep.subr.bf16.mxu1 %v3841_v6 }
 0x100   :  { %3559 = vmatpush3.bf16.msra.mxu0 %v3842_v7 }
 0x101   :  { %3581 = vmatpush3.bf16.msra.mxu1 %v3843_v8 }
 0x103   :  { %2869 = vmatmul.mubr.bf16.vlgmr.msra.gmra.mrb[28].mxu0 %v2967_v13 }
 0x104   :  { %2910 = vmatmul.mubr.bf16.vlgmr.msra.gmra.mrb[28].mxu1 %v2969_v15 }
 0x116   :  { %v3296_v17 = vpop.f32.mrb[4].mxu0 }
 0x117   :  { %v3318_v18 = vpop.f32.mrb[4].mxu1  ;;  %v3297_v19 = vpop.f32.mrb[5].mxu0 }
 0x118   :  { %v3298_v20 = vadd.f32 %v3297_v19, %v3296_v17  ;;  %v3319_v21 = vpop.f32.mrb[5].mxu1  ;;  %v3299_v22 = vpop.f32.mrb[6].mxu0 }
 0x119   :  { %v3320_v23 = vadd.f32 %v3319_v21, %v3318_v18  ;;  %v3321_v24 = vpop.f32.mrb[6].mxu1  ;;  %v3300_v25 = vpop.f32.mrb[7].mxu0 }
 0x11a   :  { %v2379_v26 = vadd.f32 %v3298_v20, %v2338_v60  ;;  %v3301_v27 = vadd.f32 %v3300_v25, %v3299_v22  ;;  %v3322_v28 = vpop.f32.mrb[7].mxu1 }
 0x11b   :  { %v3323_v29 = vadd.f32 %v3322_v28, %v3321_v24 }
 0x11c   :  { %v2420_v30 = vadd.f32 %v3320_v23, %v2379_v26  ;;  %v2382_v31 = vadd.f32 %v3301_v27, %v2341_v0 }
 0x11e   :  { %v2423_v32 = vadd.f32 %v3323_v29, %v2382_v31 }
 0x136   :  { %v3340_v33 = vpop.f32.mrb[8].mxu0 }
 0x137   :  { %v3362_v34 = vpop.f32.mrb[8].mxu1  ;;  %v3341_v35 = vpop.f32.mrb[9].mxu0 }
 0x138   :  { %v3363_v36 = vpop.f32.mrb[9].mxu1  ;;  %v3342_v37 = vadd.f32 %v3341_v35, %v3340_v33  ;;  %v3343_v39 = vpop.f32.mrb[10].mxu0 }
 0x139   :  { %v3364_v38 = vadd.f32 %v3363_v36, %v3362_v34  ;;  %v3365_v40 = vpop.f32.mrb[10].mxu1  ;;  %v3344_v41 = vpop.f32.mrb[11].mxu0 }
 0x13a   :  { %v3366_v42 = vpop.f32.mrb[11].mxu1  ;;  %v2461_v43 = vadd.f32 %v3342_v37, %v2420_v30  ;;  %v3345_v44 = vadd.f32 %v3344_v41, %v3343_v39 }
 0x13b   :  { %v3367_v45 = vadd.f32 %v3366_v42, %v3365_v40 }
 0x13c   :  { %v2502_v46 = vadd.f32 %v3364_v38, %v2461_v43  ;;  %v2464_v47 = vadd.f32 %v3345_v44, %v2423_v32 }
 0x13e   :  { %v2505_v48 = vadd.f32 %v3367_v45, %v2464_v47 }
 0x156   :  { %v3384_v49 = vpop.f32.mrb[12].mxu0 }
 0x157   :  { %v3406_v50 = vpop.f32.mrb[12].mxu1  ;;  %v3385_v51 = vpop.f32.mrb[13].mxu0 }
 0x158   :  { %v3386_v52 = vadd.f32 %v3385_v51, %v3384_v49  ;;  %v3407_v53 = vpop.f32.mrb[13].mxu1  ;;  %v3387_v54 = vpop.f32.mrb[14].mxu0 }
 0x159   :  { %v3408_v55 = vadd.f32 %v3407_v53, %v3406_v50  ;;  %v3409_v56 = vpop.f32.mrb[14].mxu1  ;;  %v3388_v57 = vpop.f32.mrb[15].mxu0 }
 0x15a   :  { %v2543_v58 = vadd.f32 %v3386_v52, %v2502_v46  ;;  %v3389_v59 = vadd.f32 %v3388_v57, %v3387_v54  ;;  %v3410_v60 = vpop.f32.mrb[15].mxu1 }
 0x15b   :  { %v3411_v61 = vadd.f32 %v3410_v60, %v3409_v56 }
 0x15c   :  { %v2584_v62 = vadd.f32 %v3408_v55, %v2543_v58  ;;  %v2546_v63 = vadd.f32 %v3389_v59, %v2505_v48 }
 0x15e   :  { %v2587_v0 = vadd.f32 %v3411_v61, %v2546_v63 }
 0x176   :  { %v3428_v1 = vpop.f32.mrb[16].mxu0 }
 0x177   :  { %v3450_v2 = vpop.f32.mrb[16].mxu1  ;;  %v3429_v3 = vpop.f32.mrb[17].mxu0 }
 0x178   :  { %v3430_v4 = vadd.f32 %v3429_v3, %v3428_v1  ;;  %v3451_v5 = vpop.f32.mrb[17].mxu1  ;;  %v3431_v6 = vpop.f32.mrb[18].mxu0 }
 0x179   :  { %v3452_v7 = vadd.f32 %v3451_v5, %v3450_v2  ;;  %v3453_v8 = vpop.f32.mrb[18].mxu1  ;;  %v3432_v9 = vpop.f32.mrb[19].mxu0 }
 0x17a   :  { %v2625_v10 = vadd.f32 %v3430_v4, %v2584_v62  ;;  %v3433_v11 = vadd.f32 %v3432_v9, %v3431_v6  ;;  %v3454_v12 = vpop.f32.mrb[19].mxu1 }
 0x17b   :  { %v3455_v13 = vadd.f32 %v3454_v12, %v3453_v8 }
 0x17c   :  { %v2666_v14 = vadd.f32 %v3452_v7, %v2625_v10  ;;  %v2628_v15 = vadd.f32 %v3433_v11, %v2587_v0 }
 0x17e   :  { %v2669_v16 = vadd.f32 %v3455_v13, %v2628_v15 }
 0x196   :  { %v3472_v17 = vpop.f32.mrb[20].mxu0 }
 0x197   :  { %v3494_v18 = vpop.f32.mrb[20].mxu1  ;;  %v3473_v19 = vpop.f32.mrb[21].mxu0 }
 0x198   :  { %v3495_v20 = vpop.f32.mrb[21].mxu1  ;;  %v3474_v21 = vadd.f32 %v3473_v19, %v3472_v17  ;;  %v3475_v23 = vpop.f32.mrb[22].mxu0 }
 0x199   :  { %v3496_v22 = vadd.f32 %v3495_v20, %v3494_v18  ;;  %v3497_v24 = vpop.f32.mrb[22].mxu1  ;;  %v3476_v25 = vpop.f32.mrb[23].mxu0 }
 0x19a   :  { %v3498_v26 = vpop.f32.mrb[23].mxu1  ;;  %v2707_v27 = vadd.f32 %v3474_v21, %v2666_v14  ;;  %v3477_v28 = vadd.f32 %v3476_v25, %v3475_v23 }
 0x19b   :  { %v3499_v29 = vadd.f32 %v3498_v26, %v3497_v24 }
 0x19c   :  { %v2748_v30 = vadd.f32 %v3496_v22, %v2707_v27  ;;  %v2710_v31 = vadd.f32 %v3477_v28, %v2669_v16 }
 0x19e   :  { %v2751_v32 = vadd.f32 %v3499_v29, %v2710_v31 }
 0x1b6   :  { %v3516_v33 = vpop.f32.mrb[24].mxu0 }
 0x1b7   :  { %v3538_v34 = vpop.f32.mrb[24].mxu1  ;;  %v3517_v35 = vpop.f32.mrb[25].mxu0 }
 0x1b8   :  { %v3518_v36 = vadd.f32 %v3517_v35, %v3516_v33  ;;  %v3539_v37 = vpop.f32.mrb[25].mxu1  ;;  %v3519_v38 = vpop.f32.mrb[26].mxu0 }
 0x1b9   :  { %v3540_v39 = vadd.f32 %v3539_v37, %v3538_v34  ;;  %v3541_v40 = vpop.f32.mrb[26].mxu1  ;;  %v3520_v41 = vpop.f32.mrb[27].mxu0 }
 0x1ba   :  { %v2789_v42 = vadd.f32 %v3518_v36, %v2748_v30  ;;  %v3521_v43 = vadd.f32 %v3520_v41, %v3519_v38  ;;  %v3542_v44 = vpop.f32.mrb[27].mxu1 }
 0x1bb   :  { %v3543_v45 = vadd.f32 %v3542_v44, %v3541_v40 }
 0x1bc   :  { %v2830_v46 = vadd.f32 %v3540_v39, %v2789_v42  ;;  %v2792_v47 = vadd.f32 %v3521_v43, %v2751_v32 }
 0x1be   :  { %v2833_v48 = vadd.f32 %v3543_v45, %v2792_v47 }
 0x1d6   :  { %v3560_v49 = vpop.f32.mrb[28].mxu0 }
 0x1d7   :  { %v3582_v50 = vpop.f32.mrb[28].mxu1  ;;  %v3561_v51 = vpop.f32.mrb[29].mxu0 }
 0x1d8   :  { %v3583_v52 = vpop.f32.mrb[29].mxu1  ;;  %v3562_v53 = vadd.f32 %v3561_v51, %v3560_v49  ;;  %v3563_v55 = vpop.f32.mrb[30].mxu0 }
 0x1d9   :  { %v3584_v54 = vadd.f32 %v3583_v52, %v3582_v50  ;;  %v3585_v56 = vpop.f32.mrb[30].mxu1  ;;  %v3564_v57 = vpop.f32.mrb[31].mxu0 }
 0x1da   :  { %v3586_v58 = vpop.f32.mrb[31].mxu1  ;;  %v2871_v59 = vadd.f32 %v3562_v53, %v2830_v46  ;;  %v3565_v60 = vadd.f32 %v3564_v57, %v3563_v55 }
 0x1db   :  { %v3587_v61 = vadd.f32 %v3586_v58, %v3585_v56 }
 0x1dc   :  { %v2912_v62 = vadd.f32 %v3584_v54, %v2871_v59  ;;  %v2874_v63 = vadd.f32 %v3565_v60, %v2833_v48 }
 0x1de   :  { %v2920_v0 = vmul.f32 0.2, %v2912_v62  ;;  %v2915_v1 = vadd.f32 %v3587_v61, %v2874_v63  ;;  %vm2918_vm0 = vcmp.ge.f32.partialorder %v2912_v62, 0.0 }
 0x1e0   :  { %vm2919_vm1 = vcmp.ge.f32.partialorder %v2915_v1, 0.0  ;;  %v2921_v2 = vmul.f32 0.2, %v2915_v1  ;;  %v2922_v3 = vsel %vm2918_vm0, %v2912_v62, %v2920_v0 }
 0x1e2   :  { %v2923_v4 = vsel %vm2919_vm1, %v2915_v1, %v2921_v2 }
 0x1e3   :  { %v3234_v5 = vpack.c.bf16 %v2923_v4, %v2922_v3 }
 0x1e5   :  { %3235 = vst [vmem:[%s4737_s3] sm:$0xff] %v3234_v5  }

// kernel: discriminator_forward.7
= control target key start
LH: loop header
LB: loop body
LE: loop exit
PB: predicated region body
PF: predicated region fallthrough
CT: control target
= control target key end

     0   :  { %v153_v36 = vlaneseq  ;;  %v1400_v37 = vmov 1966171168   ;;  %vm1045_vm2 = vcmask 1041408   ;;  %vm1059_vm3 = vcmask 1024   ;;  %s1845_s1 = inlined_call_operand.vmem [shape: bf16[1024,256], index: 1, kind: input, shape index: {}]   ;;  %s1846_s0 = inlined_call_operand.vmem [shape: bf16[2,1024], index: 0, kind: input, shape index: {}]   ;;  %s1847_s4 = inlined_call_operand.<no memory space> [shape: f32[1,1], index: 4, kind: input, shape index: {}]   ;;  %s1848_s2 = inlined_call_operand.vmem [shape: f32[1,256], index: 2, kind: input, shape index: {}]   ;;  %s1849_s3 = inlined_call_operand.vmem [shape: f32[1,256], index: 3, kind: input, shape index: {}]   ;;  %s1850_s5 = inlined_call_operand.vmem [shape: f32[2,1], index: 5, kind: output, shape index: {}]  }
   0x1   :  { %v1207_v0 = vld [vmem:[%s1845_s1 + $0x4] ss:$8 sps:$4 sm:$0xff]   ;;  %v1211_v2 = vld [vmem:[%s1845_s1] ss:$8 sps:$4 sm:$0xff]   ;;  %v1213_v4 = vld [vmem:[%s1845_s1 + $0x14] ss:$8 sps:$4 sm:$0xff]   ;;  %v166_v38 = vunpack.c.l.s4 %v1400_v37 }
   0x2   :  { %v1209_v1 = vld [vmem:[%s1845_s1 + $0x204] ss:$8 sps:$4 sm:$0xff]   ;;  %861 = vmatprep.subr.bf16.mxu1 %v1207_v0  ;;  %v1212_v3 = vld [vmem:[%s1845_s1 + $0x200] ss:$8 sps:$4 sm:$0xff]   ;;  %v1215_v5 = vld [vmem:[%s1845_s1 + $0x214] ss:$8 sps:$4 sm:$0xff]  }
   0x3   :  { %943 = vmatprep.subr.bf16.mxu0 %v1209_v1  ;;  %862 = vmatpush1.bf16.msra.mxu1 %v1211_v2  ;;  %v1217_v6 = vld [vmem:[%s1845_s1 + $0x10] ss:$8 sps:$4 sm:$0xff]   ;;  %v1219_v8 = vld [vmem:[%s1845_s1 + $0x24] ss:$8 sps:$4 sm:$0xff]   ;;  %v1223_v10 = vld [vmem:[%s1845_s1 + $0x20] ss:$8 sps:$4 sm:$0xff]   ;;  %v167_v43 = vunpack.c.0.s8 %v166_v38 }
   0x4   :  { %944 = vmatpush1.bf16.msra.mxu0 %v1212_v3  ;;  %863 = vmatprep.subr.bf16.mxu1 %v1213_v4  ;;  %v1218_v7 = vld [vmem:[%s1845_s1 + $0x210] ss:$8 sps:$4 sm:$0xff]   ;;  %v1221_v9 = vld [vmem:[%s1845_s1 + $0x224] ss:$8 sps:$4 sm:$0xff]   ;;  %v1224_v11 = vld [vmem:[%s1845_s1 + $0x220] ss:$8 sps:$4 sm:$0xff]  }
   0x5   :  { %945 = vmatprep.subr.bf16.mxu0 %v1215_v5  ;;  %v1225_v12 = vld [vmem:[%s1845_s1 + $0x34] ss:$8 sps:$4 sm:$0xff]   ;;  %v1229_v14 = vld [vmem:[%s1845_s1 + $0x30] ss:$8 sps:$4 sm:$0xff]   ;;  %v1231_v16 = vld [vmem:[%s1845_s1 + $0x44] ss:$8 sps:$4 sm:$0xff]  }
   0x6   :  { %v1227_v13 = vld [vmem:[%s1845_s1 + $0x234] ss:$8 sps:$4 sm:$0xff]   ;;  %v1230_v15 = vld [vmem:[%s1845_s1 + $0x230] ss:$8 sps:$4 sm:$0xff]   ;;  %v1233_v17 = vld [vmem:[%s1845_s1 + $0x244] ss:$8 sps:$4 sm:$0xff]  }
   0x7   :  { %864 = vmatpush1.bf16.msra.mxu1 %v1217_v6  ;;  %v1235_v18 = vld [vmem:[%s1845_s1 + $0x40] ss:$8 sps:$4 sm:$0xff]   ;;  %v1237_v20 = vld [vmem:[%s1845_s1 + $0x54] ss:$8 sps:$4 sm:$0xff]   ;;  %v1241_v22 = vld [vmem:[%s1845_s1 + $0x50] ss:$8 sps:$4 sm:$0xff]  }
   0x8   :  { %946 = vmatpush1.bf16.msra.mxu0 %v1218_v7  ;;  %865 = vmatprep.subr.bf16.mxu1 %v1219_v8  ;;  %v1236_v19 = vld [vmem:[%s1845_s1 + $0x240] ss:$8 sps:$4 sm:$0xff]   ;;  %v1239_v21 = vld [vmem:[%s1845_s1 + $0x254] ss:$8 sps:$4 sm:$0xff]   ;;  %v1242_v23 = vld [vmem:[%s1845_s1 + $0x250] ss:$8 sps:$4 sm:$0xff]  }
   0x9   :  { %947 = vmatprep.subr.bf16.mxu0 %v1221_v9  ;;  %v1243_v24 = vld [vmem:[%s1845_s1 + $0x64] ss:$8 sps:$4 sm:$0xff]   ;;  %v1247_v26 = vld [vmem:[%s1845_s1 + $0x60] ss:$8 sps:$4 sm:$0xff]   ;;  %v1249_v28 = vld [vmem:[%s1845_s1 + $0x74] ss:$8 sps:$4 sm:$0xff]  }
   0xa   :  { %v1245_v25 = vld [vmem:[%s1845_s1 + $0x264] ss:$8 sps:$4 sm:$0xff]   ;;  %v1248_v27 = vld [vmem:[%s1845_s1 + $0x260] ss:$8 sps:$4 sm:$0xff]   ;;  %v1251_v29 = vld [vmem:[%s1845_s1 + $0x274] ss:$8 sps:$4 sm:$0xff]  }
   0xb   :  { %866 = vmatpush1.bf16.msra.mxu1 %v1223_v10  ;;  %v1253_v30 = vld [vmem:[%s1845_s1 + $0x70] ss:$8 sps:$4 sm:$0xff]   ;;  %v1255_v32 = vld [vmem:[%s1845_s1 + $0x84] ss:$8 sps:$4 sm:$0xff]   ;;  %v1259_v34 = vld [vmem:[%s1845_s1 + $0x80] ss:$8 sps:$4 sm:$0xff]  }
   0xc   :  { %948 = vmatpush1.bf16.msra.mxu0 %v1224_v11  ;;  %867 = vmatprep.subr.bf16.mxu1 %v1225_v12  ;;  %v1254_v31 = vld [vmem:[%s1845_s1 + $0x270] ss:$8 sps:$4 sm:$0xff]   ;;  %v1257_v33 = vld [vmem:[%s1845_s1 + $0x284] ss:$8 sps:$4 sm:$0xff]   ;;  %v1260_v35 = vld [vmem:[%s1845_s1 + $0x280] ss:$8 sps:$4 sm:$0xff]  }
   0xd   :  { %949 = vmatprep.subr.bf16.mxu0 %v1227_v13  ;;  %v1261_v39 = vld [vmem:[%s1845_s1 + $0x94] ss:$8 sps:$4 sm:$0xff]   ;;  %v1265_v41 = vld [vmem:[%s1845_s1 + $0x90] ss:$8 sps:$4 sm:$0xff]   ;;  %v1548_v42 = vshrl.u32 %v153_v36, 7  ;;  %v22_v52 = vld [vmem:[%s1846_s0] sm:$0xff] }
   0xe   :  { %v1263_v40 = vld [vmem:[%s1845_s1 + $0x294] ss:$8 sps:$4 sm:$0xff]   ;;  %v1266_v44 = vld [vmem:[%s1845_s1 + $0x290] ss:$8 sps:$4 sm:$0xff]   ;;  %v1267_v45 = vld [vmem:[%s1845_s1 + $0xa4] ss:$8 sps:$4 sm:$0xff]   ;;  %v164_v55 = vcombine.high %v22_v52, %v22_v52 }
   0xf   :  { %868 = vmatpush1.bf16.msra.mxu1 %v1229_v14  ;;  %v1269_v46 = vld [vmem:[%s1845_s1 + $0x2a4] ss:$8 sps:$4 sm:$0xff]   ;;  %v1271_v47 = vld [vmem:[%s1845_s1 + $0xa0] ss:$8 sps:$4 sm:$0xff]   ;;  %v170_v49 = vsub.s32 %v167_v43, %v1548_v42  ;;  %v1273_v50 = vld [vmem:[%s1845_s1 + $0xb4] ss:$8 sps:$4 sm:$0xff]  }
  0x10   :  { %950 = vmatpush1.bf16.msra.mxu0 %v1230_v15  ;;  %869 = vmatprep.subr.bf16.mxu1 %v1231_v16  ;;  %v1272_v48 = vld [vmem:[%s1845_s1 + $0x2a0] ss:$8 sps:$4 sm:$0xff]   ;;  %v1275_v51 = vld [vmem:[%s1845_s1 + $0x2b4] ss:$8 sps:$4 sm:$0xff]   ;;  %v1277_v53 = vld [vmem:[%s1845_s1 + $0xb0] ss:$8 sps:$4 sm:$0xff]  }
  0x11   :  { %951 = vmatprep.subr.bf16.mxu0 %v1233_v17  ;;  %v171_v54 = vrot.slane %v22_v52, %v170_v49  ;;  %v1278_v56 = vld [vmem:[%s1845_s1 + $0x2b0] ss:$8 sps:$4 sm:$0xff]   ;;  %v1279_v57 = vld [vmem:[%s1845_s1 + $0xc4] ss:$8 sps:$4 sm:$0xff]   ;;  %v178_v60 = vrot.slane %v164_v55, %v170_v49  ;;  %v1283_v61 = vld [vmem:[%s1845_s1 + $0xc0] ss:$8 sps:$4 sm:$0xff]  }
  0x12   :  { %v1281_v58 = vld [vmem:[%s1845_s1 + $0x2c4] ss:$8 sps:$4 sm:$0xff]   ;;  %v1284_v0 = vld [vmem:[%s1845_s1 + $0x2c0] ss:$8 sps:$4 sm:$0xff]   ;;  %v1285_v1 = vld [vmem:[%s1845_s1 + $0xd4] ss:$8 sps:$4 sm:$0xff]  }
  0x13   :  { %870 = vmatpush1.bf16.msra.mxu1 %v1235_v18  ;;  %v179_v59 = vcombine.high %v171_v54, %v171_v54  ;;  %v180_v63 = vcombine.high %v178_v60, %v178_v60  ;;  %v1287_v2 = vld [vmem:[%s1845_s1 + $0x2d4] ss:$8 sps:$4 sm:$0xff]   ;;  %v1289_v4 = vld [vmem:[%s1845_s1 + $0xd0] ss:$8 sps:$4 sm:$0xff]   ;;  %v1291_v6 = vld [vmem:[%s1845_s1 + $0xe4] ss:$8 sps:$4 sm:$0xff]   ;;  %v1638_v17 = vrot.slane %v171_v54, %v170_v49  ;;  %v1640_v18 = vrot.slane %v178_v60, %v170_v49 }
  0x14   :  { %952 = vmatpush1.bf16.msra.mxu0 %v1236_v19  ;;  %871 = vmatprep.subr.bf16.mxu1 %v1237_v20  ;;  %v1290_v5 = vld [vmem:[%s1845_s1 + $0x2d0] ss:$8 sps:$4 sm:$0xff]   ;;  %v1293_v7 = vld [vmem:[%s1845_s1 + $0x2e4] ss:$8 sps:$4 sm:$0xff]   ;;  %v1295_v8 = vld [vmem:[%s1845_s1 + $0xe0] ss:$8 sps:$4 sm:$0xff]  }
  0x15   :  { %953 = vmatprep.subr.bf16.mxu0 %v1239_v21  ;;  %v201_v62 = vrot.slane %v179_v59, %v170_v49  ;;  %v208_v3 = vrot.slane %v180_v63, %v170_v49  ;;  %v1296_v9 = vld [vmem:[%s1845_s1 + $0x2e0] ss:$8 sps:$4 sm:$0xff]   ;;  %v1297_v10 = vld [vmem:[%s1845_s1 + $0xf4] ss:$8 sps:$4 sm:$0xff]   ;;  %v1301_v12 = vld [vmem:[%s1845_s1 + $0xf0] ss:$8 sps:$4 sm:$0xff]  }
  0x16   :  { %v1299_v11 = vld [vmem:[%s1845_s1 + $0x2f4] ss:$8 sps:$4 sm:$0xff]   ;;  %v1302_v13 = vld [vmem:[%s1845_s1 + $0x2f0] ss:$8 sps:$4 sm:$0xff]   ;;  %v1305_v14 = vld [vmem:[%s1845_s1 + $0x104] ss:$8 sps:$4 sm:$0xff]  }
  0x17   :  { %872 = vmatpush1.bf16.msra.mxu1 %v1241_v22  ;;  %893 = vmatprep.mubr.bf16.mxu1 %v201_v62  ;;  %v1309_v15 = vld [vmem:[%s1845_s1 + $0x304] ss:$8 sps:$4 sm:$0xff]   ;;  %v1303_v16 = vld [vmem:[%s1845_s1 + $0x100] ss:$8 sps:$4 sm:$0xff]   ;;  %v1312_v20 = vld [vmem:[%s1845_s1 + $0x114] ss:$8 sps:$4 sm:$0xff]   ;;  %v211_v22 = vcombine.high %v201_v62, %v201_v62 }
  0x18   :  { %954 = vmatpush1.bf16.msra.mxu0 %v1242_v23  ;;  %873 = vmatprep.subr.bf16.mxu1 %v1243_v24  ;;  %v1307_v19 = vld [vmem:[%s1845_s1 + $0x300] ss:$8 sps:$4 sm:$0xff]   ;;  %v1315_v21 = vld [vmem:[%s1845_s1 + $0x314] ss:$8 sps:$4 sm:$0xff]   ;;  %v212_v23 = vcombine.high %v208_v3, %v208_v3  ;;  %v1310_v24 = vld [vmem:[%s1845_s1 + $0x110] ss:$8 sps:$4 sm:$0xff]  }
  0x19   :  { %955 = vmatprep.subr.bf16.mxu0 %v1245_v25  ;;  %975 = vmatprep.mubr.bf16.mxu0 %v208_v3  ;;  %v1313_v25 = vld [vmem:[%s1845_s1 + $0x310] ss:$8 sps:$4 sm:$0xff]   ;;  %v1328_v36 = vld [vmem:[%s1845_s1 + $0x140] ss:$8 sps:$4 sm:$0xff]   ;;  %v1336_v38 = vld [vmem:[%s1845_s1 + $0x154] ss:$8 sps:$4 sm:$0xff]  }
  0x1a   :  { %v1331_v37 = vld [vmem:[%s1845_s1 + $0x340] ss:$8 sps:$4 sm:$0xff]   ;;  %v1342_v43 = vld [vmem:[%s1845_s1 + $0x164] ss:$8 sps:$4 sm:$0xff]   ;;  %v1346_v49 = vld [vmem:[%s1845_s1 + $0x170] ss:$8 sps:$4 sm:$0xff]  }
  0x1b   :  { %874 = vmatpush1.bf16.msra.mxu1 %v1247_v26  ;;  %v1318_v26 = vld [vmem:[%s1845_s1 + $0x124] ss:$8 sps:$4 sm:$0xff]   ;;  %v1355_v54 = vld [vmem:[%s1845_s1 + $0x380] ss:$8 sps:$4 sm:$0xff]   ;;  %v1360_v55 = vld [vmem:[%s1845_s1 + $0x194] ss:$8 sps:$4 sm:$0xff]  }
  0x1c   :  { %956 = vmatpush1.bf16.msra.mxu0 %v1248_v27  ;;  %875 = vmatprep.subr.bf16.mxu1 %v1249_v28  ;;  %v1321_v27 = vld [vmem:[%s1845_s1 + $0x324] ss:$8 sps:$4 sm:$0xff]   ;;  %v1316_v28 = vld [vmem:[%s1845_s1 + $0x120] ss:$8 sps:$4 sm:$0xff]   ;;  %v1372_v63 = vld [vmem:[%s1845_s1 + $0x1b4] ss:$8 sps:$4 sm:$0xff]  }
  0x1d   :  { %957 = vmatprep.subr.bf16.mxu0 %v1251_v29  ;;  %v1319_v29 = vld [vmem:[%s1845_s1 + $0x320] ss:$8 sps:$4 sm:$0xff]   ;;  %v1357_v52 = vld [vmem:[%s1845_s1 + $0x384] ss:$8 sps:$4 sm:$0xff]  }
  0x1e   :  { %v1366_v59 = vld [vmem:[%s1845_s1 + $0x1a4] ss:$8 sps:$4 sm:$0xff]   ;;  %v1367_v62 = vld [vmem:[%s1845_s1 + $0x3a0] ss:$8 sps:$4 sm:$0xff]  }
  0x1f   :  { %876 = vmatpush1.bf16.msra.mxu1 %v1253_v30  ;;  %v1324_v30 = vld [vmem:[%s1845_s1 + $0x134] ss:$8 sps:$4 sm:$0xff]   ;;  %v1369_v60 = vld [vmem:[%s1845_s1 + $0x3a4] ss:$8 sps:$4 sm:$0xff]  }
  0x20   :  { %958 = vmatpush1.bf16.msra.mxu0 %v1254_v31  ;;  %877 = vmatprep.subr.bf16.mxu1 %v1255_v32  ;;  %v1327_v31 = vld [vmem:[%s1845_s1 + $0x334] ss:$8 sps:$4 sm:$0xff]   ;;  %v1322_v32 = vld [vmem:[%s1845_s1 + $0x130] ss:$8 sps:$4 sm:$0xff]   ;;  %v1378_v3 = vld [vmem:[%s1845_s1 + $0x1c4] ss:$8 sps:$4 sm:$0xff]  }
  0x21   :  { %959 = vmatprep.subr.bf16.mxu0 %v1257_v33  ;;  %v1325_v33 = vld [vmem:[%s1845_s1 + $0x330] ss:$8 sps:$4 sm:$0xff]  }
  0x23   :  { %878 = vmatpush1.bf16.msra.mxu1 %v1259_v34  ;;  %v1330_v34 = vld [vmem:[%s1845_s1 + $0x144] ss:$8 sps:$4 sm:$0xff]  }
  0x24   :  { %960 = vmatpush1.bf16.msra.mxu0 %v1260_v35  ;;  %879 = vmatprep.subr.bf16.mxu1 %v1261_v39  ;;  %v1333_v35 = vld [vmem:[%s1845_s1 + $0x344] ss:$8 sps:$4 sm:$0xff]   ;;  %v1339_v39 = vld [vmem:[%s1845_s1 + $0x354] ss:$8 sps:$4 sm:$0xff]  }
  0x25   :  { %961 = vmatprep.subr.bf16.mxu0 %v1263_v40  ;;  %v1334_v40 = vld [vmem:[%s1845_s1 + $0x150] ss:$8 sps:$4 sm:$0xff]  }
  0x27   :  { %880 = vmatpush1.bf16.msra.mxu1 %v1265_v41  ;;  %v1337_v41 = vld [vmem:[%s1845_s1 + $0x350] ss:$8 sps:$4 sm:$0xff]  }
  0x28   :  { %962 = vmatpush1.bf16.msra.mxu0 %v1266_v44  ;;  %881 = vmatprep.subr.bf16.mxu1 %v1267_v45  ;;  %v1345_v44 = vld [vmem:[%s1845_s1 + $0x364] ss:$8 sps:$4 sm:$0xff]   ;;  %v1340_v45 = vld [vmem:[%s1845_s1 + $0x160] ss:$8 sps:$4 sm:$0xff]  }
  0x29   :  { %963 = vmatprep.subr.bf16.mxu0 %v1269_v46  ;;  %v1343_v46 = vld [vmem:[%s1845_s1 + $0x360] ss:$8 sps:$4 sm:$0xff]  }
  0x2b   :  { %882 = vmatpush1.bf16.msra.mxu1 %v1271_v47  ;;  %v1348_v47 = vld [vmem:[%s1845_s1 + $0x174] ss:$8 sps:$4 sm:$0xff]  }
  0x2c   :  { %964 = vmatpush1.bf16.msra.mxu0 %v1272_v48  ;;  %883 = vmatprep.subr.bf16.mxu1 %v1273_v50  ;;  %v1351_v48 = vld [vmem:[%s1845_s1 + $0x374] ss:$8 sps:$4 sm:$0xff]   ;;  %v1349_v50 = vld [vmem:[%s1845_s1 + $0x370] ss:$8 sps:$4 sm:$0xff]  }
  0x2d   :  { %965 = vmatprep.subr.bf16.mxu0 %v1275_v51  ;;  %v1354_v51 = vld [vmem:[%s1845_s1 + $0x184] ss:$8 sps:$4 sm:$0xff]  }
  0x2f   :  { %884 = vmatpush1.bf16.msra.mxu1 %v1277_v53  ;;  %v1352_v53 = vld [vmem:[%s1845_s1 + $0x180] ss:$8 sps:$4 sm:$0xff]  }
  0x30   :  { %966 = vmatpush1.bf16.msra.mxu0 %v1278_v56  ;;  %885 = vmatprep.subr.bf16.mxu1 %v1279_v57  ;;  %v1363_v56 = vld [vmem:[%s1845_s1 + $0x394] ss:$8 sps:$4 sm:$0xff]   ;;  %v1358_v57 = vld [vmem:[%s1845_s1 + $0x190] ss:$8 sps:$4 sm:$0xff]  }
  0x31   :  { %967 = vmatprep.subr.bf16.mxu0 %v1281_v58  ;;  %v1361_v58 = vld [vmem:[%s1845_s1 + $0x390] ss:$8 sps:$4 sm:$0xff]  }
  0x33   :  { %886 = vmatpush1.bf16.msra.mxu1 %v1283_v61  ;;  %v1364_v61 = vld [vmem:[%s1845_s1 + $0x1a0] ss:$8 sps:$4 sm:$0xff]  }
  0x34   :  { %968 = vmatpush1.bf16.msra.mxu0 %v1284_v0  ;;  %887 = vmatprep.subr.bf16.mxu1 %v1285_v1  ;;  %v1375_v0 = vld [vmem:[%s1845_s1 + $0x3b4] ss:$8 sps:$4 sm:$0xff]   ;;  %v1370_v1 = vld [vmem:[%s1845_s1 + $0x1b0] ss:$8 sps:$4 sm:$0xff]  }
  0x35   :  { %969 = vmatprep.subr.bf16.mxu0 %v1287_v2  ;;  %v1373_v2 = vld [vmem:[%s1845_s1 + $0x3b0] ss:$8 sps:$4 sm:$0xff]  }
  0x37   :  { %888 = vmatpush1.bf16.msra.mxu1 %v1289_v4  ;;  %v1381_v4 = vld [vmem:[%s1845_s1 + $0x3c4] ss:$8 sps:$4 sm:$0xff]  }
  0x38   :  { %970 = vmatpush1.bf16.msra.mxu0 %v1290_v5  ;;  %889 = vmatprep.subr.bf16.mxu1 %v1291_v6  ;;  %v1376_v5 = vld [vmem:[%s1845_s1 + $0x1c0] ss:$8 sps:$4 sm:$0xff]  }
  0x39   :  { %971 = vmatprep.subr.bf16.mxu0 %v1293_v7  ;;  %v1379_v6 = vld [vmem:[%s1845_s1 + $0x3c0] ss:$8 sps:$4 sm:$0xff]   ;;  %v1384_v7 = vld [vmem:[%s1845_s1 + $0x1d4] ss:$8 sps:$4 sm:$0xff]  }
  0x3b   :  { %890 = vmatpush1.bf16.msra.mxu1 %v1295_v8  ;;  %v1387_v8 = vld [vmem:[%s1845_s1 + $0x3d4] ss:$8 sps:$4 sm:$0xff]  }
  0x3c   :  { %972 = vmatpush1.bf16.msra.mxu0 %v1296_v9  ;;  %891 = vmatprep.subr.bf16.mxu1 %v1297_v10  ;;  %v1382_v9 = vld [vmem:[%s1845_s1 + $0x1d0] ss:$8 sps:$4 sm:$0xff]  }
  0x3d   :  { %973 = vmatprep.subr.bf16.mxu0 %v1299_v11  ;;  %v1385_v10 = vld [vmem:[%s1845_s1 + $0x3d0] ss:$8 sps:$4 sm:$0xff]   ;;  %v1390_v11 = vld [vmem:[%s1845_s1 + $0x1e4] ss:$8 sps:$4 sm:$0xff]  }
  0x3f   :  { %892 = vmatpush1.bf16.msra.mxu1 %v1301_v12  ;;  %v1393_v12 = vld [vmem:[%s1845_s1 + $0x3e4] ss:$8 sps:$4 sm:$0xff]  }
  0x40   :  { %974 = vmatpush1.bf16.msra.mxu0 %v1302_v13  ;;  %902 = vmatprep.subr.bf16.mxu1 %v1305_v14  ;;  %v1388_v13 = vld [vmem:[%s1845_s1 + $0x1e0] ss:$8 sps:$4 sm:$0xff]  }
  0x41   :  { %984 = vmatprep.subr.bf16.mxu0 %v1309_v15  ;;  %v1391_v14 = vld [vmem:[%s1845_s1 + $0x3e0] ss:$8 sps:$4 sm:$0xff]   ;;  %v1396_v15 = vld [vmem:[%s1845_s1 + $0x1f4] ss:$8 sps:$4 sm:$0xff]  }
  0x42   :  { %894 = vmatmul.mubr.bf16.vlgmr.msra.gmra.mrb[0].mxu1 %v1638_v17 }
  0x43   :  { %976 = vmatmul.mubr.bf16.vlgmr.msra.gmra.mrb[0].mxu0 %v1640_v18  ;;  %903 = vmatpush1.bf16.msra.mxu1 %v1303_v16  ;;  %v1399_v16 = vld [vmem:[%s1845_s1 + $0x3f4] ss:$8 sps:$4 sm:$0xff]  }
  0x44   :  { %985 = vmatpush1.bf16.msra.mxu0 %v1307_v19  ;;  %904 = vmatprep.subr.bf16.mxu1 %v1312_v20  ;;  %v1394_v19 = vld [vmem:[%s1845_s1 + $0x1f0] ss:$8 sps:$4 sm:$0xff]  }
  0x45   :  { %986 = vmatprep.subr.bf16.mxu0 %v1315_v21  ;;  %934 = vmatprep.mubr.bf16.mxu1 %v211_v22  ;;  %v1397_v20 = vld [vmem:[%s1845_s1 + $0x3f0] ss:$8 sps:$4 sm:$0xff]   ;;  %v209_v21 = vcombine.high %v1638_v17, %v1638_v17  ;;  %v210_v22 = vcombine.high %v1640_v18, %v1640_v18  ;;  %v159_v17 = vsub.s32 1, %v1548_v42 }
  0x46   :  { %1016 = vmatprep.mubr.bf16.mxu0 %v212_v23  ;;  %v10_v23 = vstv %s1847_s4 }
  0x47   :  { %905 = vmatpush1.bf16.msra.mxu1 %v1310_v24  ;;  %11 = vst [vmem:[#allocation2] sm:$0x1] %v10_v23  ;;  %v155_v24 = vsub.s32 0, %v1548_v42 }
  0x48   :  { %987 = vmatpush1.bf16.msra.mxu0 %v1313_v25  ;;  %906 = vmatprep.subr.bf16.mxu1 %v1318_v26  ;;  %v151_v25 = vld [vmem:[%s1848_s2] sm:$0x3] }
  0x49   :  { %988 = vmatprep.subr.bf16.mxu0 %v1321_v27  ;;  %v156_v26 = vrot.slane %v151_v25, %v155_v24  ;;  %v160_v27 = vrot.slane %v151_v25, %v159_v17 }
  0x4b   :  { %907 = vmatpush1.bf16.msra.mxu1 %v1316_v28 }
  0x4c   :  { %989 = vmatpush1.bf16.msra.mxu0 %v1319_v29  ;;  %908 = vmatprep.subr.bf16.mxu1 %v1324_v30 }
  0x4d   :  { %990 = vmatprep.subr.bf16.mxu0 %v1327_v31 }
  0x4f   :  { %909 = vmatpush1.bf16.msra.mxu1 %v1322_v32  ;;  %v1031_v32 = vld [vmem:[%s1849_s3] sm:$0x3] }
  0x50   :  { %991 = vmatpush1.bf16.msra.mxu0 %v1325_v33  ;;  %910 = vmatprep.subr.bf16.mxu1 %v1330_v34 }
  0x51   :  { %992 = vmatprep.subr.bf16.mxu0 %v1333_v35 }
  0x53   :  { %911 = vmatpush1.bf16.msra.mxu1 %v1328_v36 }
  0x54   :  { %993 = vmatpush1.bf16.msra.mxu0 %v1331_v37  ;;  %912 = vmatprep.subr.bf16.mxu1 %v1336_v38 }
  0x55   :  { %994 = vmatprep.subr.bf16.mxu0 %v1339_v39 }
  0x57   :  { %913 = vmatpush1.bf16.msra.mxu1 %v1334_v40  ;;  %v1036_v40 = vrot.slane %v1031_v32, %v155_v24 }
  0x58   :  { %995 = vmatpush1.bf16.msra.mxu0 %v1337_v41  ;;  %914 = vmatprep.subr.bf16.mxu1 %v1342_v43  ;;  %v1040_v41 = vrot.slane %v1031_v32, %v159_v17 }
  0x59   :  { %996 = vmatprep.subr.bf16.mxu0 %v1345_v44 }
  0x5b   :  { %915 = vmatpush1.bf16.msra.mxu1 %v1340_v45 }
  0x5c   :  { %997 = vmatpush1.bf16.msra.mxu0 %v1343_v46  ;;  %916 = vmatprep.subr.bf16.mxu1 %v1348_v47 }
  0x5d   :  { %998 = vmatprep.subr.bf16.mxu0 %v1351_v48 }
  0x5f   :  { %917 = vmatpush1.bf16.msra.mxu1 %v1346_v49 }
  0x60   :  { %999 = vmatpush1.bf16.msra.mxu0 %v1349_v50  ;;  %918 = vmatprep.subr.bf16.mxu1 %v1354_v51  ;;  %v1193_v51 = vld [vmem:[#allocation2] ss:$0 sm:$0xff] }
  0x61   :  { %1000 = vmatprep.subr.bf16.mxu0 %v1357_v52 }
  0x63   :  { %919 = vmatpush1.bf16.msra.mxu1 %v1352_v53 }
  0x64   :  { %1001 = vmatpush1.bf16.msra.mxu0 %v1355_v54  ;;  %920 = vmatprep.subr.bf16.mxu1 %v1360_v55 }
  0x65   :  { %1002 = vmatprep.subr.bf16.mxu0 %v1363_v56 }
  0x67   :  { %921 = vmatpush1.bf16.msra.mxu1 %v1358_v57 }
  0x68   :  { %1003 = vmatpush1.bf16.msra.mxu0 %v1361_v58  ;;  %922 = vmatprep.subr.bf16.mxu1 %v1366_v59 }
  0x69   :  { %1004 = vmatprep.subr.bf16.mxu0 %v1369_v60 }
  0x6b   :  { %923 = vmatpush1.bf16.msra.mxu1 %v1364_v61 }
  0x6c   :  { %1005 = vmatpush1.bf16.msra.mxu0 %v1367_v62  ;;  %924 = vmatprep.subr.bf16.mxu1 %v1372_v63 }
  0x6d   :  { %1006 = vmatprep.subr.bf16.mxu0 %v1375_v0 }
  0x6f   :  { %925 = vmatpush1.bf16.msra.mxu1 %v1370_v1 }
  0x70   :  { %1007 = vmatpush1.bf16.msra.mxu0 %v1373_v2  ;;  %926 = vmatprep.subr.bf16.mxu1 %v1378_v3 }
  0x71   :  { %1008 = vmatprep.subr.bf16.mxu0 %v1381_v4 }
  0x73   :  { %927 = vmatpush1.bf16.msra.mxu1 %v1376_v5 }
  0x74   :  { %1009 = vmatpush1.bf16.msra.mxu0 %v1379_v6  ;;  %928 = vmatprep.subr.bf16.mxu1 %v1384_v7 }
  0x75   :  { %1010 = vmatprep.subr.bf16.mxu0 %v1387_v8 }
  0x77   :  { %929 = vmatpush1.bf16.msra.mxu1 %v1382_v9 }
  0x78   :  { %1011 = vmatpush1.bf16.msra.mxu0 %v1385_v10  ;;  %930 = vmatprep.subr.bf16.mxu1 %v1390_v11 }
  0x79   :  { %1012 = vmatprep.subr.bf16.mxu0 %v1393_v12 }
  0x7b   :  { %931 = vmatpush1.bf16.msra.mxu1 %v1388_v13 }
  0x7c   :  { %1013 = vmatpush1.bf16.msra.mxu0 %v1391_v14  ;;  %932 = vmatprep.subr.bf16.mxu1 %v1396_v15 }
  0x7d   :  { %1014 = vmatprep.subr.bf16.mxu0 %v1399_v16 }
  0x7f   :  { %933 = vmatpush1.bf16.msra.mxu1 %v1394_v19 }
  0x80   :  { %1015 = vmatpush1.bf16.msra.mxu0 %v1397_v20 }
  0x82   :  { %935 = vmatmul.mubr.bf16.vlgmr.msra.gmra.mrb[0].mxu1 %v209_v21 }
  0x83   :  { %1017 = vmatmul.mubr.bf16.vlgmr.msra.gmra.mrb[0].mxu0 %v210_v22 }
 0x155   :  { %v936_v18 = vpop.f32.mrb[0].mxu1 }
 0x156   :  { %v1018_v28 = vpop.f32.mrb[0].mxu0  ;;  %v1194_v29 = vadd.f32 %v936_v18, %v156_v26  ;;  %v938_v30 = vpop.f32.mrb[1].mxu1 }
 0x157   :  { %v1020_v31 = vpop.f32.mrb[1].mxu0  ;;  %v1196_v33 = vadd.f32 %v938_v30, %v160_v27  ;;  %v940_v34 = vpop.f32.mrb[2].mxu1 }
 0x158   :  { %v1022_v35 = vpop.f32.mrb[2].mxu0  ;;  %v1195_v36 = vadd.f32 %v1194_v29, %v1018_v28  ;;  %v941_v37 = vpop.f32.mrb[3].mxu1 }
 0x159   :  { %v1023_v38 = vpop.f32.mrb[3].mxu0  ;;  %v1197_v39 = vadd.f32 %v1196_v33, %v1020_v31 }
 0x15a   :  { %vm1025_vm0 = vcmp.ge.f32.partialorder %v1195_v36, 0.0  ;;  %v1027_v42 = vmul.f32 0.2, %v1195_v36 }
 0x15b   :  { %vm1026_vm1 = vcmp.ge.f32.partialorder %v1197_v39, 0.0  ;;  %v1028_v43 = vmul.f32 0.2, %v1197_v39 }
 0x15c   :  { %v1029_v44 = vsel %vm1025_vm0, %v1195_v36, %v1027_v42 }
 0x15d   :  { %v1030_v45 = vsel %vm1026_vm1, %v1197_v39, %v1028_v43  ;;  %v1043_v46 = vmul.f32 %v1036_v40, %v1029_v44 }
 0x15e   :  { %v1044_v47 = vmul.f32 %v1040_v41, %v1030_v45 }
 0x15f   :  { %v1046_v48 = vsel %vm1045_vm2, %v1043_v46, 0.0 }
 0x160   :  { %v1047_v49 = vsel %vm1045_vm2, %v1044_v47, 0.0 }
 0x161   :  { %v1048_v50 = vadd.f32 %v1047_v49, %v1046_v48 }
 0x163   :  { %1049 = vadd.xlane.f32.xlu0 %v1048_v50 }
 0x1f0   :  { %v1050_v52 = vpop.xlane.xlu0 %1049 }
 0x1f1   :  { %v1058_v53 = vadd.f32 %v1193_v51, %v1050_v52 }
 0x1f3   :  { %1060 = vst.msk [vmem:[%s1850_s5] sm:$0x3] %vm1059_vm3, %v1058_v53 }

</bundles_post_ra>
